<compile_context>
chip_gen: v7x
topology: tpu7x:2x2x1
jax: 0.10.0
libtpu: 0.0.40
codegen_flags: <defaults>
</compile_context>

<pallas_src>
import jax
import jax.numpy as jnp
from jax.experimental import pallas as pl
from jax.experimental.pallas import tpu as pltpu


# ----------------------------------------------------------------------------
# Fused Pallas kernel: [conv1+BN+ReLU -> conv2+BN+ReLU] once, then per grid
# step one streamed fc1 N-tile (+ sigmoid) and its fc2 partial product.
# ----------------------------------------------------------------------------

def _neural3_kernel(p0_ref, w1_ref, s1_ref, b1_ref, w2_ref, s2_ref, b2_ref,
                    fc1w_ref, fc1b_ref, fc2w_ref, fc2b_ref,
                    o_ref, a2_pb_ref, a2_flat_ref):
    """Grid axis j tiles fc1's 1024 output columns (marked "arbitrary").

    p0_ref:   (B*49, 121*Cin) bf16  im2col of the 11x11 joint receptive field,
                                    rows ordered p-major / batch-minor
    w1_ref:   (121*Cin, 49*32) bf16 block-Toeplitz conv1 weights
    s1/b1:    (1, 49*32) f32        folded BN1 scale / (BN1 + conv1 bias)
    w2_ref:   (49*32, 64) bf16      conv2 weights, rows ordered (kh, kw, cin)
    s2/b2:    (1, 64) f32           folded BN2 scale / bias
    fc1w_ref: (3136, TILE_N) bf16   streamed fc1 weight tile (rows pre-permuted)
    fc1b_ref: (1, TILE_N) f32
    fc2w_ref: (TILE_N, n_classes) f32
    fc2b_ref: (1, n_classes) f32
    o_ref:    (B, n_classes) f32    resident output accumulator
    a2_pb:    (B*49, 64) f32        scratch, encoder output in (p, b) row order
    a2_flat:  (B, 3136) f32         scratch, torch-flatten-compatible layout
    """
    j = pl.program_id(0)
    B = o_ref.shape[0]
    P = a2_pb_ref.shape[0] // B      # 49 conv2 output positions
    C2 = a2_pb_ref.shape[1]          # 64 conv2 output channels

    @pl.when(j == 0)
    def _encode():
        # conv1 (+ folded BN1 + ReLU): one (B*49, 484) @ (484, 1568) bf16 matmul.
        # Column (kh2*7+kw2)*32 + c1 of the result is exactly the im2col entry
        # conv2 needs (ReLU'd conv1 activation at channel c1, offset (kh2, kw2)).
        z1 = jnp.dot(p0_ref[...], w1_ref[...],
                     preferred_element_type=jnp.float32)            # (B*49, 1568)
        a1 = jnp.maximum(z1 * s1_ref[...] + b1_ref[...], 0.0)

        # conv2 (+ folded BN2 + ReLU): one (B*49, 1568) @ (1568, 64) bf16 matmul.
        z2 = jnp.dot(a1.astype(jnp.bfloat16), w2_ref[...],
                     preferred_element_type=jnp.float32)            # (B*49, 64)
        a2_pb_ref[...] = jnp.maximum(z2 * s2_ref[...] + b2_ref[...], 0.0)

        # Relayout the (p-major, batch-minor) rows into the (B, 49*64) layout
        # the pre-permuted fc1 weight expects: 49 tiny static ref-to-ref copies
        # (each stays inside one (8,128) tile -> cheap masked load/store).
        for p in range(P):
            a2_flat_ref[:, p * C2:(p + 1) * C2] = a2_pb_ref[p * B:(p + 1) * B, :]

        # Initialize the output accumulator with the fc2 bias.
        o_ref[...] = jnp.broadcast_to(fc2b_ref[...], o_ref.shape)

    # fc1 tile j: (B, 3136) @ (3136, TILE_N) bf16 matmul, bias, sigmoid ...
    h = jnp.dot(a2_flat_ref[...].astype(jnp.bfloat16), fc1w_ref[...],
                preferred_element_type=jnp.float32) + fc1b_ref[...]
    s = jax.nn.sigmoid(h)
    # ... and the matching fc2 partial product, accumulated into the output.
    o_ref[...] += jnp.dot(s, fc2w_ref[...], preferred_element_type=jnp.float32)


# ----------------------------------------------------------------------------
# Wrapper
# ----------------------------------------------------------------------------

def _build_conv2_patches(x_nchw):
    """(B, Cin, 17, 17) -> (49*B, 121*Cin) bf16 im2col of the 11x11 joint
    receptive field of every conv2 output position, rows ordered p-major."""
    B, cin = x_nchw.shape[0], x_nchw.shape[1]
    # feature index = ci*121 + dh*11 + dw  (channel-major ordering)
    patches = jax.lax.conv_general_dilated_patches(
        x_nchw, filter_shape=(11, 11), window_strides=(1, 1), padding="VALID",
        dimension_numbers=("NCHW", "OIHW", "NCHW"))        # (B, Cin*121, 7, 7)
    p0 = jnp.transpose(patches, (2, 3, 0, 1)).reshape(49 * B, cin * 121)
    return p0.astype(jnp.bfloat16)


def neural3_forward(x_nchw, params, *, tile_n=256):
    B = x_nchw.shape[0]
    n_classes = params["fc2_w"].shape[1]
    k_fc1, n_hidden = params["fc1_w2"].shape        # 3136, 1024
    assert n_hidden % tile_n == 0
    nt = n_hidden // tile_n

    p0 = _build_conv2_patches(x_nchw)

    grid_spec = pltpu.PrefetchScalarGridSpec(
        num_scalar_prefetch=0,
        grid=(nt,),
        in_specs=[
            pl.BlockSpec(p0.shape, lambda j: (0, 0)),
            pl.BlockSpec(params["w1_big"].shape, lambda j: (0, 0)),
            pl.BlockSpec(params["s1_t"].shape, lambda j: (0, 0)),
            pl.BlockSpec(params["b1_t"].shape, lambda j: (0, 0)),
            pl.BlockSpec(params["w2_col"].shape, lambda j: (0, 0)),
            pl.BlockSpec(params["s2_t"].shape, lambda j: (0, 0)),
            pl.BlockSpec(params["b2_t"].shape, lambda j: (0, 0)),
            pl.BlockSpec((k_fc1, tile_n), lambda j: (0, j)),     # streamed fc1 W
            pl.BlockSpec((1, tile_n), lambda j: (0, j)),         # fc1 bias tile
            pl.BlockSpec((tile_n, n_classes), lambda j: (j, 0)),  # fc2 W tile
            pl.BlockSpec((1, n_classes), lambda j: (0, 0)),
        ],
        out_specs=pl.BlockSpec((B, n_classes), lambda j: (0, 0)),
        scratch_shapes=[
            pltpu.VMEM((49 * B, 64), jnp.float32),   # a2 in (p, b) row order
            pltpu.VMEM((B, k_fc1), jnp.float32),     # a2 in torch-flatten order
        ],
    )

    return pl.pallas_call(
        _neural3_kernel,
        out_shape=jax.ShapeDtypeStruct((B, n_classes), jnp.float32),
        grid_spec=grid_spec,
        compiler_params=pltpu.CompilerParams(
            dimension_semantics=("arbitrary",),
            vmem_limit_bytes=32 << 20),
    )(p0,
      params["w1_big"], params["s1_t"], params["b1_t"],
      params["w2_col"], params["s2_t"], params["b2_t"],
      params["fc1_w2"], params["fc1_b"], params["fc2_w"], params["fc2_b"])


# ----------------------------------------------------------------------------
# Deterministic parameter construction (PyTorch-default-like ranges)
# ----------------------------------------------------------------------------

def init_params(key, in_channels, n_classes):
    ks = jax.random.split(key, 8)
    eps = 1e-5

    def uniform(k, shape, fan_in):
        bound = 1.0 / jnp.sqrt(float(fan_in))
        return jax.random.uniform(k, shape, jnp.float32, -bound, bound)

    # Raw PyTorch-style weights (conv weights stored HWIO).
    c1_fan = in_channels * 5 * 5
    conv1_w = uniform(ks[0], (5, 5, in_channels, 32), c1_fan)
    conv1_b = uniform(ks[1], (32,), c1_fan)
    c2_fan = 32 * 7 * 7
    conv2_w = uniform(ks[2], (7, 7, 32, 64), c2_fan)
    conv2_b = uniform(ks[3], (64,), c2_fan)
    fc1_in = 64 * 7 * 7
    fc1_w = uniform(ks[4], (fc1_in, 1024), fc1_in)   # torch flatten row order
    fc1_b = uniform(ks[5], (1, 1024), fc1_in)
    fc2_w = uniform(ks[6], (1024, n_classes), 1024)
    fc2_b = uniform(ks[7], (1, n_classes), 1024)

    # Eval-mode BN fold (mean=0, var=1, gamma=1, beta=0) merged with conv bias:
    #   y = (conv(x) + b) / sqrt(1 + eps)
    inv_std = 1.0 / jnp.sqrt(1.0 + eps)
    s1 = jnp.full((32,), inv_std, jnp.float32)
    b1 = conv1_b * inv_std
    s2 = jnp.full((64,), inv_std, jnp.float32)
    b2 = conv2_b * inv_std

    # Block-Toeplitz embedding of conv1 into the 11x11 joint receptive field:
    #   w1_big[ci*121 + dh*11 + dw, (kh2*7+kw2)*32 + c1] =
    #       conv1_w[dh-kh2, dw-kw2, ci, c1]   (zero outside the 5x5 support)
    # Row order (ci, dh, dw) matches conv_general_dilated_patches; column order
    # (kh2, kw2, c1) matches conv2's HWIO im2col.  Stored bf16.
    blocks = []
    for kh2 in range(7):
        for kw2 in range(7):
            wp = jnp.zeros((11, 11, in_channels, 32), jnp.float32)
            wp = wp.at[kh2:kh2 + 5, kw2:kw2 + 5].set(conv1_w)
            blocks.append(
                jnp.transpose(wp, (2, 0, 1, 3)).reshape(121 * in_channels, 32))
    w1_big = jnp.concatenate(blocks, axis=1).astype(jnp.bfloat16)  # (121*Cin, 1568)

    w2_col = conv2_w.reshape(49 * 32, 64).astype(jnp.bfloat16)     # (1568, 64)

    # Lane-aligned (1, N) affine rows in the same column order as the matmuls.
    s1_t = jnp.tile(s1, 49).reshape(1, 49 * 32)
    b1_t = jnp.tile(b1, 49).reshape(1, 49 * 32)
    s2_t = s2.reshape(1, 64)
    b2_t = b2.reshape(1, 64)

    # fc1 rows permuted once from torch's flatten order (c2*49 + p) to the
    # kernel's activation order (p*64 + c2); stored bf16 (dominant HBM stream).
    # TODO(synk): optional per-column int8 quantization for v5e/v6e.
    fc1_w2 = jnp.transpose(fc1_w.reshape(64, 49, 1024), (1, 0, 2)) \
                .reshape(fc1_in, 1024).astype(jnp.bfloat16)

    kernel_params = dict(w1_big=w1_big, s1_t=s1_t, b1_t=b1_t,
                         w2_col=w2_col, s2_t=s2_t, b2_t=b2_t,
                         fc1_w2=fc1_w2, fc1_b=fc1_b, fc2_w=fc2_w, fc2_b=fc2_b)
    raw_params = dict(conv1_w=conv1_w, conv1_b=conv1_b,
                      conv2_w=conv2_w, conv2_b=conv2_b,
                      fc1_w=fc1_w, fc1_b=fc1_b, fc2_w=fc2_w, fc2_b=fc2_b)
    return kernel_params, raw_params


# ----------------------------------------------------------------------------
# Pure-JAX reference (loose numerical sanity check; kernel uses bf16 weights)
# ----------------------------------------------------------------------------

def neural3_reference(x_nchw, raw):
    eps = 1e-5
    inv_std = 1.0 / jnp.sqrt(1.0 + eps)
    dn = ("NCHW", "HWIO", "NCHW")
    y = jax.lax.conv_general_dilated(x_nchw, raw["conv1_w"], (1, 1), "VALID",
                                     dimension_numbers=dn)
    y = jnp.maximum((y + raw["conv1_b"][None, :, None, None]) * inv_std, 0.0)
    y = jax.lax.conv_general_dilated(y, raw["conv2_w"], (1, 1), "VALID",
                                     dimension_numbers=dn)
    y = jnp.maximum((y + raw["conv2_b"][None, :, None, None]) * inv_std, 0.0)
    y = y.reshape(y.shape[0], -1)                      # torch x.view(B, -1)
    y = jax.nn.sigmoid(y @ raw["fc1_w"] + raw["fc1_b"])
    return y @ raw["fc2_w"] + raw["fc2_b"]


# ----------------------------------------------------------------------------
# Main
# ----------------------------------------------------------------------------

if __name__ == "__main__":
    B, in_channels, n_classes = 2, 4, 10
    H = W = 17  # required so the flattened feature dim is 64*7*7

    key = jax.random.PRNGKey(0)
    k_x, k_p = jax.random.split(key)
    x = jax.random.normal(k_x, (B, in_channels, H, W), jnp.float32)  # NCHW
    params, raw = init_params(k_p, in_channels, n_classes)

    out = jax.jit(neural3_forward)(x, params)
    out = jax.block_until_ready(out)

    assert out.shape == (B, n_classes), out.shape
    assert jnp.all(jnp.isfinite(out))

    ref = neural3_reference(x, raw)
    err = float(jnp.max(jnp.abs(out - ref)))
    assert jnp.allclose(out, ref, atol=5e-2, rtol=5e-2), err

    print("KERNEL_OK")
</pallas_src>

<mosaic_0001>
module attributes {stable_mosaic.version = 11 : i64} {
  func.func @_neural3_kernel(%arg0: i32, %arg1: memref<98x484xbf16, #tpu.memory_space<vmem>>, %arg2: memref<484x1568xbf16, #tpu.memory_space<vmem>>, %arg3: memref<1x1568xf32, #tpu.memory_space<vmem>>, %arg4: memref<1x1568xf32, #tpu.memory_space<vmem>>, %arg5: memref<1568x64xbf16, #tpu.memory_space<vmem>>, %arg6: memref<1x64xf32, #tpu.memory_space<vmem>>, %arg7: memref<1x64xf32, #tpu.memory_space<vmem>>, %arg8: memref<3136x256xbf16, #tpu.memory_space<vmem>>, %arg9: memref<1x256xf32, #tpu.memory_space<vmem>>, %arg10: memref<256x10xf32, #tpu.memory_space<vmem>>, %arg11: memref<1x10xf32, #tpu.memory_space<vmem>>, %arg12: memref<2x10xf32, #tpu.memory_space<vmem>>, %arg13: memref<98x64xf32, #tpu.memory_space<vmem>>, %arg14: memref<2x3136xf32, #tpu.memory_space<vmem>>) attributes {dimension_semantics = [#tpu.dimension_semantics<arbitrary>], iteration_bounds = array<i64: 4>, scalar_prefetch = 0 : i64, scratch_operands = 2 : i64, tpu.core_type = #tpu.core_type<tc>, window_params = [{pipeline_mode = #tpu.pipeline_mode<synchronous>, transform_indices = @transform_0, window_bounds = array<i64: 98, 484>}, {pipeline_mode = #tpu.pipeline_mode<synchronous>, transform_indices = @transform_1, window_bounds = array<i64: 484, 1568>}, {pipeline_mode = #tpu.pipeline_mode<synchronous>, transform_indices = @transform_2, window_bounds = array<i64: 1, 1568>}, {pipeline_mode = #tpu.pipeline_mode<synchronous>, transform_indices = @transform_3, window_bounds = array<i64: 1, 1568>}, {pipeline_mode = #tpu.pipeline_mode<synchronous>, transform_indices = @transform_4, window_bounds = array<i64: 1568, 64>}, {pipeline_mode = #tpu.pipeline_mode<synchronous>, transform_indices = @transform_5, window_bounds = array<i64: 1, 64>}, {pipeline_mode = #tpu.pipeline_mode<synchronous>, transform_indices = @transform_6, window_bounds = array<i64: 1, 64>}, {transform_indices = @transform_7, window_bounds = array<i64: 3136, 256>}, {transform_indices = @transform_8, window_bounds = array<i64: 1, 256>}, {transform_indices = @transform_9, window_bounds = array<i64: 256, 10>}, {pipeline_mode = #tpu.pipeline_mode<synchronous>, transform_indices = @transform_10, window_bounds = array<i64: 1, 10>}, {pipeline_mode = #tpu.pipeline_mode<synchronous>, transform_indices = @transform_11, window_bounds = array<i64: 2, 10>}]} {
    %c0_i32 = arith.constant 0 : i32
    %0 = arith.cmpi eq, %arg0, %c0_i32 : i32
    %1 = arith.extui %0 : i1 to i32
    %c0_i32_0 = arith.constant 0 : i32
    %2 = arith.cmpi ne, %1, %c0_i32_0 : i32
    scf.if %2 {
      %c0_14 = arith.constant 0 : index
      %c0_15 = arith.constant 0 : index
      %20 = vector.load %arg1[%c0_14, %c0_15] : memref<98x484xbf16, #tpu.memory_space<vmem>>, vector<98x484xbf16>
      %c0_16 = arith.constant 0 : index
      %c0_17 = arith.constant 0 : index
      %21 = vector.load %arg2[%c0_16, %c0_17] : memref<484x1568xbf16, #tpu.memory_space<vmem>>, vector<484x1568xbf16>
      %cst_18 = arith.constant dense<0.000000e+00> : vector<98x1568xf32>
      %22 = tpu.matmul %20, %21, %cst_18 {dimension_numbers = #tpu.dot_dimension_numbers<[1], [0], [0], [1], [0, 0, 1, 1], [], []>} : vector<98x484xbf16>, vector<484x1568xbf16>, vector<98x1568xf32> -> vector<98x1568xf32>
      %c0_19 = arith.constant 0 : index
      %c0_20 = arith.constant 0 : index
      %23 = vector.load %arg3[%c0_19, %c0_20] : memref<1x1568xf32, #tpu.memory_space<vmem>>, vector<1x1568xf32>
      %24 = vector.broadcast %23 : vector<1x1568xf32> to vector<98x1568xf32>
      %25 = arith.mulf %22, %24 : vector<98x1568xf32>
      %c0_21 = arith.constant 0 : index
      %c0_22 = arith.constant 0 : index
      %26 = vector.load %arg4[%c0_21, %c0_22] : memref<1x1568xf32, #tpu.memory_space<vmem>>, vector<1x1568xf32>
      %27 = vector.broadcast %26 : vector<1x1568xf32> to vector<98x1568xf32>
      %28 = arith.addf %25, %27 : vector<98x1568xf32>
      %cst_23 = arith.constant 0.000000e+00 : f32
      %29 = vector.broadcast %cst_23 : f32 to vector<98x1568xf32>
      %30 = arith.maximumf %28, %29 : vector<98x1568xf32>
      %31 = arith.truncf %30 : vector<98x1568xf32> to vector<98x1568xbf16>
      %c0_24 = arith.constant 0 : index
      %c0_25 = arith.constant 0 : index
      %32 = vector.load %arg5[%c0_24, %c0_25] : memref<1568x64xbf16, #tpu.memory_space<vmem>>, vector<1568x64xbf16>
      %cst_26 = arith.constant dense<0.000000e+00> : vector<98x64xf32>
      %33 = tpu.matmul %31, %32, %cst_26 {dimension_numbers = #tpu.dot_dimension_numbers<[1], [0], [0], [1], [0, 0, 1, 1], [], []>} : vector<98x1568xbf16>, vector<1568x64xbf16>, vector<98x64xf32> -> vector<98x64xf32>
      %c0_27 = arith.constant 0 : index
      %c0_28 = arith.constant 0 : index
      %34 = vector.load %arg6[%c0_27, %c0_28] : memref<1x64xf32, #tpu.memory_space<vmem>>, vector<1x64xf32>
      %35 = vector.broadcast %34 : vector<1x64xf32> to vector<98x64xf32>
      %36 = arith.mulf %33, %35 : vector<98x64xf32>
      %c0_29 = arith.constant 0 : index
      %c0_30 = arith.constant 0 : index
      %37 = vector.load %arg7[%c0_29, %c0_30] : memref<1x64xf32, #tpu.memory_space<vmem>>, vector<1x64xf32>
      %38 = vector.broadcast %37 : vector<1x64xf32> to vector<98x64xf32>
      %39 = arith.addf %36, %38 : vector<98x64xf32>
      %cst_31 = arith.constant 0.000000e+00 : f32
      %40 = vector.broadcast %cst_31 : f32 to vector<98x64xf32>
      %41 = arith.maximumf %39, %40 : vector<98x64xf32>
      %c0_32 = arith.constant 0 : index
      %c0_33 = arith.constant 0 : index
      %42 = vector.load %arg13[%c0_32, %c0_33] : memref<98x64xf32, #tpu.memory_space<vmem>>, vector<98x64xf32>
      tpu.vector_store %arg13[%c0_32, %c0_33], %41 {strides = array<i32>} : memref<98x64xf32, #tpu.memory_space<vmem>>, vector<98x64xf32>,
      %c0_34 = arith.constant 0 : index
      %c0_35 = arith.constant 0 : index
      %43 = vector.load %arg13[%c0_34, %c0_35] : memref<98x64xf32, #tpu.memory_space<vmem>>, vector<2x64xf32>
      %c0_36 = arith.constant 0 : index
      %c0_37 = arith.constant 0 : index
      %44 = vector.load %arg14[%c0_36, %c0_37] : memref<2x3136xf32, #tpu.memory_space<vmem>>, vector<2x64xf32>
      tpu.vector_store %arg14[%c0_36, %c0_37], %43 {strides = array<i32>} : memref<2x3136xf32, #tpu.memory_space<vmem>>, vector<2x64xf32>,
      %c2 = arith.constant 2 : index
      %c0_38 = arith.constant 0 : index
      %45 = vector.load %arg13[%c2, %c0_38] : memref<98x64xf32, #tpu.memory_space<vmem>>, vector<2x64xf32>
      %c0_39 = arith.constant 0 : index
      %c64 = arith.constant 64 : index
      %46 = vector.load %arg14[%c0_39, %c64] : memref<2x3136xf32, #tpu.memory_space<vmem>>, vector<2x64xf32>
      tpu.vector_store %arg14[%c0_39, %c64], %45 {strides = array<i32>} : memref<2x3136xf32, #tpu.memory_space<vmem>>, vector<2x64xf32>,
      %c4 = arith.constant 4 : index
      %c0_40 = arith.constant 0 : index
      %47 = vector.load %arg13[%c4, %c0_40] : memref<98x64xf32, #tpu.memory_space<vmem>>, vector<2x64xf32>
      %c0_41 = arith.constant 0 : index
      %c128 = arith.constant 128 : index
      %48 = vector.load %arg14[%c0_41, %c128] : memref<2x3136xf32, #tpu.memory_space<vmem>>, vector<2x64xf32>
      tpu.vector_store %arg14[%c0_41, %c128], %47 {strides = array<i32>} : memref<2x3136xf32, #tpu.memory_space<vmem>>, vector<2x64xf32>,
      %c6 = arith.constant 6 : index
      %c0_42 = arith.constant 0 : index
      %49 = vector.load %arg13[%c6, %c0_42] : memref<98x64xf32, #tpu.memory_space<vmem>>, vector<2x64xf32>
      %c0_43 = arith.constant 0 : index
      %c192 = arith.constant 192 : index
      %50 = vector.load %arg14[%c0_43, %c192] : memref<2x3136xf32, #tpu.memory_space<vmem>>, vector<2x64xf32>
      tpu.vector_store %arg14[%c0_43, %c192], %49 {strides = array<i32>} : memref<2x3136xf32, #tpu.memory_space<vmem>>, vector<2x64xf32>,
      %c8 = arith.constant 8 : index
      %c0_44 = arith.constant 0 : index
      %51 = vector.load %arg13[%c8, %c0_44] : memref<98x64xf32, #tpu.memory_space<vmem>>, vector<2x64xf32>
      %c0_45 = arith.constant 0 : index
      %c256 = arith.constant 256 : index
      %52 = vector.load %arg14[%c0_45, %c256] : memref<2x3136xf32, #tpu.memory_space<vmem>>, vector<2x64xf32>
      tpu.vector_store %arg14[%c0_45, %c256], %51 {strides = array<i32>} : memref<2x3136xf32, #tpu.memory_space<vmem>>, vector<2x64xf32>,
      %c10 = arith.constant 10 : index
      %c0_46 = arith.constant 0 : index
      %53 = vector.load %arg13[%c10, %c0_46] : memref<98x64xf32, #tpu.memory_space<vmem>>, vector<2x64xf32>
      %c0_47 = arith.constant 0 : index
      %c320 = arith.constant 320 : index
      %54 = vector.load %arg14[%c0_47, %c320] : memref<2x3136xf32, #tpu.memory_space<vmem>>, vector<2x64xf32>
      tpu.vector_store %arg14[%c0_47, %c320], %53 {strides = array<i32>} : memref<2x3136xf32, #tpu.memory_space<vmem>>, vector<2x64xf32>,
      %c12 = arith.constant 12 : index
      %c0_48 = arith.constant 0 : index
      %55 = vector.load %arg13[%c12, %c0_48] : memref<98x64xf32, #tpu.memory_space<vmem>>, vector<2x64xf32>
      %c0_49 = arith.constant 0 : index
      %c384 = arith.constant 384 : index
      %56 = vector.load %arg14[%c0_49, %c384] : memref<2x3136xf32, #tpu.memory_space<vmem>>, vector<2x64xf32>
      tpu.vector_store %arg14[%c0_49, %c384], %55 {strides = array<i32>} : memref<2x3136xf32, #tpu.memory_space<vmem>>, vector<2x64xf32>,
      %c14 = arith.constant 14 : index
      %c0_50 = arith.constant 0 : index
      %57 = vector.load %arg13[%c14, %c0_50] : memref<98x64xf32, #tpu.memory_space<vmem>>, vector<2x64xf32>
      %c0_51 = arith.constant 0 : index
      %c448 = arith.constant 448 : index
      %58 = vector.load %arg14[%c0_51, %c448] : memref<2x3136xf32, #tpu.memory_space<vmem>>, vector<2x64xf32>
      tpu.vector_store %arg14[%c0_51, %c448], %57 {strides = array<i32>} : memref<2x3136xf32, #tpu.memory_space<vmem>>, vector<2x64xf32>,
      %c16 = arith.constant 16 : index
      %c0_52 = arith.constant 0 : index
      %59 = vector.load %arg13[%c16, %c0_52] : memref<98x64xf32, #tpu.memory_space<vmem>>, vector<2x64xf32>
      %c0_53 = arith.constant 0 : index
      %c512 = arith.constant 512 : index
      %60 = vector.load %arg14[%c0_53, %c512] : memref<2x3136xf32, #tpu.memory_space<vmem>>, vector<2x64xf32>
      tpu.vector_store %arg14[%c0_53, %c512], %59 {strides = array<i32>} : memref<2x3136xf32, #tpu.memory_space<vmem>>, vector<2x64xf32>,
      %c18 = arith.constant 18 : index
      %c0_54 = arith.constant 0 : index
      %61 = vector.load %arg13[%c18, %c0_54] : memref<98x64xf32, #tpu.memory_space<vmem>>, vector<2x64xf32>
      %c0_55 = arith.constant 0 : index
      %c576 = arith.constant 576 : index
      %62 = vector.load %arg14[%c0_55, %c576] : memref<2x3136xf32, #tpu.memory_space<vmem>>, vector<2x64xf32>
      tpu.vector_store %arg14[%c0_55, %c576], %61 {strides = array<i32>} : memref<2x3136xf32, #tpu.memory_space<vmem>>, vector<2x64xf32>,
      %c20 = arith.constant 20 : index
      %c0_56 = arith.constant 0 : index
      %63 = vector.load %arg13[%c20, %c0_56] : memref<98x64xf32, #tpu.memory_space<vmem>>, vector<2x64xf32>
      %c0_57 = arith.constant 0 : index
      %c640 = arith.constant 640 : index
      %64 = vector.load %arg14[%c0_57, %c640] : memref<2x3136xf32, #tpu.memory_space<vmem>>, vector<2x64xf32>
      tpu.vector_store %arg14[%c0_57, %c640], %63 {strides = array<i32>} : memref<2x3136xf32, #tpu.memory_space<vmem>>, vector<2x64xf32>,
      %c22 = arith.constant 22 : index
      %c0_58 = arith.constant 0 : index
      %65 = vector.load %arg13[%c22, %c0_58] : memref<98x64xf32, #tpu.memory_space<vmem>>, vector<2x64xf32>
      %c0_59 = arith.constant 0 : index
      %c704 = arith.constant 704 : index
      %66 = vector.load %arg14[%c0_59, %c704] : memref<2x3136xf32, #tpu.memory_space<vmem>>, vector<2x64xf32>
      tpu.vector_store %arg14[%c0_59, %c704], %65 {strides = array<i32>} : memref<2x3136xf32, #tpu.memory_space<vmem>>, vector<2x64xf32>,
      %c24 = arith.constant 24 : index
      %c0_60 = arith.constant 0 : index
      %67 = vector.load %arg13[%c24, %c0_60] : memref<98x64xf32, #tpu.memory_space<vmem>>, vector<2x64xf32>
      %c0_61 = arith.constant 0 : index
      %c768 = arith.constant 768 : index
      %68 = vector.load %arg14[%c0_61, %c768] : memref<2x3136xf32, #tpu.memory_space<vmem>>, vector<2x64xf32>
      tpu.vector_store %arg14[%c0_61, %c768], %67 {strides = array<i32>} : memref<2x3136xf32, #tpu.memory_space<vmem>>, vector<2x64xf32>,
      %c26 = arith.constant 26 : index
      %c0_62 = arith.constant 0 : index
      %69 = vector.load %arg13[%c26, %c0_62] : memref<98x64xf32, #tpu.memory_space<vmem>>, vector<2x64xf32>
      %c0_63 = arith.constant 0 : index
      %c832 = arith.constant 832 : index
      %70 = vector.load %arg14[%c0_63, %c832] : memref<2x3136xf32, #tpu.memory_space<vmem>>, vector<2x64xf32>
      tpu.vector_store %arg14[%c0_63, %c832], %69 {strides = array<i32>} : memref<2x3136xf32, #tpu.memory_space<vmem>>, vector<2x64xf32>,
      %c28 = arith.constant 28 : index
      %c0_64 = arith.constant 0 : index
      %71 = vector.load %arg13[%c28, %c0_64] : memref<98x64xf32, #tpu.memory_space<vmem>>, vector<2x64xf32>
      %c0_65 = arith.constant 0 : index
      %c896 = arith.constant 896 : index
      %72 = vector.load %arg14[%c0_65, %c896] : memref<2x3136xf32, #tpu.memory_space<vmem>>, vector<2x64xf32>
      tpu.vector_store %arg14[%c0_65, %c896], %71 {strides = array<i32>} : memref<2x3136xf32, #tpu.memory_space<vmem>>, vector<2x64xf32>,
      %c30 = arith.constant 30 : index
      %c0_66 = arith.constant 0 : index
      %73 = vector.load %arg13[%c30, %c0_66] : memref<98x64xf32, #tpu.memory_space<vmem>>, vector<2x64xf32>
      %c0_67 = arith.constant 0 : index
      %c960 = arith.constant 960 : index
      %74 = vector.load %arg14[%c0_67, %c960] : memref<2x3136xf32, #tpu.memory_space<vmem>>, vector<2x64xf32>
      tpu.vector_store %arg14[%c0_67, %c960], %73 {strides = array<i32>} : memref<2x3136xf32, #tpu.memory_space<vmem>>, vector<2x64xf32>,
      %c32 = arith.constant 32 : index
      %c0_68 = arith.constant 0 : index
      %75 = vector.load %arg13[%c32, %c0_68] : memref<98x64xf32, #tpu.memory_space<vmem>>, vector<2x64xf32>
      %c0_69 = arith.constant 0 : index
      %c1024 = arith.constant 1024 : index
      %76 = vector.load %arg14[%c0_69, %c1024] : memref<2x3136xf32, #tpu.memory_space<vmem>>, vector<2x64xf32>
      tpu.vector_store %arg14[%c0_69, %c1024], %75 {strides = array<i32>} : memref<2x3136xf32, #tpu.memory_space<vmem>>, vector<2x64xf32>,
      %c34 = arith.constant 34 : index
      %c0_70 = arith.constant 0 : index
      %77 = vector.load %arg13[%c34, %c0_70] : memref<98x64xf32, #tpu.memory_space<vmem>>, vector<2x64xf32>
      %c0_71 = arith.constant 0 : index
      %c1088 = arith.constant 1088 : index
      %78 = vector.load %arg14[%c0_71, %c1088] : memref<2x3136xf32, #tpu.memory_space<vmem>>, vector<2x64xf32>
      tpu.vector_store %arg14[%c0_71, %c1088], %77 {strides = array<i32>} : memref<2x3136xf32, #tpu.memory_space<vmem>>, vector<2x64xf32>,
      %c36 = arith.constant 36 : index
      %c0_72 = arith.constant 0 : index
      %79 = vector.load %arg13[%c36, %c0_72] : memref<98x64xf32, #tpu.memory_space<vmem>>, vector<2x64xf32>
      %c0_73 = arith.constant 0 : index
      %c1152 = arith.constant 1152 : index
      %80 = vector.load %arg14[%c0_73, %c1152] : memref<2x3136xf32, #tpu.memory_space<vmem>>, vector<2x64xf32>
      tpu.vector_store %arg14[%c0_73, %c1152], %79 {strides = array<i32>} : memref<2x3136xf32, #tpu.memory_space<vmem>>, vector<2x64xf32>,
      %c38 = arith.constant 38 : index
      %c0_74 = arith.constant 0 : index
      %81 = vector.load %arg13[%c38, %c0_74] : memref<98x64xf32, #tpu.memory_space<vmem>>, vector<2x64xf32>
      %c0_75 = arith.constant 0 : index
      %c1216 = arith.constant 1216 : index
      %82 = vector.load %arg14[%c0_75, %c1216] : memref<2x3136xf32, #tpu.memory_space<vmem>>, vector<2x64xf32>
      tpu.vector_store %arg14[%c0_75, %c1216], %81 {strides = array<i32>} : memref<2x3136xf32, #tpu.memory_space<vmem>>, vector<2x64xf32>,
      %c40 = arith.constant 40 : index
      %c0_76 = arith.constant 0 : index
      %83 = vector.load %arg13[%c40, %c0_76] : memref<98x64xf32, #tpu.memory_space<vmem>>, vector<2x64xf32>
      %c0_77 = arith.constant 0 : index
      %c1280 = arith.constant 1280 : index
      %84 = vector.load %arg14[%c0_77, %c1280] : memref<2x3136xf32, #tpu.memory_space<vmem>>, vector<2x64xf32>
      tpu.vector_store %arg14[%c0_77, %c1280], %83 {strides = array<i32>} : memref<2x3136xf32, #tpu.memory_space<vmem>>, vector<2x64xf32>,
      %c42 = arith.constant 42 : index
      %c0_78 = arith.constant 0 : index
      %85 = vector.load %arg13[%c42, %c0_78] : memref<98x64xf32, #tpu.memory_space<vmem>>, vector<2x64xf32>
      %c0_79 = arith.constant 0 : index
      %c1344 = arith.constant 1344 : index
      %86 = vector.load %arg14[%c0_79, %c1344] : memref<2x3136xf32, #tpu.memory_space<vmem>>, vector<2x64xf32>
      tpu.vector_store %arg14[%c0_79, %c1344], %85 {strides = array<i32>} : memref<2x3136xf32, #tpu.memory_space<vmem>>, vector<2x64xf32>,
      %c44 = arith.constant 44 : index
      %c0_80 = arith.constant 0 : index
      %87 = vector.load %arg13[%c44, %c0_80] : memref<98x64xf32, #tpu.memory_space<vmem>>, vector<2x64xf32>
      %c0_81 = arith.constant 0 : index
      %c1408 = arith.constant 1408 : index
      %88 = vector.load %arg14[%c0_81, %c1408] : memref<2x3136xf32, #tpu.memory_space<vmem>>, vector<2x64xf32>
      tpu.vector_store %arg14[%c0_81, %c1408], %87 {strides = array<i32>} : memref<2x3136xf32, #tpu.memory_space<vmem>>, vector<2x64xf32>,
      %c46 = arith.constant 46 : index
      %c0_82 = arith.constant 0 : index
      %89 = vector.load %arg13[%c46, %c0_82] : memref<98x64xf32, #tpu.memory_space<vmem>>, vector<2x64xf32>
      %c0_83 = arith.constant 0 : index
      %c1472 = arith.constant 1472 : index
      %90 = vector.load %arg14[%c0_83, %c1472] : memref<2x3136xf32, #tpu.memory_space<vmem>>, vector<2x64xf32>
      tpu.vector_store %arg14[%c0_83, %c1472], %89 {strides = array<i32>} : memref<2x3136xf32, #tpu.memory_space<vmem>>, vector<2x64xf32>,
      %c48 = arith.constant 48 : index
      %c0_84 = arith.constant 0 : index
      %91 = vector.load %arg13[%c48, %c0_84] : memref<98x64xf32, #tpu.memory_space<vmem>>, vector<2x64xf32>
      %c0_85 = arith.constant 0 : index
      %c1536 = arith.constant 1536 : index
      %92 = vector.load %arg14[%c0_85, %c1536] : memref<2x3136xf32, #tpu.memory_space<vmem>>, vector<2x64xf32>
      tpu.vector_store %arg14[%c0_85, %c1536], %91 {strides = array<i32>} : memref<2x3136xf32, #tpu.memory_space<vmem>>, vector<2x64xf32>,
      %c50 = arith.constant 50 : index
      %c0_86 = arith.constant 0 : index
      %93 = vector.load %arg13[%c50, %c0_86] : memref<98x64xf32, #tpu.memory_space<vmem>>, vector<2x64xf32>
      %c0_87 = arith.constant 0 : index
      %c1600 = arith.constant 1600 : index
      %94 = vector.load %arg14[%c0_87, %c1600] : memref<2x3136xf32, #tpu.memory_space<vmem>>, vector<2x64xf32>
      tpu.vector_store %arg14[%c0_87, %c1600], %93 {strides = array<i32>} : memref<2x3136xf32, #tpu.memory_space<vmem>>, vector<2x64xf32>,
      %c52 = arith.constant 52 : index
      %c0_88 = arith.constant 0 : index
      %95 = vector.load %arg13[%c52, %c0_88] : memref<98x64xf32, #tpu.memory_space<vmem>>, vector<2x64xf32>
      %c0_89 = arith.constant 0 : index
      %c1664 = arith.constant 1664 : index
      %96 = vector.load %arg14[%c0_89, %c1664] : memref<2x3136xf32, #tpu.memory_space<vmem>>, vector<2x64xf32>
      tpu.vector_store %arg14[%c0_89, %c1664], %95 {strides = array<i32>} : memref<2x3136xf32, #tpu.memory_space<vmem>>, vector<2x64xf32>,
      %c54 = arith.constant 54 : index
      %c0_90 = arith.constant 0 : index
      %97 = vector.load %arg13[%c54, %c0_90] : memref<98x64xf32, #tpu.memory_space<vmem>>, vector<2x64xf32>
      %c0_91 = arith.constant 0 : index
      %c1728 = arith.constant 1728 : index
      %98 = vector.load %arg14[%c0_91, %c1728] : memref<2x3136xf32, #tpu.memory_space<vmem>>, vector<2x64xf32>
      tpu.vector_store %arg14[%c0_91, %c1728], %97 {strides = array<i32>} : memref<2x3136xf32, #tpu.memory_space<vmem>>, vector<2x64xf32>,
      %c56 = arith.constant 56 : index
      %c0_92 = arith.constant 0 : index
      %99 = vector.load %arg13[%c56, %c0_92] : memref<98x64xf32, #tpu.memory_space<vmem>>, vector<2x64xf32>
      %c0_93 = arith.constant 0 : index
      %c1792 = arith.constant 1792 : index
      %100 = vector.load %arg14[%c0_93, %c1792] : memref<2x3136xf32, #tpu.memory_space<vmem>>, vector<2x64xf32>
      tpu.vector_store %arg14[%c0_93, %c1792], %99 {strides = array<i32>} : memref<2x3136xf32, #tpu.memory_space<vmem>>, vector<2x64xf32>,
      %c58 = arith.constant 58 : index
      %c0_94 = arith.constant 0 : index
      %101 = vector.load %arg13[%c58, %c0_94] : memref<98x64xf32, #tpu.memory_space<vmem>>, vector<2x64xf32>
      %c0_95 = arith.constant 0 : index
      %c1856 = arith.constant 1856 : index
      %102 = vector.load %arg14[%c0_95, %c1856] : memref<2x3136xf32, #tpu.memory_space<vmem>>, vector<2x64xf32>
      tpu.vector_store %arg14[%c0_95, %c1856], %101 {strides = array<i32>} : memref<2x3136xf32, #tpu.memory_space<vmem>>, vector<2x64xf32>,
      %c60 = arith.constant 60 : index
      %c0_96 = arith.constant 0 : index
      %103 = vector.load %arg13[%c60, %c0_96] : memref<98x64xf32, #tpu.memory_space<vmem>>, vector<2x64xf32>
      %c0_97 = arith.constant 0 : index
      %c1920 = arith.constant 1920 : index
      %104 = vector.load %arg14[%c0_97, %c1920] : memref<2x3136xf32, #tpu.memory_space<vmem>>, vector<2x64xf32>
      tpu.vector_store %arg14[%c0_97, %c1920], %103 {strides = array<i32>} : memref<2x3136xf32, #tpu.memory_space<vmem>>, vector<2x64xf32>,
      %c62 = arith.constant 62 : index
      %c0_98 = arith.constant 0 : index
      %105 = vector.load %arg13[%c62, %c0_98] : memref<98x64xf32, #tpu.memory_space<vmem>>, vector<2x64xf32>
      %c0_99 = arith.constant 0 : index
      %c1984 = arith.constant 1984 : index
      %106 = vector.load %arg14[%c0_99, %c1984] : memref<2x3136xf32, #tpu.memory_space<vmem>>, vector<2x64xf32>
      tpu.vector_store %arg14[%c0_99, %c1984], %105 {strides = array<i32>} : memref<2x3136xf32, #tpu.memory_space<vmem>>, vector<2x64xf32>,
      %c64_100 = arith.constant 64 : index
      %c0_101 = arith.constant 0 : index
      %107 = vector.load %arg13[%c64_100, %c0_101] : memref<98x64xf32, #tpu.memory_space<vmem>>, vector<2x64xf32>
      %c0_102 = arith.constant 0 : index
      %c2048 = arith.constant 2048 : index
      %108 = vector.load %arg14[%c0_102, %c2048] : memref<2x3136xf32, #tpu.memory_space<vmem>>, vector<2x64xf32>
      tpu.vector_store %arg14[%c0_102, %c2048], %107 {strides = array<i32>} : memref<2x3136xf32, #tpu.memory_space<vmem>>, vector<2x64xf32>,
      %c66 = arith.constant 66 : index
      %c0_103 = arith.constant 0 : index
      %109 = vector.load %arg13[%c66, %c0_103] : memref<98x64xf32, #tpu.memory_space<vmem>>, vector<2x64xf32>
      %c0_104 = arith.constant 0 : index
      %c2112 = arith.constant 2112 : index
      %110 = vector.load %arg14[%c0_104, %c2112] : memref<2x3136xf32, #tpu.memory_space<vmem>>, vector<2x64xf32>
      tpu.vector_store %arg14[%c0_104, %c2112], %109 {strides = array<i32>} : memref<2x3136xf32, #tpu.memory_space<vmem>>, vector<2x64xf32>,
      %c68 = arith.constant 68 : index
      %c0_105 = arith.constant 0 : index
      %111 = vector.load %arg13[%c68, %c0_105] : memref<98x64xf32, #tpu.memory_space<vmem>>, vector<2x64xf32>
      %c0_106 = arith.constant 0 : index
      %c2176 = arith.constant 2176 : index
      %112 = vector.load %arg14[%c0_106, %c2176] : memref<2x3136xf32, #tpu.memory_space<vmem>>, vector<2x64xf32>
      tpu.vector_store %arg14[%c0_106, %c2176], %111 {strides = array<i32>} : memref<2x3136xf32, #tpu.memory_space<vmem>>, vector<2x64xf32>,
      %c70 = arith.constant 70 : index
      %c0_107 = arith.constant 0 : index
      %113 = vector.load %arg13[%c70, %c0_107] : memref<98x64xf32, #tpu.memory_space<vmem>>, vector<2x64xf32>
      %c0_108 = arith.constant 0 : index
      %c2240 = arith.constant 2240 : index
      %114 = vector.load %arg14[%c0_108, %c2240] : memref<2x3136xf32, #tpu.memory_space<vmem>>, vector<2x64xf32>
      tpu.vector_store %arg14[%c0_108, %c2240], %113 {strides = array<i32>} : memref<2x3136xf32, #tpu.memory_space<vmem>>, vector<2x64xf32>,
      %c72 = arith.constant 72 : index
      %c0_109 = arith.constant 0 : index
      %115 = vector.load %arg13[%c72, %c0_109] : memref<98x64xf32, #tpu.memory_space<vmem>>, vector<2x64xf32>
      %c0_110 = arith.constant 0 : index
      %c2304 = arith.constant 2304 : index
      %116 = vector.load %arg14[%c0_110, %c2304] : memref<2x3136xf32, #tpu.memory_space<vmem>>, vector<2x64xf32>
      tpu.vector_store %arg14[%c0_110, %c2304], %115 {strides = array<i32>} : memref<2x3136xf32, #tpu.memory_space<vmem>>, vector<2x64xf32>,
      %c74 = arith.constant 74 : index
      %c0_111 = arith.constant 0 : index
      %117 = vector.load %arg13[%c74, %c0_111] : memref<98x64xf32, #tpu.memory_space<vmem>>, vector<2x64xf32>
      %c0_112 = arith.constant 0 : index
      %c2368 = arith.constant 2368 : index
      %118 = vector.load %arg14[%c0_112, %c2368] : memref<2x3136xf32, #tpu.memory_space<vmem>>, vector<2x64xf32>
      tpu.vector_store %arg14[%c0_112, %c2368], %117 {strides = array<i32>} : memref<2x3136xf32, #tpu.memory_space<vmem>>, vector<2x64xf32>,
      %c76 = arith.constant 76 : index
      %c0_113 = arith.constant 0 : index
      %119 = vector.load %arg13[%c76, %c0_113] : memref<98x64xf32, #tpu.memory_space<vmem>>, vector<2x64xf32>
      %c0_114 = arith.constant 0 : index
      %c2432 = arith.constant 2432 : index
      %120 = vector.load %arg14[%c0_114, %c2432] : memref<2x3136xf32, #tpu.memory_space<vmem>>, vector<2x64xf32>
      tpu.vector_store %arg14[%c0_114, %c2432], %119 {strides = array<i32>} : memref<2x3136xf32, #tpu.memory_space<vmem>>, vector<2x64xf32>,
      %c78 = arith.constant 78 : index
      %c0_115 = arith.constant 0 : index
      %121 = vector.load %arg13[%c78, %c0_115] : memref<98x64xf32, #tpu.memory_space<vmem>>, vector<2x64xf32>
      %c0_116 = arith.constant 0 : index
      %c2496 = arith.constant 2496 : index
      %122 = vector.load %arg14[%c0_116, %c2496] : memref<2x3136xf32, #tpu.memory_space<vmem>>, vector<2x64xf32>
      tpu.vector_store %arg14[%c0_116, %c2496], %121 {strides = array<i32>} : memref<2x3136xf32, #tpu.memory_space<vmem>>, vector<2x64xf32>,
      %c80 = arith.constant 80 : index
      %c0_117 = arith.constant 0 : index
      %123 = vector.load %arg13[%c80, %c0_117] : memref<98x64xf32, #tpu.memory_space<vmem>>, vector<2x64xf32>
      %c0_118 = arith.constant 0 : index
      %c2560 = arith.constant 2560 : index
      %124 = vector.load %arg14[%c0_118, %c2560] : memref<2x3136xf32, #tpu.memory_space<vmem>>, vector<2x64xf32>
      tpu.vector_store %arg14[%c0_118, %c2560], %123 {strides = array<i32>} : memref<2x3136xf32, #tpu.memory_space<vmem>>, vector<2x64xf32>,
      %c82 = arith.constant 82 : index
      %c0_119 = arith.constant 0 : index
      %125 = vector.load %arg13[%c82, %c0_119] : memref<98x64xf32, #tpu.memory_space<vmem>>, vector<2x64xf32>
      %c0_120 = arith.constant 0 : index
      %c2624 = arith.constant 2624 : index
      %126 = vector.load %arg14[%c0_120, %c2624] : memref<2x3136xf32, #tpu.memory_space<vmem>>, vector<2x64xf32>
      tpu.vector_store %arg14[%c0_120, %c2624], %125 {strides = array<i32>} : memref<2x3136xf32, #tpu.memory_space<vmem>>, vector<2x64xf32>,
      %c84 = arith.constant 84 : index
      %c0_121 = arith.constant 0 : index
      %127 = vector.load %arg13[%c84, %c0_121] : memref<98x64xf32, #tpu.memory_space<vmem>>, vector<2x64xf32>
      %c0_122 = arith.constant 0 : index
      %c2688 = arith.constant 2688 : index
      %128 = vector.load %arg14[%c0_122, %c2688] : memref<2x3136xf32, #tpu.memory_space<vmem>>, vector<2x64xf32>
      tpu.vector_store %arg14[%c0_122, %c2688], %127 {strides = array<i32>} : memref<2x3136xf32, #tpu.memory_space<vmem>>, vector<2x64xf32>,
      %c86 = arith.constant 86 : index
      %c0_123 = arith.constant 0 : index
      %129 = vector.load %arg13[%c86, %c0_123] : memref<98x64xf32, #tpu.memory_space<vmem>>, vector<2x64xf32>
      %c0_124 = arith.constant 0 : index
      %c2752 = arith.constant 2752 : index
      %130 = vector.load %arg14[%c0_124, %c2752] : memref<2x3136xf32, #tpu.memory_space<vmem>>, vector<2x64xf32>
      tpu.vector_store %arg14[%c0_124, %c2752], %129 {strides = array<i32>} : memref<2x3136xf32, #tpu.memory_space<vmem>>, vector<2x64xf32>,
      %c88 = arith.constant 88 : index
      %c0_125 = arith.constant 0 : index
      %131 = vector.load %arg13[%c88, %c0_125] : memref<98x64xf32, #tpu.memory_space<vmem>>, vector<2x64xf32>
      %c0_126 = arith.constant 0 : index
      %c2816 = arith.constant 2816 : index
      %132 = vector.load %arg14[%c0_126, %c2816] : memref<2x3136xf32, #tpu.memory_space<vmem>>, vector<2x64xf32>
      tpu.vector_store %arg14[%c0_126, %c2816], %131 {strides = array<i32>} : memref<2x3136xf32, #tpu.memory_space<vmem>>, vector<2x64xf32>,
      %c90 = arith.constant 90 : index
      %c0_127 = arith.constant 0 : index
      %133 = vector.load %arg13[%c90, %c0_127] : memref<98x64xf32, #tpu.memory_space<vmem>>, vector<2x64xf32>
      %c0_128 = arith.constant 0 : index
      %c2880 = arith.constant 2880 : index
      %134 = vector.load %arg14[%c0_128, %c2880] : memref<2x3136xf32, #tpu.memory_space<vmem>>, vector<2x64xf32>
      tpu.vector_store %arg14[%c0_128, %c2880], %133 {strides = array<i32>} : memref<2x3136xf32, #tpu.memory_space<vmem>>, vector<2x64xf32>,
      %c92 = arith.constant 92 : index
      %c0_129 = arith.constant 0 : index
      %135 = vector.load %arg13[%c92, %c0_129] : memref<98x64xf32, #tpu.memory_space<vmem>>, vector<2x64xf32>
      %c0_130 = arith.constant 0 : index
      %c2944 = arith.constant 2944 : index
      %136 = vector.load %arg14[%c0_130, %c2944] : memref<2x3136xf32, #tpu.memory_space<vmem>>, vector<2x64xf32>
      tpu.vector_store %arg14[%c0_130, %c2944], %135 {strides = array<i32>} : memref<2x3136xf32, #tpu.memory_space<vmem>>, vector<2x64xf32>,
      %c94 = arith.constant 94 : index
      %c0_131 = arith.constant 0 : index
      %137 = vector.load %arg13[%c94, %c0_131] : memref<98x64xf32, #tpu.memory_space<vmem>>, vector<2x64xf32>
      %c0_132 = arith.constant 0 : index
      %c3008 = arith.constant 3008 : index
      %138 = vector.load %arg14[%c0_132, %c3008] : memref<2x3136xf32, #tpu.memory_space<vmem>>, vector<2x64xf32>
      tpu.vector_store %arg14[%c0_132, %c3008], %137 {strides = array<i32>} : memref<2x3136xf32, #tpu.memory_space<vmem>>, vector<2x64xf32>,
      %c96 = arith.constant 96 : index
      %c0_133 = arith.constant 0 : index
      %139 = vector.load %arg13[%c96, %c0_133] : memref<98x64xf32, #tpu.memory_space<vmem>>, vector<2x64xf32>
      %c0_134 = arith.constant 0 : index
      %c3072 = arith.constant 3072 : index
      %140 = vector.load %arg14[%c0_134, %c3072] : memref<2x3136xf32, #tpu.memory_space<vmem>>, vector<2x64xf32>
      tpu.vector_store %arg14[%c0_134, %c3072], %139 {strides = array<i32>} : memref<2x3136xf32, #tpu.memory_space<vmem>>, vector<2x64xf32>,
      %c0_135 = arith.constant 0 : index
      %c0_136 = arith.constant 0 : index
      %141 = vector.load %arg11[%c0_135, %c0_136] : memref<1x10xf32, #tpu.memory_space<vmem>>, vector<1x10xf32>
      %142 = vector.shape_cast %141 : vector<1x10xf32> to vector<1x10xf32>
      %143 = vector.broadcast %142 : vector<1x10xf32> to vector<2x10xf32>
      %c0_137 = arith.constant 0 : index
      %c0_138 = arith.constant 0 : index
      %144 = vector.load %arg12[%c0_137, %c0_138] : memref<2x10xf32, #tpu.memory_space<vmem>>, vector<2x10xf32>
      tpu.vector_store %arg12[%c0_137, %c0_138], %143 {strides = array<i32>} : memref<2x10xf32, #tpu.memory_space<vmem>>, vector<2x10xf32>,
    } else {
    }
    %c0 = arith.constant 0 : index
    %c0_1 = arith.constant 0 : index
    %3 = vector.load %arg14[%c0, %c0_1] : memref<2x3136xf32, #tpu.memory_space<vmem>>, vector<2x3136xf32>
    %4 = arith.truncf %3 : vector<2x3136xf32> to vector<2x3136xbf16>
    %c0_2 = arith.constant 0 : index
    %c0_3 = arith.constant 0 : index
    %5 = vector.load %arg8[%c0_2, %c0_3] : memref<3136x256xbf16, #tpu.memory_space<vmem>>, vector<3136x256xbf16>
    %cst = arith.constant dense<0.000000e+00> : vector<2x256xf32>
    %6 = tpu.matmul %4, %5, %cst {dimension_numbers = #tpu.dot_dimension_numbers<[1], [0], [0], [1], [0, 0, 1, 1], [], []>} : vector<2x3136xbf16>, vector<3136x256xbf16>, vector<2x256xf32> -> vector<2x256xf32>
    %c0_4 = arith.constant 0 : index
    %c0_5 = arith.constant 0 : index
    %7 = vector.load %arg9[%c0_4, %c0_5] : memref<1x256xf32, #tpu.memory_space<vmem>>, vector<1x256xf32>
    %8 = vector.broadcast %7 : vector<1x256xf32> to vector<2x256xf32>
    %9 = arith.addf %6, %8 : vector<2x256xf32>
    %10 = arith.negf %9 : vector<2x256xf32>
    %11 = math.exp %10 : vector<2x256xf32>
    %cst_6 = arith.constant 1.000000e+00 : f32
    %12 = vector.broadcast %cst_6 : f32 to vector<2x256xf32>
    %13 = arith.addf %12, %11 : vector<2x256xf32>
    %14 = arith.divf %12, %13 : vector<2x256xf32>
    %c0_7 = arith.constant 0 : index
    %c0_8 = arith.constant 0 : index
    %15 = vector.load %arg12[%c0_7, %c0_8] : memref<2x10xf32, #tpu.memory_space<vmem>>, vector<2x10xf32>
    %c0_9 = arith.constant 0 : index
    %c0_10 = arith.constant 0 : index
    %16 = vector.load %arg10[%c0_9, %c0_10] : memref<256x10xf32, #tpu.memory_space<vmem>>, vector<256x10xf32>
    %cst_11 = arith.constant dense<0.000000e+00> : vector<2x10xf32>
    %17 = tpu.matmul %14, %16, %cst_11 {dimension_numbers = #tpu.dot_dimension_numbers<[1], [0], [0], [1], [0, 0, 1, 1], [], []>} : vector<2x256xf32>, vector<256x10xf32>, vector<2x10xf32> -> vector<2x10xf32>
    %18 = arith.addf %15, %17 : vector<2x10xf32>
    %c0_12 = arith.constant 0 : index
    %c0_13 = arith.constant 0 : index
    %19 = vector.load %arg12[%c0_12, %c0_13] : memref<2x10xf32, #tpu.memory_space<vmem>>, vector<2x10xf32>
    tpu.vector_store %arg12[%c0_12, %c0_13], %18 {strides = array<i32>} : memref<2x10xf32, #tpu.memory_space<vmem>>, vector<2x10xf32>,
    return
  }
  func.func @transform_0(%arg0: i32) -> (i32, i32) {
    %c0_i32 = arith.constant 0 : i32
    %c0_i32_0 = arith.constant 0 : i32
    %c0_i32_1 = arith.constant 0 : i32
    return %c0_i32, %c0_i32_0 : i32, i32
  }
  func.func @transform_1(%arg0: i32) -> (i32, i32) {
    %c0_i32 = arith.constant 0 : i32
    %c0_i32_0 = arith.constant 0 : i32
    %c0_i32_1 = arith.constant 0 : i32
    return %c0_i32, %c0_i32_0 : i32, i32
  }
  func.func @transform_2(%arg0: i32) -> (i32, i32) {
    %c0_i32 = arith.constant 0 : i32
    %c0_i32_0 = arith.constant 0 : i32
    %c0_i32_1 = arith.constant 0 : i32
    return %c0_i32, %c0_i32_0 : i32, i32
  }
  func.func @transform_3(%arg0: i32) -> (i32, i32) {
    %c0_i32 = arith.constant 0 : i32
    %c0_i32_0 = arith.constant 0 : i32
    %c0_i32_1 = arith.constant 0 : i32
    return %c0_i32, %c0_i32_0 : i32, i32
  }
  func.func @transform_4(%arg0: i32) -> (i32, i32) {
    %c0_i32 = arith.constant 0 : i32
    %c0_i32_0 = arith.constant 0 : i32
    %c0_i32_1 = arith.constant 0 : i32
    return %c0_i32, %c0_i32_0 : i32, i32
  }
  func.func @transform_5(%arg0: i32) -> (i32, i32) {
    %c0_i32 = arith.constant 0 : i32
    %c0_i32_0 = arith.constant 0 : i32
    %c0_i32_1 = arith.constant 0 : i32
    return %c0_i32, %c0_i32_0 : i32, i32
  }
  func.func @transform_6(%arg0: i32) -> (i32, i32) {
    %c0_i32 = arith.constant 0 : i32
    %c0_i32_0 = arith.constant 0 : i32
    %c0_i32_1 = arith.constant 0 : i32
    return %c0_i32, %c0_i32_0 : i32, i32
  }
  func.func @transform_7(%arg0: i32) -> (i32, i32) {
    %c0_i32 = arith.constant 0 : i32
    %c0_i32_0 = arith.constant 0 : i32
    return %c0_i32, %arg0 : i32, i32
  }
  func.func @transform_8(%arg0: i32) -> (i32, i32) {
    %c0_i32 = arith.constant 0 : i32
    %c0_i32_0 = arith.constant 0 : i32
    return %c0_i32, %arg0 : i32, i32
  }
  func.func @transform_9(%arg0: i32) -> (i32, i32) {
    %c0_i32 = arith.constant 0 : i32
    %c0_i32_0 = arith.constant 0 : i32
    return %arg0, %c0_i32 : i32, i32
  }
  func.func @transform_10(%arg0: i32) -> (i32, i32) {
    %c0_i32 = arith.constant 0 : i32
    %c0_i32_0 = arith.constant 0 : i32
    %c0_i32_1 = arith.constant 0 : i32
    return %c0_i32, %c0_i32_0 : i32, i32
  }
  func.func @transform_11(%arg0: i32) -> (i32, i32) {
    %c0_i32 = arith.constant 0 : i32
    %c0_i32_0 = arith.constant 0 : i32
    %c0_i32_1 = arith.constant 0 : i32
    return %c0_i32, %c0_i32_0 : i32, i32
  }
}

</mosaic_0001>

<bundles_post_ra>
// kernel: neural3_forward.1
= control target key start
LH: loop header
LB: loop body
LE: loop exit
PB: predicated region body
PF: predicated region fallthrough
CT: control target
= control target key end

     0   :  { %16 = vsyncpa [#allocation6], 0  ;;  %s15231_s17 = smov 0   ;;  %s15233_s18 = smov 0   ;;  %s19497_s0 = inlined_call_operand.vmem [shape: bf16[98,484], index: 0, kind: input, shape index: {}]   ;;  %s19498_s1 = inlined_call_operand.vmem [shape: bf16[484,1568], index: 1, kind: input, shape index: {}]   ;;  %s19499_s2 = inlined_call_operand.vmem [shape: f32[1,1568], index: 2, kind: input, shape index: {}]   ;;  %s19500_s3 = inlined_call_operand.vmem [shape: f32[1,1568], index: 3, kind: input, shape index: {}]   ;;  %s19501_s4 = inlined_call_operand.vmem [shape: bf16[1568,64], index: 4, kind: input, shape index: {}]   ;;  %s19502_s5 = inlined_call_operand.vmem [shape: f32[1,64], index: 5, kind: input, shape index: {}]   ;;  %s19503_s6 = inlined_call_operand.vmem [shape: f32[1,64], index: 6, kind: input, shape index: {}]   ;;  %s19504_s7 = inlined_call_operand.vmem [shape: bf16[3136,1024], index: 7, kind: input, shape index: {}]   ;;  %s19505_s8 = inlined_call_operand.vmem [shape: f32[1,1024], index: 8, kind: input, shape index: {}]   ;;  %s19506_s9 = inlined_call_operand.vmem [shape: f32[1024,10], index: 9, kind: input, shape index: {}]   ;;  %s19507_s10 = inlined_call_operand.vmem [shape: f32[1,10], index: 10, kind: input, shape index: {}]   ;;  %s19508_s11 = inlined_call_operand.hbm [shape: f32[2,10], index: 11, kind: output, shape index: {}]  }
   0x1   :  { %s15235_s19 = smov 0  }
   0x2 LB: > { %s15247_s20 = sadd.s32 4294967295, %s15162_s19   ;;  %s15250_s21 = sadd.s32 1, %s15162_s19   ;;  %s15162_s19 = sphi %s15235_s19, %s19561_s19   ;;  %s15158_s18 = sphi %s15233_s18, %s19560_s18   ;;  %s15154_s17 = sphi %s15231_s17, %s19559_s17  }
   0x3   : > { %s173_s22 = ssub.s32 %s15162_s19, %s15250_s21  ;;  %s176_s23 = sadd.s32 1, %s15158_s18 }
   0x4   : > { %p174_p0 = scmp.eq.s32.totalorder %s173_s22, 0  ;;  %p183_p1 = scmp.ne.s32.totalorder %s15158_s18, %s15154_s17 }
   0x5   : > { %p184_p2 = scmp.eq.s32.totalorder %s15162_s19, 0  ;;  %p11927_p4 = scmp.ge.s32.totalorder %s15162_s19, 4 }
   0x6   : > { %s15259_s24 = scalar_select %p174_p0, %s15158_s18, %s176_s23  }
   0x7   : > { %p185_p3 = por %p184_p2, %p183_p1  ;;  %327 = sbr.rel (%p11927_p4) target bundleno = 410 (0x19a), region = 48 }
   0xe   : > { %330 = sbr.rel (!%p185_p3) target bundleno = 410 (0x19a), region = 52  ;;  %s332_s25 = sand.u32 (%p185_p3), 1, %s15158_s18  }
   0xf   : > { %s12953_s26 = sshll.u32 (%p185_p3), %s15162_s19, 3  ;;  %s13688_s27 = smul.u32 (%p185_p3), 3136, %s332_s25 }
  0x10   : > { %s15267_s30 = scalar_lea.vmem (%p185_p3), %s19504_s7, %s12953_s26 }
  0x11   : > { %v1147_v0 = vld [vmem:[%s15267_s30] sm:$0xff] (%p185_p3)  ;;  %s15275_s12 = scalar_lea.vmem (%p185_p3), [#allocation4], %s13688_s27 }
  0x12   : > { %v1149_v1 = vld [vmem:[%s15267_s30 + $0x20] sm:$0xff] (%p185_p3)  ;;  %1148 = vst [vmem:[%s15275_s12] sm:$0xff] (%p185_p3), %v1147_v0 }
  0x13   : > { %v1151_v2 = vld [vmem:[%s15267_s30 + $0x40] sm:$0xff] (%p185_p3)  ;;  %1150 = vst [vmem:[%s15275_s12 + $0x8] sm:$0xff] (%p185_p3), %v1149_v1 }
  0x14   : > { %v1153_v3 = vld [vmem:[%s15267_s30 + $0x60] sm:$0xff] (%p185_p3)  ;;  %1152 = vst [vmem:[%s15275_s12 + $0x10] sm:$0xff] (%p185_p3), %v1151_v2 }
  0x15   : > { %v1155_v4 = vld [vmem:[%s15267_s30 + $0x80] sm:$0xff]  ;;  %1154 = vst [vmem:[%s15275_s12 + $0x18] sm:$0xff] %v1153_v3 }
  0x16   : > { %v1157_v5 = vld [vmem:[%s15267_s30 + $0xa0] sm:$0xff]  ;;  %1156 = vst [vmem:[%s15275_s12 + $0x20] sm:$0xff] %v1155_v4 }
  0x17   : > { %1158 = vst [vmem:[%s15275_s12 + $0x28] sm:$0xff] %v1157_v5  ;;  %v1159_v6 = vld [vmem:[%s15267_s30 + $0xc0] sm:$0xff] }
  0x18   : > { %v1161_v7 = vld [vmem:[%s15267_s30 + $0xe0] sm:$0xff]  ;;  %1160 = vst [vmem:[%s15275_s12 + $0x30] sm:$0xff] %v1159_v6 }
  0x19   : > { %v1163_v8 = vld [vmem:[%s15267_s30 + $0x100] sm:$0xff]  ;;  %1162 = vst [vmem:[%s15275_s12 + $0x38] sm:$0xff] %v1161_v7 }
  0x1a   : > { %1164 = vst [vmem:[%s15275_s12 + $0x40] sm:$0xff] %v1163_v8  ;;  %v1165_v9 = vld [vmem:[%s15267_s30 + $0x120] sm:$0xff] }
  0x1b   : > { %v1167_v10 = vld [vmem:[%s15267_s30 + $0x140] sm:$0xff]  ;;  %1166 = vst [vmem:[%s15275_s12 + $0x48] sm:$0xff] %v1165_v9 }
  0x1c   : > { %v1169_v11 = vld [vmem:[%s15267_s30 + $0x160] sm:$0xff]  ;;  %1168 = vst [vmem:[%s15275_s12 + $0x50] sm:$0xff] %v1167_v10 }
  0x1d   : > { %1170 = vst [vmem:[%s15275_s12 + $0x58] sm:$0xff] %v1169_v11  ;;  %v1171_v12 = vld [vmem:[%s15267_s30 + $0x180] sm:$0xff] }
  0x1e   : > { %v1173_v13 = vld [vmem:[%s15267_s30 + $0x1a0] sm:$0xff]  ;;  %1172 = vst [vmem:[%s15275_s12 + $0x60] sm:$0xff] %v1171_v12 }
  0x1f   : > { %v1175_v14 = vld [vmem:[%s15267_s30 + $0x1c0] sm:$0xff]  ;;  %1174 = vst [vmem:[%s15275_s12 + $0x68] sm:$0xff] %v1173_v13 }
  0x20   : > { %1176 = vst [vmem:[%s15275_s12 + $0x70] sm:$0xff] %v1175_v14  ;;  %v1177_v15 = vld [vmem:[%s15267_s30 + $0x1e0] sm:$0xff] }
  0x21   : > { %v1179_v16 = vld [vmem:[%s15267_s30 + $0x200] sm:$0xff]  ;;  %1178 = vst [vmem:[%s15275_s12 + $0x78] sm:$0xff] %v1177_v15 }
  0x22   : > { %v1181_v17 = vld [vmem:[%s15267_s30 + $0x220] sm:$0xff]  ;;  %1180 = vst [vmem:[%s15275_s12 + $0x80] sm:$0xff] %v1179_v16 }
  0x23   : > { %1182 = vst [vmem:[%s15275_s12 + $0x88] sm:$0xff] %v1181_v17  ;;  %v1183_v18 = vld [vmem:[%s15267_s30 + $0x240] sm:$0xff] }
  0x24   : > { %v1185_v19 = vld [vmem:[%s15267_s30 + $0x260] sm:$0xff]  ;;  %1184 = vst [vmem:[%s15275_s12 + $0x90] sm:$0xff] %v1183_v18 }
  0x25   : > { %v1187_v20 = vld [vmem:[%s15267_s30 + $0x280] sm:$0xff]  ;;  %1186 = vst [vmem:[%s15275_s12 + $0x98] sm:$0xff] %v1185_v19 }
  0x26   : > { %1188 = vst [vmem:[%s15275_s12 + $0xa0] sm:$0xff] %v1187_v20  ;;  %v1189_v21 = vld [vmem:[%s15267_s30 + $0x2a0] sm:$0xff] }
  0x27   : > { %v1191_v22 = vld [vmem:[%s15267_s30 + $0x2c0] sm:$0xff]  ;;  %1190 = vst [vmem:[%s15275_s12 + $0xa8] sm:$0xff] %v1189_v21 }
  0x28   : > { %v1193_v23 = vld [vmem:[%s15267_s30 + $0x2e0] sm:$0xff]  ;;  %1192 = vst [vmem:[%s15275_s12 + $0xb0] sm:$0xff] %v1191_v22 }
  0x29   : > { %1194 = vst [vmem:[%s15275_s12 + $0xb8] sm:$0xff] %v1193_v23  ;;  %v1195_v24 = vld [vmem:[%s15267_s30 + $0x300] sm:$0xff] }
  0x2a   : > { %v1197_v25 = vld [vmem:[%s15267_s30 + $0x320] sm:$0xff]  ;;  %1196 = vst [vmem:[%s15275_s12 + $0xc0] sm:$0xff] %v1195_v24 }
  0x2b   : > { %v1199_v26 = vld [vmem:[%s15267_s30 + $0x340] sm:$0xff]  ;;  %1198 = vst [vmem:[%s15275_s12 + $0xc8] sm:$0xff] %v1197_v25 }
  0x2c   : > { %1200 = vst [vmem:[%s15275_s12 + $0xd0] sm:$0xff] %v1199_v26  ;;  %v1201_v27 = vld [vmem:[%s15267_s30 + $0x360] sm:$0xff] }
  0x2d   : > { %v1203_v28 = vld [vmem:[%s15267_s30 + $0x380] sm:$0xff]  ;;  %1202 = vst [vmem:[%s15275_s12 + $0xd8] sm:$0xff] %v1201_v27 }
  0x2e   : > { %v1205_v29 = vld [vmem:[%s15267_s30 + $0x3a0] sm:$0xff]  ;;  %1204 = vst [vmem:[%s15275_s12 + $0xe0] sm:$0xff] %v1203_v28 }
  0x2f   : > { %1206 = vst [vmem:[%s15275_s12 + $0xe8] sm:$0xff] %v1205_v29  ;;  %v1207_v30 = vld [vmem:[%s15267_s30 + $0x3c0] sm:$0xff] }
  0x30   : > { %v1209_v31 = vld [vmem:[%s15267_s30 + $0x3e0] sm:$0xff]  ;;  %1208 = vst [vmem:[%s15275_s12 + $0xf0] sm:$0xff] %v1207_v30 }
  0x31   : > { %v1211_v32 = vld [vmem:[%s15267_s30 + $0x400] sm:$0xff]  ;;  %1210 = vst [vmem:[%s15275_s12 + $0xf8] sm:$0xff] %v1209_v31 }
  0x32   : > { %1212 = vst [vmem:[%s15275_s12 + $0x100] sm:$0xff] %v1211_v32  ;;  %v1213_v33 = vld [vmem:[%s15267_s30 + $0x420] sm:$0xff] }
  0x33   : > { %v1215_v34 = vld [vmem:[%s15267_s30 + $0x440] sm:$0xff]  ;;  %1214 = vst [vmem:[%s15275_s12 + $0x108] sm:$0xff] %v1213_v33 }
  0x34   : > { %v1217_v35 = vld [vmem:[%s15267_s30 + $0x460] sm:$0xff]  ;;  %1216 = vst [vmem:[%s15275_s12 + $0x110] sm:$0xff] %v1215_v34 }
  0x35   : > { %1218 = vst [vmem:[%s15275_s12 + $0x118] sm:$0xff] %v1217_v35  ;;  %v1219_v36 = vld [vmem:[%s15267_s30 + $0x480] sm:$0xff] }
  0x36   : > { %v1221_v37 = vld [vmem:[%s15267_s30 + $0x4a0] sm:$0xff]  ;;  %1220 = vst [vmem:[%s15275_s12 + $0x120] sm:$0xff] %v1219_v36 }
  0x37   : > { %v1223_v38 = vld [vmem:[%s15267_s30 + $0x4c0] sm:$0xff]  ;;  %1222 = vst [vmem:[%s15275_s12 + $0x128] sm:$0xff] %v1221_v37 }
  0x38   : > { %1224 = vst [vmem:[%s15275_s12 + $0x130] sm:$0xff] %v1223_v38  ;;  %v1225_v39 = vld [vmem:[%s15267_s30 + $0x4e0] sm:$0xff] }
  0x39   : > { %v1227_v40 = vld [vmem:[%s15267_s30 + $0x500] sm:$0xff]  ;;  %1226 = vst [vmem:[%s15275_s12 + $0x138] sm:$0xff] %v1225_v39 }
  0x3a   : > { %v1229_v41 = vld [vmem:[%s15267_s30 + $0x520] sm:$0xff]  ;;  %1228 = vst [vmem:[%s15275_s12 + $0x140] sm:$0xff] %v1227_v40 }
  0x3b   : > { %1230 = vst [vmem:[%s15275_s12 + $0x148] sm:$0xff] %v1229_v41  ;;  %v1231_v42 = vld [vmem:[%s15267_s30 + $0x540] sm:$0xff] }
  0x3c   : > { %v1233_v43 = vld [vmem:[%s15267_s30 + $0x560] sm:$0xff]  ;;  %1232 = vst [vmem:[%s15275_s12 + $0x150] sm:$0xff] %v1231_v42 }
  0x3d   : > { %v1235_v44 = vld [vmem:[%s15267_s30 + $0x580] sm:$0xff]  ;;  %1234 = vst [vmem:[%s15275_s12 + $0x158] sm:$0xff] %v1233_v43 }
  0x3e   : > { %1236 = vst [vmem:[%s15275_s12 + $0x160] sm:$0xff] %v1235_v44  ;;  %v1237_v45 = vld [vmem:[%s15267_s30 + $0x5a0] sm:$0xff] }
  0x3f   : > { %v1239_v46 = vld [vmem:[%s15267_s30 + $0x5c0] sm:$0xff]  ;;  %1238 = vst [vmem:[%s15275_s12 + $0x168] sm:$0xff] %v1237_v45 }
  0x40   : > { %v1241_v47 = vld [vmem:[%s15267_s30 + $0x5e0] sm:$0xff]  ;;  %1240 = vst [vmem:[%s15275_s12 + $0x170] sm:$0xff] %v1239_v46 }
  0x41   : > { %1242 = vst [vmem:[%s15275_s12 + $0x178] sm:$0xff] %v1241_v47  ;;  %v1243_v48 = vld [vmem:[%s15267_s30 + $0x600] sm:$0xff] }
  0x42   : > { %v1245_v49 = vld [vmem:[%s15267_s30 + $0x620] sm:$0xff]  ;;  %1244 = vst [vmem:[%s15275_s12 + $0x180] sm:$0xff] %v1243_v48 }
  0x43   : > { %v1247_v50 = vld [vmem:[%s15267_s30 + $0x640] sm:$0xff]  ;;  %1246 = vst [vmem:[%s15275_s12 + $0x188] sm:$0xff] %v1245_v49 }
  0x44   : > { %1248 = vst [vmem:[%s15275_s12 + $0x190] sm:$0xff] %v1247_v50  ;;  %v1249_v51 = vld [vmem:[%s15267_s30 + $0x660] sm:$0xff] }
  0x45   : > { %v1251_v52 = vld [vmem:[%s15267_s30 + $0x680] sm:$0xff]  ;;  %1250 = vst [vmem:[%s15275_s12 + $0x198] sm:$0xff] %v1249_v51 }
  0x46   : > { %v1253_v53 = vld [vmem:[%s15267_s30 + $0x6a0] sm:$0xff]  ;;  %1252 = vst [vmem:[%s15275_s12 + $0x1a0] sm:$0xff] %v1251_v52 }
  0x47   : > { %1254 = vst [vmem:[%s15275_s12 + $0x1a8] sm:$0xff] %v1253_v53  ;;  %v1255_v54 = vld [vmem:[%s15267_s30 + $0x6c0] sm:$0xff] }
  0x48   : > { %v1257_v55 = vld [vmem:[%s15267_s30 + $0x6e0] sm:$0xff]  ;;  %1256 = vst [vmem:[%s15275_s12 + $0x1b0] sm:$0xff] %v1255_v54 }
  0x49   : > { %v1259_v56 = vld [vmem:[%s15267_s30 + $0x700] sm:$0xff]  ;;  %1258 = vst [vmem:[%s15275_s12 + $0x1b8] sm:$0xff] %v1257_v55 }
  0x4a   : > { %1260 = vst [vmem:[%s15275_s12 + $0x1c0] sm:$0xff] %v1259_v56  ;;  %v1261_v57 = vld [vmem:[%s15267_s30 + $0x720] sm:$0xff] }
  0x4b   : > { %v1263_v58 = vld [vmem:[%s15267_s30 + $0x740] sm:$0xff]  ;;  %1262 = vst [vmem:[%s15275_s12 + $0x1c8] sm:$0xff] %v1261_v57 }
  0x4c   : > { %v1265_v59 = vld [vmem:[%s15267_s30 + $0x760] sm:$0xff]  ;;  %1264 = vst [vmem:[%s15275_s12 + $0x1d0] sm:$0xff] %v1263_v58 }
  0x4d   : > { %1266 = vst [vmem:[%s15275_s12 + $0x1d8] sm:$0xff] %v1265_v59  ;;  %v1267_v60 = vld [vmem:[%s15267_s30 + $0x780] sm:$0xff] }
  0x4e   : > { %v1269_v61 = vld [vmem:[%s15267_s30 + $0x7a0] sm:$0xff]  ;;  %1268 = vst [vmem:[%s15275_s12 + $0x1e0] sm:$0xff] %v1267_v60 }
  0x4f   : > { %v1271_v62 = vld [vmem:[%s15267_s30 + $0x7c0] sm:$0xff]  ;;  %1270 = vst [vmem:[%s15275_s12 + $0x1e8] sm:$0xff] %v1269_v61 }
  0x50   : > { %1272 = vst [vmem:[%s15275_s12 + $0x1f0] sm:$0xff] %v1271_v62  ;;  %v1273_v63 = vld [vmem:[%s15267_s30 + $0x7e0] sm:$0xff] }
  0x51   : > { %v1275_v0 = vld [vmem:[%s15267_s30 + $0x800] sm:$0xff]  ;;  %1274 = vst [vmem:[%s15275_s12 + $0x1f8] sm:$0xff] %v1273_v63 }
  0x52   : > { %v1277_v1 = vld [vmem:[%s15267_s30 + $0x820] sm:$0xff]  ;;  %1276 = vst [vmem:[%s15275_s12 + $0x200] sm:$0xff] %v1275_v0 }
  0x53   : > { %1278 = vst [vmem:[%s15275_s12 + $0x208] sm:$0xff] %v1277_v1  ;;  %v1279_v2 = vld [vmem:[%s15267_s30 + $0x840] sm:$0xff] }
  0x54   : > { %v1281_v3 = vld [vmem:[%s15267_s30 + $0x860] sm:$0xff]  ;;  %1280 = vst [vmem:[%s15275_s12 + $0x210] sm:$0xff] %v1279_v2 }
  0x55   : > { %v1283_v4 = vld [vmem:[%s15267_s30 + $0x880] sm:$0xff]  ;;  %1282 = vst [vmem:[%s15275_s12 + $0x218] sm:$0xff] %v1281_v3 }
  0x56   : > { %1284 = vst [vmem:[%s15275_s12 + $0x220] sm:$0xff] %v1283_v4  ;;  %v1285_v5 = vld [vmem:[%s15267_s30 + $0x8a0] sm:$0xff] }
  0x57   : > { %v1287_v6 = vld [vmem:[%s15267_s30 + $0x8c0] sm:$0xff]  ;;  %1286 = vst [vmem:[%s15275_s12 + $0x228] sm:$0xff] %v1285_v5 }
  0x58   : > { %v1289_v7 = vld [vmem:[%s15267_s30 + $0x8e0] sm:$0xff]  ;;  %1288 = vst [vmem:[%s15275_s12 + $0x230] sm:$0xff] %v1287_v6 }
  0x59   : > { %1290 = vst [vmem:[%s15275_s12 + $0x238] sm:$0xff] %v1289_v7  ;;  %v1291_v8 = vld [vmem:[%s15267_s30 + $0x900] sm:$0xff] }
  0x5a   : > { %v1293_v9 = vld [vmem:[%s15267_s30 + $0x920] sm:$0xff]  ;;  %1292 = vst [vmem:[%s15275_s12 + $0x240] sm:$0xff] %v1291_v8 }
  0x5b   : > { %v1295_v10 = vld [vmem:[%s15267_s30 + $0x940] sm:$0xff]  ;;  %1294 = vst [vmem:[%s15275_s12 + $0x248] sm:$0xff] %v1293_v9 }
  0x5c   : > { %1296 = vst [vmem:[%s15275_s12 + $0x250] sm:$0xff] %v1295_v10  ;;  %v1297_v11 = vld [vmem:[%s15267_s30 + $0x960] sm:$0xff] }
  0x5d   : > { %v1299_v12 = vld [vmem:[%s15267_s30 + $0x980] sm:$0xff]  ;;  %1298 = vst [vmem:[%s15275_s12 + $0x258] sm:$0xff] %v1297_v11 }
  0x5e   : > { %v1301_v13 = vld [vmem:[%s15267_s30 + $0x9a0] sm:$0xff]  ;;  %1300 = vst [vmem:[%s15275_s12 + $0x260] sm:$0xff] %v1299_v12 }
  0x5f   : > { %1302 = vst [vmem:[%s15275_s12 + $0x268] sm:$0xff] %v1301_v13  ;;  %v1303_v14 = vld [vmem:[%s15267_s30 + $0x9c0] sm:$0xff] }
  0x60   : > { %v1305_v15 = vld [vmem:[%s15267_s30 + $0x9e0] sm:$0xff]  ;;  %1304 = vst [vmem:[%s15275_s12 + $0x270] sm:$0xff] %v1303_v14 }
  0x61   : > { %v1307_v16 = vld [vmem:[%s15267_s30 + $0xa00] sm:$0xff]  ;;  %1306 = vst [vmem:[%s15275_s12 + $0x278] sm:$0xff] %v1305_v15 }
  0x62   : > { %1308 = vst [vmem:[%s15275_s12 + $0x280] sm:$0xff] %v1307_v16  ;;  %v1309_v17 = vld [vmem:[%s15267_s30 + $0xa20] sm:$0xff] }
  0x63   : > { %v1311_v18 = vld [vmem:[%s15267_s30 + $0xa40] sm:$0xff]  ;;  %1310 = vst [vmem:[%s15275_s12 + $0x288] sm:$0xff] %v1309_v17 }
  0x64   : > { %v1313_v19 = vld [vmem:[%s15267_s30 + $0xa60] sm:$0xff]  ;;  %1312 = vst [vmem:[%s15275_s12 + $0x290] sm:$0xff] %v1311_v18 }
  0x65   : > { %1314 = vst [vmem:[%s15275_s12 + $0x298] sm:$0xff] %v1313_v19  ;;  %v1315_v20 = vld [vmem:[%s15267_s30 + $0xa80] sm:$0xff] }
  0x66   : > { %v1317_v21 = vld [vmem:[%s15267_s30 + $0xaa0] sm:$0xff]  ;;  %1316 = vst [vmem:[%s15275_s12 + $0x2a0] sm:$0xff] %v1315_v20 }
  0x67   : > { %v1319_v22 = vld [vmem:[%s15267_s30 + $0xac0] sm:$0xff]  ;;  %1318 = vst [vmem:[%s15275_s12 + $0x2a8] sm:$0xff] %v1317_v21 }
  0x68   : > { %1320 = vst [vmem:[%s15275_s12 + $0x2b0] sm:$0xff] %v1319_v22  ;;  %v1321_v23 = vld [vmem:[%s15267_s30 + $0xae0] sm:$0xff] }
  0x69   : > { %v1323_v24 = vld [vmem:[%s15267_s30 + $0xb00] sm:$0xff]  ;;  %1322 = vst [vmem:[%s15275_s12 + $0x2b8] sm:$0xff] %v1321_v23 }
  0x6a   : > { %v1325_v25 = vld [vmem:[%s15267_s30 + $0xb20] sm:$0xff]  ;;  %1324 = vst [vmem:[%s15275_s12 + $0x2c0] sm:$0xff] %v1323_v24 }
  0x6b   : > { %1326 = vst [vmem:[%s15275_s12 + $0x2c8] sm:$0xff] %v1325_v25  ;;  %v1327_v26 = vld [vmem:[%s15267_s30 + $0xb40] sm:$0xff] }
  0x6c   : > { %v1329_v27 = vld [vmem:[%s15267_s30 + $0xb60] sm:$0xff]  ;;  %1328 = vst [vmem:[%s15275_s12 + $0x2d0] sm:$0xff] %v1327_v26 }
  0x6d   : > { %v1331_v28 = vld [vmem:[%s15267_s30 + $0xb80] sm:$0xff]  ;;  %1330 = vst [vmem:[%s15275_s12 + $0x2d8] sm:$0xff] %v1329_v27 }
  0x6e   : > { %1332 = vst [vmem:[%s15275_s12 + $0x2e0] sm:$0xff] %v1331_v28  ;;  %v1333_v29 = vld [vmem:[%s15267_s30 + $0xba0] sm:$0xff] }
  0x6f   : > { %v1335_v30 = vld [vmem:[%s15267_s30 + $0xbc0] sm:$0xff]  ;;  %1334 = vst [vmem:[%s15275_s12 + $0x2e8] sm:$0xff] %v1333_v29 }
  0x70   : > { %v1337_v31 = vld [vmem:[%s15267_s30 + $0xbe0] sm:$0xff]  ;;  %1336 = vst [vmem:[%s15275_s12 + $0x2f0] sm:$0xff] %v1335_v30 }
  0x71   : > { %1338 = vst [vmem:[%s15275_s12 + $0x2f8] sm:$0xff] %v1337_v31  ;;  %v1339_v32 = vld [vmem:[%s15267_s30 + $0xc00] sm:$0xff] }
  0x72   : > { %v1341_v33 = vld [vmem:[%s15267_s30 + $0xc20] sm:$0xff]  ;;  %1340 = vst [vmem:[%s15275_s12 + $0x300] sm:$0xff] %v1339_v32 }
  0x73   : > { %v1343_v34 = vld [vmem:[%s15267_s30 + $0xc40] sm:$0xff]  ;;  %1342 = vst [vmem:[%s15275_s12 + $0x308] sm:$0xff] %v1341_v33 }
  0x74   : > { %1344 = vst [vmem:[%s15275_s12 + $0x310] sm:$0xff] %v1343_v34  ;;  %v1345_v35 = vld [vmem:[%s15267_s30 + $0xc60] sm:$0xff] }
  0x75   : > { %v1347_v36 = vld [vmem:[%s15267_s30 + $0xc80] sm:$0xff]  ;;  %1346 = vst [vmem:[%s15275_s12 + $0x318] sm:$0xff] %v1345_v35 }
  0x76   : > { %v1349_v37 = vld [vmem:[%s15267_s30 + $0xca0] sm:$0xff]  ;;  %1348 = vst [vmem:[%s15275_s12 + $0x320] sm:$0xff] %v1347_v36 }
  0x77   : > { %1350 = vst [vmem:[%s15275_s12 + $0x328] sm:$0xff] %v1349_v37  ;;  %v1351_v38 = vld [vmem:[%s15267_s30 + $0xcc0] sm:$0xff] }
  0x78   : > { %v1353_v39 = vld [vmem:[%s15267_s30 + $0xce0] sm:$0xff]  ;;  %1352 = vst [vmem:[%s15275_s12 + $0x330] sm:$0xff] %v1351_v38 }
  0x79   : > { %v1355_v40 = vld [vmem:[%s15267_s30 + $0xd00] sm:$0xff]  ;;  %1354 = vst [vmem:[%s15275_s12 + $0x338] sm:$0xff] %v1353_v39 }
  0x7a   : > { %1356 = vst [vmem:[%s15275_s12 + $0x340] sm:$0xff] %v1355_v40  ;;  %v1357_v41 = vld [vmem:[%s15267_s30 + $0xd20] sm:$0xff] }
  0x7b   : > { %v1359_v42 = vld [vmem:[%s15267_s30 + $0xd40] sm:$0xff]  ;;  %1358 = vst [vmem:[%s15275_s12 + $0x348] sm:$0xff] %v1357_v41 }
  0x7c   : > { %v1361_v43 = vld [vmem:[%s15267_s30 + $0xd60] sm:$0xff]  ;;  %1360 = vst [vmem:[%s15275_s12 + $0x350] sm:$0xff] %v1359_v42 }
  0x7d   : > { %1362 = vst [vmem:[%s15275_s12 + $0x358] sm:$0xff] %v1361_v43  ;;  %v1363_v44 = vld [vmem:[%s15267_s30 + $0xd80] sm:$0xff] }
  0x7e   : > { %v1365_v45 = vld [vmem:[%s15267_s30 + $0xda0] sm:$0xff]  ;;  %1364 = vst [vmem:[%s15275_s12 + $0x360] sm:$0xff] %v1363_v44 }
  0x7f   : > { %v1367_v46 = vld [vmem:[%s15267_s30 + $0xdc0] sm:$0xff]  ;;  %1366 = vst [vmem:[%s15275_s12 + $0x368] sm:$0xff] %v1365_v45 }
  0x80   : > { %1368 = vst [vmem:[%s15275_s12 + $0x370] sm:$0xff] %v1367_v46  ;;  %v1369_v47 = vld [vmem:[%s15267_s30 + $0xde0] sm:$0xff] }
  0x81   : > { %v1371_v48 = vld [vmem:[%s15267_s30 + $0xe00] sm:$0xff]  ;;  %1370 = vst [vmem:[%s15275_s12 + $0x378] sm:$0xff] %v1369_v47 }
  0x82   : > { %v1373_v49 = vld [vmem:[%s15267_s30 + $0xe20] sm:$0xff]  ;;  %1372 = vst [vmem:[%s15275_s12 + $0x380] sm:$0xff] %v1371_v48 }
  0x83   : > { %1374 = vst [vmem:[%s15275_s12 + $0x388] sm:$0xff] %v1373_v49  ;;  %v1375_v50 = vld [vmem:[%s15267_s30 + $0xe40] sm:$0xff] }
  0x84   : > { %v1377_v51 = vld [vmem:[%s15267_s30 + $0xe60] sm:$0xff]  ;;  %1376 = vst [vmem:[%s15275_s12 + $0x390] sm:$0xff] %v1375_v50 }
  0x85   : > { %v1379_v52 = vld [vmem:[%s15267_s30 + $0xe80] sm:$0xff]  ;;  %1378 = vst [vmem:[%s15275_s12 + $0x398] sm:$0xff] %v1377_v51 }
  0x86   : > { %1380 = vst [vmem:[%s15275_s12 + $0x3a0] sm:$0xff] %v1379_v52  ;;  %v1381_v53 = vld [vmem:[%s15267_s30 + $0xea0] sm:$0xff] }
  0x87   : > { %v1383_v54 = vld [vmem:[%s15267_s30 + $0xec0] sm:$0xff]  ;;  %1382 = vst [vmem:[%s15275_s12 + $0x3a8] sm:$0xff] %v1381_v53 }
  0x88   : > { %v1385_v55 = vld [vmem:[%s15267_s30 + $0xee0] sm:$0xff]  ;;  %1384 = vst [vmem:[%s15275_s12 + $0x3b0] sm:$0xff] %v1383_v54 }
  0x89   : > { %1386 = vst [vmem:[%s15275_s12 + $0x3b8] sm:$0xff] %v1385_v55  ;;  %v1387_v56 = vld [vmem:[%s15267_s30 + $0xf00] sm:$0xff] }
  0x8a   : > { %v1389_v57 = vld [vmem:[%s15267_s30 + $0xf20] sm:$0xff]  ;;  %1388 = vst [vmem:[%s15275_s12 + $0x3c0] sm:$0xff] %v1387_v56 }
  0x8b   : > { %v1391_v58 = vld [vmem:[%s15267_s30 + $0xf40] sm:$0xff]  ;;  %1390 = vst [vmem:[%s15275_s12 + $0x3c8] sm:$0xff] %v1389_v57 }
  0x8c   : > { %1392 = vst [vmem:[%s15275_s12 + $0x3d0] sm:$0xff] %v1391_v58  ;;  %v1393_v59 = vld [vmem:[%s15267_s30 + $0xf60] sm:$0xff] }
  0x8d   : > { %v1395_v60 = vld [vmem:[%s15267_s30 + $0xf80] sm:$0xff]  ;;  %1394 = vst [vmem:[%s15275_s12 + $0x3d8] sm:$0xff] %v1393_v59 }
  0x8e   : > { %v1397_v61 = vld [vmem:[%s15267_s30 + $0xfa0] sm:$0xff]  ;;  %1396 = vst [vmem:[%s15275_s12 + $0x3e0] sm:$0xff] %v1395_v60 }
  0x8f   : > { %1398 = vst [vmem:[%s15275_s12 + $0x3e8] sm:$0xff] %v1397_v61  ;;  %v1399_v62 = vld [vmem:[%s15267_s30 + $0xfc0] sm:$0xff] }
  0x90   : > { %v1401_v63 = vld [vmem:[%s15267_s30 + $0xfe0] sm:$0xff]  ;;  %1400 = vst [vmem:[%s15275_s12 + $0x3f0] sm:$0xff] %v1399_v62 }
  0x91   : > { %v1403_v0 = vld [vmem:[%s15267_s30 + $0x1000] sm:$0xff]  ;;  %1402 = vst [vmem:[%s15275_s12 + $0x3f8] sm:$0xff] %v1401_v63 }
  0x92   : > { %1404 = vst [vmem:[%s15275_s12 + $0x400] sm:$0xff] %v1403_v0  ;;  %v1405_v1 = vld [vmem:[%s15267_s30 + $0x1020] sm:$0xff] }
  0x93   : > { %v1407_v2 = vld [vmem:[%s15267_s30 + $0x1040] sm:$0xff]  ;;  %1406 = vst [vmem:[%s15275_s12 + $0x408] sm:$0xff] %v1405_v1 }
  0x94   : > { %v1409_v3 = vld [vmem:[%s15267_s30 + $0x1060] sm:$0xff]  ;;  %1408 = vst [vmem:[%s15275_s12 + $0x410] sm:$0xff] %v1407_v2 }
  0x95   : > { %1410 = vst [vmem:[%s15275_s12 + $0x418] sm:$0xff] %v1409_v3  ;;  %v1411_v4 = vld [vmem:[%s15267_s30 + $0x1080] sm:$0xff] }
  0x96   : > { %v1413_v5 = vld [vmem:[%s15267_s30 + $0x10a0] sm:$0xff]  ;;  %1412 = vst [vmem:[%s15275_s12 + $0x420] sm:$0xff] %v1411_v4 }
  0x97   : > { %v1415_v6 = vld [vmem:[%s15267_s30 + $0x10c0] sm:$0xff]  ;;  %1414 = vst [vmem:[%s15275_s12 + $0x428] sm:$0xff] %v1413_v5 }
  0x98   : > { %1416 = vst [vmem:[%s15275_s12 + $0x430] sm:$0xff] %v1415_v6  ;;  %v1417_v7 = vld [vmem:[%s15267_s30 + $0x10e0] sm:$0xff] }
  0x99   : > { %v1419_v8 = vld [vmem:[%s15267_s30 + $0x1100] sm:$0xff]  ;;  %1418 = vst [vmem:[%s15275_s12 + $0x438] sm:$0xff] %v1417_v7 }
  0x9a   : > { %v1421_v9 = vld [vmem:[%s15267_s30 + $0x1120] sm:$0xff]  ;;  %1420 = vst [vmem:[%s15275_s12 + $0x440] sm:$0xff] %v1419_v8 }
  0x9b   : > { %1422 = vst [vmem:[%s15275_s12 + $0x448] sm:$0xff] %v1421_v9  ;;  %v1423_v10 = vld [vmem:[%s15267_s30 + $0x1140] sm:$0xff] }
  0x9c   : > { %v1425_v11 = vld [vmem:[%s15267_s30 + $0x1160] sm:$0xff]  ;;  %1424 = vst [vmem:[%s15275_s12 + $0x450] sm:$0xff] %v1423_v10 }
  0x9d   : > { %v1427_v12 = vld [vmem:[%s15267_s30 + $0x1180] sm:$0xff]  ;;  %1426 = vst [vmem:[%s15275_s12 + $0x458] sm:$0xff] %v1425_v11 }
  0x9e   : > { %1428 = vst [vmem:[%s15275_s12 + $0x460] sm:$0xff] %v1427_v12  ;;  %v1429_v13 = vld [vmem:[%s15267_s30 + $0x11a0] sm:$0xff] }
  0x9f   : > { %v1431_v14 = vld [vmem:[%s15267_s30 + $0x11c0] sm:$0xff]  ;;  %1430 = vst [vmem:[%s15275_s12 + $0x468] sm:$0xff] %v1429_v13 }
  0xa0   : > { %v1433_v15 = vld [vmem:[%s15267_s30 + $0x11e0] sm:$0xff]  ;;  %1432 = vst [vmem:[%s15275_s12 + $0x470] sm:$0xff] %v1431_v14 }
  0xa1   : > { %1434 = vst [vmem:[%s15275_s12 + $0x478] sm:$0xff] %v1433_v15  ;;  %v1435_v16 = vld [vmem:[%s15267_s30 + $0x1200] sm:$0xff] }
  0xa2   : > { %v1437_v17 = vld [vmem:[%s15267_s30 + $0x1220] sm:$0xff]  ;;  %1436 = vst [vmem:[%s15275_s12 + $0x480] sm:$0xff] %v1435_v16 }
  0xa3   : > { %v1439_v18 = vld [vmem:[%s15267_s30 + $0x1240] sm:$0xff]  ;;  %1438 = vst [vmem:[%s15275_s12 + $0x488] sm:$0xff] %v1437_v17 }
  0xa4   : > { %1440 = vst [vmem:[%s15275_s12 + $0x490] sm:$0xff] %v1439_v18  ;;  %v1441_v19 = vld [vmem:[%s15267_s30 + $0x1260] sm:$0xff] }
  0xa5   : > { %v1443_v20 = vld [vmem:[%s15267_s30 + $0x1280] sm:$0xff]  ;;  %1442 = vst [vmem:[%s15275_s12 + $0x498] sm:$0xff] %v1441_v19 }
  0xa6   : > { %v1445_v21 = vld [vmem:[%s15267_s30 + $0x12a0] sm:$0xff]  ;;  %1444 = vst [vmem:[%s15275_s12 + $0x4a0] sm:$0xff] %v1443_v20 }
  0xa7   : > { %1446 = vst [vmem:[%s15275_s12 + $0x4a8] sm:$0xff] %v1445_v21  ;;  %v1447_v22 = vld [vmem:[%s15267_s30 + $0x12c0] sm:$0xff] }
  0xa8   : > { %v1449_v23 = vld [vmem:[%s15267_s30 + $0x12e0] sm:$0xff]  ;;  %1448 = vst [vmem:[%s15275_s12 + $0x4b0] sm:$0xff] %v1447_v22 }
  0xa9   : > { %v1451_v24 = vld [vmem:[%s15267_s30 + $0x1300] sm:$0xff]  ;;  %1450 = vst [vmem:[%s15275_s12 + $0x4b8] sm:$0xff] %v1449_v23 }
  0xaa   : > { %1452 = vst [vmem:[%s15275_s12 + $0x4c0] sm:$0xff] %v1451_v24  ;;  %v1453_v25 = vld [vmem:[%s15267_s30 + $0x1320] sm:$0xff] }
  0xab   : > { %v1455_v26 = vld [vmem:[%s15267_s30 + $0x1340] sm:$0xff]  ;;  %1454 = vst [vmem:[%s15275_s12 + $0x4c8] sm:$0xff] %v1453_v25 }
  0xac   : > { %v1457_v27 = vld [vmem:[%s15267_s30 + $0x1360] sm:$0xff]  ;;  %1456 = vst [vmem:[%s15275_s12 + $0x4d0] sm:$0xff] %v1455_v26 }
  0xad   : > { %1458 = vst [vmem:[%s15275_s12 + $0x4d8] sm:$0xff] %v1457_v27  ;;  %v1459_v28 = vld [vmem:[%s15267_s30 + $0x1380] sm:$0xff] }
  0xae   : > { %v1461_v29 = vld [vmem:[%s15267_s30 + $0x13a0] sm:$0xff]  ;;  %1460 = vst [vmem:[%s15275_s12 + $0x4e0] sm:$0xff] %v1459_v28 }
  0xaf   : > { %v1463_v30 = vld [vmem:[%s15267_s30 + $0x13c0] sm:$0xff]  ;;  %1462 = vst [vmem:[%s15275_s12 + $0x4e8] sm:$0xff] %v1461_v29 }
  0xb0   : > { %1464 = vst [vmem:[%s15275_s12 + $0x4f0] sm:$0xff] %v1463_v30  ;;  %v1465_v31 = vld [vmem:[%s15267_s30 + $0x13e0] sm:$0xff] }
  0xb1   : > { %v1467_v32 = vld [vmem:[%s15267_s30 + $0x1400] sm:$0xff]  ;;  %1466 = vst [vmem:[%s15275_s12 + $0x4f8] sm:$0xff] %v1465_v31 }
  0xb2   : > { %v1469_v33 = vld [vmem:[%s15267_s30 + $0x1420] sm:$0xff]  ;;  %1468 = vst [vmem:[%s15275_s12 + $0x500] sm:$0xff] %v1467_v32 }
  0xb3   : > { %1470 = vst [vmem:[%s15275_s12 + $0x508] sm:$0xff] %v1469_v33  ;;  %v1471_v34 = vld [vmem:[%s15267_s30 + $0x1440] sm:$0xff] }
  0xb4   : > { %v1473_v35 = vld [vmem:[%s15267_s30 + $0x1460] sm:$0xff]  ;;  %1472 = vst [vmem:[%s15275_s12 + $0x510] sm:$0xff] %v1471_v34 }
  0xb5   : > { %v1475_v36 = vld [vmem:[%s15267_s30 + $0x1480] sm:$0xff]  ;;  %1474 = vst [vmem:[%s15275_s12 + $0x518] sm:$0xff] %v1473_v35 }
  0xb6   : > { %1476 = vst [vmem:[%s15275_s12 + $0x520] sm:$0xff] %v1475_v36  ;;  %v1477_v37 = vld [vmem:[%s15267_s30 + $0x14a0] sm:$0xff] }
  0xb7   : > { %v1479_v38 = vld [vmem:[%s15267_s30 + $0x14c0] sm:$0xff]  ;;  %1478 = vst [vmem:[%s15275_s12 + $0x528] sm:$0xff] %v1477_v37 }
  0xb8   : > { %v1481_v39 = vld [vmem:[%s15267_s30 + $0x14e0] sm:$0xff]  ;;  %1480 = vst [vmem:[%s15275_s12 + $0x530] sm:$0xff] %v1479_v38 }
  0xb9   : > { %1482 = vst [vmem:[%s15275_s12 + $0x538] sm:$0xff] %v1481_v39  ;;  %v1483_v40 = vld [vmem:[%s15267_s30 + $0x1500] sm:$0xff] }
  0xba   : > { %v1485_v41 = vld [vmem:[%s15267_s30 + $0x1520] sm:$0xff]  ;;  %1484 = vst [vmem:[%s15275_s12 + $0x540] sm:$0xff] %v1483_v40 }
  0xbb   : > { %v1487_v42 = vld [vmem:[%s15267_s30 + $0x1540] sm:$0xff]  ;;  %1486 = vst [vmem:[%s15275_s12 + $0x548] sm:$0xff] %v1485_v41 }
  0xbc   : > { %1488 = vst [vmem:[%s15275_s12 + $0x550] sm:$0xff] %v1487_v42  ;;  %v1489_v43 = vld [vmem:[%s15267_s30 + $0x1560] sm:$0xff] }
  0xbd   : > { %v1491_v44 = vld [vmem:[%s15267_s30 + $0x1580] sm:$0xff]  ;;  %1490 = vst [vmem:[%s15275_s12 + $0x558] sm:$0xff] %v1489_v43 }
  0xbe   : > { %v1493_v45 = vld [vmem:[%s15267_s30 + $0x15a0] sm:$0xff]  ;;  %1492 = vst [vmem:[%s15275_s12 + $0x560] sm:$0xff] %v1491_v44 }
  0xbf   : > { %1494 = vst [vmem:[%s15275_s12 + $0x568] sm:$0xff] %v1493_v45  ;;  %v1495_v46 = vld [vmem:[%s15267_s30 + $0x15c0] sm:$0xff] }
  0xc0   : > { %v1497_v47 = vld [vmem:[%s15267_s30 + $0x15e0] sm:$0xff]  ;;  %1496 = vst [vmem:[%s15275_s12 + $0x570] sm:$0xff] %v1495_v46 }
  0xc1   : > { %v1499_v48 = vld [vmem:[%s15267_s30 + $0x1600] sm:$0xff]  ;;  %1498 = vst [vmem:[%s15275_s12 + $0x578] sm:$0xff] %v1497_v47 }
  0xc2   : > { %1500 = vst [vmem:[%s15275_s12 + $0x580] sm:$0xff] %v1499_v48  ;;  %v1501_v49 = vld [vmem:[%s15267_s30 + $0x1620] sm:$0xff] }
  0xc3   : > { %v1503_v50 = vld [vmem:[%s15267_s30 + $0x1640] sm:$0xff]  ;;  %1502 = vst [vmem:[%s15275_s12 + $0x588] sm:$0xff] %v1501_v49 }
  0xc4   : > { %v1505_v51 = vld [vmem:[%s15267_s30 + $0x1660] sm:$0xff]  ;;  %1504 = vst [vmem:[%s15275_s12 + $0x590] sm:$0xff] %v1503_v50 }
  0xc5   : > { %1506 = vst [vmem:[%s15275_s12 + $0x598] sm:$0xff] %v1505_v51  ;;  %v1507_v52 = vld [vmem:[%s15267_s30 + $0x1680] sm:$0xff] }
  0xc6   : > { %v1509_v53 = vld [vmem:[%s15267_s30 + $0x16a0] sm:$0xff]  ;;  %1508 = vst [vmem:[%s15275_s12 + $0x5a0] sm:$0xff] %v1507_v52 }
  0xc7   : > { %v1511_v54 = vld [vmem:[%s15267_s30 + $0x16c0] sm:$0xff]  ;;  %1510 = vst [vmem:[%s15275_s12 + $0x5a8] sm:$0xff] %v1509_v53 }
  0xc8   : > { %1512 = vst [vmem:[%s15275_s12 + $0x5b0] sm:$0xff] %v1511_v54  ;;  %v1513_v55 = vld [vmem:[%s15267_s30 + $0x16e0] sm:$0xff] }
  0xc9   : > { %v1515_v56 = vld [vmem:[%s15267_s30 + $0x1700] sm:$0xff]  ;;  %1514 = vst [vmem:[%s15275_s12 + $0x5b8] sm:$0xff] %v1513_v55 }
  0xca   : > { %v1517_v57 = vld [vmem:[%s15267_s30 + $0x1720] sm:$0xff]  ;;  %1516 = vst [vmem:[%s15275_s12 + $0x5c0] sm:$0xff] %v1515_v56 }
  0xcb   : > { %1518 = vst [vmem:[%s15275_s12 + $0x5c8] sm:$0xff] %v1517_v57  ;;  %v1519_v58 = vld [vmem:[%s15267_s30 + $0x1740] sm:$0xff] }
  0xcc   : > { %v1521_v59 = vld [vmem:[%s15267_s30 + $0x1760] sm:$0xff]  ;;  %1520 = vst [vmem:[%s15275_s12 + $0x5d0] sm:$0xff] %v1519_v58 }
  0xcd   : > { %v1523_v60 = vld [vmem:[%s15267_s30 + $0x1780] sm:$0xff]  ;;  %1522 = vst [vmem:[%s15275_s12 + $0x5d8] sm:$0xff] %v1521_v59 }
  0xce   : > { %1524 = vst [vmem:[%s15275_s12 + $0x5e0] sm:$0xff] %v1523_v60  ;;  %v1525_v61 = vld [vmem:[%s15267_s30 + $0x17a0] sm:$0xff] }
  0xcf   : > { %v1527_v62 = vld [vmem:[%s15267_s30 + $0x17c0] sm:$0xff]  ;;  %1526 = vst [vmem:[%s15275_s12 + $0x5e8] sm:$0xff] %v1525_v61 }
  0xd0   : > { %v1529_v63 = vld [vmem:[%s15267_s30 + $0x17e0] sm:$0xff]  ;;  %1528 = vst [vmem:[%s15275_s12 + $0x5f0] sm:$0xff] %v1527_v62 }
  0xd1   : > { %1530 = vst [vmem:[%s15275_s12 + $0x5f8] sm:$0xff] %v1529_v63  ;;  %v1531_v0 = vld [vmem:[%s15267_s30 + $0x1800] sm:$0xff] }
  0xd2   : > { %v1533_v1 = vld [vmem:[%s15267_s30 + $0x1820] sm:$0xff]  ;;  %1532 = vst [vmem:[%s15275_s12 + $0x600] sm:$0xff] %v1531_v0 }
  0xd3   : > { %v1535_v2 = vld [vmem:[%s15267_s30 + $0x1840] sm:$0xff]  ;;  %1534 = vst [vmem:[%s15275_s12 + $0x608] sm:$0xff] %v1533_v1 }
  0xd4   : > { %1536 = vst [vmem:[%s15275_s12 + $0x610] sm:$0xff] %v1535_v2  ;;  %v1537_v3 = vld [vmem:[%s15267_s30 + $0x1860] sm:$0xff] }
  0xd5   : > { %v1539_v4 = vld [vmem:[%s15267_s30 + $0x1880] sm:$0xff]  ;;  %1538 = vst [vmem:[%s15275_s12 + $0x618] sm:$0xff] %v1537_v3 }
  0xd6   : > { %v1541_v5 = vld [vmem:[%s15267_s30 + $0x18a0] sm:$0xff]  ;;  %1540 = vst [vmem:[%s15275_s12 + $0x620] sm:$0xff] %v1539_v4 }
  0xd7   : > { %1542 = vst [vmem:[%s15275_s12 + $0x628] sm:$0xff] %v1541_v5  ;;  %v1543_v6 = vld [vmem:[%s15267_s30 + $0x18c0] sm:$0xff] }
  0xd8   : > { %v1545_v7 = vld [vmem:[%s15267_s30 + $0x18e0] sm:$0xff]  ;;  %1544 = vst [vmem:[%s15275_s12 + $0x630] sm:$0xff] %v1543_v6 }
  0xd9   : > { %v1547_v8 = vld [vmem:[%s15267_s30 + $0x1900] sm:$0xff]  ;;  %1546 = vst [vmem:[%s15275_s12 + $0x638] sm:$0xff] %v1545_v7 }
  0xda   : > { %1548 = vst [vmem:[%s15275_s12 + $0x640] sm:$0xff] %v1547_v8  ;;  %v1549_v9 = vld [vmem:[%s15267_s30 + $0x1920] sm:$0xff] }
  0xdb   : > { %v1551_v10 = vld [vmem:[%s15267_s30 + $0x1940] sm:$0xff]  ;;  %1550 = vst [vmem:[%s15275_s12 + $0x648] sm:$0xff] %v1549_v9 }
  0xdc   : > { %v1553_v11 = vld [vmem:[%s15267_s30 + $0x1960] sm:$0xff]  ;;  %1552 = vst [vmem:[%s15275_s12 + $0x650] sm:$0xff] %v1551_v10 }
  0xdd   : > { %1554 = vst [vmem:[%s15275_s12 + $0x658] sm:$0xff] %v1553_v11  ;;  %v1555_v12 = vld [vmem:[%s15267_s30 + $0x1980] sm:$0xff] }
  0xde   : > { %v1557_v13 = vld [vmem:[%s15267_s30 + $0x19a0] sm:$0xff]  ;;  %1556 = vst [vmem:[%s15275_s12 + $0x660] sm:$0xff] %v1555_v12 }
  0xdf   : > { %v1559_v14 = vld [vmem:[%s15267_s30 + $0x19c0] sm:$0xff]  ;;  %1558 = vst [vmem:[%s15275_s12 + $0x668] sm:$0xff] %v1557_v13 }
  0xe0   : > { %1560 = vst [vmem:[%s15275_s12 + $0x670] sm:$0xff] %v1559_v14  ;;  %v1561_v15 = vld [vmem:[%s15267_s30 + $0x19e0] sm:$0xff] }
  0xe1   : > { %v1563_v16 = vld [vmem:[%s15267_s30 + $0x1a00] sm:$0xff]  ;;  %1562 = vst [vmem:[%s15275_s12 + $0x678] sm:$0xff] %v1561_v15 }
  0xe2   : > { %v1565_v17 = vld [vmem:[%s15267_s30 + $0x1a20] sm:$0xff]  ;;  %1564 = vst [vmem:[%s15275_s12 + $0x680] sm:$0xff] %v1563_v16 }
  0xe3   : > { %1566 = vst [vmem:[%s15275_s12 + $0x688] sm:$0xff] %v1565_v17  ;;  %v1567_v18 = vld [vmem:[%s15267_s30 + $0x1a40] sm:$0xff] }
  0xe4   : > { %v1569_v19 = vld [vmem:[%s15267_s30 + $0x1a60] sm:$0xff]  ;;  %1568 = vst [vmem:[%s15275_s12 + $0x690] sm:$0xff] %v1567_v18 }
  0xe5   : > { %v1571_v20 = vld [vmem:[%s15267_s30 + $0x1a80] sm:$0xff]  ;;  %1570 = vst [vmem:[%s15275_s12 + $0x698] sm:$0xff] %v1569_v19 }
  0xe6   : > { %1572 = vst [vmem:[%s15275_s12 + $0x6a0] sm:$0xff] %v1571_v20  ;;  %v1573_v21 = vld [vmem:[%s15267_s30 + $0x1aa0] sm:$0xff] }
  0xe7   : > { %v1575_v22 = vld [vmem:[%s15267_s30 + $0x1ac0] sm:$0xff]  ;;  %1574 = vst [vmem:[%s15275_s12 + $0x6a8] sm:$0xff] %v1573_v21 }
  0xe8   : > { %v1577_v23 = vld [vmem:[%s15267_s30 + $0x1ae0] sm:$0xff]  ;;  %1576 = vst [vmem:[%s15275_s12 + $0x6b0] sm:$0xff] %v1575_v22 }
  0xe9   : > { %1578 = vst [vmem:[%s15275_s12 + $0x6b8] sm:$0xff] %v1577_v23  ;;  %v1579_v24 = vld [vmem:[%s15267_s30 + $0x1b00] sm:$0xff] }
  0xea   : > { %v1581_v25 = vld [vmem:[%s15267_s30 + $0x1b20] sm:$0xff]  ;;  %1580 = vst [vmem:[%s15275_s12 + $0x6c0] sm:$0xff] %v1579_v24 }
  0xeb   : > { %v1583_v26 = vld [vmem:[%s15267_s30 + $0x1b40] sm:$0xff]  ;;  %1582 = vst [vmem:[%s15275_s12 + $0x6c8] sm:$0xff] %v1581_v25 }
  0xec   : > { %1584 = vst [vmem:[%s15275_s12 + $0x6d0] sm:$0xff] %v1583_v26  ;;  %v1585_v27 = vld [vmem:[%s15267_s30 + $0x1b60] sm:$0xff] }
  0xed   : > { %v1587_v28 = vld [vmem:[%s15267_s30 + $0x1b80] sm:$0xff]  ;;  %1586 = vst [vmem:[%s15275_s12 + $0x6d8] sm:$0xff] %v1585_v27 }
  0xee   : > { %v1589_v29 = vld [vmem:[%s15267_s30 + $0x1ba0] sm:$0xff]  ;;  %1588 = vst [vmem:[%s15275_s12 + $0x6e0] sm:$0xff] %v1587_v28 }
  0xef   : > { %1590 = vst [vmem:[%s15275_s12 + $0x6e8] sm:$0xff] %v1589_v29  ;;  %v1591_v30 = vld [vmem:[%s15267_s30 + $0x1bc0] sm:$0xff] }
  0xf0   : > { %v1593_v31 = vld [vmem:[%s15267_s30 + $0x1be0] sm:$0xff]  ;;  %1592 = vst [vmem:[%s15275_s12 + $0x6f0] sm:$0xff] %v1591_v30 }
  0xf1   : > { %v1595_v32 = vld [vmem:[%s15267_s30 + $0x1c00] sm:$0xff]  ;;  %1594 = vst [vmem:[%s15275_s12 + $0x6f8] sm:$0xff] %v1593_v31 }
  0xf2   : > { %1596 = vst [vmem:[%s15275_s12 + $0x700] sm:$0xff] %v1595_v32  ;;  %v1597_v33 = vld [vmem:[%s15267_s30 + $0x1c20] sm:$0xff] }
  0xf3   : > { %v1599_v34 = vld [vmem:[%s15267_s30 + $0x1c40] sm:$0xff]  ;;  %1598 = vst [vmem:[%s15275_s12 + $0x708] sm:$0xff] %v1597_v33 }
  0xf4   : > { %v1601_v35 = vld [vmem:[%s15267_s30 + $0x1c60] sm:$0xff]  ;;  %1600 = vst [vmem:[%s15275_s12 + $0x710] sm:$0xff] %v1599_v34 }
  0xf5   : > { %1602 = vst [vmem:[%s15275_s12 + $0x718] sm:$0xff] %v1601_v35  ;;  %v1603_v36 = vld [vmem:[%s15267_s30 + $0x1c80] sm:$0xff] }
  0xf6   : > { %v1605_v37 = vld [vmem:[%s15267_s30 + $0x1ca0] sm:$0xff]  ;;  %1604 = vst [vmem:[%s15275_s12 + $0x720] sm:$0xff] %v1603_v36 }
  0xf7   : > { %v1607_v38 = vld [vmem:[%s15267_s30 + $0x1cc0] sm:$0xff]  ;;  %1606 = vst [vmem:[%s15275_s12 + $0x728] sm:$0xff] %v1605_v37 }
  0xf8   : > { %1608 = vst [vmem:[%s15275_s12 + $0x730] sm:$0xff] %v1607_v38  ;;  %v1609_v39 = vld [vmem:[%s15267_s30 + $0x1ce0] sm:$0xff] }
  0xf9   : > { %v1611_v40 = vld [vmem:[%s15267_s30 + $0x1d00] sm:$0xff]  ;;  %1610 = vst [vmem:[%s15275_s12 + $0x738] sm:$0xff] %v1609_v39 }
  0xfa   : > { %v1613_v41 = vld [vmem:[%s15267_s30 + $0x1d20] sm:$0xff]  ;;  %1612 = vst [vmem:[%s15275_s12 + $0x740] sm:$0xff] %v1611_v40 }
  0xfb   : > { %1614 = vst [vmem:[%s15275_s12 + $0x748] sm:$0xff] %v1613_v41  ;;  %v1615_v42 = vld [vmem:[%s15267_s30 + $0x1d40] sm:$0xff] }
  0xfc   : > { %v1617_v43 = vld [vmem:[%s15267_s30 + $0x1d60] sm:$0xff]  ;;  %1616 = vst [vmem:[%s15275_s12 + $0x750] sm:$0xff] %v1615_v42 }
  0xfd   : > { %v1619_v44 = vld [vmem:[%s15267_s30 + $0x1d80] sm:$0xff]  ;;  %1618 = vst [vmem:[%s15275_s12 + $0x758] sm:$0xff] %v1617_v43 }
  0xfe   : > { %1620 = vst [vmem:[%s15275_s12 + $0x760] sm:$0xff] %v1619_v44  ;;  %v1621_v45 = vld [vmem:[%s15267_s30 + $0x1da0] sm:$0xff] }
  0xff   : > { %v1623_v46 = vld [vmem:[%s15267_s30 + $0x1dc0] sm:$0xff]  ;;  %1622 = vst [vmem:[%s15275_s12 + $0x768] sm:$0xff] %v1621_v45 }
 0x100   : > { %v1625_v47 = vld [vmem:[%s15267_s30 + $0x1de0] sm:$0xff]  ;;  %1624 = vst [vmem:[%s15275_s12 + $0x770] sm:$0xff] %v1623_v46 }
 0x101   : > { %1626 = vst [vmem:[%s15275_s12 + $0x778] sm:$0xff] %v1625_v47  ;;  %v1627_v48 = vld [vmem:[%s15267_s30 + $0x1e00] sm:$0xff] }
 0x102   : > { %v1629_v49 = vld [vmem:[%s15267_s30 + $0x1e20] sm:$0xff]  ;;  %1628 = vst [vmem:[%s15275_s12 + $0x780] sm:$0xff] %v1627_v48 }
 0x103   : > { %v1631_v50 = vld [vmem:[%s15267_s30 + $0x1e40] sm:$0xff]  ;;  %1630 = vst [vmem:[%s15275_s12 + $0x788] sm:$0xff] %v1629_v49 }
 0x104   : > { %1632 = vst [vmem:[%s15275_s12 + $0x790] sm:$0xff] %v1631_v50  ;;  %v1633_v51 = vld [vmem:[%s15267_s30 + $0x1e60] sm:$0xff] }
 0x105   : > { %v1635_v52 = vld [vmem:[%s15267_s30 + $0x1e80] sm:$0xff]  ;;  %1634 = vst [vmem:[%s15275_s12 + $0x798] sm:$0xff] %v1633_v51 }
 0x106   : > { %v1637_v53 = vld [vmem:[%s15267_s30 + $0x1ea0] sm:$0xff]  ;;  %1636 = vst [vmem:[%s15275_s12 + $0x7a0] sm:$0xff] %v1635_v52 }
 0x107   : > { %1638 = vst [vmem:[%s15275_s12 + $0x7a8] sm:$0xff] %v1637_v53  ;;  %v1639_v54 = vld [vmem:[%s15267_s30 + $0x1ec0] sm:$0xff] }
 0x108   : > { %v1641_v55 = vld [vmem:[%s15267_s30 + $0x1ee0] sm:$0xff]  ;;  %1640 = vst [vmem:[%s15275_s12 + $0x7b0] sm:$0xff] %v1639_v54 }
 0x109   : > { %v1643_v56 = vld [vmem:[%s15267_s30 + $0x1f00] sm:$0xff]  ;;  %1642 = vst [vmem:[%s15275_s12 + $0x7b8] sm:$0xff] %v1641_v55 }
 0x10a   : > { %1644 = vst [vmem:[%s15275_s12 + $0x7c0] sm:$0xff] %v1643_v56  ;;  %v1645_v57 = vld [vmem:[%s15267_s30 + $0x1f20] sm:$0xff] }
 0x10b   : > { %v1647_v58 = vld [vmem:[%s15267_s30 + $0x1f40] sm:$0xff]  ;;  %1646 = vst [vmem:[%s15275_s12 + $0x7c8] sm:$0xff] %v1645_v57 }
 0x10c   : > { %v1649_v59 = vld [vmem:[%s15267_s30 + $0x1f60] sm:$0xff]  ;;  %1648 = vst [vmem:[%s15275_s12 + $0x7d0] sm:$0xff] %v1647_v58 }
 0x10d   : > { %1650 = vst [vmem:[%s15275_s12 + $0x7d8] sm:$0xff] %v1649_v59  ;;  %v1651_v60 = vld [vmem:[%s15267_s30 + $0x1f80] sm:$0xff] }
 0x10e   : > { %v1653_v61 = vld [vmem:[%s15267_s30 + $0x1fa0] sm:$0xff]  ;;  %1652 = vst [vmem:[%s15275_s12 + $0x7e0] sm:$0xff] %v1651_v60 }
 0x10f   : > { %v1655_v62 = vld [vmem:[%s15267_s30 + $0x1fc0] sm:$0xff]  ;;  %1654 = vst [vmem:[%s15275_s12 + $0x7e8] sm:$0xff] %v1653_v61 }
 0x110   : > { %1656 = vst [vmem:[%s15275_s12 + $0x7f0] sm:$0xff] %v1655_v62  ;;  %v1657_v63 = vld [vmem:[%s15267_s30 + $0x1fe0] sm:$0xff] }
 0x111   : > { %v1659_v0 = vld [vmem:[%s15267_s30 + $0x2000] sm:$0xff]  ;;  %1658 = vst [vmem:[%s15275_s12 + $0x7f8] sm:$0xff] %v1657_v63 }
 0x112   : > { %v1661_v1 = vld [vmem:[%s15267_s30 + $0x2020] sm:$0xff]  ;;  %1660 = vst [vmem:[%s15275_s12 + $0x800] sm:$0xff] %v1659_v0 }
 0x113   : > { %1662 = vst [vmem:[%s15275_s12 + $0x808] sm:$0xff] %v1661_v1  ;;  %v1663_v2 = vld [vmem:[%s15267_s30 + $0x2040] sm:$0xff] }
 0x114   : > { %v1665_v3 = vld [vmem:[%s15267_s30 + $0x2060] sm:$0xff]  ;;  %1664 = vst [vmem:[%s15275_s12 + $0x810] sm:$0xff] %v1663_v2 }
 0x115   : > { %v1667_v4 = vld [vmem:[%s15267_s30 + $0x2080] sm:$0xff]  ;;  %1666 = vst [vmem:[%s15275_s12 + $0x818] sm:$0xff] %v1665_v3 }
 0x116   : > { %1668 = vst [vmem:[%s15275_s12 + $0x820] sm:$0xff] %v1667_v4  ;;  %v1669_v5 = vld [vmem:[%s15267_s30 + $0x20a0] sm:$0xff] }
 0x117   : > { %v1671_v6 = vld [vmem:[%s15267_s30 + $0x20c0] sm:$0xff]  ;;  %1670 = vst [vmem:[%s15275_s12 + $0x828] sm:$0xff] %v1669_v5 }
 0x118   : > { %v1673_v7 = vld [vmem:[%s15267_s30 + $0x20e0] sm:$0xff]  ;;  %1672 = vst [vmem:[%s15275_s12 + $0x830] sm:$0xff] %v1671_v6 }
 0x119   : > { %1674 = vst [vmem:[%s15275_s12 + $0x838] sm:$0xff] %v1673_v7  ;;  %v1675_v8 = vld [vmem:[%s15267_s30 + $0x2100] sm:$0xff] }
 0x11a   : > { %v1677_v9 = vld [vmem:[%s15267_s30 + $0x2120] sm:$0xff]  ;;  %1676 = vst [vmem:[%s15275_s12 + $0x840] sm:$0xff] %v1675_v8 }
 0x11b   : > { %v1679_v10 = vld [vmem:[%s15267_s30 + $0x2140] sm:$0xff]  ;;  %1678 = vst [vmem:[%s15275_s12 + $0x848] sm:$0xff] %v1677_v9 }
 0x11c   : > { %1680 = vst [vmem:[%s15275_s12 + $0x850] sm:$0xff] %v1679_v10  ;;  %v1681_v11 = vld [vmem:[%s15267_s30 + $0x2160] sm:$0xff] }
 0x11d   : > { %v1683_v12 = vld [vmem:[%s15267_s30 + $0x2180] sm:$0xff]  ;;  %1682 = vst [vmem:[%s15275_s12 + $0x858] sm:$0xff] %v1681_v11 }
 0x11e   : > { %v1685_v13 = vld [vmem:[%s15267_s30 + $0x21a0] sm:$0xff]  ;;  %1684 = vst [vmem:[%s15275_s12 + $0x860] sm:$0xff] %v1683_v12 }
 0x11f   : > { %1686 = vst [vmem:[%s15275_s12 + $0x868] sm:$0xff] %v1685_v13  ;;  %v1687_v14 = vld [vmem:[%s15267_s30 + $0x21c0] sm:$0xff] }
 0x120   : > { %v1689_v15 = vld [vmem:[%s15267_s30 + $0x21e0] sm:$0xff]  ;;  %1688 = vst [vmem:[%s15275_s12 + $0x870] sm:$0xff] %v1687_v14 }
 0x121   : > { %v1691_v16 = vld [vmem:[%s15267_s30 + $0x2200] sm:$0xff]  ;;  %1690 = vst [vmem:[%s15275_s12 + $0x878] sm:$0xff] %v1689_v15 }
 0x122   : > { %1692 = vst [vmem:[%s15275_s12 + $0x880] sm:$0xff] %v1691_v16  ;;  %v1693_v17 = vld [vmem:[%s15267_s30 + $0x2220] sm:$0xff] }
 0x123   : > { %v1695_v18 = vld [vmem:[%s15267_s30 + $0x2240] sm:$0xff]  ;;  %1694 = vst [vmem:[%s15275_s12 + $0x888] sm:$0xff] %v1693_v17 }
 0x124   : > { %v1697_v19 = vld [vmem:[%s15267_s30 + $0x2260] sm:$0xff]  ;;  %1696 = vst [vmem:[%s15275_s12 + $0x890] sm:$0xff] %v1695_v18 }
 0x125   : > { %1698 = vst [vmem:[%s15275_s12 + $0x898] sm:$0xff] %v1697_v19  ;;  %v1699_v20 = vld [vmem:[%s15267_s30 + $0x2280] sm:$0xff] }
 0x126   : > { %v1701_v21 = vld [vmem:[%s15267_s30 + $0x22a0] sm:$0xff]  ;;  %1700 = vst [vmem:[%s15275_s12 + $0x8a0] sm:$0xff] %v1699_v20 }
 0x127   : > { %v1703_v22 = vld [vmem:[%s15267_s30 + $0x22c0] sm:$0xff]  ;;  %1702 = vst [vmem:[%s15275_s12 + $0x8a8] sm:$0xff] %v1701_v21 }
 0x128   : > { %1704 = vst [vmem:[%s15275_s12 + $0x8b0] sm:$0xff] %v1703_v22  ;;  %v1705_v23 = vld [vmem:[%s15267_s30 + $0x22e0] sm:$0xff] }
 0x129   : > { %v1707_v24 = vld [vmem:[%s15267_s30 + $0x2300] sm:$0xff]  ;;  %1706 = vst [vmem:[%s15275_s12 + $0x8b8] sm:$0xff] %v1705_v23 }
 0x12a   : > { %v1709_v25 = vld [vmem:[%s15267_s30 + $0x2320] sm:$0xff]  ;;  %1708 = vst [vmem:[%s15275_s12 + $0x8c0] sm:$0xff] %v1707_v24 }
 0x12b   : > { %1710 = vst [vmem:[%s15275_s12 + $0x8c8] sm:$0xff] %v1709_v25  ;;  %v1711_v26 = vld [vmem:[%s15267_s30 + $0x2340] sm:$0xff] }
 0x12c   : > { %v1713_v27 = vld [vmem:[%s15267_s30 + $0x2360] sm:$0xff]  ;;  %1712 = vst [vmem:[%s15275_s12 + $0x8d0] sm:$0xff] %v1711_v26 }
 0x12d   : > { %v1715_v28 = vld [vmem:[%s15267_s30 + $0x2380] sm:$0xff]  ;;  %1714 = vst [vmem:[%s15275_s12 + $0x8d8] sm:$0xff] %v1713_v27 }
 0x12e   : > { %1716 = vst [vmem:[%s15275_s12 + $0x8e0] sm:$0xff] %v1715_v28  ;;  %v1717_v29 = vld [vmem:[%s15267_s30 + $0x23a0] sm:$0xff] }
 0x12f   : > { %v1719_v30 = vld [vmem:[%s15267_s30 + $0x23c0] sm:$0xff]  ;;  %1718 = vst [vmem:[%s15275_s12 + $0x8e8] sm:$0xff] %v1717_v29 }
 0x130   : > { %v1721_v31 = vld [vmem:[%s15267_s30 + $0x23e0] sm:$0xff]  ;;  %1720 = vst [vmem:[%s15275_s12 + $0x8f0] sm:$0xff] %v1719_v30 }
 0x131   : > { %1722 = vst [vmem:[%s15275_s12 + $0x8f8] sm:$0xff] %v1721_v31  ;;  %v1723_v32 = vld [vmem:[%s15267_s30 + $0x2400] sm:$0xff] }
 0x132   : > { %v1725_v33 = vld [vmem:[%s15267_s30 + $0x2420] sm:$0xff]  ;;  %1724 = vst [vmem:[%s15275_s12 + $0x900] sm:$0xff] %v1723_v32 }
 0x133   : > { %v1727_v34 = vld [vmem:[%s15267_s30 + $0x2440] sm:$0xff]  ;;  %1726 = vst [vmem:[%s15275_s12 + $0x908] sm:$0xff] %v1725_v33 }
 0x134   : > { %1728 = vst [vmem:[%s15275_s12 + $0x910] sm:$0xff] %v1727_v34  ;;  %v1729_v35 = vld [vmem:[%s15267_s30 + $0x2460] sm:$0xff] }
 0x135   : > { %v1731_v36 = vld [vmem:[%s15267_s30 + $0x2480] sm:$0xff]  ;;  %1730 = vst [vmem:[%s15275_s12 + $0x918] sm:$0xff] %v1729_v35 }
 0x136   : > { %v1733_v37 = vld [vmem:[%s15267_s30 + $0x24a0] sm:$0xff]  ;;  %1732 = vst [vmem:[%s15275_s12 + $0x920] sm:$0xff] %v1731_v36 }
 0x137   : > { %1734 = vst [vmem:[%s15275_s12 + $0x928] sm:$0xff] %v1733_v37  ;;  %v1735_v38 = vld [vmem:[%s15267_s30 + $0x24c0] sm:$0xff] }
 0x138   : > { %v1737_v39 = vld [vmem:[%s15267_s30 + $0x24e0] sm:$0xff]  ;;  %1736 = vst [vmem:[%s15275_s12 + $0x930] sm:$0xff] %v1735_v38 }
 0x139   : > { %v1739_v40 = vld [vmem:[%s15267_s30 + $0x2500] sm:$0xff]  ;;  %1738 = vst [vmem:[%s15275_s12 + $0x938] sm:$0xff] %v1737_v39 }
 0x13a   : > { %1740 = vst [vmem:[%s15275_s12 + $0x940] sm:$0xff] %v1739_v40  ;;  %v1741_v41 = vld [vmem:[%s15267_s30 + $0x2520] sm:$0xff] }
 0x13b   : > { %v1743_v42 = vld [vmem:[%s15267_s30 + $0x2540] sm:$0xff]  ;;  %1742 = vst [vmem:[%s15275_s12 + $0x948] sm:$0xff] %v1741_v41 }
 0x13c   : > { %v1745_v43 = vld [vmem:[%s15267_s30 + $0x2560] sm:$0xff]  ;;  %1744 = vst [vmem:[%s15275_s12 + $0x950] sm:$0xff] %v1743_v42 }
 0x13d   : > { %1746 = vst [vmem:[%s15275_s12 + $0x958] sm:$0xff] %v1745_v43  ;;  %v1747_v44 = vld [vmem:[%s15267_s30 + $0x2580] sm:$0xff] }
 0x13e   : > { %v1749_v45 = vld [vmem:[%s15267_s30 + $0x25a0] sm:$0xff]  ;;  %1748 = vst [vmem:[%s15275_s12 + $0x960] sm:$0xff] %v1747_v44 }
 0x13f   : > { %v1751_v46 = vld [vmem:[%s15267_s30 + $0x25c0] sm:$0xff]  ;;  %1750 = vst [vmem:[%s15275_s12 + $0x968] sm:$0xff] %v1749_v45 }
 0x140   : > { %1752 = vst [vmem:[%s15275_s12 + $0x970] sm:$0xff] %v1751_v46  ;;  %v1753_v47 = vld [vmem:[%s15267_s30 + $0x25e0] sm:$0xff] }
 0x141   : > { %v1755_v48 = vld [vmem:[%s15267_s30 + $0x2600] sm:$0xff]  ;;  %1754 = vst [vmem:[%s15275_s12 + $0x978] sm:$0xff] %v1753_v47 }
 0x142   : > { %v1757_v49 = vld [vmem:[%s15267_s30 + $0x2620] sm:$0xff]  ;;  %1756 = vst [vmem:[%s15275_s12 + $0x980] sm:$0xff] %v1755_v48 }
 0x143   : > { %1758 = vst [vmem:[%s15275_s12 + $0x988] sm:$0xff] %v1757_v49  ;;  %v1759_v50 = vld [vmem:[%s15267_s30 + $0x2640] sm:$0xff] }
 0x144   : > { %v1761_v51 = vld [vmem:[%s15267_s30 + $0x2660] sm:$0xff]  ;;  %1760 = vst [vmem:[%s15275_s12 + $0x990] sm:$0xff] %v1759_v50 }
 0x145   : > { %v1763_v52 = vld [vmem:[%s15267_s30 + $0x2680] sm:$0xff]  ;;  %1762 = vst [vmem:[%s15275_s12 + $0x998] sm:$0xff] %v1761_v51 }
 0x146   : > { %1764 = vst [vmem:[%s15275_s12 + $0x9a0] sm:$0xff] %v1763_v52  ;;  %v1765_v53 = vld [vmem:[%s15267_s30 + $0x26a0] sm:$0xff] }
 0x147   : > { %v1767_v54 = vld [vmem:[%s15267_s30 + $0x26c0] sm:$0xff]  ;;  %1766 = vst [vmem:[%s15275_s12 + $0x9a8] sm:$0xff] %v1765_v53 }
 0x148   : > { %v1769_v55 = vld [vmem:[%s15267_s30 + $0x26e0] sm:$0xff]  ;;  %1768 = vst [vmem:[%s15275_s12 + $0x9b0] sm:$0xff] %v1767_v54 }
 0x149   : > { %1770 = vst [vmem:[%s15275_s12 + $0x9b8] sm:$0xff] %v1769_v55  ;;  %v1771_v56 = vld [vmem:[%s15267_s30 + $0x2700] sm:$0xff] }
 0x14a   : > { %v1773_v57 = vld [vmem:[%s15267_s30 + $0x2720] sm:$0xff]  ;;  %1772 = vst [vmem:[%s15275_s12 + $0x9c0] sm:$0xff] %v1771_v56 }
 0x14b   : > { %v1775_v58 = vld [vmem:[%s15267_s30 + $0x2740] sm:$0xff]  ;;  %1774 = vst [vmem:[%s15275_s12 + $0x9c8] sm:$0xff] %v1773_v57 }
 0x14c   : > { %1776 = vst [vmem:[%s15275_s12 + $0x9d0] sm:$0xff] %v1775_v58  ;;  %v1777_v59 = vld [vmem:[%s15267_s30 + $0x2760] sm:$0xff] }
 0x14d   : > { %v1779_v60 = vld [vmem:[%s15267_s30 + $0x2780] sm:$0xff]  ;;  %1778 = vst [vmem:[%s15275_s12 + $0x9d8] sm:$0xff] %v1777_v59 }
 0x14e   : > { %v1781_v61 = vld [vmem:[%s15267_s30 + $0x27a0] sm:$0xff]  ;;  %1780 = vst [vmem:[%s15275_s12 + $0x9e0] sm:$0xff] %v1779_v60 }
 0x14f   : > { %1782 = vst [vmem:[%s15275_s12 + $0x9e8] sm:$0xff] %v1781_v61  ;;  %v1783_v62 = vld [vmem:[%s15267_s30 + $0x27c0] sm:$0xff] }
 0x150   : > { %v1785_v63 = vld [vmem:[%s15267_s30 + $0x27e0] sm:$0xff]  ;;  %1784 = vst [vmem:[%s15275_s12 + $0x9f0] sm:$0xff] %v1783_v62 }
 0x151   : > { %v1787_v0 = vld [vmem:[%s15267_s30 + $0x2800] sm:$0xff]  ;;  %1786 = vst [vmem:[%s15275_s12 + $0x9f8] sm:$0xff] %v1785_v63 }
 0x152   : > { %1788 = vst [vmem:[%s15275_s12 + $0xa00] sm:$0xff] %v1787_v0  ;;  %v1789_v1 = vld [vmem:[%s15267_s30 + $0x2820] sm:$0xff] }
 0x153   : > { %v1791_v2 = vld [vmem:[%s15267_s30 + $0x2840] sm:$0xff]  ;;  %1790 = vst [vmem:[%s15275_s12 + $0xa08] sm:$0xff] %v1789_v1 }
 0x154   : > { %v1793_v3 = vld [vmem:[%s15267_s30 + $0x2860] sm:$0xff]  ;;  %1792 = vst [vmem:[%s15275_s12 + $0xa10] sm:$0xff] %v1791_v2 }
 0x155   : > { %1794 = vst [vmem:[%s15275_s12 + $0xa18] sm:$0xff] %v1793_v3  ;;  %v1795_v4 = vld [vmem:[%s15267_s30 + $0x2880] sm:$0xff] }
 0x156   : > { %v1797_v5 = vld [vmem:[%s15267_s30 + $0x28a0] sm:$0xff]  ;;  %1796 = vst [vmem:[%s15275_s12 + $0xa20] sm:$0xff] %v1795_v4 }
 0x157   : > { %v1799_v6 = vld [vmem:[%s15267_s30 + $0x28c0] sm:$0xff]  ;;  %1798 = vst [vmem:[%s15275_s12 + $0xa28] sm:$0xff] %v1797_v5 }
 0x158   : > { %1800 = vst [vmem:[%s15275_s12 + $0xa30] sm:$0xff] %v1799_v6  ;;  %v1801_v7 = vld [vmem:[%s15267_s30 + $0x28e0] sm:$0xff] }
 0x159   : > { %v1803_v8 = vld [vmem:[%s15267_s30 + $0x2900] sm:$0xff]  ;;  %1802 = vst [vmem:[%s15275_s12 + $0xa38] sm:$0xff] %v1801_v7 }
 0x15a   : > { %v1805_v9 = vld [vmem:[%s15267_s30 + $0x2920] sm:$0xff]  ;;  %1804 = vst [vmem:[%s15275_s12 + $0xa40] sm:$0xff] %v1803_v8 }
 0x15b   : > { %1806 = vst [vmem:[%s15275_s12 + $0xa48] sm:$0xff] %v1805_v9  ;;  %v1807_v10 = vld [vmem:[%s15267_s30 + $0x2940] sm:$0xff] }
 0x15c   : > { %v1809_v11 = vld [vmem:[%s15267_s30 + $0x2960] sm:$0xff]  ;;  %1808 = vst [vmem:[%s15275_s12 + $0xa50] sm:$0xff] %v1807_v10 }
 0x15d   : > { %v1811_v12 = vld [vmem:[%s15267_s30 + $0x2980] sm:$0xff]  ;;  %1810 = vst [vmem:[%s15275_s12 + $0xa58] sm:$0xff] %v1809_v11 }
 0x15e   : > { %1812 = vst [vmem:[%s15275_s12 + $0xa60] sm:$0xff] %v1811_v12  ;;  %v1813_v13 = vld [vmem:[%s15267_s30 + $0x29a0] sm:$0xff] }
 0x15f   : > { %v1815_v14 = vld [vmem:[%s15267_s30 + $0x29c0] sm:$0xff]  ;;  %1814 = vst [vmem:[%s15275_s12 + $0xa68] sm:$0xff] %v1813_v13 }
 0x160   : > { %v1817_v15 = vld [vmem:[%s15267_s30 + $0x29e0] sm:$0xff]  ;;  %1816 = vst [vmem:[%s15275_s12 + $0xa70] sm:$0xff] %v1815_v14 }
 0x161   : > { %1818 = vst [vmem:[%s15275_s12 + $0xa78] sm:$0xff] %v1817_v15  ;;  %v1819_v16 = vld [vmem:[%s15267_s30 + $0x2a00] sm:$0xff] }
 0x162   : > { %v1821_v17 = vld [vmem:[%s15267_s30 + $0x2a20] sm:$0xff]  ;;  %1820 = vst [vmem:[%s15275_s12 + $0xa80] sm:$0xff] %v1819_v16 }
 0x163   : > { %v1823_v18 = vld [vmem:[%s15267_s30 + $0x2a40] sm:$0xff]  ;;  %1822 = vst [vmem:[%s15275_s12 + $0xa88] sm:$0xff] %v1821_v17 }
 0x164   : > { %1824 = vst [vmem:[%s15275_s12 + $0xa90] sm:$0xff] %v1823_v18  ;;  %v1825_v19 = vld [vmem:[%s15267_s30 + $0x2a60] sm:$0xff] }
 0x165   : > { %v1827_v20 = vld [vmem:[%s15267_s30 + $0x2a80] sm:$0xff]  ;;  %1826 = vst [vmem:[%s15275_s12 + $0xa98] sm:$0xff] %v1825_v19 }
 0x166   : > { %v1829_v21 = vld [vmem:[%s15267_s30 + $0x2aa0] sm:$0xff]  ;;  %1828 = vst [vmem:[%s15275_s12 + $0xaa0] sm:$0xff] %v1827_v20 }
 0x167   : > { %1830 = vst [vmem:[%s15275_s12 + $0xaa8] sm:$0xff] %v1829_v21  ;;  %v1831_v22 = vld [vmem:[%s15267_s30 + $0x2ac0] sm:$0xff] }
 0x168   : > { %v1833_v23 = vld [vmem:[%s15267_s30 + $0x2ae0] sm:$0xff]  ;;  %1832 = vst [vmem:[%s15275_s12 + $0xab0] sm:$0xff] %v1831_v22 }
 0x169   : > { %v1835_v24 = vld [vmem:[%s15267_s30 + $0x2b00] sm:$0xff]  ;;  %1834 = vst [vmem:[%s15275_s12 + $0xab8] sm:$0xff] %v1833_v23 }
 0x16a   : > { %1836 = vst [vmem:[%s15275_s12 + $0xac0] sm:$0xff] %v1835_v24  ;;  %v1837_v25 = vld [vmem:[%s15267_s30 + $0x2b20] sm:$0xff] }
 0x16b   : > { %v1839_v26 = vld [vmem:[%s15267_s30 + $0x2b40] sm:$0xff]  ;;  %1838 = vst [vmem:[%s15275_s12 + $0xac8] sm:$0xff] %v1837_v25 }
 0x16c   : > { %v1841_v27 = vld [vmem:[%s15267_s30 + $0x2b60] sm:$0xff]  ;;  %1840 = vst [vmem:[%s15275_s12 + $0xad0] sm:$0xff] %v1839_v26 }
 0x16d   : > { %1842 = vst [vmem:[%s15275_s12 + $0xad8] sm:$0xff] %v1841_v27  ;;  %v1843_v28 = vld [vmem:[%s15267_s30 + $0x2b80] sm:$0xff] }
 0x16e   : > { %v1845_v29 = vld [vmem:[%s15267_s30 + $0x2ba0] sm:$0xff]  ;;  %1844 = vst [vmem:[%s15275_s12 + $0xae0] sm:$0xff] %v1843_v28 }
 0x16f   : > { %v1847_v30 = vld [vmem:[%s15267_s30 + $0x2bc0] sm:$0xff]  ;;  %1846 = vst [vmem:[%s15275_s12 + $0xae8] sm:$0xff] %v1845_v29 }
 0x170   : > { %1848 = vst [vmem:[%s15275_s12 + $0xaf0] sm:$0xff] %v1847_v30  ;;  %v1849_v31 = vld [vmem:[%s15267_s30 + $0x2be0] sm:$0xff] }
 0x171   : > { %v1851_v32 = vld [vmem:[%s15267_s30 + $0x2c00] sm:$0xff]  ;;  %1850 = vst [vmem:[%s15275_s12 + $0xaf8] sm:$0xff] %v1849_v31 }
 0x172   : > { %v1853_v33 = vld [vmem:[%s15267_s30 + $0x2c20] sm:$0xff]  ;;  %1852 = vst [vmem:[%s15275_s12 + $0xb00] sm:$0xff] %v1851_v32 }
 0x173   : > { %1854 = vst [vmem:[%s15275_s12 + $0xb08] sm:$0xff] %v1853_v33  ;;  %v1855_v34 = vld [vmem:[%s15267_s30 + $0x2c40] sm:$0xff] }
 0x174   : > { %v1857_v35 = vld [vmem:[%s15267_s30 + $0x2c60] sm:$0xff]  ;;  %1856 = vst [vmem:[%s15275_s12 + $0xb10] sm:$0xff] %v1855_v34 }
 0x175   : > { %v1859_v36 = vld [vmem:[%s15267_s30 + $0x2c80] sm:$0xff]  ;;  %1858 = vst [vmem:[%s15275_s12 + $0xb18] sm:$0xff] %v1857_v35 }
 0x176   : > { %1860 = vst [vmem:[%s15275_s12 + $0xb20] sm:$0xff] %v1859_v36  ;;  %v1861_v37 = vld [vmem:[%s15267_s30 + $0x2ca0] sm:$0xff] }
 0x177   : > { %v1863_v38 = vld [vmem:[%s15267_s30 + $0x2cc0] sm:$0xff]  ;;  %1862 = vst [vmem:[%s15275_s12 + $0xb28] sm:$0xff] %v1861_v37 }
 0x178   : > { %v1865_v39 = vld [vmem:[%s15267_s30 + $0x2ce0] sm:$0xff]  ;;  %1864 = vst [vmem:[%s15275_s12 + $0xb30] sm:$0xff] %v1863_v38 }
 0x179   : > { %1866 = vst [vmem:[%s15275_s12 + $0xb38] sm:$0xff] %v1865_v39  ;;  %v1867_v40 = vld [vmem:[%s15267_s30 + $0x2d00] sm:$0xff] }
 0x17a   : > { %v1869_v41 = vld [vmem:[%s15267_s30 + $0x2d20] sm:$0xff]  ;;  %1868 = vst [vmem:[%s15275_s12 + $0xb40] sm:$0xff] %v1867_v40 }
 0x17b   : > { %v1871_v42 = vld [vmem:[%s15267_s30 + $0x2d40] sm:$0xff]  ;;  %1870 = vst [vmem:[%s15275_s12 + $0xb48] sm:$0xff] %v1869_v41 }
 0x17c   : > { %1872 = vst [vmem:[%s15275_s12 + $0xb50] sm:$0xff] %v1871_v42  ;;  %v1873_v43 = vld [vmem:[%s15267_s30 + $0x2d60] sm:$0xff] }
 0x17d   : > { %v1875_v44 = vld [vmem:[%s15267_s30 + $0x2d80] sm:$0xff]  ;;  %1874 = vst [vmem:[%s15275_s12 + $0xb58] sm:$0xff] %v1873_v43 }
 0x17e   : > { %v1877_v45 = vld [vmem:[%s15267_s30 + $0x2da0] sm:$0xff]  ;;  %1876 = vst [vmem:[%s15275_s12 + $0xb60] sm:$0xff] %v1875_v44 }
 0x17f   : > { %1878 = vst [vmem:[%s15275_s12 + $0xb68] sm:$0xff] %v1877_v45  ;;  %v1879_v46 = vld [vmem:[%s15267_s30 + $0x2dc0] sm:$0xff] }
 0x180   : > { %v1881_v47 = vld [vmem:[%s15267_s30 + $0x2de0] sm:$0xff]  ;;  %1880 = vst [vmem:[%s15275_s12 + $0xb70] sm:$0xff] %v1879_v46 }
 0x181   : > { %v1883_v48 = vld [vmem:[%s15267_s30 + $0x2e00] sm:$0xff]  ;;  %1882 = vst [vmem:[%s15275_s12 + $0xb78] sm:$0xff] %v1881_v47 }
 0x182   : > { %1884 = vst [vmem:[%s15275_s12 + $0xb80] sm:$0xff] %v1883_v48  ;;  %v1885_v49 = vld [vmem:[%s15267_s30 + $0x2e20] sm:$0xff] }
 0x183   : > { %v1887_v50 = vld [vmem:[%s15267_s30 + $0x2e40] sm:$0xff]  ;;  %1886 = vst [vmem:[%s15275_s12 + $0xb88] sm:$0xff] %v1885_v49 }
 0x184   : > { %v1889_v51 = vld [vmem:[%s15267_s30 + $0x2e60] sm:$0xff]  ;;  %1888 = vst [vmem:[%s15275_s12 + $0xb90] sm:$0xff] %v1887_v50 }
 0x185   : > { %1890 = vst [vmem:[%s15275_s12 + $0xb98] sm:$0xff] %v1889_v51  ;;  %v1891_v52 = vld [vmem:[%s15267_s30 + $0x2e80] sm:$0xff] }
 0x186   : > { %v1893_v53 = vld [vmem:[%s15267_s30 + $0x2ea0] sm:$0xff]  ;;  %1892 = vst [vmem:[%s15275_s12 + $0xba0] sm:$0xff] %v1891_v52 }
 0x187   : > { %v1895_v54 = vld [vmem:[%s15267_s30 + $0x2ec0] sm:$0xff]  ;;  %1894 = vst [vmem:[%s15275_s12 + $0xba8] sm:$0xff] %v1893_v53 }
 0x188   : > { %1896 = vst [vmem:[%s15275_s12 + $0xbb0] sm:$0xff] %v1895_v54  ;;  %v1897_v55 = vld [vmem:[%s15267_s30 + $0x2ee0] sm:$0xff] }
 0x189   : > { %v1899_v56 = vld [vmem:[%s15267_s30 + $0x2f00] sm:$0xff]  ;;  %1898 = vst [vmem:[%s15275_s12 + $0xbb8] sm:$0xff] %v1897_v55 }
 0x18a   : > { %v1901_v57 = vld [vmem:[%s15267_s30 + $0x2f20] sm:$0xff]  ;;  %1900 = vst [vmem:[%s15275_s12 + $0xbc0] sm:$0xff] %v1899_v56 }
 0x18b   : > { %1902 = vst [vmem:[%s15275_s12 + $0xbc8] sm:$0xff] %v1901_v57  ;;  %v1903_v58 = vld [vmem:[%s15267_s30 + $0x2f40] sm:$0xff] }
 0x18c   : > { %v1905_v59 = vld [vmem:[%s15267_s30 + $0x2f60] sm:$0xff]  ;;  %1904 = vst [vmem:[%s15275_s12 + $0xbd0] sm:$0xff] %v1903_v58 }
 0x18d   : > { %v1907_v60 = vld [vmem:[%s15267_s30 + $0x2f80] sm:$0xff]  ;;  %1906 = vst [vmem:[%s15275_s12 + $0xbd8] sm:$0xff] %v1905_v59 }
 0x18e   : > { %1908 = vst [vmem:[%s15275_s12 + $0xbe0] sm:$0xff] %v1907_v60  ;;  %v1909_v61 = vld [vmem:[%s15267_s30 + $0x2fa0] sm:$0xff] }
 0x18f   : > { %v1911_v62 = vld [vmem:[%s15267_s30 + $0x2fc0] sm:$0xff]  ;;  %1910 = vst [vmem:[%s15275_s12 + $0xbe8] sm:$0xff] %v1909_v61 }
 0x190   : > { %v1913_v63 = vld [vmem:[%s15267_s30 + $0x2fe0] sm:$0xff]  ;;  %1912 = vst [vmem:[%s15275_s12 + $0xbf0] sm:$0xff] %v1911_v62 }
 0x191   : > { %1914 = vst [vmem:[%s15275_s12 + $0xbf8] sm:$0xff] %v1913_v63  ;;  %v1915_v0 = vld [vmem:[%s15267_s30 + $0x3000] sm:$0xff] }
 0x192   : > { %v1917_v1 = vld [vmem:[%s15267_s30 + $0x3020] sm:$0xff]  ;;  %1916 = vst [vmem:[%s15275_s12 + $0xc00] sm:$0xff] %v1915_v0 }
 0x193   : > { %v1919_v2 = vld [vmem:[%s15267_s30 + $0x3040] sm:$0xff]  ;;  %1918 = vst [vmem:[%s15275_s12 + $0xc08] sm:$0xff] %v1917_v1 }
 0x194   : > { %1920 = vst [vmem:[%s15275_s12 + $0xc10] sm:$0xff] %v1919_v2  ;;  %v1921_v3 = vld [vmem:[%s15267_s30 + $0x3060] sm:$0xff] }
 0x195   : > { %v1923_v4 = vld [vmem:[%s15267_s30 + $0x3080] sm:$0xff]  ;;  %1922 = vst [vmem:[%s15275_s12 + $0xc18] sm:$0xff] %v1921_v3 }
 0x196   : > { %v1925_v5 = vld [vmem:[%s15267_s30 + $0x30a0] sm:$0xff]  ;;  %1924 = vst [vmem:[%s15275_s12 + $0xc20] sm:$0xff] %v1923_v4 }
 0x197   : > { %1926 = vst [vmem:[%s15275_s12 + $0xc28] sm:$0xff] %v1925_v5  ;;  %v1927_v6 = vld [vmem:[%s15267_s30 + $0x30c0] sm:$0xff] }
 0x198   : > { %v1929_v7 = vld [vmem:[%s15267_s30 + $0x30e0] sm:$0xff]  ;;  %1928 = vst [vmem:[%s15275_s12 + $0xc30] sm:$0xff] %v1927_v6 }
 0x199   : > { %1930 = vst [vmem:[%s15275_s12 + $0xc38] sm:$0xff] %v1929_v7 }
 0x19a PF: > { %p11930_p5 = scmp.ge.s32.totalorder %s15162_s19, 1  ;;  %p1952_p6 = scmp.lt.s32.totalorder %s15162_s19, 5 }
 0x19c   : > { %p1953_p7 = pnand %p11930_p5, %p1952_p6 }
 0x19d   : > { %s1959_s13 = sand.u32 (!%p1953_p7), 1, %s15154_s17   ;;  %s11931_s14 = sshll.u32 (!%p1953_p7), %s15247_s20, 1 }
 0x19e   : > { %1956 = sbr.rel (%p1953_p7) target bundleno = 2354 (0x932), region = 98  ;;  %p2004_p8 = scmp.lt.s32.totalorder (!%p1953_p7), %s11931_s14, 7 }
 0x19f   : > { %s13689_s15 = smul.u32 (!%p1953_p7), 3136, %s1959_s13  ;;  %s11932_s16 = sshll.u32 (!%p1953_p7), %s15247_s20, 5 }
 0x1a0   : > { %p2009_p9 = scmp.lt.s32.totalorder (!%p1953_p7), %s11932_s16, 127  ;;  %p11934_p10 = scmp.ne.s32.totalorder (!%p1953_p7), %s15247_s20, 0 }
 0x1a1   : > { %s16071_s17 = scalar_lea.vmem (!%p1953_p7), [#allocation4], %s13689_s15 }
 0x1a5   : > { %s19563_s14 = smov (!%p2004_p8, %s11931_s14), 7  ;;  %s19565_s16 = smov (!%p2009_p9, %s11932_s16), 127 }
 0x1a6   : > { %s2006_s25 = scalar_lea.vmem %s19505_s8, %s19563_s14  ;;  %s11933_s19 = sshll.u32 %s19565_s16, 3 }
 0x1a7   : > { %s16069_s28 = scalar_lea.vmem %s19506_s9, %s11933_s19  ;;  %2018 = sbr.rel (%p11934_p10) target bundleno = 1478 (0x5c6), region = 106 }
 0x1ae   : > { %v13727_v8 = vld [vmem:[%s19498_s1 + $0x4] ss:$52 sps:$4 sm:$0xff]   ;;  %v13729_v9 = vld [vmem:[%s19498_s1 + $0xc] ss:$52 sps:$4 sm:$0xff]   ;;  %v13732_v11 = vld [vmem:[%s19498_s1 + $0x8] ss:$52 sps:$4 sm:$0xff]  }
 0x1af   : > { %4674 = vmatprep.subr.bf16.mxu0 %v13727_v8  ;;  %v13731_v10 = vld [vmem:[%s19498_s1] ss:$52 sps:$4 sm:$0xff]   ;;  %4876 = vmatprep.subr.bf16.mxu1 %v13729_v9  ;;  %v13737_v14 = vld [vmem:[%s19498_s1 + $0x68] ss:$52 sps:$4 sm:$0xff]   ;;  %v13738_v15 = vld [vmem:[%s19498_s1 + $0x70] ss:$52 sps:$4 sm:$0xff]  }
 0x1b0   : > { %v13733_v12 = vld [vmem:[%s19498_s1 + $0x6c] ss:$52 sps:$4 sm:$0xff]   ;;  %4675 = vmatpush1.bf16.msra.mxu0 %v13731_v10  ;;  %4877 = vmatpush1.bf16.msra.mxu1 %v13732_v11  ;;  %v13735_v13 = vld [vmem:[%s19498_s1 + $0x74] ss:$52 sps:$4 sm:$0xff]   ;;  %v13741_v17 = vld [vmem:[%s19498_s1 + $0xdc] ss:$52 sps:$4 sm:$0xff]  }
 0x1b1   : > { %4676 = vmatprep.subr.bf16.mxu0 %v13733_v12  ;;  %4878 = vmatprep.subr.bf16.mxu1 %v13735_v13  ;;  %v13739_v16 = vld [vmem:[%s19498_s1 + $0xd4] ss:$52 sps:$4 sm:$0xff]   ;;  %v13743_v18 = vld [vmem:[%s19498_s1 + $0xd0] ss:$52 sps:$4 sm:$0xff]   ;;  %v13744_v19 = vld [vmem:[%s19498_s1 + $0xd8] ss:$52 sps:$4 sm:$0xff]  }
 0x1b2   : > { %v13745_v20 = vld [vmem:[%s19498_s1 + $0x13c] ss:$52 sps:$4 sm:$0xff]   ;;  %v13747_v21 = vld [vmem:[%s19498_s1 + $0x144] ss:$52 sps:$4 sm:$0xff]   ;;  %v13750_v23 = vld [vmem:[%s19498_s1 + $0x140] ss:$52 sps:$4 sm:$0xff]  }
 0x1b3   : > { %v13749_v22 = vld [vmem:[%s19498_s1 + $0x138] ss:$52 sps:$4 sm:$0xff]   ;;  %v13755_v26 = vld [vmem:[%s19498_s1 + $0x1a0] ss:$52 sps:$4 sm:$0xff]   ;;  %v13756_v27 = vld [vmem:[%s19498_s1 + $0x1a8] ss:$52 sps:$4 sm:$0xff]  }
 0x1b4   : > { %4677 = vmatpush1.bf16.msra.mxu0 %v13737_v14  ;;  %4879 = vmatpush1.bf16.msra.mxu1 %v13738_v15  ;;  %v13751_v24 = vld [vmem:[%s19498_s1 + $0x1a4] ss:$52 sps:$4 sm:$0xff]   ;;  %v13753_v25 = vld [vmem:[%s19498_s1 + $0x1ac] ss:$52 sps:$4 sm:$0xff]   ;;  %v13759_v29 = vld [vmem:[%s19498_s1 + $0x214] ss:$52 sps:$4 sm:$0xff]  }
 0x1b5   : > { %4678 = vmatprep.subr.bf16.mxu0 %v13739_v16  ;;  %4880 = vmatprep.subr.bf16.mxu1 %v13741_v17  ;;  %v13757_v28 = vld [vmem:[%s19498_s1 + $0x20c] ss:$52 sps:$4 sm:$0xff]   ;;  %v13761_v30 = vld [vmem:[%s19498_s1 + $0x208] ss:$52 sps:$4 sm:$0xff]   ;;  %v13762_v31 = vld [vmem:[%s19498_s1 + $0x210] ss:$52 sps:$4 sm:$0xff]  }
 0x1b6   : > { %v13763_v32 = vld [vmem:[%s19498_s1 + $0x274] ss:$52 sps:$4 sm:$0xff]   ;;  %v13765_v33 = vld [vmem:[%s19498_s1 + $0x27c] ss:$52 sps:$4 sm:$0xff]   ;;  %v13768_v35 = vld [vmem:[%s19498_s1 + $0x278] ss:$52 sps:$4 sm:$0xff]  }
 0x1b7   : > { %v13767_v34 = vld [vmem:[%s19498_s1 + $0x270] ss:$52 sps:$4 sm:$0xff]   ;;  %v13773_v38 = vld [vmem:[%s19498_s1 + $0x2d8] ss:$52 sps:$4 sm:$0xff]   ;;  %v13774_v39 = vld [vmem:[%s19498_s1 + $0x2e0] ss:$52 sps:$4 sm:$0xff]  }
 0x1b8   : > { %4679 = vmatpush1.bf16.msra.mxu0 %v13743_v18  ;;  %4881 = vmatpush1.bf16.msra.mxu1 %v13744_v19  ;;  %v13769_v36 = vld [vmem:[%s19498_s1 + $0x2dc] ss:$52 sps:$4 sm:$0xff]   ;;  %v13771_v37 = vld [vmem:[%s19498_s1 + $0x2e4] ss:$52 sps:$4 sm:$0xff]   ;;  %v13777_v41 = vld [vmem:[%s19498_s1 + $0x34c] ss:$52 sps:$4 sm:$0xff]  }
 0x1b9   : > { %4680 = vmatprep.subr.bf16.mxu0 %v13745_v20  ;;  %4882 = vmatprep.subr.bf16.mxu1 %v13747_v21  ;;  %v13775_v40 = vld [vmem:[%s19498_s1 + $0x344] ss:$52 sps:$4 sm:$0xff]   ;;  %v13779_v42 = vld [vmem:[%s19498_s1 + $0x340] ss:$52 sps:$4 sm:$0xff]   ;;  %v13780_v43 = vld [vmem:[%s19498_s1 + $0x348] ss:$52 sps:$4 sm:$0xff]  }
 0x1ba   : > { %v13781_v44 = vld [vmem:[%s19498_s1 + $0x3ac] ss:$52 sps:$4 sm:$0xff]   ;;  %v13783_v45 = vld [vmem:[%s19498_s1 + $0x3b4] ss:$52 sps:$4 sm:$0xff]   ;;  %v13786_v47 = vld [vmem:[%s19498_s1 + $0x3b0] ss:$52 sps:$4 sm:$0xff]  }
 0x1bb   : > { %v13785_v46 = vld [vmem:[%s19498_s1 + $0x3a8] ss:$52 sps:$4 sm:$0xff]   ;;  %v13791_v50 = vld [vmem:[%s19498_s1 + $0x410] ss:$52 sps:$4 sm:$0xff]   ;;  %v13792_v51 = vld [vmem:[%s19498_s1 + $0x418] ss:$52 sps:$4 sm:$0xff]  }
 0x1bc   : > { %4681 = vmatpush1.bf16.msra.mxu0 %v13749_v22  ;;  %4883 = vmatpush1.bf16.msra.mxu1 %v13750_v23  ;;  %v13787_v48 = vld [vmem:[%s19498_s1 + $0x414] ss:$52 sps:$4 sm:$0xff]   ;;  %v13789_v49 = vld [vmem:[%s19498_s1 + $0x41c] ss:$52 sps:$4 sm:$0xff]   ;;  %v13795_v53 = vld [vmem:[%s19498_s1 + $0x484] ss:$52 sps:$4 sm:$0xff]  }
 0x1bd   : > { %4682 = vmatprep.subr.bf16.mxu0 %v13751_v24  ;;  %4884 = vmatprep.subr.bf16.mxu1 %v13753_v25  ;;  %v13793_v52 = vld [vmem:[%s19498_s1 + $0x47c] ss:$52 sps:$4 sm:$0xff]   ;;  %v13797_v54 = vld [vmem:[%s19498_s1 + $0x478] ss:$52 sps:$4 sm:$0xff]   ;;  %v13823_v55 = vld [vmem:[%s19497_s0 + $0x4] ss:$16 sps:$4 sm:$0xff]  }
 0x1be   : > { %v13798_v56 = vld [vmem:[%s19498_s1 + $0x480] ss:$52 sps:$4 sm:$0xff]   ;;  %v13799_v57 = vld [vmem:[%s19498_s1 + $0x4e4] ss:$52 sps:$4 sm:$0xff]   ;;  %4706 = vmatprep.mubr.bf16.mxu0 %v13823_v55  ;;  %4908 = vmatprep.mubr.bf16.mxu1 %v13823_v55  ;;  %v13804_v60 = vld [vmem:[%s19498_s1 + $0x4e8] ss:$52 sps:$4 sm:$0xff]  }
 0x1bf   : > { %v13801_v58 = vld [vmem:[%s19498_s1 + $0x4ec] ss:$52 sps:$4 sm:$0xff]   ;;  %v13807_v62 = vld [vmem:[%s19498_s1 + $0x554] ss:$52 sps:$4 sm:$0xff]   ;;  %v13810_v0 = vld [vmem:[%s19498_s1 + $0x550] ss:$52 sps:$4 sm:$0xff]  }
 0x1c0   : > { %4683 = vmatpush1.bf16.msra.mxu0 %v13755_v26  ;;  %4885 = vmatpush1.bf16.msra.mxu1 %v13756_v27  ;;  %v13803_v59 = vld [vmem:[%s19498_s1 + $0x4e0] ss:$52 sps:$4 sm:$0xff]   ;;  %v13809_v63 = vld [vmem:[%s19498_s1 + $0x548] ss:$52 sps:$4 sm:$0xff]   ;;  %v13815_v3 = vld [vmem:[%s19498_s1 + $0x5b0] ss:$52 sps:$4 sm:$0xff]  }
 0x1c1   : > { %4684 = vmatprep.subr.bf16.mxu0 %v13757_v28  ;;  %4886 = vmatprep.subr.bf16.mxu1 %v13759_v29  ;;  %v13805_v61 = vld [vmem:[%s19498_s1 + $0x54c] ss:$52 sps:$4 sm:$0xff]   ;;  %v13811_v1 = vld [vmem:[%s19498_s1 + $0x5b4] ss:$52 sps:$4 sm:$0xff]   ;;  %v13813_v2 = vld [vmem:[%s19498_s1 + $0x5bc] ss:$52 sps:$4 sm:$0xff]  }
 0x1c2   : > { %v13816_v4 = vld [vmem:[%s19498_s1 + $0x5b8] ss:$52 sps:$4 sm:$0xff]   ;;  %v13817_v5 = vld [vmem:[%s19498_s1 + $0x61c] ss:$52 sps:$4 sm:$0xff]   ;;  %v13822_v8 = vld [vmem:[%s19498_s1 + $0x620] ss:$52 sps:$4 sm:$0xff]  }
 0x1c3   : > { %v13819_v6 = vld [vmem:[%s19498_s1 + $0x624] ss:$52 sps:$4 sm:$0xff]   ;;  %v13830_v10 = vld [vmem:[%s19498_s1 + $0x68c] ss:$52 sps:$4 sm:$0xff]   ;;  %v13828_v12 = vld [vmem:[%s19498_s1 + $0x688] ss:$52 sps:$4 sm:$0xff]  }
 0x1c4   : > { %4685 = vmatpush1.bf16.msra.mxu0 %v13761_v30  ;;  %4887 = vmatpush1.bf16.msra.mxu1 %v13762_v31  ;;  %v13821_v7 = vld [vmem:[%s19498_s1 + $0x618] ss:$52 sps:$4 sm:$0xff]   ;;  %v13825_v11 = vld [vmem:[%s19498_s1 + $0x680] ss:$52 sps:$4 sm:$0xff]   ;;  %v13832_v17 = vld [vmem:[%s19498_s1 + $0x6e8] ss:$52 sps:$4 sm:$0xff]  }
 0x1c5   : > { %4686 = vmatprep.subr.bf16.mxu0 %v13763_v32  ;;  %4888 = vmatprep.subr.bf16.mxu1 %v13765_v33  ;;  %v13827_v9 = vld [vmem:[%s19498_s1 + $0x684] ss:$52 sps:$4 sm:$0xff]   ;;  %v13831_v13 = vld [vmem:[%s19497_s0] ss:$16 sps:$4 sm:$0xff]   ;;  %v13837_v15 = vld [vmem:[%s19498_s1 + $0x6f4] ss:$52 sps:$4 sm:$0xff]  }
 0x1c6   : > { %v13834_v14 = vld [vmem:[%s19498_s1 + $0x6ec] ss:$52 sps:$4 sm:$0xff]   ;;  %v13844_v16 = vld [vmem:[%s19497_s0 + $0x24] ss:$16 sps:$4 sm:$0xff]   ;;  %v13843_v20 = vld [vmem:[%s19498_s1 + $0x75c] ss:$52 sps:$4 sm:$0xff]  }
 0x1c7   : > { %v13835_v18 = vld [vmem:[%s19498_s1 + $0x6f0] ss:$52 sps:$4 sm:$0xff]   ;;  %v13840_v19 = vld [vmem:[%s19498_s1 + $0x754] ss:$52 sps:$4 sm:$0xff]   ;;  %v13841_v22 = vld [vmem:[%s19498_s1 + $0x758] ss:$52 sps:$4 sm:$0xff]  }
 0x1c8   : > { %4687 = vmatpush1.bf16.msra.mxu0 %v13767_v34  ;;  %4889 = vmatpush1.bf16.msra.mxu1 %v13768_v35  ;;  %v13838_v21 = vld [vmem:[%s19498_s1 + $0x750] ss:$52 sps:$4 sm:$0xff]   ;;  %v13847_v27 = vld [vmem:[%s19498_s1 + $0x7b8] ss:$52 sps:$4 sm:$0xff]   ;;  %v13850_v28 = vld [vmem:[%s19498_s1 + $0x7c0] ss:$52 sps:$4 sm:$0xff]  }
 0x1c9   : > { %4688 = vmatprep.subr.bf16.mxu0 %v13769_v36  ;;  %4890 = vmatprep.subr.bf16.mxu1 %v13771_v37  ;;  %v13846_v23 = vld [vmem:[%s19497_s0 + $0x20] ss:$16 sps:$4 sm:$0xff]   ;;  %v13852_v25 = vld [vmem:[%s19498_s1 + $0x7c4] ss:$52 sps:$4 sm:$0xff]   ;;  %v13856_v32 = vld [vmem:[%s19498_s1 + $0x828] ss:$52 sps:$4 sm:$0xff]  }
 0x1ca   : > { %v13849_v24 = vld [vmem:[%s19498_s1 + $0x7bc] ss:$52 sps:$4 sm:$0xff]   ;;  %v13859_v26 = vld [vmem:[%s19497_s0 + $0x44] ss:$16 sps:$4 sm:$0xff]   ;;  %v13858_v30 = vld [vmem:[%s19498_s1 + $0x82c] ss:$52 sps:$4 sm:$0xff]  }
 0x1cb   : > { %v13855_v29 = vld [vmem:[%s19498_s1 + $0x824] ss:$52 sps:$4 sm:$0xff]   ;;  %v13853_v31 = vld [vmem:[%s19498_s1 + $0x820] ss:$52 sps:$4 sm:$0xff]   ;;  %v13862_v37 = vld [vmem:[%s19498_s1 + $0x888] ss:$52 sps:$4 sm:$0xff]  }
 0x1cc   : > { %4689 = vmatpush1.bf16.msra.mxu0 %v13773_v38  ;;  %4891 = vmatpush1.bf16.msra.mxu1 %v13774_v39  ;;  %v13861_v33 = vld [vmem:[%s19497_s0 + $0x40] ss:$16 sps:$4 sm:$0xff]   ;;  %v13867_v35 = vld [vmem:[%s19498_s1 + $0x894] ss:$52 sps:$4 sm:$0xff]   ;;  %vm4612_vm0 = vcmask 818176   ;;  %vm4634_vm1 = vcmask 1041408  }
 0x1cd   : > { %4690 = vmatprep.subr.bf16.mxu0 %v13775_v40  ;;  %4892 = vmatprep.subr.bf16.mxu1 %v13777_v41  ;;  %v13864_v34 = vld [vmem:[%s19498_s1 + $0x88c] ss:$52 sps:$4 sm:$0xff]   ;;  %v13874_v36 = vld [vmem:[%s19497_s0 + $0x64] ss:$16 sps:$4 sm:$0xff]   ;;  %v13873_v40 = vld [vmem:[%s19498_s1 + $0x8fc] ss:$52 sps:$4 sm:$0xff]  }
 0x1ce   : > { %v13865_v38 = vld [vmem:[%s19498_s1 + $0x890] ss:$52 sps:$4 sm:$0xff]   ;;  %v13870_v39 = vld [vmem:[%s19498_s1 + $0x8f4] ss:$52 sps:$4 sm:$0xff]   ;;  %vm15166_vm2 = vmmov 0   ;;  %vm7582_vm3 = vcmask 261120  }
 0x1cf   : > { %v13876_v41 = vld [vmem:[%s19497_s0 + $0x60] ss:$16 sps:$4 sm:$0xff]   ;;  %v13897_v55 = vld [vmem:[%s19498_s1 + $0xa34] ss:$52 sps:$4 sm:$0xff]   ;;  %vm8273_vm4 = vcmask 523264   ;;  %s15167_s15 = smov 64  }
 0x1d0   : > { %4691 = vmatpush1.bf16.msra.mxu0 %v13779_v42  ;;  %4893 = vmatpush1.bf16.msra.mxu1 %v13780_v43  ;;  %v13868_v42 = vld [vmem:[%s19498_s1 + $0x8f0] ss:$52 sps:$4 sm:$0xff]   ;;  %v13871_v43 = vld [vmem:[%s19498_s1 + $0x8f8] ss:$52 sps:$4 sm:$0xff]   ;;  %vm8286_vm5 = vcmask 517120   ;;  %vm8658_vm6 = vcmask 74752  }
 0x1d1   : > { %4692 = vmatprep.subr.bf16.mxu0 %v13781_v44  ;;  %4894 = vmatprep.subr.bf16.mxu1 %v13783_v45  ;;  %v13879_v44 = vld [vmem:[%s19498_s1 + $0x95c] ss:$52 sps:$4 sm:$0xff]   ;;  %v13882_v45 = vld [vmem:[%s19498_s1 + $0x964] ss:$52 sps:$4 sm:$0xff]   ;;  %vm8302_vm7 = vcmask 1041920  }
 0x1d4   : > { %4693 = vmatpush1.bf16.msra.mxu0 %v13785_v46  ;;  %4895 = vmatpush1.bf16.msra.mxu1 %v13786_v47  ;;  %v13889_v46 = vld [vmem:[%s19497_s0 + $0x84] ss:$16 sps:$4 sm:$0xff]   ;;  %v13877_v47 = vld [vmem:[%s19498_s1 + $0x958] ss:$52 sps:$4 sm:$0xff]  }
 0x1d5   : > { %4694 = vmatprep.subr.bf16.mxu0 %v13787_v48  ;;  %4896 = vmatprep.subr.bf16.mxu1 %v13789_v49  ;;  %v13880_v48 = vld [vmem:[%s19498_s1 + $0x960] ss:$52 sps:$4 sm:$0xff]   ;;  %v13885_v49 = vld [vmem:[%s19498_s1 + $0x9c4] ss:$52 sps:$4 sm:$0xff]  }
 0x1d8   : > { %4695 = vmatpush1.bf16.msra.mxu0 %v13791_v50  ;;  %4897 = vmatpush1.bf16.msra.mxu1 %v13792_v51  ;;  %v13888_v50 = vld [vmem:[%s19498_s1 + $0x9cc] ss:$52 sps:$4 sm:$0xff]  }
 0x1d9   : > { %4696 = vmatprep.subr.bf16.mxu0 %v13793_v52  ;;  %4898 = vmatprep.subr.bf16.mxu1 %v13795_v53  ;;  %v13883_v51 = vld [vmem:[%s19498_s1 + $0x9c0] ss:$52 sps:$4 sm:$0xff]   ;;  %v13886_v53 = vld [vmem:[%s19498_s1 + $0x9c8] ss:$52 sps:$4 sm:$0xff]  }
 0x1da   : > { %v13891_v52 = vld [vmem:[%s19497_s0 + $0x80] ss:$16 sps:$4 sm:$0xff]  }
 0x1dc   : > { %4697 = vmatpush1.bf16.msra.mxu0 %v13797_v54  ;;  %4899 = vmatpush1.bf16.msra.mxu1 %v13798_v56  ;;  %v13894_v54 = vld [vmem:[%s19498_s1 + $0xa2c] ss:$52 sps:$4 sm:$0xff]   ;;  %v13904_v56 = vld [vmem:[%s19497_s0 + $0xa4] ss:$16 sps:$4 sm:$0xff]  }
 0x1dd   : > { %4698 = vmatprep.subr.bf16.mxu0 %v13799_v57  ;;  %4900 = vmatprep.subr.bf16.mxu1 %v13801_v58  ;;  %v13892_v57 = vld [vmem:[%s19498_s1 + $0xa28] ss:$52 sps:$4 sm:$0xff]   ;;  %v13895_v58 = vld [vmem:[%s19498_s1 + $0xa30] ss:$52 sps:$4 sm:$0xff]  }
 0x1e0   : > { %4699 = vmatpush1.bf16.msra.mxu0 %v13803_v59  ;;  %4901 = vmatpush1.bf16.msra.mxu1 %v13804_v60  ;;  %v13900_v59 = vld [vmem:[%s19498_s1 + $0xa94] ss:$52 sps:$4 sm:$0xff]   ;;  %v13903_v60 = vld [vmem:[%s19498_s1 + $0xa9c] ss:$52 sps:$4 sm:$0xff]  }
 0x1e1   : > { %4700 = vmatprep.subr.bf16.mxu0 %v13805_v61  ;;  %4902 = vmatprep.subr.bf16.mxu1 %v13807_v62  ;;  %v13898_v61 = vld [vmem:[%s19498_s1 + $0xa90] ss:$52 sps:$4 sm:$0xff]  }
 0x1e2   : > { %v13906_v62 = vld [vmem:[%s19497_s0 + $0xa0] ss:$16 sps:$4 sm:$0xff]  }
 0x1e4   : > { %4701 = vmatpush1.bf16.msra.mxu0 %v13809_v63  ;;  %4903 = vmatpush1.bf16.msra.mxu1 %v13810_v0  ;;  %v2043_v63 = vld [vmem:[%s19497_s0 + $0xc0] sm:$0x11]  ;;  %v13901_v0 = vld [vmem:[%s19498_s1 + $0xa98] ss:$52 sps:$4 sm:$0xff]  }
 0x1e5   : > { %4702 = vmatprep.subr.bf16.mxu0 %v13811_v1  ;;  %4904 = vmatprep.subr.bf16.mxu1 %v13813_v2  ;;  %v13909_v1 = vld [vmem:[%s19498_s1 + $0xafc] ss:$52 sps:$4 sm:$0xff]   ;;  %v13912_v2 = vld [vmem:[%s19498_s1 + $0xb04] ss:$52 sps:$4 sm:$0xff]  }
 0x1e8   : > { %4703 = vmatpush1.bf16.msra.mxu0 %v13815_v3  ;;  %4905 = vmatpush1.bf16.msra.mxu1 %v13816_v4  ;;  %v16443_v3 = vcombine.high %v2043_v63, %v2043_v63  ;;  %v13907_v4 = vld [vmem:[%s19498_s1 + $0xaf8] ss:$52 sps:$4 sm:$0xff]  }
 0x1e9   : > { %4704 = vmatprep.subr.bf16.mxu0 %v13817_v5  ;;  %4906 = vmatprep.subr.bf16.mxu1 %v13819_v6  ;;  %v13910_v5 = vld [vmem:[%s19498_s1 + $0xb00] ss:$52 sps:$4 sm:$0xff]   ;;  %v13915_v6 = vld [vmem:[%s19498_s1 + $0xb64] ss:$52 sps:$4 sm:$0xff]  }
 0x1ec   : > { %4705 = vmatpush1.bf16.msra.mxu0 %v13821_v7  ;;  %4907 = vmatpush1.bf16.msra.mxu1 %v13822_v8  ;;  %v13918_v7 = vld [vmem:[%s19498_s1 + $0xb6c] ss:$52 sps:$4 sm:$0xff]  }
 0x1ed   : > { %4775 = vmatprep.subr.bf16.mxu0 %v13827_v9  ;;  %4977 = vmatprep.subr.bf16.mxu1 %v13830_v10  ;;  %v13913_v8 = vld [vmem:[%s19498_s1 + $0xb60] ss:$52 sps:$4 sm:$0xff]   ;;  %v13916_v9 = vld [vmem:[%s19498_s1 + $0xb68] ss:$52 sps:$4 sm:$0xff]   ;;  %v16465_v10 = vcombine.low %v2043_v63, %v2043_v63  ;;  %v13988_v63 = vld [vmem:[%s19498_s1 + $0x2f0] ss:$52 sps:$4 sm:$0xff]  }
 0x1ef   : > { %4707 = vmatmul.mubr.bf16.vlgmr.msra.gmra.mrb[0].mxu0 %v13831_v13  ;;  %4909 = vmatmul.mubr.bf16.vlgmr.msra.gmra.mrb[0].mxu1 %v13831_v13  ;;  %v2465_v13 = vld [vmem:[%s19498_s1 + $0xc30] sm:$0x33] }
 0x1f0   : > { %4776 = vmatpush1.bf16.msra.mxu0 %v13825_v11  ;;  %4978 = vmatpush1.bf16.msra.mxu1 %v13828_v12  ;;  %v13923_v11 = vld [vmem:[%s19498_s1 + $0xbcc] ss:$52 sps:$4 sm:$0xff]   ;;  %v13926_v12 = vld [vmem:[%s19498_s1 + $0xbd4] ss:$52 sps:$4 sm:$0xff]  }
 0x1f1   : > { %4777 = vmatprep.subr.bf16.mxu0 %v13834_v14  ;;  %4979 = vmatprep.subr.bf16.mxu1 %v13837_v15  ;;  %v2466_v14 = vld [vmem:[%s19498_s1 + $0xc38] sm:$0x33] }
 0x1f2   : > { %4716 = vmatprep.mubr.bf16.mxu0 %v13844_v16  ;;  %4918 = vmatprep.mubr.bf16.mxu1 %v13844_v16  ;;  %v13931_v15 = vld [vmem:[%s19497_s0 + $0xc] ss:$16 sps:$4 sm:$0xff]  }
 0x1f3   : > { %v13921_v16 = vld [vmem:[%s19498_s1 + $0xbc8] ss:$52 sps:$4 sm:$0xff]  }
 0x1f4   : > { %4778 = vmatpush1.bf16.msra.mxu0 %v13832_v17  ;;  %4980 = vmatpush1.bf16.msra.mxu1 %v13835_v18  ;;  %v13924_v17 = vld [vmem:[%s19498_s1 + $0xbd0] ss:$52 sps:$4 sm:$0xff]   ;;  %v12354_v18 = vcombine.high %v2465_v13, %v2465_v13 }
 0x1f5   : > { %4779 = vmatprep.subr.bf16.mxu0 %v13840_v19  ;;  %4981 = vmatprep.subr.bf16.mxu1 %v13843_v20  ;;  %v12356_v19 = vcombine.high %v2466_v14, %v2466_v14  ;;  %v12353_v20 = vcombine.low %v2465_v13, %v2465_v13  ;;  %v14014_v13 = vld [vmem:[%s19498_s1 + $0x42c] ss:$52 sps:$4 sm:$0xff]  }
 0x1f7   : > { %4717 = vmatmul.mubr.bf16.gmra.mrb[4].mxu0 %v13846_v23  ;;  %4919 = vmatmul.mubr.bf16.gmra.mrb[4].mxu1 %v13846_v23  ;;  %v4636_v23 = vsel %vm4634_vm1, %v12353_v20, 0 }
 0x1f8   : > { %4780 = vmatpush1.bf16.msra.mxu0 %v13838_v21  ;;  %4982 = vmatpush1.bf16.msra.mxu1 %v13841_v22  ;;  %v12355_v21 = vcombine.low %v2466_v14, %v2466_v14  ;;  %v13936_v22 = vld [vmem:[%s19498_s1 + $0x14] ss:$52 sps:$4 sm:$0xff]  }
 0x1f9   : > { %4781 = vmatprep.subr.bf16.mxu0 %v13849_v24  ;;  %4983 = vmatprep.subr.bf16.mxu1 %v13852_v25  ;;  %v13939_v25 = vld [vmem:[%s19498_s1 + $0x1c] ss:$52 sps:$4 sm:$0xff]   ;;  %v14008_v14 = vld [vmem:[%s19497_s0 + $0xa8] ss:$16 sps:$4 sm:$0xff]  }
 0x1fa   : > { %4726 = vmatprep.mubr.bf16.mxu0 %v13859_v26  ;;  %4928 = vmatprep.mubr.bf16.mxu1 %v13859_v26  ;;  %v4642_v24 = vsel %vm4634_vm1, %v12355_v21, 0  ;;  %v13933_v26 = vld [vmem:[%s19497_s0 + $0x8] ss:$16 sps:$4 sm:$0xff]  }
 0x1fb   : > { %v14015_v21 = vld [vmem:[%s19498_s1 + $0x488] ss:$52 sps:$4 sm:$0xff]  }
 0x1fc   : > { %4782 = vmatpush1.bf16.msra.mxu0 %v13847_v27  ;;  %4984 = vmatpush1.bf16.msra.mxu1 %v13850_v28  ;;  %v13934_v27 = vld [vmem:[%s19498_s1 + $0x10] ss:$52 sps:$4 sm:$0xff]   ;;  %v13937_v28 = vld [vmem:[%s19498_s1 + $0x18] ss:$52 sps:$4 sm:$0xff]  }
 0x1fd   : > { %4783 = vmatprep.subr.bf16.mxu0 %v13855_v29  ;;  %4985 = vmatprep.subr.bf16.mxu1 %v13858_v30  ;;  %v13942_v29 = vld [vmem:[%s19498_s1 + $0x7c] ss:$52 sps:$4 sm:$0xff]   ;;  %v13945_v30 = vld [vmem:[%s19498_s1 + $0x84] ss:$52 sps:$4 sm:$0xff]  }
 0x1ff   : > { %4727 = vmatmul.mubr.bf16.gmra.mrb[8].mxu0 %v13861_v33  ;;  %4929 = vmatmul.mubr.bf16.gmra.mrb[8].mxu1 %v13861_v33  ;;  %v13943_v33 = vld [vmem:[%s19498_s1 + $0x80] ss:$52 sps:$4 sm:$0xff]  }
 0x200   : > { %4784 = vmatpush1.bf16.msra.mxu0 %v13853_v31  ;;  %4986 = vmatpush1.bf16.msra.mxu1 %v13856_v32  ;;  %v13946_v31 = vld [vmem:[%s19497_s0 + $0x2c] ss:$16 sps:$4 sm:$0xff]  }
 0x201   : > { %4785 = vmatprep.subr.bf16.mxu0 %v13864_v34  ;;  %4987 = vmatprep.subr.bf16.mxu1 %v13867_v35  ;;  %v13940_v32 = vld [vmem:[%s19498_s1 + $0x78] ss:$52 sps:$4 sm:$0xff]  }
 0x202   : > { %4736 = vmatprep.mubr.bf16.mxu0 %v13874_v36  ;;  %4938 = vmatprep.mubr.bf16.mxu1 %v13874_v36  ;;  %v13951_v34 = vld [vmem:[%s19498_s1 + $0xe4] ss:$52 sps:$4 sm:$0xff]   ;;  %v13954_v35 = vld [vmem:[%s19498_s1 + $0xec] ss:$52 sps:$4 sm:$0xff]  }
 0x203   : > { %v13948_v36 = vld [vmem:[%s19497_s0 + $0x28] ss:$16 sps:$4 sm:$0xff]  }
 0x204   : > { %4786 = vmatpush1.bf16.msra.mxu0 %v13862_v37  ;;  %4988 = vmatpush1.bf16.msra.mxu1 %v13865_v38  ;;  %v13949_v37 = vld [vmem:[%s19498_s1 + $0xe0] ss:$52 sps:$4 sm:$0xff]   ;;  %v13952_v38 = vld [vmem:[%s19498_s1 + $0xe8] ss:$52 sps:$4 sm:$0xff]  }
 0x205   : > { %4787 = vmatprep.subr.bf16.mxu0 %v13870_v39  ;;  %4989 = vmatprep.subr.bf16.mxu1 %v13873_v40  ;;  %v13957_v39 = vld [vmem:[%s19498_s1 + $0x14c] ss:$52 sps:$4 sm:$0xff]   ;;  %v13960_v40 = vld [vmem:[%s19498_s1 + $0x154] ss:$52 sps:$4 sm:$0xff]  }
 0x207   : > { %4737 = vmatmul.mubr.bf16.gmra.mrb[12].mxu0 %v13876_v41  ;;  %4939 = vmatmul.mubr.bf16.gmra.mrb[12].mxu1 %v13876_v41  ;;  %v13961_v41 = vld [vmem:[%s19497_s0 + $0x4c] ss:$16 sps:$4 sm:$0xff]  }
 0x208   : > { %4788 = vmatpush1.bf16.msra.mxu0 %v13868_v42  ;;  %4990 = vmatpush1.bf16.msra.mxu1 %v13871_v43  ;;  %v13955_v42 = vld [vmem:[%s19498_s1 + $0x148] ss:$52 sps:$4 sm:$0xff]   ;;  %v13958_v43 = vld [vmem:[%s19498_s1 + $0x150] ss:$52 sps:$4 sm:$0xff]  }
 0x209   : > { %4789 = vmatprep.subr.bf16.mxu0 %v13879_v44  ;;  %4991 = vmatprep.subr.bf16.mxu1 %v13882_v45  ;;  %v13966_v44 = vld [vmem:[%s19498_s1 + $0x1b4] ss:$52 sps:$4 sm:$0xff]   ;;  %v13969_v45 = vld [vmem:[%s19498_s1 + $0x1bc] ss:$52 sps:$4 sm:$0xff]  }
 0x20a   : > { %4746 = vmatprep.mubr.bf16.mxu0 %v13889_v46  ;;  %4948 = vmatprep.mubr.bf16.mxu1 %v13889_v46  ;;  %v13963_v46 = vld [vmem:[%s19497_s0 + $0x48] ss:$16 sps:$4 sm:$0xff]  }
 0x20c   : > { %4790 = vmatpush1.bf16.msra.mxu0 %v13877_v47  ;;  %4992 = vmatpush1.bf16.msra.mxu1 %v13880_v48  ;;  %v13964_v47 = vld [vmem:[%s19498_s1 + $0x1b0] ss:$52 sps:$4 sm:$0xff]   ;;  %v13967_v48 = vld [vmem:[%s19498_s1 + $0x1b8] ss:$52 sps:$4 sm:$0xff]  }
 0x20d   : > { %4791 = vmatprep.subr.bf16.mxu0 %v13885_v49  ;;  %4993 = vmatprep.subr.bf16.mxu1 %v13888_v50  ;;  %v13972_v49 = vld [vmem:[%s19498_s1 + $0x21c] ss:$52 sps:$4 sm:$0xff]   ;;  %v13975_v50 = vld [vmem:[%s19498_s1 + $0x224] ss:$52 sps:$4 sm:$0xff]  }
 0x20f   : > { %4747 = vmatmul.mubr.bf16.gmra.mrb[16].mxu0 %v13891_v52  ;;  %4949 = vmatmul.mubr.bf16.gmra.mrb[16].mxu1 %v13891_v52  ;;  %v13970_v52 = vld [vmem:[%s19498_s1 + $0x218] ss:$52 sps:$4 sm:$0xff]  }
 0x210   : > { %4792 = vmatpush1.bf16.msra.mxu0 %v13883_v51  ;;  %4994 = vmatpush1.bf16.msra.mxu1 %v13886_v53  ;;  %v13976_v51 = vld [vmem:[%s19497_s0 + $0x6c] ss:$16 sps:$4 sm:$0xff]   ;;  %v13973_v53 = vld [vmem:[%s19498_s1 + $0x220] ss:$52 sps:$4 sm:$0xff]  }
 0x211   : > { %4793 = vmatprep.subr.bf16.mxu0 %v13894_v54  ;;  %4995 = vmatprep.subr.bf16.mxu1 %v13897_v55  ;;  %v13981_v54 = vld [vmem:[%s19498_s1 + $0x284] ss:$52 sps:$4 sm:$0xff]   ;;  %v13984_v55 = vld [vmem:[%s19498_s1 + $0x28c] ss:$52 sps:$4 sm:$0xff]  }
 0x212   : > { %4756 = vmatprep.mubr.bf16.mxu0 %v13904_v56  ;;  %4958 = vmatprep.mubr.bf16.mxu1 %v13904_v56  ;;  %v13978_v56 = vld [vmem:[%s19497_s0 + $0x68] ss:$16 sps:$4 sm:$0xff]  }
 0x214   : > { %4794 = vmatpush1.bf16.msra.mxu0 %v13892_v57  ;;  %4996 = vmatpush1.bf16.msra.mxu1 %v13895_v58  ;;  %v13979_v57 = vld [vmem:[%s19498_s1 + $0x280] ss:$52 sps:$4 sm:$0xff]   ;;  %v13982_v58 = vld [vmem:[%s19498_s1 + $0x288] ss:$52 sps:$4 sm:$0xff]  }
 0x215   : > { %4795 = vmatprep.subr.bf16.mxu0 %v13900_v59  ;;  %4997 = vmatprep.subr.bf16.mxu1 %v13903_v60  ;;  %v13987_v59 = vld [vmem:[%s19498_s1 + $0x2ec] ss:$52 sps:$4 sm:$0xff]   ;;  %v13990_v60 = vld [vmem:[%s19498_s1 + $0x2f4] ss:$52 sps:$4 sm:$0xff]  }
 0x217   : > { %4757 = vmatmul.mubr.bf16.gmra.mrb[20].mxu0 %v13906_v62  ;;  %4959 = vmatmul.mubr.bf16.gmra.mrb[20].mxu1 %v13906_v62  ;;  %v13985_v62 = vld [vmem:[%s19498_s1 + $0x2e8] ss:$52 sps:$4 sm:$0xff]  }
 0x218   : > { %4796 = vmatpush1.bf16.msra.mxu0 %v13898_v61  ;;  %4998 = vmatpush1.bf16.msra.mxu1 %v13901_v0  ;;  %v13991_v61 = vld [vmem:[%s19497_s0 + $0x8c] ss:$16 sps:$4 sm:$0xff]   ;;  %v13996_v0 = vld [vmem:[%s19498_s1 + $0x354] ss:$52 sps:$4 sm:$0xff]  }
 0x219   : > { %4797 = vmatprep.subr.bf16.mxu0 %v13909_v1  ;;  %4999 = vmatprep.subr.bf16.mxu1 %v13912_v2  ;;  %v13999_v1 = vld [vmem:[%s19498_s1 + $0x35c] ss:$52 sps:$4 sm:$0xff]   ;;  %v13993_v2 = vld [vmem:[%s19497_s0 + $0x88] ss:$16 sps:$4 sm:$0xff]  }
 0x21a   : > { %4766 = vmatprep.mubr.bf16.mxu0 %v16443_v3  ;;  %4968 = vmatprep.mubr.bf16.mxu1 %v16443_v3 }
 0x21c   : > { %4798 = vmatpush1.bf16.msra.mxu0 %v13907_v4  ;;  %5000 = vmatpush1.bf16.msra.mxu1 %v13910_v5  ;;  %v13994_v4 = vld [vmem:[%s19498_s1 + $0x350] ss:$52 sps:$4 sm:$0xff]   ;;  %v13997_v5 = vld [vmem:[%s19498_s1 + $0x358] ss:$52 sps:$4 sm:$0xff]  }
 0x21d   : > { %4799 = vmatprep.subr.bf16.mxu0 %v13915_v6  ;;  %5001 = vmatprep.subr.bf16.mxu1 %v13918_v7  ;;  %v14002_v6 = vld [vmem:[%s19498_s1 + $0x3bc] ss:$52 sps:$4 sm:$0xff]   ;;  %v14005_v7 = vld [vmem:[%s19498_s1 + $0x3c4] ss:$52 sps:$4 sm:$0xff]  }
 0x21f   : > { %4767 = vmatmul.mubr.bf16.gmra.mrb[24].mxu0 %v16465_v10  ;;  %4969 = vmatmul.mubr.bf16.gmra.mrb[24].mxu1 %v16465_v10 }
 0x220   : > { %4800 = vmatpush1.bf16.msra.mxu0 %v13913_v8  ;;  %5002 = vmatpush1.bf16.msra.mxu1 %v13916_v9  ;;  %v14006_v8 = vld [vmem:[%s19497_s0 + $0xac] ss:$16 sps:$4 sm:$0xff]  }
 0x221   : > { %4801 = vmatprep.subr.bf16.mxu0 %v13923_v11  ;;  %5003 = vmatprep.subr.bf16.mxu1 %v13926_v12  ;;  %v14000_v9 = vld [vmem:[%s19498_s1 + $0x3b8] ss:$52 sps:$4 sm:$0xff]   ;;  %v14003_v11 = vld [vmem:[%s19498_s1 + $0x3c0] ss:$52 sps:$4 sm:$0xff]  }
 0x222   : > { %12367 = vmatprep.mubr.msk.bf16.mxu0 %vm4612_vm0, %v13931_v15  ;;  %12375 = vmatprep.mubr.msk.bf16.mxu1 %vm4612_vm0, %v13931_v15  ;;  %v14011_v12 = vld [vmem:[%s19498_s1 + $0x424] ss:$52 sps:$4 sm:$0xff]   ;;  %v14009_v15 = vld [vmem:[%s19498_s1 + $0x420] ss:$52 sps:$4 sm:$0xff]  }
 0x224   : > { %4802 = vmatpush1.bf16.msra.mxu0 %v13921_v16  ;;  %5004 = vmatpush1.bf16.msra.mxu1 %v13924_v17  ;;  %v14012_v16 = vld [vmem:[%s19498_s1 + $0x428] ss:$52 sps:$4 sm:$0xff]  }
 0x225   : > { %12366 = vmatprep.subr.msk.bf16.mxu0 %vm4634_vm1, %v12354_v18  ;;  %12374 = vmatprep.subr.msk.bf16.mxu1 %vm4634_vm1, %v12356_v19  ;;  %v2044_v17 = vld [vmem:[%s19497_s0 + $0xc8] sm:$0x11] }
 0x226   : > { %v14017_v18 = vld [vmem:[%s19498_s1 + $0x48c] ss:$52 sps:$4 sm:$0xff]   ;;  %v14020_v19 = vld [vmem:[%s19498_s1 + $0x494] ss:$52 sps:$4 sm:$0xff]   ;;  %v16680_v20 = vcombine.high %v2044_v17, %v2044_v17 }
 0x228   : > { %4804 = vmatpush1.bf16.msra.mxu0 %v4636_v23  ;;  %5006 = vmatpush1.bf16.msra.mxu1 %v4642_v24  ;;  %v14025_v23 = vld [vmem:[%s19498_s1 + $0x4f4] ss:$52 sps:$4 sm:$0xff]   ;;  %v14028_v24 = vld [vmem:[%s19498_s1 + $0x4fc] ss:$52 sps:$4 sm:$0xff]  }
 0x229   : > { %5078 = vmatprep.subr.bf16.mxu0 %v13936_v22  ;;  %5280 = vmatprep.subr.bf16.mxu1 %v13939_v25  ;;  %v14018_v22 = vld [vmem:[%s19498_s1 + $0x490] ss:$52 sps:$4 sm:$0xff]   ;;  %v16698_v25 = vcombine.low %v2044_v17, %v2044_v17 }
 0x22a   : > { %v14092_v17 = vld [vmem:[%s19498_s1 + $0x970] ss:$52 sps:$4 sm:$0xff]  }
 0x22b   : > { %4808 = vmatmul.mubr.bf16.vlgmr.msra.gmra.mrb[0].mxu0 %v13933_v26  ;;  %5010 = vmatmul.mubr.bf16.vlgmr.msra.gmra.mrb[0].mxu1 %v13933_v26  ;;  %v14023_v26 = vld [vmem:[%s19498_s1 + $0x4f0] ss:$52 sps:$4 sm:$0xff]  }
 0x22c   : > { %5079 = vmatpush1.bf16.msra.mxu0 %v13934_v27  ;;  %5281 = vmatpush1.bf16.msra.mxu1 %v13937_v28  ;;  %v14026_v27 = vld [vmem:[%s19498_s1 + $0x4f8] ss:$52 sps:$4 sm:$0xff]   ;;  %v14031_v28 = vld [vmem:[%s19498_s1 + $0x55c] ss:$52 sps:$4 sm:$0xff]  }
 0x22d   : > { %5080 = vmatprep.subr.bf16.mxu0 %v13942_v29  ;;  %5282 = vmatprep.subr.bf16.mxu1 %v13945_v30  ;;  %v14034_v29 = vld [vmem:[%s19498_s1 + $0x564] ss:$52 sps:$4 sm:$0xff]  }
 0x22e   : > { %12368 = vmatprep.mubr.msk.bf16.mxu0 %vm4612_vm0, %v13946_v31  ;;  %12376 = vmatprep.mubr.msk.bf16.mxu1 %vm4612_vm0, %v13946_v31  ;;  %v14029_v30 = vld [vmem:[%s19498_s1 + $0x558] ss:$52 sps:$4 sm:$0xff]   ;;  %v14032_v31 = vld [vmem:[%s19498_s1 + $0x560] ss:$52 sps:$4 sm:$0xff]  }
 0x230   : > { %5081 = vmatpush1.bf16.msra.mxu0 %v13940_v32  ;;  %5283 = vmatpush1.bf16.msra.mxu1 %v13943_v33  ;;  %v14037_v32 = vld [vmem:[%s19498_s1 + $0x5c4] ss:$52 sps:$4 sm:$0xff]   ;;  %v14040_v33 = vld [vmem:[%s19498_s1 + $0x5cc] ss:$52 sps:$4 sm:$0xff]  }
 0x231   : > { %5082 = vmatprep.subr.bf16.mxu0 %v13951_v34  ;;  %5284 = vmatprep.subr.bf16.mxu1 %v13954_v35  ;;  %v14448_v34 = vld [vmem:[%s19497_s0 + $0x4] ss:$16 sps:$4 sm:$0xff]  }
 0x232   : > { %v14035_v35 = vld [vmem:[%s19498_s1 + $0x5c0] ss:$52 sps:$4 sm:$0xff]  }
 0x233   : > { %4818 = vmatmul.mubr.bf16.gmra.mrb[4].mxu0 %v13948_v36  ;;  %5020 = vmatmul.mubr.bf16.gmra.mrb[4].mxu1 %v13948_v36  ;;  %v14038_v36 = vld [vmem:[%s19498_s1 + $0x5c8] ss:$52 sps:$4 sm:$0xff]  }
 0x234   : > { %5083 = vmatpush1.bf16.msra.mxu0 %v13949_v37  ;;  %5285 = vmatpush1.bf16.msra.mxu1 %v13952_v38  ;;  %v14043_v37 = vld [vmem:[%s19498_s1 + $0x62c] ss:$52 sps:$4 sm:$0xff]   ;;  %v14046_v38 = vld [vmem:[%s19498_s1 + $0x634] ss:$52 sps:$4 sm:$0xff]  }
 0x235   : > { %5084 = vmatprep.subr.bf16.mxu0 %v13957_v39  ;;  %5286 = vmatprep.subr.bf16.mxu1 %v13960_v40  ;;  %v14041_v39 = vld [vmem:[%s19498_s1 + $0x628] ss:$52 sps:$4 sm:$0xff]   ;;  %v14044_v40 = vld [vmem:[%s19498_s1 + $0x630] ss:$52 sps:$4 sm:$0xff]  }
 0x236   : > { %12369 = vmatprep.mubr.msk.bf16.mxu0 %vm4612_vm0, %v13961_v41  ;;  %12377 = vmatprep.mubr.msk.bf16.mxu1 %vm4612_vm0, %v13961_v41  ;;  %v14049_v41 = vld [vmem:[%s19498_s1 + $0x694] ss:$52 sps:$4 sm:$0xff]  }
 0x238   : > { %5085 = vmatpush1.bf16.msra.mxu0 %v13955_v42  ;;  %5287 = vmatpush1.bf16.msra.mxu1 %v13958_v43  ;;  %v14052_v42 = vld [vmem:[%s19498_s1 + $0x69c] ss:$52 sps:$4 sm:$0xff]  }
 0x239   : > { %5086 = vmatprep.subr.bf16.mxu0 %v13966_v44  ;;  %5288 = vmatprep.subr.bf16.mxu1 %v13969_v45  ;;  %v14047_v43 = vld [vmem:[%s19498_s1 + $0x690] ss:$52 sps:$4 sm:$0xff]   ;;  %v14050_v44 = vld [vmem:[%s19498_s1 + $0x698] ss:$52 sps:$4 sm:$0xff]  }
 0x23a   : > { %v14055_v45 = vld [vmem:[%s19498_s1 + $0x6fc] ss:$52 sps:$4 sm:$0xff]  }
 0x23b   : > { %4828 = vmatmul.mubr.bf16.gmra.mrb[8].mxu0 %v13963_v46  ;;  %5030 = vmatmul.mubr.bf16.gmra.mrb[8].mxu1 %v13963_v46  ;;  %v14058_v46 = vld [vmem:[%s19498_s1 + $0x704] ss:$52 sps:$4 sm:$0xff]  }
 0x23c   : > { %5087 = vmatpush1.bf16.msra.mxu0 %v13964_v47  ;;  %5289 = vmatpush1.bf16.msra.mxu1 %v13967_v48  ;;  %v14449_v47 = vld [vmem:[%s19497_s0] ss:$16 sps:$4 sm:$0xff]   ;;  %v14053_v48 = vld [vmem:[%s19498_s1 + $0x6f8] ss:$52 sps:$4 sm:$0xff]  }
 0x23d   : > { %5088 = vmatprep.subr.bf16.mxu0 %v13972_v49  ;;  %5290 = vmatprep.subr.bf16.mxu1 %v13975_v50  ;;  %v14056_v49 = vld [vmem:[%s19498_s1 + $0x700] ss:$52 sps:$4 sm:$0xff]   ;;  %v14061_v50 = vld [vmem:[%s19498_s1 + $0x764] ss:$52 sps:$4 sm:$0xff]  }
 0x23e   : > { %12370 = vmatprep.mubr.msk.bf16.mxu0 %vm4612_vm0, %v13976_v51  ;;  %12378 = vmatprep.mubr.msk.bf16.mxu1 %vm4612_vm0, %v13976_v51  ;;  %v14064_v51 = vld [vmem:[%s19498_s1 + $0x76c] ss:$52 sps:$4 sm:$0xff]  }
 0x240   : > { %5089 = vmatpush1.bf16.msra.mxu0 %v13970_v52  ;;  %5291 = vmatpush1.bf16.msra.mxu1 %v13973_v53  ;;  %v14450_v52 = vld [vmem:[%s19497_s0 + $0x24] ss:$16 sps:$4 sm:$0xff]  }
 0x241   : > { %5090 = vmatprep.subr.bf16.mxu0 %v13981_v54  ;;  %5292 = vmatprep.subr.bf16.mxu1 %v13984_v55  ;;  %v14059_v53 = vld [vmem:[%s19498_s1 + $0x760] ss:$52 sps:$4 sm:$0xff]   ;;  %v14062_v54 = vld [vmem:[%s19498_s1 + $0x768] ss:$52 sps:$4 sm:$0xff]  }
 0x242   : > { %v14067_v55 = vld [vmem:[%s19498_s1 + $0x7cc] ss:$52 sps:$4 sm:$0xff]  }
 0x243   : > { %4838 = vmatmul.mubr.bf16.gmra.mrb[12].mxu0 %v13978_v56  ;;  %5040 = vmatmul.mubr.bf16.gmra.mrb[12].mxu1 %v13978_v56  ;;  %v14070_v56 = vld [vmem:[%s19498_s1 + $0x7d4] ss:$52 sps:$4 sm:$0xff]  }
 0x244   : > { %5091 = vmatpush1.bf16.msra.mxu0 %v13979_v57  ;;  %5293 = vmatpush1.bf16.msra.mxu1 %v13982_v58  ;;  %v14451_v57 = vld [vmem:[%s19497_s0 + $0x20] ss:$16 sps:$4 sm:$0xff]   ;;  %v14065_v58 = vld [vmem:[%s19498_s1 + $0x7c8] ss:$52 sps:$4 sm:$0xff]  }
 0x245   : > { %5092 = vmatprep.subr.bf16.mxu0 %v13987_v59  ;;  %5294 = vmatprep.subr.bf16.mxu1 %v13990_v60  ;;  %v14068_v59 = vld [vmem:[%s19498_s1 + $0x7d0] ss:$52 sps:$4 sm:$0xff]   ;;  %v14073_v60 = vld [vmem:[%s19498_s1 + $0x834] ss:$52 sps:$4 sm:$0xff]  }
 0x246   : > { %12371 = vmatprep.mubr.msk.bf16.mxu0 %vm4612_vm0, %v13991_v61  ;;  %12379 = vmatprep.mubr.msk.bf16.mxu1 %vm4612_vm0, %v13991_v61  ;;  %v14076_v61 = vld [vmem:[%s19498_s1 + $0x83c] ss:$52 sps:$4 sm:$0xff]  }
 0x248   : > { %5093 = vmatpush1.bf16.msra.mxu0 %v13985_v62  ;;  %5295 = vmatpush1.bf16.msra.mxu1 %v13988_v63  ;;  %v14452_v62 = vld [vmem:[%s19497_s0 + $0x44] ss:$16 sps:$4 sm:$0xff]  }
 0x249   : > { %5094 = vmatprep.subr.bf16.mxu0 %v13996_v0  ;;  %5296 = vmatprep.subr.bf16.mxu1 %v13999_v1  ;;  %v14071_v63 = vld [vmem:[%s19498_s1 + $0x830] ss:$52 sps:$4 sm:$0xff]   ;;  %v14074_v0 = vld [vmem:[%s19498_s1 + $0x838] ss:$52 sps:$4 sm:$0xff]  }
 0x24a   : > { %v14079_v1 = vld [vmem:[%s19498_s1 + $0x89c] ss:$52 sps:$4 sm:$0xff]  }
 0x24b   : > { %4848 = vmatmul.mubr.bf16.gmra.mrb[16].mxu0 %v13993_v2  ;;  %5050 = vmatmul.mubr.bf16.gmra.mrb[16].mxu1 %v13993_v2  ;;  %v14082_v2 = vld [vmem:[%s19498_s1 + $0x8a4] ss:$52 sps:$4 sm:$0xff]  }
 0x24c   : > { %5095 = vmatpush1.bf16.msra.mxu0 %v13994_v4  ;;  %5297 = vmatpush1.bf16.msra.mxu1 %v13997_v5  ;;  %v14453_v4 = vld [vmem:[%s19497_s0 + $0x40] ss:$16 sps:$4 sm:$0xff]   ;;  %v14077_v5 = vld [vmem:[%s19498_s1 + $0x898] ss:$52 sps:$4 sm:$0xff]  }
 0x24d   : > { %5096 = vmatprep.subr.bf16.mxu0 %v14002_v6  ;;  %5298 = vmatprep.subr.bf16.mxu1 %v14005_v7  ;;  %v14080_v6 = vld [vmem:[%s19498_s1 + $0x8a0] ss:$52 sps:$4 sm:$0xff]   ;;  %v14085_v7 = vld [vmem:[%s19498_s1 + $0x904] ss:$52 sps:$4 sm:$0xff]  }
 0x24e   : > { %12372 = vmatprep.mubr.msk.bf16.mxu0 %vm4612_vm0, %v14006_v8  ;;  %12380 = vmatprep.mubr.msk.bf16.mxu1 %vm4612_vm0, %v14006_v8  ;;  %v14088_v8 = vld [vmem:[%s19498_s1 + $0x90c] ss:$52 sps:$4 sm:$0xff]  }
 0x250   : > { %5097 = vmatpush1.bf16.msra.mxu0 %v14000_v9  ;;  %5299 = vmatpush1.bf16.msra.mxu1 %v14003_v11  ;;  %v14454_v9 = vld [vmem:[%s19497_s0 + $0x64] ss:$16 sps:$4 sm:$0xff]  }
 0x251   : > { %5098 = vmatprep.subr.bf16.mxu0 %v14011_v12  ;;  %5300 = vmatprep.subr.bf16.mxu1 %v14014_v13  ;;  %v14083_v11 = vld [vmem:[%s19498_s1 + $0x900] ss:$52 sps:$4 sm:$0xff]   ;;  %v14086_v12 = vld [vmem:[%s19498_s1 + $0x908] ss:$52 sps:$4 sm:$0xff]  }
 0x252   : > { %v14091_v13 = vld [vmem:[%s19498_s1 + $0x96c] ss:$52 sps:$4 sm:$0xff]  }
 0x253   : > { %4858 = vmatmul.mubr.bf16.gmra.mrb[20].mxu0 %v14008_v14  ;;  %5060 = vmatmul.mubr.bf16.gmra.mrb[20].mxu1 %v14008_v14  ;;  %v14094_v14 = vld [vmem:[%s19498_s1 + $0x974] ss:$52 sps:$4 sm:$0xff]  }
 0x254   : > { %5099 = vmatpush1.bf16.msra.mxu0 %v14009_v15  ;;  %5301 = vmatpush1.bf16.msra.mxu1 %v14012_v16  ;;  %v14455_v15 = vld [vmem:[%s19497_s0 + $0x60] ss:$16 sps:$4 sm:$0xff]   ;;  %v14089_v16 = vld [vmem:[%s19498_s1 + $0x968] ss:$52 sps:$4 sm:$0xff]  }
 0x255   : > { %5100 = vmatprep.subr.bf16.mxu0 %v14017_v18  ;;  %5302 = vmatprep.subr.bf16.mxu1 %v14020_v19  ;;  %v14097_v18 = vld [vmem:[%s19498_s1 + $0x9d4] ss:$52 sps:$4 sm:$0xff]   ;;  %v14100_v19 = vld [vmem:[%s19498_s1 + $0x9dc] ss:$52 sps:$4 sm:$0xff]  }
 0x256   : > { %12373 = vmatprep.mubr.msk.bf16.mxu0 %vm4612_vm0, %v16680_v20  ;;  %12381 = vmatprep.mubr.msk.bf16.mxu1 %vm4612_vm0, %v16680_v20 }
 0x258   : > { %5101 = vmatpush1.bf16.msra.mxu0 %v14015_v21  ;;  %5303 = vmatpush1.bf16.msra.mxu1 %v14018_v22  ;;  %v14456_v21 = vld [vmem:[%s19497_s0 + $0x84] ss:$16 sps:$4 sm:$0xff]  }
 0x259   : > { %5102 = vmatprep.subr.bf16.mxu0 %v14025_v23  ;;  %5304 = vmatprep.subr.bf16.mxu1 %v14028_v24  ;;  %v14095_v22 = vld [vmem:[%s19498_s1 + $0x9d0] ss:$52 sps:$4 sm:$0xff]   ;;  %v14098_v23 = vld [vmem:[%s19498_s1 + $0x9d8] ss:$52 sps:$4 sm:$0xff]  }
 0x25a   : > { %v14103_v24 = vld [vmem:[%s19498_s1 + $0xa3c] ss:$52 sps:$4 sm:$0xff]  }
 0x25b   : > { %4868 = vmatmul.mubr.bf16.gmra.mrb[24].mxu0 %v16698_v25  ;;  %5070 = vmatmul.mubr.bf16.gmra.mrb[24].mxu1 %v16698_v25 }
 0x25c   : > { %5103 = vmatpush1.bf16.msra.mxu0 %v14023_v26  ;;  %5305 = vmatpush1.bf16.msra.mxu1 %v14026_v27  ;;  %v14106_v26 = vld [vmem:[%s19498_s1 + $0xa44] ss:$52 sps:$4 sm:$0xff]   ;;  %v14457_v27 = vld [vmem:[%s19497_s0 + $0x80] ss:$16 sps:$4 sm:$0xff]  }
 0x25d   : > { %5104 = vmatprep.subr.bf16.mxu0 %v14031_v28  ;;  %5306 = vmatprep.subr.bf16.mxu1 %v14034_v29  ;;  %v14101_v28 = vld [vmem:[%s19498_s1 + $0xa38] ss:$52 sps:$4 sm:$0xff]   ;;  %v14104_v29 = vld [vmem:[%s19498_s1 + $0xa40] ss:$52 sps:$4 sm:$0xff]  }
 0x25e   : > { %5110 = vmatprep.mubr.bf16.mxu0 %v14448_v34  ;;  %5312 = vmatprep.mubr.bf16.mxu1 %v14448_v34  ;;  %v14110_v34 = vld [vmem:[%s19498_s1 + $0xaa8] ss:$52 sps:$4 sm:$0xff]  }
 0x260   : > { %5105 = vmatpush1.bf16.msra.mxu0 %v14029_v30  ;;  %5307 = vmatpush1.bf16.msra.mxu1 %v14032_v31  ;;  %v14109_v30 = vld [vmem:[%s19498_s1 + $0xaa4] ss:$52 sps:$4 sm:$0xff]   ;;  %v14112_v31 = vld [vmem:[%s19498_s1 + $0xaac] ss:$52 sps:$4 sm:$0xff]  }
 0x261   : > { %5106 = vmatprep.subr.bf16.mxu0 %v14037_v32  ;;  %5308 = vmatprep.subr.bf16.mxu1 %v14040_v33  ;;  %v14458_v32 = vld [vmem:[%s19497_s0 + $0xa4] ss:$16 sps:$4 sm:$0xff]  }
 0x262   : > { %v14107_v33 = vld [vmem:[%s19498_s1 + $0xaa0] ss:$52 sps:$4 sm:$0xff]  }
 0x264   : > { %5107 = vmatpush1.bf16.msra.mxu0 %v14035_v35  ;;  %5309 = vmatpush1.bf16.msra.mxu1 %v14038_v36  ;;  %v14115_v35 = vld [vmem:[%s19498_s1 + $0xb0c] ss:$52 sps:$4 sm:$0xff]   ;;  %v14118_v36 = vld [vmem:[%s19498_s1 + $0xb14] ss:$52 sps:$4 sm:$0xff]  }
 0x265   : > { %5108 = vmatprep.subr.bf16.mxu0 %v14043_v37  ;;  %5310 = vmatprep.subr.bf16.mxu1 %v14046_v38  ;;  %v14459_v37 = vld [vmem:[%s19497_s0 + $0xa0] ss:$16 sps:$4 sm:$0xff]   ;;  %v14113_v38 = vld [vmem:[%s19498_s1 + $0xb08] ss:$52 sps:$4 sm:$0xff]  }
 0x268   : > { %5109 = vmatpush1.bf16.msra.mxu0 %v14041_v39  ;;  %5311 = vmatpush1.bf16.msra.mxu1 %v14044_v40  ;;  %v14116_v39 = vld [vmem:[%s19498_s1 + $0xb10] ss:$52 sps:$4 sm:$0xff]   ;;  %v14121_v40 = vld [vmem:[%s19498_s1 + $0xb74] ss:$52 sps:$4 sm:$0xff]  }
 0x269   : > { %5179 = vmatprep.subr.bf16.mxu0 %v14049_v41  ;;  %5381 = vmatprep.subr.bf16.mxu1 %v14052_v42  ;;  %v14124_v41 = vld [vmem:[%s19498_s1 + $0xb7c] ss:$52 sps:$4 sm:$0xff]  }
 0x26a   : > { %v14119_v42 = vld [vmem:[%s19498_s1 + $0xb70] ss:$52 sps:$4 sm:$0xff]  }
 0x26b   : > { %5111 = vmatmul.mubr.bf16.vlgmr.msra.gmra.mrb[28].mxu0 %v14449_v47  ;;  %5313 = vmatmul.mubr.bf16.vlgmr.msra.gmra.mrb[28].mxu1 %v14449_v47  ;;  %v2468_v47 = vld [vmem:[%s19498_s1 + $0xc48] sm:$0x33] }
 0x26c   : > { %5180 = vmatpush1.bf16.msra.mxu0 %v14047_v43  ;;  %5382 = vmatpush1.bf16.msra.mxu1 %v14050_v44  ;;  %v14122_v43 = vld [vmem:[%s19498_s1 + $0xb78] ss:$52 sps:$4 sm:$0xff]   ;;  %v14127_v44 = vld [vmem:[%s19498_s1 + $0xbdc] ss:$52 sps:$4 sm:$0xff]  }
 0x26d   : > { %5181 = vmatprep.subr.bf16.mxu0 %v14055_v45  ;;  %5383 = vmatprep.subr.bf16.mxu1 %v14058_v46  ;;  %v14130_v45 = vld [vmem:[%s19498_s1 + $0xbe4] ss:$52 sps:$4 sm:$0xff]  }
 0x26e   : > { %5120 = vmatprep.mubr.bf16.mxu0 %v14450_v52  ;;  %5322 = vmatprep.mubr.bf16.mxu1 %v14450_v52  ;;  %v2467_v46 = vld [vmem:[%s19498_s1 + $0xc40] sm:$0x33] }
 0x26f   : > { %v12357_v52 = vcombine.low %v2467_v46, %v2467_v46 }
 0x270   : > { %5182 = vmatpush1.bf16.msra.mxu0 %v14053_v48  ;;  %5384 = vmatpush1.bf16.msra.mxu1 %v14056_v49  ;;  %v14125_v48 = vld [vmem:[%s19498_s1 + $0xbd8] ss:$52 sps:$4 sm:$0xff]   ;;  %v14128_v49 = vld [vmem:[%s19498_s1 + $0xbe0] ss:$52 sps:$4 sm:$0xff]  }
 0x271   : > { %5183 = vmatprep.subr.bf16.mxu0 %v14061_v50  ;;  %5385 = vmatprep.subr.bf16.mxu1 %v14064_v51  ;;  %v12358_v50 = vcombine.high %v2467_v46, %v2467_v46  ;;  %v12360_v51 = vcombine.high %v2468_v47, %v2468_v47  ;;  %v14192_v46 = vld [vmem:[%s19498_s1 + $0x3d0] ss:$52 sps:$4 sm:$0xff]  }
 0x273   : > { %5121 = vmatmul.mubr.bf16.gmra.mrb[32].mxu0 %v14451_v57  ;;  %5323 = vmatmul.mubr.bf16.gmra.mrb[32].mxu1 %v14451_v57 }
 0x274   : > { %5184 = vmatpush1.bf16.msra.mxu0 %v14059_v53  ;;  %5386 = vmatpush1.bf16.msra.mxu1 %v14062_v54  ;;  %v12359_v53 = vcombine.low %v2468_v47, %v2468_v47  ;;  %v14460_v54 = vld [vmem:[%s19497_s0 + $0xc] ss:$16 sps:$4 sm:$0xff]   ;;  %v14469_v47 = vld [vmem:[%s19497_s0 + $0x88] ss:$16 sps:$4 sm:$0xff]  }
 0x275   : > { %5185 = vmatprep.subr.bf16.mxu0 %v14067_v55  ;;  %5387 = vmatprep.subr.bf16.mxu1 %v14070_v56  ;;  %v14137_v55 = vld [vmem:[%s19498_s1 + $0x24] ss:$52 sps:$4 sm:$0xff]   ;;  %v4648_v56 = vsel %vm4634_vm1, %v12357_v52, 0 }
 0x276   : > { %5130 = vmatprep.mubr.bf16.mxu0 %v14452_v62  ;;  %5332 = vmatprep.mubr.bf16.mxu1 %v14452_v62  ;;  %v4654_v57 = vsel %vm4634_vm1, %v12359_v53, 0  ;;  %v14146_v62 = vld [vmem:[%s19498_s1 + $0x94] ss:$52 sps:$4 sm:$0xff]   ;;  %v14198_v52 = vld [vmem:[%s19498_s1 + $0x438] ss:$52 sps:$4 sm:$0xff]  }
 0x278   : > { %5186 = vmatpush1.bf16.msra.mxu0 %v14065_v58  ;;  %5388 = vmatpush1.bf16.msra.mxu1 %v14068_v59  ;;  %v14140_v58 = vld [vmem:[%s19498_s1 + $0x2c] ss:$52 sps:$4 sm:$0xff]  }
 0x279   : > { %5187 = vmatprep.subr.bf16.mxu0 %v14073_v60  ;;  %5389 = vmatprep.subr.bf16.mxu1 %v14076_v61  ;;  %v14135_v59 = vld [vmem:[%s19498_s1 + $0x20] ss:$52 sps:$4 sm:$0xff]   ;;  %v14138_v60 = vld [vmem:[%s19498_s1 + $0x28] ss:$52 sps:$4 sm:$0xff]  }
 0x27a   : > { %v14143_v61 = vld [vmem:[%s19498_s1 + $0x8c] ss:$52 sps:$4 sm:$0xff]  }
 0x27b   : > { %5131 = vmatmul.mubr.bf16.gmra.mrb[36].mxu0 %v14453_v4  ;;  %5333 = vmatmul.mubr.bf16.gmra.mrb[36].mxu1 %v14453_v4  ;;  %v14152_v4 = vld [vmem:[%s19498_s1 + $0xfc] ss:$52 sps:$4 sm:$0xff]  }
 0x27c   : > { %5188 = vmatpush1.bf16.msra.mxu0 %v14071_v63  ;;  %5390 = vmatpush1.bf16.msra.mxu1 %v14074_v0  ;;  %v14461_v63 = vld [vmem:[%s19497_s0 + $0x8] ss:$16 sps:$4 sm:$0xff]  }
 0x27d   : > { %5189 = vmatprep.subr.bf16.mxu0 %v14079_v1  ;;  %5391 = vmatprep.subr.bf16.mxu1 %v14082_v2  ;;  %v14141_v0 = vld [vmem:[%s19498_s1 + $0x88] ss:$52 sps:$4 sm:$0xff]   ;;  %v14144_v1 = vld [vmem:[%s19498_s1 + $0x90] ss:$52 sps:$4 sm:$0xff]  }
 0x27e   : > { %5140 = vmatprep.mubr.bf16.mxu0 %v14454_v9  ;;  %5342 = vmatprep.mubr.bf16.mxu1 %v14454_v9  ;;  %v14149_v2 = vld [vmem:[%s19498_s1 + $0xf4] ss:$52 sps:$4 sm:$0xff]   ;;  %v14158_v9 = vld [vmem:[%s19498_s1 + $0x164] ss:$52 sps:$4 sm:$0xff]  }
 0x280   : > { %5190 = vmatpush1.bf16.msra.mxu0 %v14077_v5  ;;  %5392 = vmatpush1.bf16.msra.mxu1 %v14080_v6  ;;  %v14462_v5 = vld [vmem:[%s19497_s0 + $0x2c] ss:$16 sps:$4 sm:$0xff]   ;;  %v14147_v6 = vld [vmem:[%s19498_s1 + $0xf0] ss:$52 sps:$4 sm:$0xff]  }
 0x281   : > { %5191 = vmatprep.subr.bf16.mxu0 %v14085_v7  ;;  %5393 = vmatprep.subr.bf16.mxu1 %v14088_v8  ;;  %v14150_v7 = vld [vmem:[%s19498_s1 + $0xf8] ss:$52 sps:$4 sm:$0xff]   ;;  %v14155_v8 = vld [vmem:[%s19498_s1 + $0x15c] ss:$52 sps:$4 sm:$0xff]  }
 0x283   : > { %5141 = vmatmul.mubr.bf16.gmra.mrb[40].mxu0 %v14455_v15  ;;  %5343 = vmatmul.mubr.bf16.gmra.mrb[40].mxu1 %v14455_v15  ;;  %v14164_v15 = vld [vmem:[%s19498_s1 + $0x1cc] ss:$52 sps:$4 sm:$0xff]  }
 0x284   : > { %5192 = vmatpush1.bf16.msra.mxu0 %v14083_v11  ;;  %5394 = vmatpush1.bf16.msra.mxu1 %v14086_v12  ;;  %v14463_v11 = vld [vmem:[%s19497_s0 + $0x28] ss:$16 sps:$4 sm:$0xff]  }
 0x285   : > { %5193 = vmatprep.subr.bf16.mxu0 %v14091_v13  ;;  %5395 = vmatprep.subr.bf16.mxu1 %v14094_v14  ;;  %v14153_v12 = vld [vmem:[%s19498_s1 + $0x158] ss:$52 sps:$4 sm:$0xff]   ;;  %v14156_v13 = vld [vmem:[%s19498_s1 + $0x160] ss:$52 sps:$4 sm:$0xff]  }
 0x286   : > { %5150 = vmatprep.mubr.bf16.mxu0 %v14456_v21  ;;  %5352 = vmatprep.mubr.bf16.mxu1 %v14456_v21  ;;  %v14161_v14 = vld [vmem:[%s19498_s1 + $0x1c4] ss:$52 sps:$4 sm:$0xff]   ;;  %v14170_v21 = vld [vmem:[%s19498_s1 + $0x234] ss:$52 sps:$4 sm:$0xff]  }
 0x288   : > { %5194 = vmatpush1.bf16.msra.mxu0 %v14089_v16  ;;  %5396 = vmatpush1.bf16.msra.mxu1 %v14092_v17  ;;  %v14464_v16 = vld [vmem:[%s19497_s0 + $0x4c] ss:$16 sps:$4 sm:$0xff]   ;;  %v14159_v17 = vld [vmem:[%s19498_s1 + $0x1c0] ss:$52 sps:$4 sm:$0xff]  }
 0x289   : > { %5195 = vmatprep.subr.bf16.mxu0 %v14097_v18  ;;  %5397 = vmatprep.subr.bf16.mxu1 %v14100_v19  ;;  %v14162_v18 = vld [vmem:[%s19498_s1 + $0x1c8] ss:$52 sps:$4 sm:$0xff]   ;;  %v14167_v19 = vld [vmem:[%s19498_s1 + $0x22c] ss:$52 sps:$4 sm:$0xff]  }
 0x28b   : > { %5151 = vmatmul.mubr.bf16.gmra.mrb[44].mxu0 %v14457_v27  ;;  %5353 = vmatmul.mubr.bf16.gmra.mrb[44].mxu1 %v14457_v27  ;;  %v14176_v27 = vld [vmem:[%s19498_s1 + $0x29c] ss:$52 sps:$4 sm:$0xff]  }
 0x28c   : > { %5196 = vmatpush1.bf16.msra.mxu0 %v14095_v22  ;;  %5398 = vmatpush1.bf16.msra.mxu1 %v14098_v23  ;;  %v14165_v22 = vld [vmem:[%s19498_s1 + $0x228] ss:$52 sps:$4 sm:$0xff]  }
 0x28d   : > { %5197 = vmatprep.subr.bf16.mxu0 %v14103_v24  ;;  %5399 = vmatprep.subr.bf16.mxu1 %v14106_v26  ;;  %v14465_v23 = vld [vmem:[%s19497_s0 + $0x48] ss:$16 sps:$4 sm:$0xff]   ;;  %v14168_v24 = vld [vmem:[%s19498_s1 + $0x230] ss:$52 sps:$4 sm:$0xff]  }
 0x28e   : > { %5160 = vmatprep.mubr.bf16.mxu0 %v14458_v32  ;;  %5362 = vmatprep.mubr.bf16.mxu1 %v14458_v32  ;;  %v14173_v26 = vld [vmem:[%s19498_s1 + $0x294] ss:$52 sps:$4 sm:$0xff]   ;;  %v14182_v32 = vld [vmem:[%s19498_s1 + $0x304] ss:$52 sps:$4 sm:$0xff]  }
 0x290   : > { %5198 = vmatpush1.bf16.msra.mxu0 %v14101_v28  ;;  %5400 = vmatpush1.bf16.msra.mxu1 %v14104_v29  ;;  %v14466_v28 = vld [vmem:[%s19497_s0 + $0x6c] ss:$16 sps:$4 sm:$0xff]   ;;  %v14171_v29 = vld [vmem:[%s19498_s1 + $0x290] ss:$52 sps:$4 sm:$0xff]  }
 0x291   : > { %5199 = vmatprep.subr.bf16.mxu0 %v14109_v30  ;;  %5401 = vmatprep.subr.bf16.mxu1 %v14112_v31  ;;  %v14174_v30 = vld [vmem:[%s19498_s1 + $0x298] ss:$52 sps:$4 sm:$0xff]   ;;  %v14179_v31 = vld [vmem:[%s19498_s1 + $0x2fc] ss:$52 sps:$4 sm:$0xff]  }
 0x293   : > { %5161 = vmatmul.mubr.bf16.gmra.mrb[48].mxu0 %v14459_v37  ;;  %5363 = vmatmul.mubr.bf16.gmra.mrb[48].mxu1 %v14459_v37  ;;  %v14188_v37 = vld [vmem:[%s19498_s1 + $0x36c] ss:$52 sps:$4 sm:$0xff]  }
 0x294   : > { %5200 = vmatpush1.bf16.msra.mxu0 %v14107_v33  ;;  %5402 = vmatpush1.bf16.msra.mxu1 %v14110_v34  ;;  %v14177_v33 = vld [vmem:[%s19498_s1 + $0x2f8] ss:$52 sps:$4 sm:$0xff]  }
 0x295   : > { %5201 = vmatprep.subr.bf16.mxu0 %v14115_v35  ;;  %5403 = vmatprep.subr.bf16.mxu1 %v14118_v36  ;;  %v14467_v34 = vld [vmem:[%s19497_s0 + $0x68] ss:$16 sps:$4 sm:$0xff]   ;;  %v14180_v35 = vld [vmem:[%s19498_s1 + $0x300] ss:$52 sps:$4 sm:$0xff]  }
 0x296   : > { %5170 = vmatprep.mubr.bf16.mxu0 %v16443_v3  ;;  %5372 = vmatprep.mubr.bf16.mxu1 %v16443_v3  ;;  %v14185_v36 = vld [vmem:[%s19498_s1 + $0x364] ss:$52 sps:$4 sm:$0xff]  }
 0x298   : > { %5202 = vmatpush1.bf16.msra.mxu0 %v14113_v38  ;;  %5404 = vmatpush1.bf16.msra.mxu1 %v14116_v39  ;;  %v6066_v38 = vlaneseq  ;;  %v14468_v39 = vld [vmem:[%s19497_s0 + $0x8c] ss:$16 sps:$4 sm:$0xff]  }
 0x299   : > { %5203 = vmatprep.subr.bf16.mxu0 %v14121_v40  ;;  %5405 = vmatprep.subr.bf16.mxu1 %v14124_v41  ;;  %v14183_v40 = vld [vmem:[%s19498_s1 + $0x360] ss:$52 sps:$4 sm:$0xff]   ;;  %v14186_v41 = vld [vmem:[%s19498_s1 + $0x368] ss:$52 sps:$4 sm:$0xff]  }
 0x29b   : > { %5171 = vmatmul.mubr.bf16.gmra.mrb[52].mxu0 %v16465_v10  ;;  %5373 = vmatmul.mubr.bf16.gmra.mrb[52].mxu1 %v16465_v10 }
 0x29c   : > { %5204 = vmatpush1.bf16.msra.mxu0 %v14119_v42  ;;  %5406 = vmatpush1.bf16.msra.mxu1 %v14122_v43  ;;  %v14191_v42 = vld [vmem:[%s19498_s1 + $0x3cc] ss:$52 sps:$4 sm:$0xff]   ;;  %v14194_v43 = vld [vmem:[%s19498_s1 + $0x3d4] ss:$52 sps:$4 sm:$0xff]  }
 0x29d   : > { %5205 = vmatprep.subr.bf16.mxu0 %v14127_v44  ;;  %5407 = vmatprep.subr.bf16.mxu1 %v14130_v45  ;;  %v17113_v44 = vshrl.u32 %v6066_v38, 7  ;;  %v14189_v45 = vld [vmem:[%s19498_s1 + $0x3c8] ss:$52 sps:$4 sm:$0xff]   ;;  %v14260_v38 = vld [vmem:[%s19498_s1 + $0x84c] ss:$52 sps:$4 sm:$0xff]  }
 0x29e   : > { %12383 = vmatprep.mubr.msk.bf16.mxu0 %vm4612_vm0, %v14460_v54  ;;  %12391 = vmatprep.mubr.msk.bf16.mxu1 %vm4612_vm0, %v14460_v54  ;;  %v14203_v54 = vld [vmem:[%s19498_s1 + $0x49c] ss:$52 sps:$4 sm:$0xff]  }
 0x29f   : > { %v17142_v53 = vsub.s32 0, %v17113_v44 }
 0x2a0   : > { %5206 = vmatpush1.bf16.msra.mxu0 %v14125_v48  ;;  %5408 = vmatpush1.bf16.msra.mxu1 %v14128_v49  ;;  %v14197_v48 = vld [vmem:[%s19498_s1 + $0x434] ss:$52 sps:$4 sm:$0xff]   ;;  %v14200_v49 = vld [vmem:[%s19498_s1 + $0x43c] ss:$52 sps:$4 sm:$0xff]  }
 0x2a1   : > { %12382 = vmatprep.subr.msk.bf16.mxu0 %vm4634_vm1, %v12358_v50  ;;  %12390 = vmatprep.subr.msk.bf16.mxu1 %vm4634_vm1, %v12360_v51  ;;  %v14470_v50 = vld [vmem:[%s19497_s0 + $0xac] ss:$16 sps:$4 sm:$0xff]   ;;  %v14195_v51 = vld [vmem:[%s19498_s1 + $0x430] ss:$52 sps:$4 sm:$0xff]   ;;  %19526 = vst [vmem:[#allocation8_spill] sm:$0xff] %v17142_v53 }
 0x2a4   : > { %5208 = vmatpush1.bf16.msra.mxu0 %v4648_v56  ;;  %5410 = vmatpush1.bf16.msra.mxu1 %v4654_v57  ;;  %v17151_v56 = vsub.s32 1, %v17113_v44  ;;  %v14206_v57 = vld [vmem:[%s19498_s1 + $0x4a4] ss:$52 sps:$4 sm:$0xff]  }
 0x2a5   : > { %5482 = vmatprep.subr.bf16.mxu0 %v14137_v55  ;;  %5684 = vmatprep.subr.bf16.mxu1 %v14140_v58  ;;  %v17148_v55 = vsub.s32 2, %v17113_v44  ;;  %v14201_v58 = vld [vmem:[%s19498_s1 + $0x498] ss:$52 sps:$4 sm:$0xff]  }
 0x2a6   : > { %19528 = vst [vmem:[#allocation10_spill] sm:$0xff] %v17151_v56 }
 0x2a7   : > { %5212 = vmatmul.mubr.bf16.vlgmr.msra.gmra.mrb[28].mxu0 %v14461_v63  ;;  %5414 = vmatmul.mubr.bf16.vlgmr.msra.gmra.mrb[28].mxu1 %v14461_v63  ;;  %19527 = vst [vmem:[#allocation9_spill] sm:$0xff] %v17148_v55  ;;  %v14207_v63 = vld [vmem:[%s19498_s1 + $0x500] ss:$52 sps:$4 sm:$0xff]  }
 0x2a8   : > { %5483 = vmatpush1.bf16.msra.mxu0 %v14135_v59  ;;  %5685 = vmatpush1.bf16.msra.mxu1 %v14138_v60  ;;  %v14204_v59 = vld [vmem:[%s19498_s1 + $0x4a0] ss:$52 sps:$4 sm:$0xff]   ;;  %v14471_v60 = vld [vmem:[%s19497_s0 + $0xa8] ss:$16 sps:$4 sm:$0xff]  }
 0x2a9   : > { %5484 = vmatprep.subr.bf16.mxu0 %v14143_v61  ;;  %5686 = vmatprep.subr.bf16.mxu1 %v14146_v62  ;;  %v14209_v61 = vld [vmem:[%s19498_s1 + $0x504] ss:$52 sps:$4 sm:$0xff]   ;;  %v14212_v62 = vld [vmem:[%s19498_s1 + $0x50c] ss:$52 sps:$4 sm:$0xff]  }
 0x2aa   : > { %12384 = vmatprep.mubr.msk.bf16.mxu0 %vm4612_vm0, %v14462_v5  ;;  %12392 = vmatprep.mubr.msk.bf16.mxu1 %vm4612_vm0, %v14462_v5  ;;  %v14216_v5 = vld [vmem:[%s19498_s1 + $0x570] ss:$52 sps:$4 sm:$0xff]  }
 0x2ac   : > { %5485 = vmatpush1.bf16.msra.mxu0 %v14141_v0  ;;  %5687 = vmatpush1.bf16.msra.mxu1 %v14144_v1  ;;  %v14210_v0 = vld [vmem:[%s19498_s1 + $0x508] ss:$52 sps:$4 sm:$0xff]   ;;  %v14215_v1 = vld [vmem:[%s19498_s1 + $0x56c] ss:$52 sps:$4 sm:$0xff]  }
 0x2ad   : > { %5486 = vmatprep.subr.bf16.mxu0 %v14149_v2  ;;  %5688 = vmatprep.subr.bf16.mxu1 %v14152_v4  ;;  %v14218_v2 = vld [vmem:[%s19498_s1 + $0x574] ss:$52 sps:$4 sm:$0xff]  }
 0x2ae   : > { %v14213_v4 = vld [vmem:[%s19498_s1 + $0x568] ss:$52 sps:$4 sm:$0xff]  }
 0x2af   : > { %5222 = vmatmul.mubr.bf16.gmra.mrb[32].mxu0 %v14463_v11  ;;  %5424 = vmatmul.mubr.bf16.gmra.mrb[32].mxu1 %v14463_v11  ;;  %v14472_v11 = vld [vmem:[%s19497_s0 + $0x4] ss:$16 sps:$4 sm:$0xff]  }
 0x2b0   : > { %5487 = vmatpush1.bf16.msra.mxu0 %v14147_v6  ;;  %5689 = vmatpush1.bf16.msra.mxu1 %v14150_v7  ;;  %v14221_v6 = vld [vmem:[%s19498_s1 + $0x5d4] ss:$52 sps:$4 sm:$0xff]   ;;  %v14224_v7 = vld [vmem:[%s19498_s1 + $0x5dc] ss:$52 sps:$4 sm:$0xff]  }
 0x2b1   : > { %5488 = vmatprep.subr.bf16.mxu0 %v14155_v8  ;;  %5690 = vmatprep.subr.bf16.mxu1 %v14158_v9  ;;  %v14219_v8 = vld [vmem:[%s19498_s1 + $0x5d0] ss:$52 sps:$4 sm:$0xff]   ;;  %v14222_v9 = vld [vmem:[%s19498_s1 + $0x5d8] ss:$52 sps:$4 sm:$0xff]  }
 0x2b2   : > { %12385 = vmatprep.mubr.msk.bf16.mxu0 %vm4612_vm0, %v14464_v16  ;;  %12393 = vmatprep.mubr.msk.bf16.mxu1 %vm4612_vm0, %v14464_v16  ;;  %v14233_v16 = vld [vmem:[%s19498_s1 + $0x6a4] ss:$52 sps:$4 sm:$0xff]  }
 0x2b4   : > { %5489 = vmatpush1.bf16.msra.mxu0 %v14153_v12  ;;  %5691 = vmatpush1.bf16.msra.mxu1 %v14156_v13  ;;  %v14227_v12 = vld [vmem:[%s19498_s1 + $0x63c] ss:$52 sps:$4 sm:$0xff]   ;;  %v14230_v13 = vld [vmem:[%s19498_s1 + $0x644] ss:$52 sps:$4 sm:$0xff]  }
 0x2b5   : > { %5490 = vmatprep.subr.bf16.mxu0 %v14161_v14  ;;  %5692 = vmatprep.subr.bf16.mxu1 %v14164_v15  ;;  %v14225_v14 = vld [vmem:[%s19498_s1 + $0x638] ss:$52 sps:$4 sm:$0xff]   ;;  %v14228_v15 = vld [vmem:[%s19498_s1 + $0x640] ss:$52 sps:$4 sm:$0xff]  }
 0x2b7   : > { %5232 = vmatmul.mubr.bf16.gmra.mrb[36].mxu0 %v14465_v23  ;;  %5434 = vmatmul.mubr.bf16.gmra.mrb[36].mxu1 %v14465_v23  ;;  %v14237_v23 = vld [vmem:[%s19498_s1 + $0x708] ss:$52 sps:$4 sm:$0xff]  }
 0x2b8   : > { %5491 = vmatpush1.bf16.msra.mxu0 %v14159_v17  ;;  %5693 = vmatpush1.bf16.msra.mxu1 %v14162_v18  ;;  %v14236_v17 = vld [vmem:[%s19498_s1 + $0x6ac] ss:$52 sps:$4 sm:$0xff]  }
 0x2b9   : > { %5492 = vmatprep.subr.bf16.mxu0 %v14167_v19  ;;  %5694 = vmatprep.subr.bf16.mxu1 %v14170_v21  ;;  %v14231_v18 = vld [vmem:[%s19498_s1 + $0x6a0] ss:$52 sps:$4 sm:$0xff]   ;;  %v14234_v19 = vld [vmem:[%s19498_s1 + $0x6a8] ss:$52 sps:$4 sm:$0xff]  }
 0x2ba   : > { %12386 = vmatprep.mubr.msk.bf16.mxu0 %vm4612_vm0, %v14466_v28  ;;  %12394 = vmatprep.mubr.msk.bf16.mxu1 %vm4612_vm0, %v14466_v28  ;;  %v14239_v21 = vld [vmem:[%s19498_s1 + $0x70c] ss:$52 sps:$4 sm:$0xff]   ;;  %v14248_v28 = vld [vmem:[%s19498_s1 + $0x77c] ss:$52 sps:$4 sm:$0xff]  }
 0x2bc   : > { %5493 = vmatpush1.bf16.msra.mxu0 %v14165_v22  ;;  %5695 = vmatpush1.bf16.msra.mxu1 %v14168_v24  ;;  %v14242_v22 = vld [vmem:[%s19498_s1 + $0x714] ss:$52 sps:$4 sm:$0xff]   ;;  %v14240_v24 = vld [vmem:[%s19498_s1 + $0x710] ss:$52 sps:$4 sm:$0xff]  }
 0x2bd   : > { %5494 = vmatprep.subr.bf16.mxu0 %v14173_v26  ;;  %5696 = vmatprep.subr.bf16.mxu1 %v14176_v27  ;;  %v14473_v26 = vld [vmem:[%s19497_s0] ss:$16 sps:$4 sm:$0xff]   ;;  %v14245_v27 = vld [vmem:[%s19498_s1 + $0x774] ss:$52 sps:$4 sm:$0xff]  }
 0x2bf   : > { %5242 = vmatmul.mubr.bf16.gmra.mrb[40].mxu0 %v14467_v34  ;;  %5444 = vmatmul.mubr.bf16.gmra.mrb[40].mxu1 %v14467_v34  ;;  %v14249_v34 = vld [vmem:[%s19498_s1 + $0x7d8] ss:$52 sps:$4 sm:$0xff]  }
 0x2c0   : > { %5495 = vmatpush1.bf16.msra.mxu0 %v14171_v29  ;;  %5697 = vmatpush1.bf16.msra.mxu1 %v14174_v30  ;;  %v14243_v29 = vld [vmem:[%s19498_s1 + $0x770] ss:$52 sps:$4 sm:$0xff]   ;;  %v14246_v30 = vld [vmem:[%s19498_s1 + $0x778] ss:$52 sps:$4 sm:$0xff]  }
 0x2c1   : > { %5496 = vmatprep.subr.bf16.mxu0 %v14179_v31  ;;  %5698 = vmatprep.subr.bf16.mxu1 %v14182_v32  ;;  %v14474_v31 = vld [vmem:[%s19497_s0 + $0x24] ss:$16 sps:$4 sm:$0xff]   ;;  %v14251_v32 = vld [vmem:[%s19498_s1 + $0x7dc] ss:$52 sps:$4 sm:$0xff]  }
 0x2c2   : > { %12387 = vmatprep.mubr.msk.bf16.mxu0 %vm4612_vm0, %v14468_v39  ;;  %12395 = vmatprep.mubr.msk.bf16.mxu1 %vm4612_vm0, %v14468_v39  ;;  %v14255_v39 = vld [vmem:[%s19498_s1 + $0x840] ss:$52 sps:$4 sm:$0xff]  }
 0x2c4   : > { %5497 = vmatpush1.bf16.msra.mxu0 %v14177_v33  ;;  %5699 = vmatpush1.bf16.msra.mxu1 %v14180_v35  ;;  %v14254_v33 = vld [vmem:[%s19498_s1 + $0x7e4] ss:$52 sps:$4 sm:$0xff]   ;;  %v14252_v35 = vld [vmem:[%s19498_s1 + $0x7e0] ss:$52 sps:$4 sm:$0xff]  }
 0x2c5   : > { %5498 = vmatprep.subr.bf16.mxu0 %v14185_v36  ;;  %5700 = vmatprep.subr.bf16.mxu1 %v14188_v37  ;;  %v14475_v36 = vld [vmem:[%s19497_s0 + $0x20] ss:$16 sps:$4 sm:$0xff]   ;;  %v14257_v37 = vld [vmem:[%s19498_s1 + $0x844] ss:$52 sps:$4 sm:$0xff]  }
 0x2c7   : > { %5252 = vmatmul.mubr.bf16.gmra.mrb[44].mxu0 %v14469_v47  ;;  %5454 = vmatmul.mubr.bf16.gmra.mrb[44].mxu1 %v14469_v47  ;;  %v14477_v47 = vld [vmem:[%s19497_s0 + $0x40] ss:$16 sps:$4 sm:$0xff]  }
 0x2c8   : > { %5499 = vmatpush1.bf16.msra.mxu0 %v14183_v40  ;;  %5701 = vmatpush1.bf16.msra.mxu1 %v14186_v41  ;;  %v14476_v40 = vld [vmem:[%s19497_s0 + $0x44] ss:$16 sps:$4 sm:$0xff]   ;;  %v14258_v41 = vld [vmem:[%s19498_s1 + $0x848] ss:$52 sps:$4 sm:$0xff]  }
 0x2c9   : > { %5500 = vmatprep.subr.bf16.mxu0 %v14191_v42  ;;  %5702 = vmatprep.subr.bf16.mxu1 %v14194_v43  ;;  %v14263_v42 = vld [vmem:[%s19498_s1 + $0x8ac] ss:$52 sps:$4 sm:$0xff]   ;;  %v14266_v43 = vld [vmem:[%s19498_s1 + $0x8b4] ss:$52 sps:$4 sm:$0xff]  }
 0x2ca   : > { %12388 = vmatprep.mubr.msk.bf16.mxu0 %vm4612_vm0, %v14470_v50  ;;  %12396 = vmatprep.mubr.msk.bf16.mxu1 %vm4612_vm0, %v14470_v50  ;;  %v6300_v50 = vld [vmem:[%s19500_s3] sm:$0xff] }
 0x2cc   : > { %5501 = vmatpush1.bf16.msra.mxu0 %v14189_v45  ;;  %5703 = vmatpush1.bf16.msra.mxu1 %v14192_v46  ;;  %v14261_v45 = vld [vmem:[%s19498_s1 + $0x8a8] ss:$52 sps:$4 sm:$0xff]   ;;  %v14264_v46 = vld [vmem:[%s19498_s1 + $0x8b0] ss:$52 sps:$4 sm:$0xff]  }
 0x2cd   : > { %5502 = vmatprep.subr.bf16.mxu0 %v14197_v48  ;;  %5704 = vmatprep.subr.bf16.mxu1 %v14200_v49  ;;  %v6062_v48 = vld [vmem:[%s19499_s2] sm:$0xff]  ;;  %v17313_v49 = vsub.s32 3, %v17113_v44 }
 0x2cf   : > { %5262 = vmatmul.mubr.bf16.gmra.mrb[48].mxu0 %v14471_v60  ;;  %5464 = vmatmul.mubr.bf16.gmra.mrb[48].mxu1 %v14471_v60  ;;  %19529 = vst [vmem:[#allocation11_spill] sm:$0xff] %v17313_v49  ;;  %v17337_v60 = vrot.slane %v6062_v48, %v17148_v55 }
 0x2d0   : > { %5503 = vmatpush1.bf16.msra.mxu0 %v14195_v51  ;;  %5705 = vmatpush1.bf16.msra.mxu1 %v14198_v52  ;;  %v14269_v51 = vld [vmem:[%s19498_s1 + $0x914] ss:$52 sps:$4 sm:$0xff]   ;;  %v14272_v52 = vld [vmem:[%s19498_s1 + $0x91c] ss:$52 sps:$4 sm:$0xff]  }
 0x2d1   : > { %5504 = vmatprep.subr.bf16.mxu0 %v14203_v54  ;;  %5706 = vmatprep.subr.bf16.mxu1 %v14206_v57  ;;  %v14267_v54 = vld [vmem:[%s19498_s1 + $0x910] ss:$52 sps:$4 sm:$0xff]   ;;  %v14270_v57 = vld [vmem:[%s19498_s1 + $0x918] ss:$52 sps:$4 sm:$0xff]   ;;  %19531 = vst [vmem:[#allocation13_spill] sm:$0xff] %v17337_v60 }
 0x2d2   : > { %12389 = vmatprep.mubr.msk.bf16.mxu0 %vm4612_vm0, %v16680_v20  ;;  %12397 = vmatprep.mubr.msk.bf16.mxu1 %vm4612_vm0, %v16680_v20 }
 0x2d4   : > { %5505 = vmatpush1.bf16.msra.mxu0 %v14201_v58  ;;  %5707 = vmatpush1.bf16.msra.mxu1 %v14204_v59  ;;  %v14478_v58 = vld [vmem:[%s19497_s0 + $0x64] ss:$16 sps:$4 sm:$0xff]   ;;  %v17334_v59 = vrot.slane %v6062_v48, %v17142_v53 }
 0x2d5   : > { %5506 = vmatprep.subr.bf16.mxu0 %v14209_v61  ;;  %5708 = vmatprep.subr.bf16.mxu1 %v14212_v62  ;;  %v17340_v61 = vrot.slane %v6062_v48, %v17151_v56  ;;  %v17343_v62 = vrot.slane %v6300_v50, %v17142_v53 }
 0x2d6   : > { %19530 = vst [vmem:[#allocation12_spill] sm:$0xff] %v17334_v59 }
 0x2d7   : > { %5272 = vmatmul.mubr.bf16.gmra.mrb[52].mxu0 %v16698_v25  ;;  %5474 = vmatmul.mubr.bf16.gmra.mrb[52].mxu1 %v16698_v25  ;;  %19532 = vst [vmem:[#allocation14_spill] sm:$0xff] %v17343_v62 }
 0x2d8   : > { %5507 = vmatpush1.bf16.msra.mxu0 %v14207_v63  ;;  %5709 = vmatpush1.bf16.msra.mxu1 %v14210_v0  ;;  %v17346_v63 = vrot.slane %v6300_v50, %v17148_v55  ;;  %v14275_v0 = vld [vmem:[%s19498_s1 + $0x97c] ss:$52 sps:$4 sm:$0xff]  }
 0x2d9   : > { %5508 = vmatprep.subr.bf16.mxu0 %v14215_v1  ;;  %5710 = vmatprep.subr.bf16.mxu1 %v14218_v2 }
 0x2da   : > { %5514 = vmatprep.mubr.bf16.mxu0 %v14472_v11  ;;  %5716 = vmatprep.mubr.bf16.mxu1 %v14472_v11  ;;  %19533 = vst [vmem:[#allocation15_spill] sm:$0xff] %v17346_v63 }
 0x2dc   : > { %5509 = vmatpush1.bf16.msra.mxu0 %v14213_v4  ;;  %5711 = vmatpush1.bf16.msra.mxu1 %v14216_v5  ;;  %v17352_v4 = vrot.slane %v6300_v50, %v17151_v56  ;;  %v17355_v5 = vrot.slane %v6062_v48, %v17313_v49 }
 0x2dd   : > { %5510 = vmatprep.subr.bf16.mxu0 %v14221_v6  ;;  %5712 = vmatprep.subr.bf16.mxu1 %v14224_v7  ;;  %v14273_v6 = vld [vmem:[%s19498_s1 + $0x978] ss:$52 sps:$4 sm:$0xff]  }
 0x2de   : > { %v14278_v7 = vld [vmem:[%s19498_s1 + $0x984] ss:$52 sps:$4 sm:$0xff]  }
 0x2e0   : > { %5511 = vmatpush1.bf16.msra.mxu0 %v14219_v8  ;;  %5713 = vmatpush1.bf16.msra.mxu1 %v14222_v9 }
 0x2e1   : > { %5512 = vmatprep.subr.bf16.mxu0 %v14227_v12  ;;  %5714 = vmatprep.subr.bf16.mxu1 %v14230_v13  ;;  %v14479_v13 = vld [vmem:[%s19497_s0 + $0x60] ss:$16 sps:$4 sm:$0xff]  }
 0x2e4   : > { %5513 = vmatpush1.bf16.msra.mxu0 %v14225_v14  ;;  %5715 = vmatpush1.bf16.msra.mxu1 %v14228_v15  ;;  %v14276_v14 = vld [vmem:[%s19498_s1 + $0x980] ss:$52 sps:$4 sm:$0xff]  }
 0x2e5   : > { %5583 = vmatprep.subr.bf16.mxu0 %v14233_v16  ;;  %5785 = vmatprep.subr.bf16.mxu1 %v14236_v17  ;;  %v17373_v16 = vrot.slane %v6300_v50, %v17313_v49 }
 0x2e7   : > { %5515 = vmatmul.mubr.bf16.vlgmr.msra.gmra.mrb[56].mxu0 %v14473_v26  ;;  %5717 = vmatmul.mubr.bf16.vlgmr.msra.gmra.mrb[56].mxu1 %v14473_v26  ;;  %19534 = vst [vmem:[#allocation16_spill] sm:$0xff] %v17373_v16 }
 0x2e8   : > { %5584 = vmatpush1.bf16.msra.mxu0 %v14231_v18  ;;  %5786 = vmatpush1.bf16.msra.mxu1 %v14234_v19  ;;  %v14281_v19 = vld [vmem:[%s19498_s1 + $0x9e4] ss:$52 sps:$4 sm:$0xff]  }
 0x2e9   : > { %5585 = vmatprep.subr.bf16.mxu0 %v14239_v21  ;;  %5787 = vmatprep.subr.bf16.mxu1 %v14242_v22 }
 0x2ea   : > { %5524 = vmatprep.mubr.bf16.mxu0 %v14474_v31  ;;  %5726 = vmatprep.mubr.bf16.mxu1 %v14474_v31 }
 0x2ec   : > { %5586 = vmatpush1.bf16.msra.mxu0 %v14237_v23  ;;  %5788 = vmatpush1.bf16.msra.mxu1 %v14240_v24 }
 0x2ed   : > { %5587 = vmatprep.subr.bf16.mxu0 %v14245_v27  ;;  %5789 = vmatprep.subr.bf16.mxu1 %v14248_v28  ;;  %v14284_v28 = vld [vmem:[%s19498_s1 + $0x9ec] ss:$52 sps:$4 sm:$0xff]  }
 0x2ef   : > { %5525 = vmatmul.mubr.bf16.gmra.mrb[60].mxu0 %v14475_v36  ;;  %5727 = vmatmul.mubr.bf16.gmra.mrb[60].mxu1 %v14475_v36 }
 0x2f0   : > { %5588 = vmatpush1.bf16.msra.mxu0 %v14243_v29  ;;  %5790 = vmatpush1.bf16.msra.mxu1 %v14246_v30 }
 0x2f1   : > { %5589 = vmatprep.subr.bf16.mxu0 %v14251_v32  ;;  %5791 = vmatprep.subr.bf16.mxu1 %v14254_v33  ;;  %v14279_v33 = vld [vmem:[%s19498_s1 + $0x9e0] ss:$52 sps:$4 sm:$0xff]  }
 0x2f2   : > { %5534 = vmatprep.mubr.bf16.mxu0 %v14476_v40  ;;  %5736 = vmatprep.mubr.bf16.mxu1 %v14476_v40 }
 0x2f4   : > { %5590 = vmatpush1.bf16.msra.mxu0 %v14249_v34  ;;  %5792 = vmatpush1.bf16.msra.mxu1 %v14252_v35  ;;  %v14282_v34 = vld [vmem:[%s19498_s1 + $0x9e8] ss:$52 sps:$4 sm:$0xff]  }
 0x2f5   : > { %5591 = vmatprep.subr.bf16.mxu0 %v14257_v37  ;;  %5793 = vmatprep.subr.bf16.mxu1 %v14260_v38  ;;  %v14480_v37 = vld [vmem:[%s19497_s0 + $0x84] ss:$16 sps:$4 sm:$0xff]   ;;  %v14287_v38 = vld [vmem:[%s19498_s1 + $0xa4c] ss:$52 sps:$4 sm:$0xff]  }
 0x2f7   : > { %5535 = vmatmul.mubr.bf16.gmra.mrb[64].mxu0 %v14477_v47  ;;  %5737 = vmatmul.mubr.bf16.gmra.mrb[64].mxu1 %v14477_v47  ;;  %v14290_v47 = vld [vmem:[%s19498_s1 + $0xa54] ss:$52 sps:$4 sm:$0xff]  }
 0x2f8   : > { %5592 = vmatpush1.bf16.msra.mxu0 %v14255_v39  ;;  %5794 = vmatpush1.bf16.msra.mxu1 %v14258_v41  ;;  %v17410_v41 = vld [vmem:[%s19498_s1 + $0xc50] sm:$0x33] }
 0x2f9   : > { %5593 = vmatprep.subr.bf16.mxu0 %v14263_v42  ;;  %5795 = vmatprep.subr.bf16.mxu1 %v14266_v43 }
 0x2fa   : > { %5544 = vmatprep.mubr.bf16.mxu0 %v14478_v58  ;;  %5746 = vmatprep.mubr.bf16.mxu1 %v14478_v58  ;;  %v14285_v58 = vld [vmem:[%s19498_s1 + $0xa48] ss:$52 sps:$4 sm:$0xff]  }
 0x2fc   : > { %5594 = vmatpush1.bf16.msra.mxu0 %v14261_v45  ;;  %5796 = vmatpush1.bf16.msra.mxu1 %v14264_v46 }
 0x2fd   : > { %5595 = vmatprep.subr.bf16.mxu0 %v14269_v51  ;;  %5797 = vmatprep.subr.bf16.mxu1 %v14272_v52 }
 0x2fe   : > { %v4809_v1 = vpop.f32.mrb[0].mxu0  ;;  %v5011_v2 = vpop.f32.mrb[0].mxu1 }
 0x2ff   : > { %v6131_v8 = vmul.f32 %v17334_v59, %v4809_v1  ;;  %v6133_v9 = vmul.f32 %v17337_v60, %v5011_v2  ;;  %v4811_v11 = vpop.f32.mrb[1].mxu0  ;;  %v5013_v12 = vpop.f32.mrb[1].mxu1  ;;  %5545 = vmatmul.mubr.bf16.gmra.mrb[68].mxu0 %v14479_v13  ;;  %5747 = vmatmul.mubr.bf16.gmra.mrb[68].mxu1 %v14479_v13  ;;  %v17426_v1 = vld [vmem:[%s19498_s1 + $0xc58] sm:$0x33]  ;;  %v14293_v13 = vld [vmem:[%s19498_s1 + $0xab4] ss:$52 sps:$4 sm:$0xff]  }
 0x300   : > { %v6132_v15 = vmul.f32 %v17340_v61, %v4811_v11  ;;  %v4813_v17 = vpop.f32.mrb[2].mxu0  ;;  %v5015_v18 = vpop.f32.mrb[2].mxu1  ;;  %5596 = vmatpush1.bf16.msra.mxu0 %v14267_v54  ;;  %5798 = vmatpush1.bf16.msra.mxu1 %v14270_v57  ;;  %v6134_v30 = vmul.f32 %v17355_v5, %v5013_v12  ;;  %v14481_v12 = vld [vmem:[%s19497_s0 + $0x80] ss:$16 sps:$4 sm:$0xff]  }
 0x301   : > { %v6369_v21 = vadd.f32 %v17343_v62, %v6131_v8  ;;  %v6371_v22 = vadd.f32 %v17346_v63, %v6133_v9  ;;  %v6144_v23 = vmul.f32 %v17334_v59, %v4813_v17  ;;  %v6146_v24 = vmul.f32 %v17337_v60, %v5015_v18  ;;  %v4815_v26 = vpop.f32.mrb[3].mxu0  ;;  %v5017_v27 = vpop.f32.mrb[3].mxu1  ;;  %5597 = vmatprep.subr.bf16.mxu0 %v14275_v0  ;;  %v14288_v0 = vld [vmem:[%s19498_s1 + $0xa50] ss:$52 sps:$4 sm:$0xff]  }
 0x302   : > { %v6370_v29 = vadd.f32 %v17352_v4, %v6132_v15  ;;  %v6145_v31 = vmul.f32 %v17340_v61, %v4815_v26  ;;  %v6147_v32 = vmul.f32 %v17355_v5, %v5017_v27  ;;  %5799 = vmatprep.subr.bf16.mxu1 %v14278_v7  ;;  %5554 = vmatprep.mubr.bf16.mxu0 %v14480_v37 }
 0x303   : > { %v6382_v35 = vadd.f32 %v17343_v62, %v6144_v23  ;;  %v6384_v36 = vadd.f32 %v17346_v63, %v6146_v24  ;;  %5756 = vmatprep.mubr.bf16.mxu1 %v14480_v37  ;;  %v6538_v42 = vmax.f32 %v6369_v21, 0.0  ;;  %v6540_v43 = vmax.f32 %v6371_v22, 0.0 }
 0x304   : > { %v6383_v39 = vadd.f32 %v17352_v4, %v6145_v31  ;;  %v17405_v40 = vadd.f32 %v17373_v16, %v6147_v32  ;;  %5598 = vmatpush1.bf16.msra.mxu0 %v14273_v6  ;;  %5800 = vmatpush1.bf16.msra.mxu1 %v14276_v14  ;;  %v6539_v48 = vmax.f32 %v6370_v29, 0.0  ;;  %v6372_v50 = vadd.f32 %v17373_v16, %v6134_v30 }
 0x305   : > { %v6551_v45 = vmax.f32 %v6382_v35, 0.0  ;;  %v6553_v46 = vmax.f32 %v6384_v36, 0.0  ;;  %5599 = vmatprep.subr.bf16.mxu0 %v14281_v19  ;;  %5801 = vmatprep.subr.bf16.mxu1 %v14284_v28  ;;  %v12361_v18 = vcombine.low %v17410_v41, %v17410_v41  ;;  %v14296_v28 = vld [vmem:[%s19498_s1 + $0xabc] ss:$52 sps:$4 sm:$0xff]  }
 0x306   : > { %v6552_v51 = vmax.f32 %v6383_v39, 0.0  ;;  %v6554_v52 = vmax.f32 %v17405_v40, 0.0  ;;  %v4819_v54 = vpop.f32.mrb[4].mxu0  ;;  %v5021_v57 = vpop.f32.mrb[4].mxu1  ;;  %v6541_v35 = vmax.f32 %v6372_v50, 0.0  ;;  %v12363_v40 = vcombine.low %v17426_v1, %v17426_v1 }
 0x307   : > { %v17428_v2 = vpack.c.bf16 %v6551_v45, %v6538_v42  ;;  %v17430_v6 = vpack.c.bf16 %v6553_v46, %v6540_v43  ;;  %v6157_v7 = vmul.f32 %v17334_v59, %v4819_v54  ;;  %v6159_v8 = vmul.f32 %v17337_v60, %v5021_v57  ;;  %v4821_v9 = vpop.f32.mrb[5].mxu0  ;;  %v5023_v11 = vpop.f32.mrb[5].mxu1  ;;  %5555 = vmatmul.mubr.bf16.gmra.mrb[72].mxu0 %v14481_v12  ;;  %v14299_v39 = vld [vmem:[%s19498_s1 + $0xb1c] ss:$52 sps:$4 sm:$0xff]  }
 0x308   : > { %v6158_v14 = vmul.f32 %v17340_v61, %v4821_v9  ;;  %v4823_v15 = vpop.f32.mrb[6].mxu0  ;;  %v5025_v17 = vpop.f32.mrb[6].mxu1  ;;  %5600 = vmatpush1.bf16.msra.mxu0 %v14279_v33  ;;  %5802 = vmatpush1.bf16.msra.mxu1 %v14282_v34  ;;  %v17443_v19 = vpack.c.bf16 %v6552_v51, %v6539_v48  ;;  %v6160_v30 = vmul.f32 %v17355_v5, %v5023_v11  ;;  %v14291_v33 = vld [vmem:[%s19498_s1 + $0xab0] ss:$52 sps:$4 sm:$0xff]   ;;  %v14294_v34 = vld [vmem:[%s19498_s1 + $0xab8] ss:$52 sps:$4 sm:$0xff]  }
 0x309   : > { %v6395_v21 = vadd.f32 %v17343_v62, %v6157_v7  ;;  %v6397_v22 = vadd.f32 %v17346_v63, %v6159_v8  ;;  %v6170_v23 = vmul.f32 %v17334_v59, %v4823_v15  ;;  %v6172_v24 = vmul.f32 %v17337_v60, %v5025_v17  ;;  %v4825_v26 = vpop.f32.mrb[7].mxu0  ;;  %v5027_v27 = vpop.f32.mrb[7].mxu1  ;;  %5601 = vmatprep.subr.bf16.mxu0 %v14287_v38  ;;  %v17467_v38 = vld [vmem:[%s19497_s0 + $0xa4] ss:$16 sps:$4 sm:$0xff]   ;;  %v14297_v11 = vld [vmem:[%s19498_s1 + $0xb18] ss:$52 sps:$4 sm:$0xff]  }
 0x30a   : > { %v6396_v29 = vadd.f32 %v17352_v4, %v6158_v14  ;;  %v6171_v31 = vmul.f32 %v17340_v61, %v4825_v26  ;;  %v6173_v32 = vmul.f32 %v17355_v5, %v5027_v27  ;;  %5757 = vmatmul.mubr.bf16.gmra.mrb[72].mxu1 %v14481_v12  ;;  %5803 = vmatprep.subr.bf16.mxu1 %v14290_v47  ;;  %v17480_v46 = vsel %vm4634_vm1, %v12361_v18, 0  ;;  %v14302_v51 = vld [vmem:[%s19498_s1 + $0xb24] ss:$52 sps:$4 sm:$0xff]   ;;  %v14300_v12 = vld [vmem:[%s19498_s1 + $0xb20] ss:$52 sps:$4 sm:$0xff]  }
 0x30b   : > { %v6408_v36 = vadd.f32 %v17343_v62, %v6170_v23  ;;  %v6410_v37 = vadd.f32 %v17346_v63, %v6172_v24  ;;  %5564 = vmatprep.mubr.bf16.mxu0 %v17467_v38  ;;  %v6564_v42 = vmax.f32 %v6395_v21, 0.0  ;;  %v6566_v47 = vmax.f32 %v6397_v22, 0.0  ;;  %5766 = vmatprep.mubr.bf16.mxu1 %v17467_v38  ;;  %v17501_v17 = vld [vmem:[%s19497_s0 + $0xa0] ss:$16 sps:$4 sm:$0xff]   ;;  %v14305_v18 = vld [vmem:[%s19498_s1 + $0xb84] ss:$52 sps:$4 sm:$0xff]  }
 0x30c   : > { %v6409_v43 = vadd.f32 %v17352_v4, %v6171_v31  ;;  %v17477_v45 = vadd.f32 %v17373_v16, %v6173_v32  ;;  %5602 = vmatpush1.bf16.msra.mxu0 %v14285_v58  ;;  %5804 = vmatpush1.bf16.msra.mxu1 %v14288_v0  ;;  %v17485_v54 = vpack.c.bf16 %v6554_v52, %v6541_v35  ;;  %v6565_v57 = vmax.f32 %v6396_v29, 0.0  ;;  %v14308_v21 = vld [vmem:[%s19498_s1 + $0xb8c] ss:$52 sps:$4 sm:$0xff]  }
 0x30d   : > { %v6577_v48 = vmax.f32 %v6408_v36, 0.0  ;;  %v6579_v50 = vmax.f32 %v6410_v37, 0.0  ;;  %5603 = vmatprep.subr.bf16.mxu0 %v14293_v13  ;;  %5805 = vmatprep.subr.bf16.mxu1 %v14296_v28  ;;  %v6398_v7 = vadd.f32 %v17373_v16, %v6160_v30 }
 0x30e   : > { %v6578_v8 = vmax.f32 %v6409_v43, 0.0  ;;  %v6580_v58 = vmax.f32 %v17477_v45, 0.0  ;;  %v4829_v0 = vpop.f32.mrb[8].mxu0  ;;  %v5031_v9 = vpop.f32.mrb[8].mxu1  ;;  %v14303_v43 = vld [vmem:[%s19498_s1 + $0xb80] ss:$52 sps:$4 sm:$0xff]  }
 0x30f   : > { %v6183_v52 = vmul.f32 %v17334_v59, %v4829_v0  ;;  %v6185_v13 = vmul.f32 %v17337_v60, %v5031_v9  ;;  %v4831_v14 = vpop.f32.mrb[9].mxu0  ;;  %v5033_v15 = vpop.f32.mrb[9].mxu1  ;;  %5565 = vmatmul.mubr.bf16.gmra.mrb[76].mxu0 %v17501_v17  ;;  %v17510_v22 = vpack.c.bf16 %v6577_v48, %v6564_v42  ;;  %v17512_v23 = vpack.c.bf16 %v6579_v50, %v6566_v47  ;;  %v14306_v45 = vld [vmem:[%s19498_s1 + $0xb88] ss:$52 sps:$4 sm:$0xff]   ;;  %v14311_v50 = vld [vmem:[%s19498_s1 + $0xbec] ss:$52 sps:$4 sm:$0xff]  }
 0x310   : > { %v6184_v24 = vmul.f32 %v17340_v61, %v4831_v14  ;;  %v4833_v26 = vpop.f32.mrb[10].mxu0  ;;  %v5035_v27 = vpop.f32.mrb[10].mxu1  ;;  %5604 = vmatpush1.bf16.msra.mxu0 %v14291_v33  ;;  %5806 = vmatpush1.bf16.msra.mxu1 %v14294_v34  ;;  %v17515_v28 = vpack.c.bf16 %v6578_v8, %v6565_v57  ;;  %v6186_v42 = vmul.f32 %v17355_v5, %v5033_v15  ;;  %v6567_v47 = vmax.f32 %v6398_v7, 0.0 }
 0x311   : > { %v6421_v29 = vadd.f32 %v17343_v62, %v6183_v52  ;;  %v6423_v30 = vadd.f32 %v17346_v63, %v6185_v13  ;;  %v6196_v31 = vmul.f32 %v17334_v59, %v4833_v26  ;;  %v6198_v32 = vmul.f32 %v17337_v60, %v5035_v27  ;;  %v4835_v35 = vpop.f32.mrb[11].mxu0  ;;  %v5037_v36 = vpop.f32.mrb[11].mxu1  ;;  %5605 = vmatprep.subr.bf16.mxu0 %v14299_v39 }
 0x312   : > { %v6422_v37 = vadd.f32 %v17352_v4, %v6184_v24  ;;  %v6197_v33 = vmul.f32 %v17340_v61, %v4835_v35  ;;  %v6199_v34 = vmul.f32 %v17355_v5, %v5037_v36  ;;  %5767 = vmatmul.mubr.bf16.gmra.mrb[76].mxu1 %v17501_v17  ;;  %5807 = vmatprep.subr.bf16.mxu1 %v14302_v51  ;;  %v17539_v57 = vsel %vm4634_vm1, %v12363_v40, 0 }
 0x313   : > { %v6434_v39 = vadd.f32 %v17343_v62, %v6196_v31  ;;  %v6436_v48 = vadd.f32 %v17346_v63, %v6198_v32  ;;  %5574 = vmatprep.mubr.bf16.mxu0 %v16443_v3  ;;  %v6590_v8 = vmax.f32 %v6421_v29, 0.0  ;;  %v6592_v0 = vmax.f32 %v6423_v30, 0.0  ;;  %5776 = vmatprep.mubr.bf16.mxu1 %v16443_v3  ;;  %v14314_v30 = vld [vmem:[%s19498_s1 + $0xbf4] ss:$52 sps:$4 sm:$0xff]  }
 0x314   : > { %v6435_v9 = vadd.f32 %v17352_v4, %v6197_v33  ;;  %v17543_v7 = vadd.f32 %v17373_v16, %v6199_v34  ;;  %5606 = vmatpush1.bf16.msra.mxu0 %v14297_v11  ;;  %5808 = vmatpush1.bf16.msra.mxu1 %v14300_v12  ;;  %v12362_v13 = vcombine.high %v17410_v41, %v17410_v41  ;;  %v6591_v40 = vmax.f32 %v6422_v37, 0.0  ;;  %v14309_v11 = vld [vmem:[%s19498_s1 + $0xbe8] ss:$52 sps:$4 sm:$0xff]   ;;  %v14312_v41 = vld [vmem:[%s19498_s1 + $0xbf0] ss:$52 sps:$4 sm:$0xff]  }
 0x315   : > { %v6603_v52 = vmax.f32 %v6434_v39, 0.0  ;;  %v6605_v51 = vmax.f32 %v6436_v48, 0.0  ;;  %5607 = vmatprep.subr.bf16.mxu0 %v14305_v18  ;;  %5809 = vmatprep.subr.bf16.mxu1 %v14308_v21  ;;  %v17547_v14 = vpack.c.bf16 %v6580_v58, %v6567_v47  ;;  %v6424_v15 = vadd.f32 %v17373_v16, %v6186_v42 }
 0x316   : > { %v6604_v24 = vmax.f32 %v6435_v9, 0.0  ;;  %v6606_v26 = vmax.f32 %v17543_v7, 0.0  ;;  %v4839_v27 = vpop.f32.mrb[12].mxu0  ;;  %v5041_v29 = vpop.f32.mrb[12].mxu1  ;;  %v12364_v42 = vcombine.high %v17426_v1, %v17426_v1 }
 0x317   : > { %v6209_v58 = vmul.f32 %v17334_v59, %v4839_v27  ;;  %v6211_v12 = vmul.f32 %v17337_v60, %v5041_v29  ;;  %v4841_v18 = vpop.f32.mrb[13].mxu0  ;;  %v5043_v21 = vpop.f32.mrb[13].mxu1  ;;  %5575 = vmatmul.mubr.bf16.gmra.mrb[80].mxu0 %v16465_v10  ;;  %v17564_v31 = vpack.c.bf16 %v6603_v52, %v6590_v8  ;;  %v17566_v32 = vpack.c.bf16 %v6605_v51, %v6592_v0 }
 0x318   : > { %v6210_v35 = vmul.f32 %v17340_v61, %v4841_v18  ;;  %v4843_v36 = vpop.f32.mrb[14].mxu0  ;;  %v5045_v37 = vpop.f32.mrb[14].mxu1  ;;  %5608 = vmatpush1.bf16.msra.mxu0 %v14303_v43  ;;  %5810 = vmatpush1.bf16.msra.mxu1 %v14306_v45  ;;  %v17571_v33 = vpack.c.bf16 %v6604_v24, %v6591_v40  ;;  %v6212_v43 = vmul.f32 %v17355_v5, %v5043_v21  ;;  %v6593_v7 = vmax.f32 %v6424_v15, 0.0  ;;  %v14319_v24 = vld [vmem:[%s19498_s1 + $0x370] ss:$52 sps:$4 sm:$0xff]  }
 0x319   : > { %v6447_v34 = vadd.f32 %v17343_v62, %v6209_v58  ;;  %v6449_v47 = vadd.f32 %v17346_v63, %v6211_v12  ;;  %v6222_v39 = vmul.f32 %v17334_v59, %v4843_v36  ;;  %v6224_v48 = vmul.f32 %v17337_v60, %v5045_v37  ;;  %v4845_v8 = vpop.f32.mrb[15].mxu0  ;;  %v5047_v0 = vpop.f32.mrb[15].mxu1  ;;  %5609 = vmatprep.subr.bf16.mxu0 %v14311_v50  ;;  %v17587_v50 = vld [vmem:[%s19497_s0 + $0xc] ss:$16 sps:$4 sm:$0xff]  }
 0x31a   : > { %v6448_v9 = vadd.f32 %v17352_v4, %v6210_v35  ;;  %v6223_v45 = vmul.f32 %v17340_v61, %v4845_v8  ;;  %v6225_v1 = vmul.f32 %v17355_v5, %v5047_v0  ;;  %5777 = vmatmul.mubr.bf16.gmra.mrb[80].mxu1 %v16465_v10  ;;  %5811 = vmatprep.subr.bf16.mxu1 %v14314_v30 }
 0x31b   : > { %v6616_v52 = vmax.f32 %v6447_v34, 0.0  ;;  %v6460_v51 = vadd.f32 %v17343_v62, %v6222_v39  ;;  %v6462_v40 = vadd.f32 %v17346_v63, %v6224_v48  ;;  %12399 = vmatprep.mubr.msk.bf16.mxu0 %vm4612_vm0, %v17587_v50  ;;  %v6618_v27 = vmax.f32 %v6449_v47, 0.0  ;;  %12407 = vmatprep.mubr.msk.bf16.mxu1 %vm4612_vm0, %v17587_v50 }
 0x31c   : > { %v6617_v15 = vmax.f32 %v6448_v9, 0.0  ;;  %v6461_v29 = vadd.f32 %v17352_v4, %v6223_v45  ;;  %v17596_v58 = vadd.f32 %v17373_v16, %v6225_v1  ;;  %5610 = vmatpush1.bf16.msra.mxu0 %v14309_v11  ;;  %5812 = vmatpush1.bf16.msra.mxu1 %v14312_v41  ;;  %v17600_v21 = vpack.c.bf16 %v6606_v26, %v6593_v7  ;;  %v14320_v11 = vld [vmem:[%s19498_s1 + $0x30] ss:$52 sps:$4 sm:$0xff]  }
 0x31d   : > { %v6629_v12 = vmax.f32 %v6460_v51, 0.0  ;;  %v6631_v18 = vmax.f32 %v6462_v40, 0.0  ;;  %12398 = vmatprep.subr.msk.bf16.mxu0 %vm4634_vm1, %v12362_v13  ;;  %12406 = vmatprep.subr.msk.bf16.mxu1 %vm4634_vm1, %v12364_v42  ;;  %v6450_v30 = vadd.f32 %v17373_v16, %v6212_v43  ;;  %v14321_v13 = vld [vmem:[%s19498_s1 + $0x6b0] ss:$52 sps:$4 sm:$0xff]  }
 0x31e   : > { %v6630_v35 = vmax.f32 %v6461_v29, 0.0  ;;  %v6632_v36 = vmax.f32 %v17596_v58, 0.0  ;;  %v4849_v37 = vpop.f32.mrb[16].mxu0  ;;  %v5051_v34 = vpop.f32.mrb[16].mxu1  ;;  %v14322_v58 = vld [vmem:[%s19498_s1 + $0x718] ss:$52 sps:$4 sm:$0xff]  }
 0x31f   : > { %v6235_v26 = vmul.f32 %v17334_v59, %v4849_v37  ;;  %v6237_v41 = vmul.f32 %v17337_v60, %v5051_v34  ;;  %v4851_v42 = vpop.f32.mrb[17].mxu0  ;;  %v5053_v47 = vpop.f32.mrb[17].mxu1  ;;  %v17614_v39 = vpack.c.bf16 %v6629_v12, %v6616_v52  ;;  %v17616_v48 = vpack.c.bf16 %v6631_v18, %v6618_v27  ;;  %v14323_v12 = vld [vmem:[%s19498_s1 + $0x3d8] ss:$52 sps:$4 sm:$0xff]  }
 0x320   : > { %v6236_v8 = vmul.f32 %v17340_v61, %v4851_v42  ;;  %v4853_v0 = vpop.f32.mrb[18].mxu0  ;;  %v5055_v9 = vpop.f32.mrb[18].mxu1  ;;  %5612 = vmatpush1.bf16.msra.mxu0 %v17480_v46  ;;  %5814 = vmatpush1.bf16.msra.mxu1 %v17539_v57  ;;  %v17621_v43 = vpack.c.bf16 %v6630_v35, %v6617_v15  ;;  %v6238_v29 = vmul.f32 %v17355_v5, %v5053_v47  ;;  %v19509_v15 = vmov 0  }
 0x321   : > { %v6473_v45 = vadd.f32 %v17343_v62, %v6235_v26  ;;  %v6475_v1 = vadd.f32 %v17346_v63, %v6237_v41  ;;  %v6248_v7 = vmul.f32 %v17334_v59, %v4853_v0  ;;  %v6250_v52 = vmul.f32 %v17337_v60, %v5055_v9  ;;  %v4855_v51 = vpop.f32.mrb[19].mxu0  ;;  %v5057_v40 = vpop.f32.mrb[19].mxu1  ;;  %12954 = vmatprep.subr.bf16.mxu0 %v14319_v24  ;;  %v14324_v24 = vld [vmem:[%s19498_s1 + $0x98] ss:$52 sps:$4 sm:$0xff]  }
 0x322   : > { %v6474_v27 = vadd.f32 %v17352_v4, %v6236_v8  ;;  %v6249_v46 = vmul.f32 %v17340_v61, %v4855_v51  ;;  %v6251_v57 = vmul.f32 %v17355_v5, %v5057_v40  ;;  %5974 = vmatprep.subr.bf16.mxu1 %v19509_v15  ;;  %v6619_v18 = vmax.f32 %v6450_v30, 0.0  ;;  %v17646_v26 = vld [vmem:[%s19497_s0 + $0x8] ss:$16 sps:$4 sm:$0xff]   ;;  %v14327_v8 = vld [vmem:[%s19498_s1 + $0x440] ss:$52 sps:$4 sm:$0xff]  }
 0x323   : > { %v6642_v35 = vmax.f32 %v6473_v45, 0.0  ;;  %v6486_v37 = vadd.f32 %v17343_v62, %v6248_v7  ;;  %v6488_v34 = vadd.f32 %v17346_v63, %v6250_v52  ;;  %5616 = vmatmul.mubr.bf16.vlgmr.msra.gmra.mrb[56].mxu0 %v17646_v26  ;;  %5818 = vmatmul.mubr.bf16.vlgmr.msra.gmra.mrb[56].mxu1 %v17646_v26  ;;  %v6644_v41 = vmax.f32 %v6475_v1, 0.0  ;;  %v17661_v45 = vld [vmem:[%s19497_s0 + $0x2c] ss:$16 sps:$4 sm:$0xff]   ;;  %v14325_v40 = vld [vmem:[%s19498_s1 + $0x780] ss:$52 sps:$4 sm:$0xff]  }
 0x324   : > { %v6643_v42 = vmax.f32 %v6474_v27, 0.0  ;;  %v6487_v47 = vadd.f32 %v17352_v4, %v6249_v46  ;;  %v17652_v30 = vadd.f32 %v17373_v16, %v6251_v57  ;;  %12955 = vmatpush3.bf16.msra.mxu0 %v14320_v11  ;;  %5975 = vmatpush1.bf16.msra.mxu1 %v14321_v13  ;;  %v17665_v1 = vpack.c.bf16 %v6632_v36, %v6619_v18 }
 0x325   : > { %v6655_v0 = vmax.f32 %v6486_v37, 0.0  ;;  %v6657_v9 = vmax.f32 %v6488_v34, 0.0  ;;  %5976 = vmatprep.subr.bf16.mxu1 %v19509_v15  ;;  %12400 = vmatprep.mubr.msk.bf16.mxu0 %vm4612_vm0, %v17661_v45  ;;  %v6476_v11 = vadd.f32 %v17373_v16, %v6238_v29 }
 0x326   : > { %v6656_v13 = vmax.f32 %v6487_v47, 0.0  ;;  %v6658_v7 = vmax.f32 %v17652_v30, 0.0  ;;  %v4859_v52 = vpop.f32.mrb[20].mxu0  ;;  %v5061_v51 = vpop.f32.mrb[20].mxu1  ;;  %12408 = vmatprep.mubr.msk.bf16.mxu1 %vm4612_vm0, %v17661_v45  ;;  %12956 = vmatprep.subr.bf16.mxu0 %v14323_v12 }
 0x327   : > { %v6261_v27 = vmul.f32 %v17334_v59, %v4859_v52  ;;  %v6263_v36 = vmul.f32 %v17337_v60, %v5061_v51  ;;  %v4861_v46 = vpop.f32.mrb[21].mxu0  ;;  %v5063_v57 = vpop.f32.mrb[21].mxu1  ;;  %v17676_v29 = vpack.c.bf16 %v6655_v0, %v6642_v35  ;;  %v17678_v18 = vpack.c.bf16 %v6657_v9, %v6644_v41 }
 0x328   : > { %v6262_v37 = vmul.f32 %v17340_v61, %v4861_v46  ;;  %v6264_v34 = vmul.f32 %v17355_v5, %v5063_v57  ;;  %v4863_v47 = vpop.f32.mrb[22].mxu0  ;;  %v5065_v12 = vpop.f32.mrb[22].mxu1  ;;  %5977 = vmatpush1.bf16.msra.mxu1 %v14322_v58  ;;  %12957 = vmatpush3.bf16.msra.mxu0 %v14324_v24  ;;  %v17682_v30 = vpack.c.bf16 %v6656_v13, %v6643_v42  ;;  %v19536_v9 = vmov 0   ;;  %v14328_v42 = vld [vmem:[%s19498_s1 + $0x100] ss:$52 sps:$4 sm:$0xff]  }
 0x329   : > { %19535 = vst [vmem:[#allocation17_spill] sm:$0xff] %v17678_v18  ;;  %v6499_v52 = vadd.f32 %v17343_v62, %v6261_v27  ;;  %v6501_v51 = vadd.f32 %v17346_v63, %v6263_v36  ;;  %v6274_v15 = vmul.f32 %v17334_v59, %v4863_v47  ;;  %v6276_v35 = vmul.f32 %v17337_v60, %v5065_v12  ;;  %v4865_v41 = vpop.f32.mrb[23].mxu0  ;;  %v5067_v0 = vpop.f32.mrb[23].mxu1  ;;  %v14326_v47 = vld [vmem:[%s19498_s1 + $0x7e8] ss:$52 sps:$4 sm:$0xff]  }
 0x32a   : > { %5978 = vmatprep.subr.bf16.mxu1 %v19536_v9  ;;  %v6500_v46 = vadd.f32 %v17352_v4, %v6262_v37  ;;  %v6502_v57 = vadd.f32 %v17373_v16, %v6264_v34  ;;  %v6275_v58 = vmul.f32 %v17340_v61, %v4865_v41  ;;  %v6277_v24 = vmul.f32 %v17355_v5, %v5067_v0  ;;  %v17701_v37 = vld [vmem:[%s19497_s0 + $0x28] ss:$16 sps:$4 sm:$0xff]   ;;  %v17716_v12 = vld [vmem:[%s19497_s0 + $0x4c] ss:$16 sps:$4 sm:$0xff]  }
 0x32b   : > { %12958 = vmatprep.subr.bf16.mxu0 %v14327_v8  ;;  %v6645_v13 = vmax.f32 %v6476_v11, 0.0  ;;  %v6512_v27 = vadd.f32 %v17343_v62, %v6274_v15  ;;  %v6514_v36 = vadd.f32 %v17346_v63, %v6276_v35  ;;  %5626 = vmatmul.mubr.bf16.gmra.mrb[60].mxu0 %v17701_v37  ;;  %v14330_v8 = vld [vmem:[%s19498_s1 + $0x4a8] ss:$52 sps:$4 sm:$0xff]   ;;  %v6668_v34 = vmax.f32 %v6499_v52, 0.0 }
 0x32c   : > { %5828 = vmatmul.mubr.bf16.gmra.mrb[60].mxu1 %v17701_v37  ;;  %v6513_v11 = vadd.f32 %v17352_v4, %v6275_v58  ;;  %v6515_v15 = vadd.f32 %v17373_v16, %v6277_v24  ;;  %12401 = vmatprep.mubr.msk.bf16.mxu0 %vm4612_vm0, %v17716_v12  ;;  %v6670_v35 = vmax.f32 %v6501_v51, 0.0  ;;  %v6669_v58 = vmax.f32 %v6500_v46, 0.0  ;;  %v14329_v46 = vld [vmem:[%s19498_s1 + $0x850] ss:$52 sps:$4 sm:$0xff]  }
 0x32d   : > { %5979 = vmatpush1.bf16.msra.mxu1 %v14325_v40  ;;  %v6681_v41 = vmax.f32 %v6512_v27, 0.0  ;;  %v6683_v52 = vmax.f32 %v6514_v36, 0.0  ;;  %12409 = vmatprep.mubr.msk.bf16.mxu1 %vm4612_vm0, %v17716_v12  ;;  %v14332_v40 = vld [vmem:[%s19498_s1 + $0x168] ss:$52 sps:$4 sm:$0xff]   ;;  %v17726_v0 = vpack.c.bf16 %v6658_v7, %v6645_v13  ;;  %v6671_v24 = vmax.f32 %v6502_v57, 0.0 }
 0x32e   : > { %5980 = vmatprep.subr.bf16.mxu1 %v19536_v9  ;;  %v6682_v49 = vmax.f32 %v6513_v11, 0.0  ;;  %v6684_v56 = vmax.f32 %v6515_v15, 0.0  ;;  %v17728_v55 = vpop.f32.mrb[24].mxu0  ;;  %v17730_v51 = vpop.f32.mrb[24].mxu1  ;;  %12959 = vmatpush3.bf16.msra.mxu0 %v14328_v42 }
 0x32f   : > { %19537 = vst [vmem:[#allocation18_spill] sm:$0xff] %v17730_v51  ;;  %v17732_v27 = vpop.f32.mrb[25].mxu0  ;;  %v17734_v36 = vpop.f32.mrb[25].mxu1  ;;  %12960 = vmatprep.subr.bf16.mxu0 %v14330_v8  ;;  %v17736_v53 = vpack.c.bf16 %v6681_v41, %v6668_v34  ;;  %v17738_v63 = vpack.c.bf16 %v6683_v52, %v6670_v35  ;;  %v14334_v8 = vld [vmem:[%s19498_s1 + $0x510] ss:$52 sps:$4 sm:$0xff]  }
 0x330   : > { %v4873_v7 = vpop.f32.mrb[26].mxu0  ;;  %v5075_v13 = vpop.f32.mrb[26].mxu1  ;;  %v17743_v57 = vpack.c.bf16 %v6682_v49, %v6669_v58  ;;  %v17745_v11 = vpack.c.bf16 %v6684_v56, %v6671_v24  ;;  %v17754_v34 = vld [vmem:[%s19497_s0 + $0x48] ss:$16 sps:$4 sm:$0xff]   ;;  %v14335_v56 = vld [vmem:[%s19498_s1 + $0x1d0] ss:$52 sps:$4 sm:$0xff]  }
 0x331   : > { %19538 = vst [vmem:[#allocation19_spill] sm:$0xff] %v17736_v53  ;;  %19539 = vst [vmem:[#allocation20_spill] sm:$0xff] %v17738_v63  ;;  %5981 = vmatpush1.bf16.msra.mxu1 %v14326_v47  ;;  %v4874_v42 = vpop.f32.mrb[27].mxu0  ;;  %v5076_v15 = vpop.f32.mrb[27].mxu1  ;;  %v14331_v49 = vld [vmem:[%s19498_s1 + $0x8b8] ss:$52 sps:$4 sm:$0xff]  }
 0x332   : > { %19540 = vst [vmem:[#allocation21_spill] sm:$0xff] %v17745_v11  ;;  %5982 = vmatprep.subr.bf16.mxu1 %v19536_v9  ;;  %12961 = vmatpush3.bf16.msra.mxu0 %v14332_v40  ;;  %v17767_v47 = vld [vmem:[%s19497_s0 + $0x6c] ss:$16 sps:$4 sm:$0xff]   ;;  %v14333_v41 = vld [vmem:[%s19498_s1 + $0x920] ss:$52 sps:$4 sm:$0xff]  }
 0x333   : > { %5636 = vmatmul.mubr.bf16.gmra.mrb[64].mxu0 %v17754_v34  ;;  %v14338_v35 = vld [vmem:[%s19498_s1 + $0x578] ss:$52 sps:$4 sm:$0xff]   ;;  %12962 = vmatprep.subr.bf16.mxu0 %v14334_v8  ;;  %v14342_v58 = vld [vmem:[%s19498_s1 + $0x5e0] ss:$52 sps:$4 sm:$0xff]   ;;  %v14336_v24 = vld [vmem:[%s19498_s1 + $0x988] ss:$52 sps:$4 sm:$0xff]  }
 0x334   : > { %5838 = vmatmul.mubr.bf16.gmra.mrb[64].mxu1 %v17754_v34  ;;  %12402 = vmatprep.mubr.msk.bf16.mxu0 %vm4612_vm0, %v17767_v47  ;;  %v14339_v52 = vld [vmem:[%s19498_s1 + $0x238] ss:$52 sps:$4 sm:$0xff]   ;;  %v14343_v13 = vld [vmem:[%s19498_s1 + $0x2a0] ss:$52 sps:$4 sm:$0xff]   ;;  %v14345_v42 = vld [vmem:[%s19498_s1 + $0x648] ss:$52 sps:$4 sm:$0xff]  }
 0x335   : > { %5983 = vmatpush1.bf16.msra.mxu1 %v14329_v46  ;;  %12410 = vmatprep.mubr.msk.bf16.mxu1 %vm4612_vm0, %v17767_v47  ;;  %v17787_v40 = vld [vmem:[%s19497_s0 + $0x68] ss:$16 sps:$4 sm:$0xff]   ;;  %v17800_v7 = vld [vmem:[%s19497_s0 + $0x8c] ss:$16 sps:$4 sm:$0xff]   ;;  %v14337_v46 = vld [vmem:[%s19498_s1 + $0x9f0] ss:$52 sps:$4 sm:$0xff]  }
 0x336   : > { %5984 = vmatprep.subr.bf16.mxu1 %v19536_v9  ;;  %12963 = vmatpush3.bf16.msra.mxu0 %v14335_v56  ;;  %v17820_v15 = vld [vmem:[%s19497_s0 + $0x88] ss:$16 sps:$4 sm:$0xff]  }
 0x337   : > { %12964 = vmatprep.subr.bf16.mxu0 %v14338_v35  ;;  %v14347_v8 = vld [vmem:[%s19498_s1 + $0x308] ss:$52 sps:$4 sm:$0xff]   ;;  %v14340_v56 = vld [vmem:[%s19498_s1 + $0xa58] ss:$52 sps:$4 sm:$0xff]   ;;  %v14350_v35 = vld [vmem:[%s19501_s4 + $0x40] sm:$0xff]  }
 0x339   : > { %5985 = vmatpush1.bf16.msra.mxu1 %v14331_v49  ;;  %v17833_v49 = vld [vmem:[%s19497_s0 + $0xac] ss:$16 sps:$4 sm:$0xff]  }
 0x33a   : > { %5986 = vmatprep.subr.bf16.mxu1 %v19536_v9  ;;  %12965 = vmatpush3.bf16.msra.mxu0 %v14339_v52  ;;  %v17850_v52 = vld [vmem:[%s19497_s0 + $0xa8] ss:$16 sps:$4 sm:$0xff]  }
 0x33b   : > { %5646 = vmatmul.mubr.bf16.gmra.mrb[68].mxu0 %v17787_v40  ;;  %12966 = vmatprep.subr.bf16.mxu0 %v14342_v58  ;;  %v14344_v58 = vld [vmem:[%s19498_s1 + $0xb28] ss:$52 sps:$4 sm:$0xff]  }
 0x33c   : > { %5848 = vmatmul.mubr.bf16.gmra.mrb[68].mxu1 %v17787_v40  ;;  %12403 = vmatprep.mubr.msk.bf16.mxu0 %vm4612_vm0, %v17800_v7 }
 0x33d   : > { %5987 = vmatpush1.bf16.msra.mxu1 %v14333_v41  ;;  %12411 = vmatprep.mubr.msk.bf16.mxu1 %vm4612_vm0, %v17800_v7  ;;  %v14341_v41 = vld [vmem:[%s19498_s1 + $0xac0] ss:$52 sps:$4 sm:$0xff]  }
 0x33e   : > { %5988 = vmatprep.subr.bf16.mxu1 %v19536_v9  ;;  %12967 = vmatpush3.bf16.msra.mxu0 %v14343_v13  ;;  %v14348_v13 = vld [vmem:[%s19498_s1 + $0xbf8] ss:$52 sps:$4 sm:$0xff]  }
 0x33f   : > { %12968 = vmatprep.subr.bf16.mxu0 %v14345_v42  ;;  %v14349_v42 = vld [vmem:[%s19498_s1 + $0xc60] ss:$0 sps:$4 sm:$0x33]  }
 0x341   : > { %5989 = vmatpush1.bf16.msra.mxu1 %v14336_v24  ;;  %v14346_v24 = vld [vmem:[%s19498_s1 + $0xb90] ss:$52 sps:$4 sm:$0xff]  }
 0x342   : > { %5990 = vmatprep.subr.bf16.mxu1 %v19536_v9  ;;  %12969 = vmatpush3.bf16.msra.mxu0 %v14347_v8  ;;  %v14351_v8 = vld [vmem:[%s19501_s4] sm:$0xff]  }
 0x343   : > { %5656 = vmatmul.mubr.bf16.gmra.mrb[72].mxu0 %v17820_v15  ;;  %13012 = vmatprep.subr.bf16.mxu0 %v14350_v35  ;;  %v14352_v35 = vld [vmem:[%s19501_s4 + $0x48] sm:$0xff]  }
 0x344   : > { %5858 = vmatmul.mubr.bf16.gmra.mrb[72].mxu1 %v17820_v15  ;;  %12404 = vmatprep.mubr.msk.bf16.mxu0 %vm4612_vm0, %v17833_v49 }
 0x345   : > { %5991 = vmatpush1.bf16.msra.mxu1 %v14337_v46  ;;  %12412 = vmatprep.mubr.msk.bf16.mxu1 %vm4612_vm0, %v17833_v49  ;;  %v14496_v46 = vld [vmem:[%s19497_s0 + $0x4] ss:$16 sps:$4 sm:$0xff]  }
 0x346   : > { %5992 = vmatprep.subr.bf16.mxu1 %v19536_v9 }
 0x349   : > { %5993 = vmatpush1.bf16.msra.mxu1 %v14340_v56  ;;  %v4672_v56 = vsel %vm4634_vm1, %v14349_v42, 0  ;;  %v14355_v42 = vld [vmem:[%s19501_s4 + $0x10] sm:$0xff]  }
 0x34a   : > { %5994 = vmatprep.subr.bf16.mxu1 %v19536_v9 }
 0x34b   : > { %5666 = vmatmul.mubr.bf16.gmra.mrb[76].mxu0 %v17850_v52 }
 0x34c   : > { %5868 = vmatmul.mubr.bf16.gmra.mrb[76].mxu1 %v17850_v52  ;;  %12405 = vmatprep.mubr.msk.bf16.mxu0 %vm4612_vm0, %v16680_v20 }
 0x34d   : > { %5995 = vmatpush1.bf16.msra.mxu1 %v14341_v41  ;;  %12413 = vmatprep.mubr.msk.bf16.mxu1 %vm4612_vm0, %v16680_v20  ;;  %v14358_v41 = vld [vmem:[%s19501_s4 + $0xc0] sm:$0xff]  }
 0x34e   : > { %5996 = vmatprep.subr.bf16.mxu1 %v19536_v9 }
 0x351   : > { %5997 = vmatpush1.bf16.msra.mxu1 %v14344_v58  ;;  %v14498_v58 = vld [vmem:[%s19497_s0 + $0x24] ss:$16 sps:$4 sm:$0xff]  }
 0x352   : > { %5998 = vmatprep.subr.bf16.mxu1 %v19536_v9 }
 0x353   : > { %5676 = vmatmul.mubr.bf16.gmra.mrb[80].mxu0 %v16698_v25 }
 0x354   : > { %5878 = vmatmul.mubr.bf16.gmra.mrb[80].mxu1 %v16698_v25  ;;  %5918 = vmatprep.mubr.bf16.mxu0 %v14496_v46  ;;  %v14362_v46 = vld [vmem:[%s19501_s4 + $0xc8] sm:$0xff]  }
 0x355   : > { %5999 = vmatpush1.bf16.msra.mxu1 %v14346_v24  ;;  %12414 = vmatprep.mubr.msk.bf16.mxu1 %vm4612_vm0, %v17587_v50  ;;  %v14497_v50 = vld [vmem:[%s19497_s0] ss:$16 sps:$4 sm:$0xff]  }
 0x356   : > { %6000 = vmatprep.subr.bf16.mxu1 %v19536_v9  ;;  %v14354_v24 = vld [vmem:[%s19501_s4 + $0x50] sm:$0xff]  }
 0x359   : > { %6001 = vmatpush1.bf16.msra.mxu1 %v14348_v13  ;;  %v14359_v13 = vld [vmem:[%s19501_s4 + $0x80] sm:$0xff]  }
 0x35a   : > { %6002 = vmatprep.subr.bf16.mxu1 %v19536_v9  ;;  %v14353_v9 = vld [vmem:[%s19501_s4 + $0x8] sm:$0xff]  }
 0x35b   : > { %5919 = vmatmul.mubr.bf16.vlgmr.msra.gmra.mrb[84].mxu0 %v14497_v50  ;;  %v14360_v50 = vld [vmem:[%s19501_s4 + $0x60] sm:$0xff]  }
 0x35c   : > { %13013 = vmatpush3.bf16.msra.mxu0 %v14351_v8  ;;  %5926 = vmatprep.mubr.bf16.mxu0 %v14498_v58  ;;  %v14356_v8 = vld [vmem:[%s19501_s4 + $0x58] sm:$0xff]  }
 0x35d   : > { %6003 = vmatpush1.bf16.msra.mxu1 %v4672_v56  ;;  %13014 = vmatprep.subr.bf16.mxu0 %v14352_v35  ;;  %v14363_v56 = vld [vmem:[%s19501_s4 + $0x88] sm:$0xff]   ;;  %v14500_v35 = vld [vmem:[%s19497_s0 + $0x44] ss:$16 sps:$4 sm:$0xff]   ;;  %v14368_v58 = vld [vmem:[%s19501_s4 + $0xd8] sm:$0xff]  }
 0x35e   : > { %13070 = vmatprep.subr.bf16.mxu1 %v14358_v41  ;;  %v14357_v41 = vld [vmem:[%s19501_s4 + $0x18] sm:$0xff]  }
 0x360   : > { %6007 = vmatmul.mubr.bf16.vlgmr.msra.gmra.mrb[84].mxu1 %v17646_v26  ;;  %13015 = vmatpush3.bf16.msra.mxu0 %v14353_v9  ;;  %v14364_v26 = vld [vmem:[%s19501_s4 + $0xd0] sm:$0xff]  }
 0x361   : > { %12415 = vmatprep.mubr.msk.bf16.mxu1 %vm4612_vm0, %v17661_v45  ;;  %13016 = vmatprep.subr.bf16.mxu0 %v14354_v24  ;;  %v14499_v45 = vld [vmem:[%s19497_s0 + $0x20] ss:$16 sps:$4 sm:$0xff]  }
 0x362   : > { %13071 = vmatpush3.bf16.msra.mxu1 %v14359_v13  ;;  %v14365_v9 = vld [vmem:[%s19501_s4 + $0x90] sm:$0xff]   ;;  %v14361_v24 = vld [vmem:[%s19501_s4 + $0x20] sm:$0xff]   ;;  %v14366_v13 = vld [vmem:[%s19501_s4 + $0x68] sm:$0xff]  }
 0x363   : > { %13072 = vmatprep.subr.bf16.mxu1 %v14362_v46  ;;  %5927 = vmatmul.mubr.bf16.gmra.mrb[88].mxu0 %v14499_v45  ;;  %v14369_v46 = vld [vmem:[%s19501_s4 + $0x98] sm:$0xff]   ;;  %v14374_v45 = vld [vmem:[%s19501_s4 + $0xe8] sm:$0xff]  }
 0x364   : > { %5934 = vmatprep.mubr.bf16.mxu0 %v14500_v35  ;;  %13017 = vmatpush3.bf16.msra.mxu0 %v14355_v42  ;;  %v14502_v42 = vld [vmem:[%s19497_s0 + $0x64] ss:$16 sps:$4 sm:$0xff]  }
 0x365   : > { %13018 = vmatprep.subr.bf16.mxu0 %v14356_v8  ;;  %v14367_v8 = vld [vmem:[%s19501_s4 + $0x28] sm:$0xff]   ;;  %v14373_v35 = vld [vmem:[%s19501_s4 + $0x30] sm:$0xff]  }
 0x366   : > { %13073 = vmatpush3.bf16.msra.mxu1 %v14363_v56  ;;  %v14371_v56 = vld [vmem:[%s19501_s4 + $0x70] sm:$0xff]  }
 0x367   : > { %13074 = vmatprep.subr.bf16.mxu1 %v14364_v26  ;;  %v14372_v26 = vld [vmem:[%s19501_s4 + $0xa0] sm:$0xff]  }
 0x368   : > { %6015 = vmatmul.mubr.bf16.gmra.mrb[88].mxu1 %v17701_v37  ;;  %13019 = vmatpush3.bf16.msra.mxu0 %v14357_v41  ;;  %v14370_v37 = vld [vmem:[%s19501_s4 + $0xe0] sm:$0xff]   ;;  %v14375_v41 = vld [vmem:[%s19501_s4 + $0xa8] sm:$0xff]  }
 0x369   : > { %12416 = vmatprep.mubr.msk.bf16.mxu1 %vm4612_vm0, %v17716_v12  ;;  %13020 = vmatprep.subr.bf16.mxu0 %v14360_v50  ;;  %v14501_v12 = vld [vmem:[%s19497_s0 + $0x40] ss:$16 sps:$4 sm:$0xff]   ;;  %v14376_v50 = vld [vmem:[%s19501_s4 + $0x78] sm:$0xff]  }
 0x36a   : > { %13075 = vmatpush3.bf16.msra.mxu1 %v14365_v9  ;;  %v17994_v9 = vsub.s32 4, %v17113_v44 }
 0x36b   : > { %13076 = vmatprep.subr.bf16.mxu1 %v14368_v58  ;;  %5935 = vmatmul.mubr.bf16.gmra.mrb[92].mxu0 %v14501_v12  ;;  %v6092_v58 = vsub.s32 6, %v17113_v44  ;;  %v14379_v12 = vld [vmem:[%s19501_s4 + $0xb0] sm:$0xff]  }
 0x36c   : > { %5942 = vmatprep.mubr.bf16.mxu0 %v14502_v42  ;;  %13021 = vmatpush3.bf16.msra.mxu0 %v14361_v24  ;;  %19541 = vst [vmem:[#allocation22_spill] sm:$0xff] %v17994_v9  ;;  %v14504_v24 = vld [vmem:[%s19497_s0 + $0x84] ss:$16 sps:$4 sm:$0xff]  }
 0x36d   : > { %13022 = vmatprep.subr.bf16.mxu0 %v14366_v13  ;;  %v6088_v13 = vsub.s32 5, %v17113_v44  ;;  %v14382_v42 = vld [vmem:[%s19501_s4 + $0x140] sm:$0xff]  }
 0x36e   : > { %13077 = vmatpush3.bf16.msra.mxu1 %v14369_v46  ;;  %v6096_v46 = vsub.s32 7, %v17113_v44  ;;  %v14380_v44 = vld [vmem:[%s19501_s4 + $0xf8] sm:$0xff]  }
 0x36f   : > { %13078 = vmatprep.subr.bf16.mxu1 %v14370_v37  ;;  %v14378_v37 = vld [vmem:[%s19501_s4 + $0x38] sm:$0xff]  }
 0x370   : > { %6023 = vmatmul.mubr.bf16.gmra.mrb[92].mxu1 %v17754_v34  ;;  %13023 = vmatpush3.bf16.msra.mxu0 %v14367_v8  ;;  %v14377_v34 = vld [vmem:[%s19501_s4 + $0xf0] sm:$0xff]   ;;  %v14505_v8 = vld [vmem:[%s19499_s2] sm:$0xff] }
 0x371   : > { %12417 = vmatprep.mubr.msk.bf16.mxu1 %vm4612_vm0, %v17767_v47  ;;  %13024 = vmatprep.subr.bf16.mxu0 %v14371_v56  ;;  %v14503_v47 = vld [vmem:[%s19497_s0 + $0x60] ss:$16 sps:$4 sm:$0xff]   ;;  %v18019_v56 = vrot.slane %v14505_v8, %v17994_v9 }
 0x372   : > { %13079 = vmatpush3.bf16.msra.mxu1 %v14372_v26  ;;  %v18021_v26 = vrot.slane %v14505_v8, %v6092_v58 }
 0x373   : > { %13080 = vmatprep.subr.bf16.mxu1 %v14374_v45  ;;  %5943 = vmatmul.mubr.bf16.gmra.mrb[96].mxu0 %v14503_v47  ;;  %v18023_v45 = vrot.slane %v14505_v8, %v6088_v13 }
 0x374   : > { %5950 = vmatprep.mubr.bf16.mxu0 %v14504_v24  ;;  %13025 = vmatpush3.bf16.msra.mxu0 %v14373_v35  ;;  %v18025_v35 = vrot.slane %v14505_v8, %v6096_v46 }
 0x375   : > { %13026 = vmatprep.subr.bf16.mxu0 %v14376_v50 }
 0x376   : > { %13081 = vmatpush3.bf16.msra.mxu1 %v14375_v41 }
 0x377   : > { %13082 = vmatprep.subr.bf16.mxu1 %v14377_v34  ;;  %v14381_v34 = vld [vmem:[%s19501_s4 + $0xb8] sm:$0xff]  }
 0x378   : > { %6031 = vmatmul.mubr.bf16.gmra.mrb[96].mxu1 %v17787_v40  ;;  %13027 = vmatpush3.bf16.msra.mxu0 %v14378_v37  ;;  %v14506_v40 = vld [vmem:[%s19500_s3] sm:$0xff] }
 0x379   : > { %12418 = vmatprep.mubr.msk.bf16.mxu1 %vm4612_vm0, %v17800_v7  ;;  %v18033_v41 = vrot.slane %v14506_v40, %v17994_v9  ;;  %v18035_v50 = vrot.slane %v14506_v40, %v6092_v58  ;;  %13128 = vmatprep.subr.bf16.mxu0 %v14382_v42  ;;  %v18040_v8 = vrot.slane %v14506_v40, %v6088_v13  ;;  %v14390_v37 = vld [vmem:[%s19501_s4 + $0x1c0] sm:$0xff]  }
 0x37a   : > { %13083 = vmatpush3.bf16.msra.mxu1 %v14379_v12  ;;  %v5213_v47 = vpop.f32.mrb[28].mxu0  ;;  %v5415_v24 = vpop.f32.mrb[28].mxu1  ;;  %v18042_v7 = vrot.slane %v14506_v40, %v6096_v46  ;;  %v14507_v42 = vld [vmem:[%s19497_s0 + $0x80] ss:$16 sps:$4 sm:$0xff]  }
 0x37b   : > { %13084 = vmatprep.subr.bf16.mxu1 %v14380_v44  ;;  %v6135_v58 = vmul.f32 %v18019_v56, %v5213_v47  ;;  %v6137_v12 = vmul.f32 %v18021_v26, %v5415_v24  ;;  %v5215_v9 = vpop.f32.mrb[29].mxu0  ;;  %v5417_v63 = vpop.f32.mrb[29].mxu1  ;;  %5951 = vmatmul.mubr.bf16.gmra.mrb[100].mxu0 %v14507_v42 }
 0x37c   : > { %v6136_v13 = vmul.f32 %v18023_v45, %v5215_v9  ;;  %v6138_v46 = vmul.f32 %v18025_v35, %v5417_v63  ;;  %v5217_v44 = vpop.f32.mrb[30].mxu0  ;;  %v5419_v40 = vpop.f32.mrb[30].mxu1  ;;  %5958 = vmatprep.mubr.bf16.mxu0 %v17467_v38 }
 0x37d   : > { %v6373_v53 = vadd.f32 %v18033_v41, %v6135_v58  ;;  %v6375_v47 = vadd.f32 %v18035_v50, %v6137_v12  ;;  %v6148_v24 = vmul.f32 %v18019_v56, %v5217_v44  ;;  %v6150_v60 = vmul.f32 %v18021_v26, %v5419_v40  ;;  %v5219_v51 = vpop.f32.mrb[31].mxu0  ;;  %v5421_v62 = vpop.f32.mrb[31].mxu1 }
 0x37e   : > { %13085 = vmatpush3.bf16.msra.mxu1 %v14381_v34  ;;  %v6374_v42 = vadd.f32 %v18040_v8, %v6136_v13  ;;  %v6376_v9 = vadd.f32 %v18042_v7, %v6138_v46  ;;  %v6149_v63 = vmul.f32 %v18023_v45, %v5219_v51  ;;  %v6151_v11 = vmul.f32 %v18025_v35, %v5421_v62 }
 0x37f   : > { %13186 = vmatprep.subr.bf16.mxu1 %v14390_v37  ;;  %v6386_v38 = vadd.f32 %v18033_v41, %v6148_v24  ;;  %v6388_v58 = vadd.f32 %v18035_v50, %v6150_v60  ;;  %v6542_v34 = vmax.f32 %v6373_v53, 0.0  ;;  %v6544_v13 = vmax.f32 %v6375_v47, 0.0 }
 0x380   : > { %6039 = vmatmul.mubr.bf16.gmra.mrb[100].mxu1 %v17820_v15  ;;  %v6387_v12 = vadd.f32 %v18040_v8, %v6149_v63  ;;  %v6389_v44 = vadd.f32 %v18042_v7, %v6151_v11  ;;  %v6543_v40 = vmax.f32 %v6374_v42, 0.0  ;;  %v6545_v62 = vmax.f32 %v6376_v9, 0.0 }
 0x381   : > { %12419 = vmatprep.mubr.msk.bf16.mxu1 %vm4612_vm0, %v17833_v49  ;;  %v6555_v46 = vmax.f32 %v6386_v38, 0.0  ;;  %v6557_v51 = vmax.f32 %v6388_v58, 0.0 }
 0x382   : > { %v6556_v37 = vmax.f32 %v6387_v12, 0.0  ;;  %v6558_v18 = vmax.f32 %v6389_v44, 0.0  ;;  %v5223_v24 = vpop.f32.mrb[32].mxu0  ;;  %v5425_v16 = vpop.f32.mrb[32].mxu1 }
 0x383   : > { %v18070_v60 = vpack.c.bf16 %v6555_v46, %v6542_v34  ;;  %v18072_v15 = vpack.c.bf16 %v6557_v51, %v6544_v13  ;;  %v6161_v63 = vmul.f32 %v18019_v56, %v5223_v24  ;;  %v6163_v11 = vmul.f32 %v18021_v26, %v5425_v16  ;;  %v5225_v59 = vpop.f32.mrb[33].mxu0  ;;  %v5427_v49 = vpop.f32.mrb[33].mxu1  ;;  %5959 = vmatmul.mubr.bf16.gmra.mrb[104].mxu0 %v17501_v17 }
 0x384   : > { %v6162_v53 = vmul.f32 %v18023_v45, %v5225_v59  ;;  %v6164_v47 = vmul.f32 %v18025_v35, %v5427_v49  ;;  %v5227_v42 = vpop.f32.mrb[34].mxu0  ;;  %v5429_v9 = vpop.f32.mrb[34].mxu1  ;;  %5966 = vmatprep.mubr.bf16.mxu0 %v16443_v3  ;;  %v18080_v38 = vpack.c.bf16 %v6556_v37, %v6543_v40  ;;  %v18082_v58 = vpack.c.bf16 %v6558_v18, %v6545_v62 }
 0x385   : > { %v6399_v12 = vadd.f32 %v18033_v41, %v6161_v63  ;;  %v6401_v16 = vadd.f32 %v18035_v50, %v6163_v11  ;;  %v6174_v44 = vmul.f32 %v18019_v56, %v5227_v42  ;;  %v6176_v17 = vmul.f32 %v18021_v26, %v5429_v9  ;;  %v5229_v34 = vpop.f32.mrb[35].mxu0  ;;  %v5431_v59 = vpop.f32.mrb[35].mxu1 }
 0x386   : > { %v6400_v13 = vadd.f32 %v18040_v8, %v6162_v53  ;;  %v6402_v46 = vadd.f32 %v18042_v7, %v6164_v47  ;;  %v6175_v3 = vmul.f32 %v18023_v45, %v5229_v34  ;;  %v6177_v51 = vmul.f32 %v18025_v35, %v5431_v59 }
 0x387   : > { %v6412_v18 = vadd.f32 %v18033_v41, %v6174_v44  ;;  %v6414_v40 = vadd.f32 %v18035_v50, %v6176_v17  ;;  %v6568_v24 = vmax.f32 %v6399_v12, 0.0  ;;  %v6570_v63 = vmax.f32 %v6401_v16, 0.0 }
 0x388   : > { %6047 = vmatmul.mubr.bf16.gmra.mrb[104].mxu1 %v17850_v52  ;;  %v6413_v62 = vadd.f32 %v18040_v8, %v6175_v3  ;;  %v6415_v37 = vadd.f32 %v18042_v7, %v6177_v51  ;;  %v6569_v53 = vmax.f32 %v6400_v13, 0.0  ;;  %v6571_v47 = vmax.f32 %v6402_v46, 0.0 }
 0x389   : > { %12420 = vmatprep.mubr.msk.bf16.mxu1 %vm4612_vm0, %v16680_v20  ;;  %v6581_v11 = vmax.f32 %v6412_v18, 0.0  ;;  %v6583_v49 = vmax.f32 %v6414_v40, 0.0 }
 0x38a   : > { %v6582_v42 = vmax.f32 %v6413_v62, 0.0  ;;  %v6584_v9 = vmax.f32 %v6415_v37, 0.0  ;;  %v5233_v44 = vpop.f32.mrb[36].mxu0  ;;  %v5435_v34 = vpop.f32.mrb[36].mxu1 }
 0x38b   : > { %v6187_v17 = vmul.f32 %v18019_v56, %v5233_v44  ;;  %v6189_v52 = vmul.f32 %v18021_v26, %v5435_v34  ;;  %v5235_v59 = vpop.f32.mrb[37].mxu0  ;;  %v5437_v3 = vpop.f32.mrb[37].mxu1  ;;  %5967 = vmatmul.mubr.bf16.gmra.mrb[108].mxu0 %v16465_v10  ;;  %v18102_v51 = vpack.c.bf16 %v6581_v11, %v6568_v24  ;;  %v18104_v20 = vpack.c.bf16 %v6583_v49, %v6570_v63  ;;  %v14383_v34 = vld [vmem:[%s19501_s4 + $0x100] sm:$0xff]  }
 0x38c   : > { %v6188_v12 = vmul.f32 %v18023_v45, %v5235_v59  ;;  %v5237_v16 = vpop.f32.mrb[38].mxu0  ;;  %v5439_v13 = vpop.f32.mrb[38].mxu1  ;;  %7636 = vmatprep.mubr.bf16.mxu0 %v17443_v19  ;;  %v18108_v46 = vpack.c.bf16 %v6582_v42, %v6569_v53  ;;  %v18110_v18 = vpack.c.bf16 %v6584_v9, %v6571_v47  ;;  %v6190_v49 = vmul.f32 %v18025_v35, %v5437_v3 }
 0x38d   : > { %v6425_v40 = vadd.f32 %v18033_v41, %v6187_v17  ;;  %v6427_v62 = vadd.f32 %v18035_v50, %v6189_v52  ;;  %v6200_v10 = vmul.f32 %v18019_v56, %v5237_v16  ;;  %v6202_v37 = vmul.f32 %v18021_v26, %v5439_v13  ;;  %v5239_v24 = vpop.f32.mrb[39].mxu0  ;;  %v5441_v63 = vpop.f32.mrb[39].mxu1 }
 0x38e   : > { %v6426_v11 = vadd.f32 %v18040_v8, %v6188_v12  ;;  %v6201_v19 = vmul.f32 %v18023_v45, %v5239_v24  ;;  %v6203_v53 = vmul.f32 %v18025_v35, %v5441_v63  ;;  %v14384_v12 = vld [vmem:[%s19501_s4 + $0x148] sm:$0xff]  }
 0x38f   : > { %v6438_v47 = vadd.f32 %v18033_v41, %v6200_v10  ;;  %v6440_v42 = vadd.f32 %v18035_v50, %v6202_v37  ;;  %v6594_v17 = vmax.f32 %v6425_v40, 0.0  ;;  %v6596_v52 = vmax.f32 %v6427_v62, 0.0 }
 0x390   : > { %6055 = vmatmul.mubr.bf16.gmra.mrb[108].mxu1 %v16698_v25  ;;  %v6439_v9 = vadd.f32 %v18040_v8, %v6201_v19  ;;  %v6441_v44 = vadd.f32 %v18042_v7, %v6203_v53  ;;  %v6595_v16 = vmax.f32 %v6426_v11, 0.0  ;;  %v6428_v25 = vadd.f32 %v18042_v7, %v6190_v49 }
 0x391   : > { %7724 = vmatprep.mubr.bf16.mxu1 %v17485_v54  ;;  %v6607_v59 = vmax.f32 %v6438_v47, 0.0  ;;  %v6609_v3 = vmax.f32 %v6440_v42, 0.0  ;;  %v14385_v42 = vld [vmem:[%s19501_s4 + $0x108] sm:$0xff]  }
 0x392   : > { %v6608_v13 = vmax.f32 %v6439_v9, 0.0  ;;  %v5243_v10 = vpop.f32.mrb[40].mxu0  ;;  %v5445_v37 = vpop.f32.mrb[40].mxu1  ;;  %v6610_v53 = vmax.f32 %v6441_v44, 0.0 }
 0x393   : > { %v6213_v54 = vmul.f32 %v18019_v56, %v5243_v10  ;;  %v6215_v24 = vmul.f32 %v18021_v26, %v5445_v37  ;;  %v5245_v63 = vpop.f32.mrb[41].mxu0  ;;  %v5447_v19 = vpop.f32.mrb[41].mxu1  ;;  %7637 = vmatmul.mubr.bf16.vlgmr.msra.gmra.mrb[112].mxu0 %v17428_v2  ;;  %v18136_v40 = vpack.c.bf16 %v6607_v59, %v6594_v17  ;;  %v18138_v62 = vpack.c.bf16 %v6609_v3, %v6596_v52 }
 0x394   : > { %v6214_v11 = vmul.f32 %v18023_v45, %v5245_v63  ;;  %v5247_v47 = vpop.f32.mrb[42].mxu0  ;;  %v5449_v49 = vpop.f32.mrb[42].mxu1  ;;  %7644 = vmatprep.mubr.bf16.mxu0 %v17515_v28  ;;  %13129 = vmatpush3.bf16.msra.mxu0 %v14383_v34  ;;  %v18145_v9 = vpack.c.bf16 %v6608_v13, %v6595_v16  ;;  %v14386_v28 = vld [vmem:[%s19501_s4 + $0x150] sm:$0xff]   ;;  %v14391_v34 = vld [vmem:[%s19501_s4 + $0x180] sm:$0xff]   ;;  %v6216_v13 = vmul.f32 %v18025_v35, %v5447_v19 }
 0x395   : > { %v6451_v2 = vadd.f32 %v18033_v41, %v6213_v54  ;;  %v6453_v17 = vadd.f32 %v18035_v50, %v6215_v24  ;;  %v6226_v52 = vmul.f32 %v18019_v56, %v5247_v47  ;;  %v6228_v44 = vmul.f32 %v18021_v26, %v5449_v49  ;;  %v5249_v59 = vpop.f32.mrb[43].mxu0  ;;  %v5451_v3 = vpop.f32.mrb[43].mxu1  ;;  %13130 = vmatprep.subr.bf16.mxu0 %v14384_v12  ;;  %v14394_v12 = vld [vmem:[%s19501_s4 + $0x1c8] sm:$0xff]   ;;  %v14387_v19 = vld [vmem:[%s19501_s4 + $0x110] sm:$0xff]  }
 0x396   : > { %v6452_v16 = vadd.f32 %v18040_v8, %v6214_v11  ;;  %v6227_v10 = vmul.f32 %v18023_v45, %v5249_v59  ;;  %v6229_v37 = vmul.f32 %v18025_v35, %v5451_v3  ;;  %v6597_v54 = vmax.f32 %v6428_v25, 0.0 }
 0x397   : > { %v6464_v24 = vadd.f32 %v18033_v41, %v6226_v52  ;;  %v6466_v63 = vadd.f32 %v18035_v50, %v6228_v44  ;;  %v6620_v47 = vmax.f32 %v6451_v2, 0.0  ;;  %v6622_v49 = vmax.f32 %v6453_v17, 0.0 }
 0x398   : > { %7725 = vmatmul.mubr.bf16.vlgmr.msra.gmra.mrb[112].mxu1 %v17430_v6  ;;  %v6465_v11 = vadd.f32 %v18040_v8, %v6227_v10  ;;  %13131 = vmatpush3.bf16.msra.mxu0 %v14385_v42  ;;  %v6467_v25 = vadd.f32 %v18042_v7, %v6229_v37  ;;  %v14388_v6 = vld [vmem:[%s19501_s4 + $0x158] sm:$0xff]   ;;  %v18176_v2 = vpack.c.bf16 %v6610_v53, %v6597_v54  ;;  %v6621_v17 = vmax.f32 %v6452_v16, 0.0  ;;  %v14395_v10 = vld [vmem:[%s19501_s4 + $0x188] sm:$0xff]   ;;  %v14396_v53 = vld [vmem:[%s19501_s4 + $0x1d0] sm:$0xff]  }
 0x399   : > { %7732 = vmatprep.mubr.bf16.mxu1 %v17547_v14  ;;  %v6633_v59 = vmax.f32 %v6464_v24, 0.0  ;;  %v6635_v3 = vmax.f32 %v6466_v63, 0.0  ;;  %13132 = vmatprep.subr.bf16.mxu0 %v14386_v28  ;;  %v6454_v14 = vadd.f32 %v18042_v7, %v6216_v13 }
 0x39a   : > { %13187 = vmatpush3.bf16.msra.mxu1 %v14391_v34  ;;  %v6634_v42 = vmax.f32 %v6465_v11, 0.0  ;;  %v5253_v52 = vpop.f32.mrb[44].mxu0  ;;  %v5455_v44 = vpop.f32.mrb[44].mxu1  ;;  %v14389_v11 = vld [vmem:[%s19501_s4 + $0x118] sm:$0xff]  }
 0x39b   : > { %13188 = vmatprep.subr.bf16.mxu1 %v14394_v12  ;;  %v6239_v28 = vmul.f32 %v18019_v56, %v5253_v52  ;;  %v6241_v37 = vmul.f32 %v18021_v26, %v5455_v44  ;;  %v5255_v24 = vpop.f32.mrb[45].mxu0  ;;  %v5457_v63 = vpop.f32.mrb[45].mxu1  ;;  %7645 = vmatmul.mubr.bf16.gmra.mrb[116].mxu0 %v17510_v22  ;;  %v18188_v34 = vpack.c.bf16 %v6633_v59, %v6620_v47  ;;  %v6636_v52 = vmax.f32 %v6467_v25, 0.0 }
 0x39c   : > { %v18190_v16 = vpack.c.bf16 %v6635_v3, %v6622_v49  ;;  %v6240_v13 = vmul.f32 %v18023_v45, %v5255_v24  ;;  %v5257_v12 = vpop.f32.mrb[46].mxu0  ;;  %v5459_v54 = vpop.f32.mrb[46].mxu1  ;;  %7652 = vmatprep.mubr.bf16.mxu0 %v17571_v33  ;;  %13133 = vmatpush3.bf16.msra.mxu0 %v14387_v19  ;;  %v18197_v22 = vpack.c.bf16 %v6634_v42, %v6621_v17  ;;  %v14392_v33 = vld [vmem:[%s19501_s4 + $0x160] sm:$0xff]   ;;  %v14397_v42 = vld [vmem:[%s19501_s4 + $0x190] sm:$0xff]  }
 0x39d   : > { %v6477_v44 = vadd.f32 %v18033_v41, %v6239_v28  ;;  %v6252_v47 = vmul.f32 %v18019_v56, %v5257_v12  ;;  %v6254_v49 = vmul.f32 %v18021_v26, %v5459_v54  ;;  %v5259_v59 = vpop.f32.mrb[47].mxu0  ;;  %v5461_v3 = vpop.f32.mrb[47].mxu1  ;;  %13134 = vmatprep.subr.bf16.mxu0 %v14388_v6  ;;  %v6242_v24 = vmul.f32 %v18025_v35, %v5457_v63  ;;  %v14400_v63 = vld [vmem:[%s19501_s4 + $0x1d8] sm:$0xff]  }
 0x39e   : > { %v6478_v19 = vadd.f32 %v18040_v8, %v6240_v13  ;;  %v6253_v17 = vmul.f32 %v18023_v45, %v5259_v59  ;;  %v6255_v25 = vmul.f32 %v18025_v35, %v5461_v3  ;;  %13189 = vmatpush3.bf16.msra.mxu1 %v14395_v10  ;;  %v6623_v28 = vmax.f32 %v6454_v14, 0.0  ;;  %v14393_v14 = vld [vmem:[%s19501_s4 + $0x120] sm:$0xff]  }
 0x39f   : > { %v18213_v6 = vadd.f32 %v18035_v50, %v6241_v37  ;;  %v6490_v12 = vadd.f32 %v18033_v41, %v6252_v47  ;;  %13190 = vmatprep.subr.bf16.mxu1 %v14396_v53  ;;  %v18221_v13 = vadd.f32 %v18035_v50, %v6254_v49  ;;  %v6646_v37 = vmax.f32 %v6477_v44, 0.0  ;;  %v14398_v53 = vld [vmem:[%s19501_s4 + $0x168] sm:$0xff]   ;;  %v14401_v44 = vld [vmem:[%s19501_s4 + $0x198] sm:$0xff]  }
 0x3a0   : > { %7733 = vmatmul.mubr.bf16.gmra.mrb[116].mxu1 %v17512_v23  ;;  %v6491_v10 = vadd.f32 %v18040_v8, %v6253_v17  ;;  %13135 = vmatpush3.bf16.msra.mxu0 %v14389_v11  ;;  %v6493_v23 = vadd.f32 %v18042_v7, %v6255_v25  ;;  %v18232_v47 = vpack.c.bf16 %v6636_v52, %v6623_v28  ;;  %v6647_v49 = vmax.f32 %v6478_v19, 0.0  ;;  %v14402_v19 = vld [vmem:[%s19501_s4 + $0x1e0] sm:$0xff]  }
 0x3a1   : > { %7740 = vmatprep.mubr.bf16.mxu1 %v17600_v21  ;;  %v6659_v54 = vmax.f32 %v6490_v12, 0.0  ;;  %13136 = vmatprep.subr.bf16.mxu0 %v14392_v33  ;;  %v6480_v59 = vadd.f32 %v18042_v7, %v6242_v24  ;;  %v6648_v17 = vmax.f32 %v18213_v6, 0.0 }
 0x3a2   : > { %v6660_v21 = vmax.f32 %v6491_v10, 0.0  ;;  %v5263_v11 = vpop.f32.mrb[48].mxu0  ;;  %v5465_v3 = vpop.f32.mrb[48].mxu1  ;;  %13191 = vmatpush3.bf16.msra.mxu1 %v14397_v42  ;;  %v6661_v42 = vmax.f32 %v18221_v13, 0.0 }
 0x3a3   : > { %v6265_v33 = vmul.f32 %v18019_v56, %v5263_v11  ;;  %v6267_v25 = vmul.f32 %v18021_v26, %v5465_v3  ;;  %v5265_v12 = vpop.f32.mrb[49].mxu0  ;;  %v5467_v52 = vpop.f32.mrb[49].mxu1  ;;  %7653 = vmatmul.mubr.bf16.gmra.mrb[120].mxu0 %v17564_v31  ;;  %13192 = vmatprep.subr.bf16.mxu1 %v14400_v63  ;;  %v18245_v24 = vpack.c.bf16 %v6659_v54, %v6646_v37  ;;  %v14399_v31 = vld [vmem:[%s19501_s4 + $0x128] sm:$0xff]   ;;  %v6662_v3 = vmax.f32 %v6493_v23, 0.0 }
 0x3a4   : > { %v6266_v28 = vmul.f32 %v18023_v45, %v5265_v12  ;;  %v6268_v6 = vmul.f32 %v18025_v35, %v5467_v52  ;;  %v5267_v10 = vpop.f32.mrb[50].mxu0  ;;  %v5469_v11 = vpop.f32.mrb[50].mxu1  ;;  %7660 = vmatprep.mubr.bf16.mxu0 %v17621_v43  ;;  %13137 = vmatpush3.bf16.msra.mxu0 %v14393_v14  ;;  %v18254_v63 = vpack.c.bf16 %v6660_v21, %v6647_v49  ;;  %v14403_v43 = vld [vmem:[%s19501_s4 + $0x170] sm:$0xff]   ;;  %v14404_v21 = vld [vmem:[%s19501_s4 + $0x1a0] sm:$0xff]  }
 0x3a5   : > { %19542 = vst [vmem:[#allocation23_spill] sm:$0xff] %v18245_v24  ;;  %v6503_v37 = vadd.f32 %v18033_v41, %v6265_v33  ;;  %v6278_v13 = vmul.f32 %v18019_v56, %v5267_v10  ;;  %v6280_v54 = vmul.f32 %v18021_v26, %v5469_v11  ;;  %v5269_v12 = vpop.f32.mrb[51].mxu0  ;;  %v5471_v52 = vpop.f32.mrb[51].mxu1  ;;  %13138 = vmatprep.subr.bf16.mxu0 %v14398_v53  ;;  %v6649_v33 = vmax.f32 %v6480_v59, 0.0  ;;  %v14405_v59 = vld [vmem:[%s19501_s4 + $0x130] sm:$0xff]  }
 0x3a6   : > { %v6505_v14 = vadd.f32 %v18035_v50, %v6267_v25  ;;  %v6504_v24 = vadd.f32 %v18040_v8, %v6266_v28  ;;  %v6279_v49 = vmul.f32 %v18023_v45, %v5269_v12  ;;  %v6281_v23 = vmul.f32 %v18025_v35, %v5471_v52  ;;  %13193 = vmatpush3.bf16.msra.mxu1 %v14401_v44  ;;  %v14406_v25 = vld [vmem:[%s19501_s4 + $0x1e8] sm:$0xff]  }
 0x3a7   : > { %v6506_v53 = vadd.f32 %v18042_v7, %v6268_v6  ;;  %v6516_v10 = vadd.f32 %v18033_v41, %v6278_v13  ;;  %v6518_v11 = vadd.f32 %v18035_v50, %v6280_v54  ;;  %13194 = vmatprep.subr.bf16.mxu1 %v14402_v19  ;;  %v6672_v28 = vmax.f32 %v6503_v37, 0.0 }
 0x3a8   : > { %7741 = vmatmul.mubr.bf16.gmra.mrb[120].mxu1 %v17566_v32  ;;  %v6517_v44 = vadd.f32 %v18040_v8, %v6279_v49  ;;  %v6519_v12 = vadd.f32 %v18042_v7, %v6281_v23  ;;  %13139 = vmatpush3.bf16.msra.mxu0 %v14399_v31  ;;  %v14408_v32 = vld [vmem:[%s19501_s4 + $0x178] sm:$0xff]   ;;  %v18285_v19 = vpack.c.bf16 %v6662_v3, %v6649_v33  ;;  %v6673_v54 = vmax.f32 %v6504_v24, 0.0 }
 0x3a9   : > { %7748 = vmatprep.mubr.bf16.mxu1 %v17665_v1  ;;  %v6685_v6 = vmax.f32 %v6516_v10, 0.0  ;;  %v6687_v13 = vmax.f32 %v6518_v11, 0.0  ;;  %13140 = vmatprep.subr.bf16.mxu0 %v14403_v43  ;;  %v18287_v37 = vpack.c.bf16 %v6661_v42, %v6648_v17  ;;  %v14407_v43 = vld [vmem:[%s19501_s4 + $0x1a8] sm:$0xff]   ;;  %v6674_v23 = vmax.f32 %v6505_v14, 0.0  ;;  %v14409_v17 = vld [vmem:[%s19501_s4 + $0x1f0] sm:$0xff]   ;;  %v14410_v14 = vld [vmem:[%s19501_s4 + $0x138] sm:$0xff]  }
 0x3aa   : > { %v6686_v52 = vmax.f32 %v6517_v44, 0.0  ;;  %v6688_v49 = vmax.f32 %v6519_v12, 0.0  ;;  %v18289_v1 = vpop.f32.mrb[52].mxu0  ;;  %v18291_v31 = vpop.f32.mrb[52].mxu1  ;;  %13195 = vmatpush3.bf16.msra.mxu1 %v14404_v21  ;;  %v6675_v10 = vmax.f32 %v6506_v53, 0.0  ;;  %v14411_v12 = vld [vmem:[%s19501_s4 + $0x1b0] sm:$0xff]  }
 0x3ab   : > { %v18296_v11 = vpop.f32.mrb[53].mxu0  ;;  %v18298_v3 = vpop.f32.mrb[53].mxu1  ;;  %7661 = vmatmul.mubr.bf16.gmra.mrb[124].mxu0 %v17614_v39  ;;  %13196 = vmatprep.subr.bf16.mxu1 %v14406_v25  ;;  %v18304_v24 = vpack.c.bf16 %v6685_v6, %v6672_v28  ;;  %v14414_v25 = vld [vmem:[%s19501_s4 + $0x240] sm:$0xff]   ;;  %v18317_v44 = vpack.c.bf16 %v6687_v13, %v6674_v23 }
 0x3ac   : > { %v5277_v42 = vpop.f32.mrb[54].mxu0  ;;  %v5479_v21 = vpop.f32.mrb[54].mxu1  ;;  %7668 = vmatprep.mubr.bf16.mxu0 %v17682_v30  ;;  %13141 = vmatpush3.bf16.msra.mxu0 %v14405_v59  ;;  %v18310_v33 = vpack.c.bf16 %v6686_v52, %v6673_v54  ;;  %v18315_v28 = vpack.c.bf16 %v6688_v49, %v6675_v10  ;;  %v6288_v30 = vmul.f32 %v17340_v61, %v17732_v27  ;;  %v14412_v59 = vld [vmem:[%s19501_s4 + $0x1f8] sm:$0xff]   ;;  %v19546_v54 = vld [vmem:[#allocation21_spill] sm:$0xff]  ;;  %v19548_v49 = vld [vmem:[#allocation18_spill] sm:$0xff] }
 0x3ad   : > { %v5278_v53 = vpop.f32.mrb[55].mxu0  ;;  %v5480_v39 = vpop.f32.mrb[55].mxu1  ;;  %13142 = vmatprep.subr.bf16.mxu0 %v14408_v32  ;;  %v6290_v61 = vmul.f32 %v17355_v5, %v17734_v36  ;;  %v14413_v27 = vld [vmem:[%s19501_s4 + $0x1b8] sm:$0xff]   ;;  %v19545_v36 = vld [vmem:[#allocation17_spill] sm:$0xff] }
 0x3ae   : > { %13197 = vmatpush3.bf16.msra.mxu1 %v14407_v43  ;;  %v6526_v6 = vadd.f32 %v17352_v4, %v6288_v30  ;;  %v19544_v32 = vld [vmem:[#allocation16_spill] sm:$0xff]  ;;  %v19549_v43 = vld [vmem:[#allocation13_spill] sm:$0xff]  ;;  %v19551_v42 = vld [vmem:[#allocation15_spill] sm:$0xff] }
 0x3af   : > { %13198 = vmatprep.subr.bf16.mxu1 %v14409_v17  ;;  %v6528_v5 = vadd.f32 %v19544_v32, %v6290_v61  ;;  %v6289_v23 = vmul.f32 %v19549_v43, %v19548_v49  ;;  %v19552_v53 = vld [vmem:[#allocation20_spill] sm:$0xff]  ;;  %v14435_v32 = vld [vmem:[%s19501_s4 + $0x270] sm:$0xff]   ;;  %v15165_v49 = vmov 0.0  }
 0x3b0   : > { %7749 = vmatmul.mubr.bf16.gmra.mrb[124].mxu1 %v17616_v48  ;;  %13143 = vmatpush3.bf16.msra.mxu0 %v14410_v14  ;;  %v14422_v48 = vld [vmem:[%s19501_s4 + $0x2c0] sm:$0xff]   ;;  %v6695_v13 = vmax.f32 %v6526_v6, 0.0  ;;  %v14420_v61 = vld [vmem:[%s19501_s4 + $0x258] sm:$0xff]  }
 0x3b1   : > { %7756 = vmatprep.mubr.bf16.mxu1 %v17726_v0  ;;  %13244 = vmatprep.subr.bf16.mxu0 %v14414_v25  ;;  %v19543_v0 = vld [vmem:[#allocation12_spill] sm:$0xff]  ;;  %v6697_v17 = vmax.f32 %v6528_v5, 0.0  ;;  %v6527_v21 = vadd.f32 %v19551_v42, %v6289_v23  ;;  %v19553_v43 = vld [vmem:[#allocation23_spill] sm:$0xff] }
 0x3b2   : > { %13199 = vmatpush3.bf16.msra.mxu1 %v14411_v12  ;;  %v6287_v4 = vmul.f32 %v19543_v0, %v17728_v55  ;;  %v6786_v10 = vpack.c.bf16 %v6695_v13, %v6695_v13  ;;  %v14415_v12 = vld [vmem:[%s19501_s4 + $0x200] sm:$0xff]   ;;  %v14429_v0 = vld [vmem:[%s19501_s4 + $0x290] sm:$0xff]   ;;  %v14433_v13 = vld [vmem:[%s19501_s4 + $0x298] sm:$0xff]  }
 0x3b3   : > { %7669 = vmatmul.mubr.bf16.gmra.mrb[128].mxu0 %v17676_v29  ;;  %13200 = vmatprep.subr.bf16.mxu1 %v14412_v59  ;;  %v19547_v29 = vld [vmem:[#allocation14_spill] sm:$0xff]  ;;  %v6788_v14 = vpack.c.bf16 %v6697_v17, %v6697_v17  ;;  %v6696_v25 = vmax.f32 %v6527_v21, 0.0  ;;  %v14423_v6 = vld [vmem:[%s19501_s4 + $0x280] sm:$0xff]  }
 0x3b4   : > { %7676 = vmatprep.mubr.bf16.mxu0 %v17743_v57  ;;  %v6525_v52 = vadd.f32 %v19547_v29, %v6287_v4  ;;  %v19550_v57 = vld [vmem:[#allocation19_spill] sm:$0xff]  ;;  %v14416_v59 = vld [vmem:[%s19501_s4 + $0x248] sm:$0xff]   ;;  %v14436_v5 = vld [vmem:[%s19501_s4 + $0x2a0] sm:$0xff]  }
 0x3b5   : > { %v6787_v30 = vpack.c.bf16 %v6696_v25, %v6696_v25  ;;  %v14430_v4 = vld [vmem:[%s19501_s4 + $0x268] sm:$0xff]   ;;  %v14443_v29 = vld [vmem:[%s19501_s4 + $0x2b0] sm:$0xff]  }
 0x3b6   : > { %13201 = vmatpush3.bf16.msra.mxu1 %v14413_v27  ;;  %v6694_v55 = vmax.f32 %v6525_v52, 0.0  ;;  %v14427_v27 = vld [vmem:[%s19501_s4 + $0x288] sm:$0xff]   ;;  %v6292_v52 = vmul.f32 %v18023_v45, %v18296_v11  ;;  %v6294_v11 = vmul.f32 %v18025_v35, %v18298_v3  ;;  %v6293_v35 = vmul.f32 %v18021_v26, %v18291_v31 }
 0x3b7   : > { %13302 = vmatprep.subr.bf16.mxu1 %v14422_v48  ;;  %v14424_v48 = vld [vmem:[%s19501_s4 + $0x260] sm:$0xff]  }
 0x3b8   : > { %7757 = vmatmul.mubr.bf16.gmra.mrb[128].mxu1 %v19545_v36  ;;  %v6785_v39 = vpack.c.bf16 %v6694_v55, %v6694_v55  ;;  %v14439_v36 = vld [vmem:[%s19501_s4 + $0x2a8] sm:$0xff]   ;;  %v6530_v45 = vadd.f32 %v18040_v8, %v6292_v52  ;;  %v6532_v23 = vadd.f32 %v18042_v7, %v6294_v11 }
 0x3b9   : > { %7764 = vmatprep.mubr.bf16.mxu1 %v19546_v54  ;;  %v14440_v54 = vld [vmem:[%s19501_s4 + $0x278] sm:$0xff]   ;;  %v18484_v7 = vld [vmem:[%s19500_s3 + $0x8] sm:$0x1f] }
 0x3ba   : > { %v6701_v3 = vmax.f32 %v6532_v23, 0.0  ;;  %v19555_v26 = vld [vmem:[#allocation9_spill] sm:$0xff] }
 0x3bb   : > { %7677 = vmatmul.mubr.bf16.gmra.mrb[132].mxu0 %v19550_v57  ;;  %v19557_v57 = vld [vmem:[#allocation11_spill] sm:$0xff]  ;;  %v18510_v42 = vrot.slane %v18484_v7, %v19555_v26 }
 0x3bc   : > { %7684 = vmatprep.mubr.bf16.mxu0 %v6786_v10  ;;  %v19556_v10 = vld [vmem:[#allocation10_spill] sm:$0xff]  ;;  %v6792_v21 = vpack.c.bf16 %v6701_v3, %v6701_v3 }
 0x3c0   : > { %7765 = vmatmul.mubr.bf16.gmra.mrb[132].mxu1 %v19552_v53  ;;  %v18514_v53 = vrot.slane %v18484_v7, %v19556_v10 }
 0x3c1   : > { %7772 = vmatprep.mubr.bf16.mxu1 %v6788_v14 }
 0x3c3   : > { %7685 = vmatmul.mubr.bf16.gmra.mrb[136].mxu0 %v6785_v39  ;;  %v18518_v39 = vrot.slane %v18484_v7, %v19557_v57 }
 0x3c4   : > { %7812 = vmatprep.mubr.bf16.mxu0 %v18080_v38  ;;  %v14417_v38 = vld [vmem:[%s19501_s4 + $0x208] sm:$0xff]  }
 0x3c8   : > { %7773 = vmatmul.mubr.bf16.gmra.mrb[136].mxu1 %v6787_v30 }
 0x3c9   : > { %7900 = vmatprep.mubr.bf16.mxu1 %v18082_v58  ;;  %v14418_v58 = vld [vmem:[%s19501_s4 + $0x250] sm:$0xff]  }
 0x3cb   : > { %7813 = vmatmul.mubr.bf16.vlgmr.msra.gmra.mrb[140].mxu0 %v18070_v60  ;;  %v14426_v60 = vld [vmem:[%s19501_s4 + $0x2c8] sm:$0xff]  }
 0x3cc   : > { %7820 = vmatprep.mubr.bf16.mxu0 %v18108_v46  ;;  %13245 = vmatpush3.bf16.msra.mxu0 %v14415_v12  ;;  %v14419_v46 = vld [vmem:[%s19501_s4 + $0x210] sm:$0xff]  }
 0x3cd   : > { %13246 = vmatprep.subr.bf16.mxu0 %v14416_v59 }
 0x3d0   : > { %7901 = vmatmul.mubr.bf16.vlgmr.msra.gmra.mrb[140].mxu1 %v18072_v15  ;;  %13247 = vmatpush3.bf16.msra.mxu0 %v14417_v38  ;;  %v14428_v15 = vld [vmem:[%s19501_s4 + $0x2d0] sm:$0xff]  }
 0x3d1   : > { %7908 = vmatprep.mubr.bf16.mxu1 %v18110_v18  ;;  %13248 = vmatprep.subr.bf16.mxu0 %v14418_v58  ;;  %v14421_v18 = vld [vmem:[%s19501_s4 + $0x218] sm:$0xff]  }
 0x3d2   : > { %13303 = vmatpush3.bf16.msra.mxu1 %v14423_v6 }
 0x3d3   : > { %13304 = vmatprep.subr.bf16.mxu1 %v14426_v60  ;;  %7821 = vmatmul.mubr.bf16.gmra.mrb[144].mxu0 %v18102_v51  ;;  %v14432_v51 = vld [vmem:[%s19501_s4 + $0x2d8] sm:$0xff]  }
 0x3d4   : > { %7828 = vmatprep.mubr.bf16.mxu0 %v18145_v9  ;;  %13249 = vmatpush3.bf16.msra.mxu0 %v14419_v46  ;;  %v14425_v9 = vld [vmem:[%s19501_s4 + $0x220] sm:$0xff]  }
 0x3d5   : > { %13250 = vmatprep.subr.bf16.mxu0 %v14420_v61 }
 0x3d6   : > { %13305 = vmatpush3.bf16.msra.mxu1 %v14427_v27 }
 0x3d7   : > { %13306 = vmatprep.subr.bf16.mxu1 %v14428_v15 }
 0x3d8   : > { %7909 = vmatmul.mubr.bf16.gmra.mrb[144].mxu1 %v18104_v20  ;;  %13251 = vmatpush3.bf16.msra.mxu0 %v14421_v18  ;;  %v14434_v20 = vld [vmem:[%s19501_s4 + $0x2e0] sm:$0xff]  }
 0x3d9   : > { %7916 = vmatprep.mubr.bf16.mxu1 %v18176_v2  ;;  %13252 = vmatprep.subr.bf16.mxu0 %v14424_v48  ;;  %v14431_v2 = vld [vmem:[%s19501_s4 + $0x228] sm:$0xff]  }
 0x3da   : > { %13307 = vmatpush3.bf16.msra.mxu1 %v14429_v0 }
 0x3db   : > { %13308 = vmatprep.subr.bf16.mxu1 %v14432_v51  ;;  %7829 = vmatmul.mubr.bf16.gmra.mrb[148].mxu0 %v18136_v40  ;;  %v14438_v40 = vld [vmem:[%s19501_s4 + $0x2e8] sm:$0xff]  }
 0x3dc   : > { %7836 = vmatprep.mubr.bf16.mxu0 %v18197_v22  ;;  %13253 = vmatpush3.bf16.msra.mxu0 %v14425_v9  ;;  %v14437_v22 = vld [vmem:[%s19501_s4 + $0x230] sm:$0xff]  }
 0x3dd   : > { %13254 = vmatprep.subr.bf16.mxu0 %v14430_v4 }
 0x3de   : > { %13309 = vmatpush3.bf16.msra.mxu1 %v14433_v13 }
 0x3df   : > { %13310 = vmatprep.subr.bf16.mxu1 %v14434_v20 }
 0x3e0   : > { %7917 = vmatmul.mubr.bf16.gmra.mrb[148].mxu1 %v18138_v62  ;;  %13255 = vmatpush3.bf16.msra.mxu0 %v14431_v2  ;;  %v14441_v62 = vld [vmem:[%s19501_s4 + $0x2f0] sm:$0xff]  }
 0x3e1   : > { %7924 = vmatprep.mubr.bf16.mxu1 %v18232_v47  ;;  %13256 = vmatprep.subr.bf16.mxu0 %v14435_v32  ;;  %v14442_v47 = vld [vmem:[%s19501_s4 + $0x238] sm:$0xff]  }
 0x3e2   : > { %13311 = vmatpush3.bf16.msra.mxu1 %v14436_v5 }
 0x3e3   : > { %13312 = vmatprep.subr.bf16.mxu1 %v14438_v40  ;;  %7837 = vmatmul.mubr.bf16.gmra.mrb[152].mxu0 %v18188_v34  ;;  %v14444_v34 = vld [vmem:[%s19501_s4 + $0x2f8] sm:$0xff]  }
 0x3e4   : > { %7844 = vmatprep.mubr.bf16.mxu0 %v18254_v63  ;;  %13257 = vmatpush3.bf16.msra.mxu0 %v14437_v22  ;;  %v14445_v63 = vld [vmem:[%s19501_s4 + $0x2b8] sm:$0xff]  }
 0x3e5   : > { %13258 = vmatprep.subr.bf16.mxu0 %v14440_v54 }
 0x3e6   : > { %13313 = vmatpush3.bf16.msra.mxu1 %v14439_v36 }
 0x3e7   : > { %13314 = vmatprep.subr.bf16.mxu1 %v14441_v62 }
 0x3e8   : > { %7925 = vmatmul.mubr.bf16.gmra.mrb[152].mxu1 %v18190_v16  ;;  %13259 = vmatpush3.bf16.msra.mxu0 %v14442_v47  ;;  %v6291_v16 = vmul.f32 %v18019_v56, %v18289_v1  ;;  %v18479_v56 = vld [vmem:[%s19499_s2 + $0x8] sm:$0x1f] }
 0x3e9   : > { %7932 = vmatprep.mubr.bf16.mxu1 %v18285_v19  ;;  %13404 = vmatprep.subr.bf16.mxu0 %v15165_v49  ;;  %v6699_v19 = vmax.f32 %v6530_v45, 0.0  ;;  %v18493_v31 = vrot.slane %v18479_v56, %v19555_v26  ;;  %v18498_v17 = vrot.slane %v18479_v56, %v19556_v10  ;;  %v18502_v55 = vrot.slane %v18479_v56, %v19557_v57 }
 0x3ea   : > { %13315 = vmatpush3.bf16.msra.mxu1 %v14443_v29  ;;  %v6529_v8 = vadd.f32 %v18033_v41, %v6291_v16  ;;  %v19554_v41 = vld [vmem:[#allocation8_spill] sm:$0xff] }
 0x3eb   : > { %13316 = vmatprep.subr.bf16.mxu1 %v14444_v34  ;;  %7845 = vmatmul.mubr.bf16.gmra.mrb[156].mxu0 %v19553_v43  ;;  %v6790_v1 = vpack.c.bf16 %v6699_v19, %v6699_v19 }
 0x3ec   : > { %7852 = vmatprep.mubr.bf16.mxu0 %v18310_v33  ;;  %v6698_v33 = vmax.f32 %v6529_v8, 0.0 }
 0x3ee   : > { %13317 = vmatpush3.bf16.msra.mxu1 %v14445_v63  ;;  %v6789_v38 = vpack.c.bf16 %v6698_v33, %v6698_v33 }
 0x3ef   : > { %13468 = vmatprep.subr.bf16.mxu1 %v15165_v49 }
 0x3f0   : > { %7933 = vmatmul.mubr.bf16.gmra.mrb[156].mxu1 %v18287_v37  ;;  %v18489_v37 = vrot.slane %v18479_v56, %v19554_v41 }
 0x3f1   : > { %7940 = vmatprep.mubr.bf16.mxu1 %v18315_v28  ;;  %v6531_v28 = vadd.f32 %v18035_v50, %v6293_v35 }
 0x3f3   : > { %7853 = vmatmul.mubr.bf16.gmra.mrb[160].mxu0 %v18304_v24  ;;  %v18506_v24 = vrot.slane %v18484_v7, %v19554_v41  ;;  %v6700_v58 = vmax.f32 %v6531_v28, 0.0  ;;  %v14446_v28 = vld [vmem:[%s19501_s4 + $0x300] sm:$0xff]  }
 0x3f4   : > { %7860 = vmatprep.mubr.bf16.mxu0 %v6790_v1 }
 0x3f5   : > { %v6791_v32 = vpack.c.bf16 %v6700_v58, %v6700_v58 }
 0x3f6   : > { %v5617_v14 = vpop.f32.mrb[56].mxu0  ;;  %v5819_v50 = vpop.f32.mrb[56].mxu1 }
 0x3f7   : > { %v6139_v25 = vmul.f32 %v18489_v37, %v5617_v14  ;;  %v6141_v30 = vmul.f32 %v18493_v31, %v5819_v50  ;;  %v5619_v12 = vpop.f32.mrb[57].mxu0  ;;  %v5821_v59 = vpop.f32.mrb[57].mxu1 }
 0x3f8   : > { %7941 = vmatmul.mubr.bf16.gmra.mrb[160].mxu1 %v18317_v44  ;;  %v6140_v6 = vmul.f32 %v18498_v17, %v5619_v12  ;;  %v6142_v60 = vmul.f32 %v18502_v55, %v5821_v59  ;;  %v5621_v46 = vpop.f32.mrb[58].mxu0  ;;  %v5823_v61 = vpop.f32.mrb[58].mxu1 }
 0x3f9   : > { %7948 = vmatprep.mubr.bf16.mxu1 %v6792_v21  ;;  %v6377_v27 = vadd.f32 %v18506_v24, %v6139_v25  ;;  %v6379_v15 = vadd.f32 %v18510_v42, %v6141_v30  ;;  %v6152_v18 = vmul.f32 %v18489_v37, %v5621_v46  ;;  %v6154_v48 = vmul.f32 %v18493_v31, %v5823_v61  ;;  %v5623_v0 = vpop.f32.mrb[59].mxu0  ;;  %v5825_v51 = vpop.f32.mrb[59].mxu1  ;;  %v14447_v61 = vld [vmem:[%s19501_s4 + $0x308] sm:$0xff]  }
 0x3fa   : > { %v6378_v44 = vadd.f32 %v18514_v53, %v6140_v6  ;;  %v6380_v9 = vadd.f32 %v18518_v39, %v6142_v60  ;;  %v6153_v4 = vmul.f32 %v18498_v17, %v5623_v0  ;;  %v6155_v13 = vmul.f32 %v18502_v55, %v5825_v51 }
 0x3fb   : > { %v6390_v20 = vadd.f32 %v18506_v24, %v6152_v18  ;;  %v6392_v2 = vadd.f32 %v18510_v42, %v6154_v48  ;;  %7861 = vmatmul.mubr.bf16.gmra.mrb[164].mxu0 %v6789_v38  ;;  %v6546_v22 = vmax.f32 %v6377_v27, 0.0  ;;  %v6548_v36 = vmax.f32 %v6379_v15, 0.0 }
 0x3fc   : > { %v6391_v5 = vadd.f32 %v18514_v53, %v6153_v4  ;;  %v6393_v40 = vadd.f32 %v18518_v39, %v6155_v13  ;;  %v6547_v47 = vmax.f32 %v6378_v44, 0.0  ;;  %v6549_v29 = vmax.f32 %v6380_v9, 0.0 }
 0x3fd   : > { %v6559_v54 = vmax.f32 %v6390_v20, 0.0  ;;  %v6561_v62 = vmax.f32 %v6392_v2, 0.0 }
 0x3fe   : > { %v6560_v52 = vmax.f32 %v6391_v5, 0.0  ;;  %v6562_v34 = vmax.f32 %v6393_v40, 0.0  ;;  %v5627_v63 = vpop.f32.mrb[60].mxu0 }
 0x3ff   : > { %v5829_v45 = vpop.f32.mrb[60].mxu1  ;;  %v6715_v11 = vpack.c.bf16 %v6559_v54, %v6546_v22  ;;  %v6717_v43 = vpack.c.bf16 %v6561_v62, %v6548_v36  ;;  %v6165_v16 = vmul.f32 %v18489_v37, %v5627_v63  ;;  %v5629_v23 = vpop.f32.mrb[61].mxu0 }
 0x400   : > { %v6167_v19 = vmul.f32 %v18493_v31, %v5829_v45  ;;  %v5831_v8 = vpop.f32.mrb[61].mxu1  ;;  %7949 = vmatmul.mubr.bf16.gmra.mrb[164].mxu1 %v6791_v32  ;;  %v6166_v35 = vmul.f32 %v18498_v17, %v5629_v23  ;;  %v5631_v3 = vpop.f32.mrb[62].mxu0  ;;  %v6716_v26 = vpack.c.bf16 %v6560_v52, %v6547_v47  ;;  %v6718_v33 = vpack.c.bf16 %v6562_v34, %v6549_v29 }
 0x401   : > { %v6168_v1 = vmul.f32 %v18502_v55, %v5831_v8  ;;  %v5833_v41 = vpop.f32.mrb[62].mxu1  ;;  %v6403_v10 = vadd.f32 %v18506_v24, %v6165_v16  ;;  %v6178_v21 = vmul.f32 %v18489_v37, %v5631_v3  ;;  %v5633_v50 = vpop.f32.mrb[63].mxu0 }
 0x402   : > { %v6405_v57 = vadd.f32 %v18510_v42, %v6167_v19  ;;  %v6180_v14 = vmul.f32 %v18493_v31, %v5833_v41  ;;  %v5835_v25 = vpop.f32.mrb[63].mxu1  ;;  %v6404_v30 = vadd.f32 %v18514_v53, %v6166_v35  ;;  %v6179_v59 = vmul.f32 %v18498_v17, %v5633_v50  ;;  %7988 = vmatprep.mubr.bf16.mxu0 %v6716_v26 }
 0x403   : > { %v6406_v12 = vadd.f32 %v18518_v39, %v6168_v1  ;;  %v6181_v38 = vmul.f32 %v18502_v55, %v5835_v25  ;;  %v6416_v58 = vadd.f32 %v18506_v24, %v6178_v21  ;;  %8076 = vmatprep.mubr.bf16.mxu1 %v6718_v33  ;;  %7989 = vmatmul.mubr.bf16.vlgmr.msra.gmra.mrb[168].mxu0 %v6715_v11  ;;  %v6572_v27 = vmax.f32 %v6403_v10, 0.0 }
 0x404   : > { %v6418_v6 = vadd.f32 %v18510_v42, %v6180_v14  ;;  %v6417_v60 = vadd.f32 %v18514_v53, %v6179_v59  ;;  %13405 = vmatpush3.bf16.msra.mxu0 %v14446_v28  ;;  %v6574_v15 = vmax.f32 %v6405_v57, 0.0  ;;  %v6573_v0 = vmax.f32 %v6404_v30, 0.0 }
 0x405   : > { %v6419_v46 = vadd.f32 %v18518_v39, %v6181_v38  ;;  %v6585_v18 = vmax.f32 %v6416_v58, 0.0  ;;  %13406 = vmatprep.subr.bf16.mxu0 %v15165_v49  ;;  %v6575_v51 = vmax.f32 %v6406_v12, 0.0 }
 0x406   : > { %v6587_v48 = vmax.f32 %v6418_v6, 0.0  ;;  %v6586_v44 = vmax.f32 %v6417_v60, 0.0  ;;  %v5637_v4 = vpop.f32.mrb[64].mxu0 }
 0x407   : > { %v6588_v9 = vmax.f32 %v6419_v46, 0.0  ;;  %v5839_v13 = vpop.f32.mrb[64].mxu1  ;;  %v6191_v20 = vmul.f32 %v18489_v37, %v5637_v4  ;;  %v5639_v32 = vpop.f32.mrb[65].mxu0  ;;  %v6728_v40 = vpack.c.bf16 %v6585_v18, %v6572_v27 }
 0x408   : > { %v6193_v2 = vmul.f32 %v18493_v31, %v5839_v13  ;;  %v5841_v5 = vpop.f32.mrb[65].mxu1  ;;  %8077 = vmatmul.mubr.bf16.vlgmr.msra.gmra.mrb[168].mxu1 %v6717_v43  ;;  %v6730_v22 = vpack.c.bf16 %v6587_v48, %v6574_v15  ;;  %v6192_v36 = vmul.f32 %v18498_v17, %v5639_v32  ;;  %v5641_v62 = vpop.f32.mrb[66].mxu0  ;;  %v6729_v29 = vpack.c.bf16 %v6586_v44, %v6573_v0 }
 0x409   : > { %v6194_v54 = vmul.f32 %v18502_v55, %v5841_v5  ;;  %v5843_v47 = vpop.f32.mrb[66].mxu1  ;;  %v6731_v52 = vpack.c.bf16 %v6588_v9, %v6575_v51  ;;  %13407 = vmatpush3.bf16.msra.mxu0 %v14447_v61  ;;  %v6429_v34 = vadd.f32 %v18506_v24, %v6191_v20  ;;  %v6204_v45 = vmul.f32 %v18489_v37, %v5641_v62  ;;  %v5643_v43 = vpop.f32.mrb[67].mxu0 }
 0x40a   : > { %v6431_v63 = vadd.f32 %v18510_v42, %v6193_v2  ;;  %v6206_v11 = vmul.f32 %v18493_v31, %v5843_v47  ;;  %v5845_v16 = vpop.f32.mrb[67].mxu1  ;;  %13470 = vmatpush3.bf16.msra.mxu1 %v14446_v28  ;;  %v6430_v19 = vadd.f32 %v18514_v53, %v6192_v36  ;;  %v6205_v8 = vmul.f32 %v18498_v17, %v5643_v43 }
 0x40b   : > { %v6432_v23 = vadd.f32 %v18518_v39, %v6194_v54  ;;  %v6207_v35 = vmul.f32 %v18502_v55, %v5845_v16  ;;  %7996 = vmatprep.mubr.bf16.mxu0 %v6729_v29  ;;  %v6442_v1 = vadd.f32 %v18506_v24, %v6204_v45  ;;  %8084 = vmatprep.mubr.bf16.mxu1 %v6731_v52  ;;  %v6598_v33 = vmax.f32 %v6429_v34, 0.0 }
 0x40c   : > { %v6444_v3 = vadd.f32 %v18510_v42, %v6206_v11  ;;  %7997 = vmatmul.mubr.bf16.gmra.mrb[172].mxu0 %v6728_v40  ;;  %v6443_v41 = vadd.f32 %v18514_v53, %v6205_v8  ;;  %13469 = vmatprep.subr.bf16.mxu1 %v15165_v49  ;;  %v6600_v28 = vmax.f32 %v6431_v63, 0.0  ;;  %v6599_v21 = vmax.f32 %v6430_v19, 0.0 }
 0x40d   : > { %v6445_v26 = vadd.f32 %v18518_v39, %v6207_v35  ;;  %v6611_v10 = vmax.f32 %v6442_v1, 0.0  ;;  %v6601_v14 = vmax.f32 %v6432_v23, 0.0 }
 0x40e   : > { %v6613_v57 = vmax.f32 %v6444_v3, 0.0  ;;  %13471 = vmatpush3.bf16.msra.mxu1 %v14447_v61  ;;  %v6612_v50 = vmax.f32 %v6443_v41, 0.0  ;;  %v5647_v30 = vpop.f32.mrb[68].mxu0 }
 0x40f   : > { %v6614_v25 = vmax.f32 %v6445_v26, 0.0  ;;  %v5849_v12 = vpop.f32.mrb[68].mxu1  ;;  %v6217_v59 = vmul.f32 %v18489_v37, %v5647_v30  ;;  %v5649_v58 = vpop.f32.mrb[69].mxu0  ;;  %v6741_v60 = vpack.c.bf16 %v6611_v10, %v6598_v33 }
 0x410   : > { %v6219_v38 = vmul.f32 %v18493_v31, %v5849_v12  ;;  %v5851_v6 = vpop.f32.mrb[69].mxu1  ;;  %8085 = vmatmul.mubr.bf16.gmra.mrb[172].mxu1 %v6730_v22  ;;  %v6743_v46 = vpack.c.bf16 %v6613_v57, %v6600_v28  ;;  %v6218_v27 = vmul.f32 %v18498_v17, %v5649_v58  ;;  %v5651_v61 = vpop.f32.mrb[70].mxu0  ;;  %v6742_v48 = vpack.c.bf16 %v6612_v50, %v6599_v21 }
 0x411   : > { %v6220_v15 = vmul.f32 %v18502_v55, %v5851_v6  ;;  %v5853_v18 = vpop.f32.mrb[70].mxu1  ;;  %v6744_v0 = vpack.c.bf16 %v6614_v25, %v6601_v14  ;;  %v6455_v51 = vadd.f32 %v18506_v24, %v6217_v59  ;;  %v6230_v9 = vmul.f32 %v18489_v37, %v5651_v61  ;;  %v5653_v13 = vpop.f32.mrb[71].mxu0 }
 0x412   : > { %v6457_v44 = vadd.f32 %v18510_v42, %v6219_v38  ;;  %v6232_v4 = vmul.f32 %v18493_v31, %v5853_v18  ;;  %v5855_v20 = vpop.f32.mrb[71].mxu1  ;;  %v6456_v2 = vadd.f32 %v18514_v53, %v6218_v27  ;;  %v6231_v5 = vmul.f32 %v18498_v17, %v5653_v13  ;;  %8004 = vmatprep.mubr.bf16.mxu0 %v6742_v48 }
 0x413   : > { %v6458_v32 = vadd.f32 %v18518_v39, %v6220_v15  ;;  %v6233_v40 = vmul.f32 %v18502_v55, %v5855_v20  ;;  %v6468_v22 = vadd.f32 %v18506_v24, %v6230_v9  ;;  %8092 = vmatprep.mubr.bf16.mxu1 %v6744_v0  ;;  %v6624_v47 = vmax.f32 %v6455_v51, 0.0 }
 0x414   : > { %v6470_v36 = vadd.f32 %v18510_v42, %v6232_v4  ;;  %8005 = vmatmul.mubr.bf16.gmra.mrb[176].mxu0 %v6741_v60  ;;  %v6469_v54 = vadd.f32 %v18514_v53, %v6231_v5  ;;  %v6626_v29 = vmax.f32 %v6457_v44, 0.0  ;;  %v6625_v63 = vmax.f32 %v6456_v2, 0.0 }
 0x415   : > { %v6471_v62 = vadd.f32 %v18518_v39, %v6233_v40  ;;  %v6637_v52 = vmax.f32 %v6468_v22, 0.0  ;;  %v6627_v45 = vmax.f32 %v6458_v32, 0.0 }
 0x416   : > { %v6639_v34 = vmax.f32 %v6470_v36, 0.0  ;;  %v6638_v11 = vmax.f32 %v6469_v54, 0.0  ;;  %v5657_v16 = vpop.f32.mrb[72].mxu0 }
 0x417   : > { %v6640_v43 = vmax.f32 %v6471_v62, 0.0  ;;  %v5859_v19 = vpop.f32.mrb[72].mxu1  ;;  %v6243_v23 = vmul.f32 %v18489_v37, %v5657_v16  ;;  %v5659_v35 = vpop.f32.mrb[73].mxu0  ;;  %v6754_v3 = vpack.c.bf16 %v6637_v52, %v6624_v47 }
 0x418   : > { %v6245_v8 = vmul.f32 %v18493_v31, %v5859_v19  ;;  %v5861_v1 = vpop.f32.mrb[73].mxu1  ;;  %8093 = vmatmul.mubr.bf16.gmra.mrb[176].mxu1 %v6743_v46  ;;  %v6756_v41 = vpack.c.bf16 %v6639_v34, %v6626_v29  ;;  %v6244_v26 = vmul.f32 %v18498_v17, %v5659_v35  ;;  %v5661_v28 = vpop.f32.mrb[74].mxu0  ;;  %v6755_v57 = vpack.c.bf16 %v6638_v11, %v6625_v63 }
 0x419   : > { %v6246_v33 = vmul.f32 %v18502_v55, %v5861_v1  ;;  %v5863_v10 = vpop.f32.mrb[74].mxu1  ;;  %v6757_v21 = vpack.c.bf16 %v6640_v43, %v6627_v45  ;;  %v6481_v14 = vadd.f32 %v18506_v24, %v6243_v23  ;;  %v6256_v25 = vmul.f32 %v18489_v37, %v5661_v28  ;;  %v5663_v12 = vpop.f32.mrb[75].mxu0 }
 0x41a   : > { %v6483_v50 = vadd.f32 %v18510_v42, %v6245_v8  ;;  %v6258_v30 = vmul.f32 %v18493_v31, %v5863_v10  ;;  %v5865_v59 = vpop.f32.mrb[75].mxu1  ;;  %v6482_v38 = vadd.f32 %v18514_v53, %v6244_v26  ;;  %v6257_v6 = vmul.f32 %v18498_v17, %v5663_v12  ;;  %8012 = vmatprep.mubr.bf16.mxu0 %v6755_v57 }
 0x41b   : > { %v6484_v58 = vadd.f32 %v18518_v39, %v6246_v33  ;;  %v6259_v60 = vmul.f32 %v18502_v55, %v5865_v59  ;;  %v6494_v46 = vadd.f32 %v18506_v24, %v6256_v25  ;;  %8100 = vmatprep.mubr.bf16.mxu1 %v6757_v21  ;;  %v6650_v18 = vmax.f32 %v6481_v14, 0.0 }
 0x41c   : > { %v6496_v27 = vadd.f32 %v18510_v42, %v6258_v30  ;;  %8013 = vmatmul.mubr.bf16.gmra.mrb[180].mxu0 %v6754_v3  ;;  %v6495_v15 = vadd.f32 %v18514_v53, %v6257_v6  ;;  %v6652_v48 = vmax.f32 %v6483_v50, 0.0  ;;  %v6651_v44 = vmax.f32 %v6482_v38, 0.0 }
 0x41d   : > { %v6497_v61 = vadd.f32 %v18518_v39, %v6259_v60  ;;  %v6663_v0 = vmax.f32 %v6494_v46, 0.0  ;;  %v6653_v9 = vmax.f32 %v6484_v58, 0.0 }
 0x41e   : > { %v6665_v51 = vmax.f32 %v6496_v27, 0.0  ;;  %v6664_v4 = vmax.f32 %v6495_v15, 0.0  ;;  %v5667_v20 = vpop.f32.mrb[76].mxu0 }
 0x41f   : > { %v6666_v13 = vmax.f32 %v6497_v61, 0.0  ;;  %v5869_v2 = vpop.f32.mrb[76].mxu1  ;;  %v6269_v32 = vmul.f32 %v18489_v37, %v5667_v20  ;;  %v5669_v40 = vpop.f32.mrb[77].mxu0  ;;  %v6767_v36 = vpack.c.bf16 %v6663_v0, %v6650_v18 }
 0x420   : > { %v6271_v5 = vmul.f32 %v18493_v31, %v5869_v2  ;;  %v5871_v22 = vpop.f32.mrb[77].mxu1  ;;  %8101 = vmatmul.mubr.bf16.gmra.mrb[180].mxu1 %v6756_v41  ;;  %v6769_v54 = vpack.c.bf16 %v6665_v51, %v6652_v48  ;;  %v6270_v62 = vmul.f32 %v18498_v17, %v5669_v40  ;;  %v5671_v29 = vpop.f32.mrb[78].mxu0  ;;  %v6768_v34 = vpack.c.bf16 %v6664_v4, %v6651_v44 }
 0x421   : > { %v6272_v47 = vmul.f32 %v18502_v55, %v5871_v22  ;;  %v5873_v52 = vpop.f32.mrb[78].mxu1  ;;  %v6770_v63 = vpack.c.bf16 %v6666_v13, %v6653_v9  ;;  %v6507_v45 = vadd.f32 %v18506_v24, %v6269_v32  ;;  %v6282_v43 = vmul.f32 %v18489_v37, %v5671_v29  ;;  %v5673_v19 = vpop.f32.mrb[79].mxu0 }
 0x422   : > { %v6509_v11 = vadd.f32 %v18510_v42, %v6271_v5  ;;  %v6284_v16 = vmul.f32 %v18493_v31, %v5873_v52  ;;  %v5875_v23 = vpop.f32.mrb[79].mxu1  ;;  %v6508_v8 = vadd.f32 %v18514_v53, %v6270_v62  ;;  %v6283_v1 = vmul.f32 %v18498_v17, %v5673_v19  ;;  %8020 = vmatprep.mubr.bf16.mxu0 %v6768_v34  ;;  %v19558_v62 = vld [vmem:[#allocation22_spill] sm:$0xff] }
 0x423   : > { %v6510_v35 = vadd.f32 %v18518_v39, %v6272_v47  ;;  %v6285_v3 = vmul.f32 %v18502_v55, %v5875_v23  ;;  %v6520_v41 = vadd.f32 %v18506_v24, %v6282_v43  ;;  %8108 = vmatprep.mubr.bf16.mxu1 %v6770_v63  ;;  %v6676_v10 = vmax.f32 %v6507_v45, 0.0 }
 0x424   : > { %v6522_v26 = vadd.f32 %v18510_v42, %v6284_v16  ;;  %8021 = vmatmul.mubr.bf16.gmra.mrb[184].mxu0 %v6767_v36  ;;  %v6521_v33 = vadd.f32 %v18514_v53, %v6283_v1  ;;  %v6678_v57 = vmax.f32 %v6509_v11, 0.0  ;;  %v6677_v50 = vmax.f32 %v6508_v8, 0.0 }
 0x425   : > { %v6523_v28 = vadd.f32 %v18518_v39, %v6285_v3  ;;  %v6689_v21 = vmax.f32 %v6520_v41, 0.0  ;;  %v6679_v25 = vmax.f32 %v6510_v35, 0.0  ;;  %v18635_v47 = vrot.slane %v18479_v56, %v19558_v62 }
 0x426   : > { %v6691_v14 = vmax.f32 %v6522_v26, 0.0  ;;  %v6690_v30 = vmax.f32 %v6521_v33, 0.0  ;;  %v5677_v59 = vpop.f32.mrb[80].mxu0 }
 0x427   : > { %v6692_v12 = vmax.f32 %v6523_v28, 0.0  ;;  %v5879_v38 = vpop.f32.mrb[80].mxu1  ;;  %v6295_v58 = vmul.f32 %v18489_v37, %v5677_v59  ;;  %v5679_v6 = vpop.f32.mrb[81].mxu0  ;;  %v6780_v46 = vpack.c.bf16 %v6689_v21, %v6676_v10 }
 0x428   : > { %v5881_v60 = vpop.f32.mrb[81].mxu1  ;;  %8109 = vmatmul.mubr.bf16.gmra.mrb[184].mxu1 %v6769_v54  ;;  %v6782_v27 = vpack.c.bf16 %v6691_v14, %v6678_v57  ;;  %v6296_v15 = vmul.f32 %v18498_v17, %v5679_v6  ;;  %v5681_v18 = vpop.f32.mrb[82].mxu0  ;;  %v6781_v0 = vpack.c.bf16 %v6690_v30, %v6677_v50  ;;  %v6297_v9 = vmul.f32 %v18493_v31, %v5879_v38 }
 0x429   : > { %v6298_v61 = vmul.f32 %v18502_v55, %v5881_v60  ;;  %v5883_v48 = vpop.f32.mrb[82].mxu1  ;;  %v6783_v51 = vpack.c.bf16 %v6692_v12, %v6679_v25  ;;  %v6533_v44 = vadd.f32 %v18506_v24, %v6295_v58  ;;  %v5682_v4 = vpop.f32.mrb[83].mxu0 }
 0x42a   : > { %v5884_v13 = vpop.f32.mrb[83].mxu1  ;;  %v6534_v37 = vadd.f32 %v18514_v53, %v6296_v15  ;;  %8028 = vmatprep.mubr.bf16.mxu0 %v6781_v0  ;;  %v6535_v32 = vadd.f32 %v18510_v42, %v6297_v9  ;;  %v18639_v42 = vrot.slane %v18484_v7, %v19558_v62 }
 0x42b   : > { %v6536_v20 = vadd.f32 %v18518_v39, %v6298_v61  ;;  %8116 = vmatprep.mubr.bf16.mxu1 %v6783_v51  ;;  %v6702_v55 = vmax.f32 %v6533_v44, 0.0 }
 0x42c   : > { %8029 = vmatmul.mubr.bf16.gmra.mrb[188].mxu0 %v6780_v46  ;;  %v6703_v17 = vmax.f32 %v6534_v37, 0.0  ;;  %v6704_v54 = vmax.f32 %v6535_v32, 0.0 }
 0x42d   : > { %v6705_v2 = vmax.f32 %v6536_v20, 0.0  ;;  %v6793_v53 = vpack.c.bf16 %v6702_v55, %v6702_v55 }
 0x42e   : > { %v6794_v5 = vpack.c.bf16 %v6703_v17, %v6703_v17  ;;  %v12970_v22 = vpop.f32.mrb[84].mxu0  ;;  %v6795_v11 = vpack.c.bf16 %v6704_v54, %v6704_v54 }
 0x42f   : > { %v6796_v40 = vpack.c.bf16 %v6705_v2, %v6705_v2  ;;  %v12971_v24 = vpop.f32.mrb[85].mxu0 }
 0x430   : > { %8117 = vmatmul.mubr.bf16.gmra.mrb[188].mxu1 %v6782_v27  ;;  %v12972_v31 = vadd.f32 %v12971_v24, %v12970_v22  ;;  %v12973_v36 = vpop.f32.mrb[86].mxu0  ;;  %8036 = vmatprep.mubr.bf16.mxu0 %v6794_v5 }
 0x431   : > { %8124 = vmatprep.mubr.bf16.mxu1 %v6796_v40  ;;  %v12974_v39 = vpop.f32.mrb[87].mxu0 }
 0x432   : > { %v12975_v29 = vadd.f32 %v12974_v39, %v12973_v36 }
 0x433   : > { %v6008_v52 = vpop.f32.mrb[84].mxu1 }
 0x434   : > { %v6009_v34 = vadd.f32 %v12972_v31, %v6008_v52  ;;  %v6010_v63 = vpop.f32.mrb[85].mxu1  ;;  %8037 = vmatmul.mubr.bf16.gmra.mrb[192].mxu0 %v6793_v53 }
 0x435   : > { %v6011_v45 = vpop.f32.mrb[86].mxu1  ;;  %13408 = vmatprep.mubr.msk.bf16.mxu0 %vm15166_vm2, %v15165_v49 }
 0x436   : > { %v6143_v43 = vmul.f32 %v18635_v47, %v6009_v34  ;;  %v6012_v16 = vadd.f32 %v12975_v29, %v6011_v45  ;;  %v6013_v56 = vpop.f32.mrb[87].mxu1  ;;  %v12976_v19 = vpop.f32.mrb[88].mxu0 }
 0x437   : > { %v12977_v35 = vpop.f32.mrb[89].mxu0 }
 0x438   : > { %v6381_v23 = vadd.f32 %v18639_v42, %v6143_v43  ;;  %v6156_v8 = vmul.f32 %v18635_v47, %v6012_v16  ;;  %8125 = vmatmul.mubr.bf16.gmra.mrb[192].mxu1 %v6795_v11  ;;  %v12978_v7 = vadd.f32 %v12977_v35, %v12976_v19  ;;  %v12979_v1 = vpop.f32.mrb[90].mxu0 }
 0x439   : > { %13424 = vmatprep.mubr.msk.bf16.mxu1 %vm15166_vm2, %v15165_v49  ;;  %v12980_v41 = vpop.f32.mrb[91].mxu0 }
 0x43a   : > { %v6394_v3 = vadd.f32 %v18639_v42, %v6156_v8  ;;  %v12981_v26 = vadd.f32 %v12980_v41, %v12979_v1  ;;  %v6550_v28 = vmax.f32 %v6381_v23, 0.0 }
 0x43b   : > { %v6016_v33 = vpop.f32.mrb[88].mxu1 }
 0x43c   : > { %v6563_v10 = vmax.f32 %v6394_v3, 0.0  ;;  %v6017_v57 = vadd.f32 %v12978_v7, %v6016_v33  ;;  %v6018_v21 = vpop.f32.mrb[89].mxu1 }
 0x43d   : > { %v6019_v14 = vpop.f32.mrb[90].mxu1 }
 0x43e   : > { %v6719_v50 = vpack.c.bf16 %v6563_v10, %v6550_v28  ;;  %v6169_v25 = vmul.f32 %v18635_v47, %v6017_v57  ;;  %v6020_v30 = vadd.f32 %v12981_v26, %v6019_v14  ;;  %v6021_v12 = vpop.f32.mrb[91].mxu1  ;;  %v12982_v59 = vpop.f32.mrb[92].mxu0 }
 0x43f   : > { %v12983_v6 = vpop.f32.mrb[93].mxu0 }
 0x440   : > { %v6407_v38 = vadd.f32 %v18639_v42, %v6169_v25  ;;  %v6182_v58 = vmul.f32 %v18635_v47, %v6020_v30  ;;  %13409 = vmatmul.mubr.msk.bf16.vlgmr.msra.gmra.mrb[196].mxu0 %vm7582_vm3, %v6719_v50  ;;  %v12984_v60 = vadd.f32 %v12983_v6, %v12982_v59  ;;  %v12985_v46 = vpop.f32.mrb[94].mxu0 }
 0x441   : > { %13412 = vmatprep.mubr.msk.bf16.mxu0 %vm15166_vm2, %v15165_v49  ;;  %v12986_v61 = vpop.f32.mrb[95].mxu0 }
 0x442   : > { %v6576_v27 = vmax.f32 %v6407_v38, 0.0  ;;  %v6420_v15 = vadd.f32 %v18639_v42, %v6182_v58  ;;  %v12987_v18 = vadd.f32 %v12986_v61, %v12985_v46 }
 0x443   : > { %v6024_v48 = vpop.f32.mrb[92].mxu1 }
 0x444   : > { %v6589_v0 = vmax.f32 %v6420_v15, 0.0  ;;  %v6025_v51 = vadd.f32 %v12984_v60, %v6024_v48  ;;  %v6026_v44 = vpop.f32.mrb[93].mxu1 }
 0x445   : > { %v6027_v9 = vpop.f32.mrb[94].mxu1 }
 0x446   : > { %v6732_v4 = vpack.c.bf16 %v6589_v0, %v6576_v27  ;;  %v6195_v13 = vmul.f32 %v18635_v47, %v6025_v51  ;;  %v6028_v37 = vadd.f32 %v12987_v18, %v6027_v9  ;;  %v6029_v20 = vpop.f32.mrb[95].mxu1  ;;  %v12988_v17 = vpop.f32.mrb[96].mxu0 }
 0x447   : > { %v12989_v32 = vpop.f32.mrb[97].mxu0 }
 0x448   : > { %v6433_v2 = vadd.f32 %v18639_v42, %v6195_v13  ;;  %v6208_v55 = vmul.f32 %v18635_v47, %v6028_v37  ;;  %13413 = vmatmul.mubr.msk.bf16.gmra.mrb[200].mxu0 %vm7582_vm3, %v6732_v4  ;;  %v12990_v5 = vadd.f32 %v12989_v32, %v12988_v17  ;;  %v12991_v40 = vpop.f32.mrb[98].mxu0 }
 0x449   : > { %13416 = vmatprep.mubr.msk.bf16.mxu0 %vm15166_vm2, %v15165_v49  ;;  %v12992_v31 = vpop.f32.mrb[99].mxu0 }
 0x44a   : > { %v6602_v22 = vmax.f32 %v6433_v2, 0.0  ;;  %v6446_v24 = vadd.f32 %v18639_v42, %v6208_v55  ;;  %v12993_v36 = vadd.f32 %v12992_v31, %v12991_v40 }
 0x44b   : > { %v6032_v53 = vpop.f32.mrb[96].mxu1 }
 0x44c   : > { %v6615_v54 = vmax.f32 %v6446_v24, 0.0  ;;  %v6033_v39 = vadd.f32 %v12990_v5, %v6032_v53  ;;  %v6034_v62 = vpop.f32.mrb[97].mxu1 }
 0x44d   : > { %v6035_v29 = vpop.f32.mrb[98].mxu1 }
 0x44e   : > { %v6745_v52 = vpack.c.bf16 %v6615_v54, %v6602_v22  ;;  %v6221_v34 = vmul.f32 %v18635_v47, %v6033_v39  ;;  %v6036_v63 = vadd.f32 %v12993_v36, %v6035_v29  ;;  %v6037_v45 = vpop.f32.mrb[99].mxu1  ;;  %v12994_v11 = vpop.f32.mrb[100].mxu0 }
 0x44f   : > { %v12995_v56 = vpop.f32.mrb[101].mxu0 }
 0x450   : > { %v6459_v43 = vadd.f32 %v18639_v42, %v6221_v34  ;;  %v6234_v16 = vmul.f32 %v18635_v47, %v6036_v63  ;;  %13417 = vmatmul.mubr.msk.bf16.gmra.mrb[204].mxu0 %vm7582_vm3, %v6745_v52  ;;  %v12996_v19 = vadd.f32 %v12995_v56, %v12994_v11  ;;  %v12997_v23 = vpop.f32.mrb[102].mxu0 }
 0x451   : > { %13420 = vmatprep.mubr.msk.bf16.mxu0 %vm15166_vm2, %v15165_v49  ;;  %v12998_v7 = vpop.f32.mrb[103].mxu0 }
 0x452   : > { %v6628_v8 = vmax.f32 %v6459_v43, 0.0  ;;  %v6472_v35 = vadd.f32 %v18639_v42, %v6234_v16  ;;  %v12999_v1 = vadd.f32 %v12998_v7, %v12997_v23 }
 0x453   : > { %v6040_v3 = vpop.f32.mrb[100].mxu1 }
 0x454   : > { %v6641_v41 = vmax.f32 %v6472_v35, 0.0  ;;  %v6041_v26 = vadd.f32 %v12996_v19, %v6040_v3  ;;  %v6042_v33 = vpop.f32.mrb[101].mxu1 }
 0x455   : > { %v6043_v28 = vpop.f32.mrb[102].mxu1 }
 0x456   : > { %v6758_v10 = vpack.c.bf16 %v6641_v41, %v6628_v8  ;;  %v6247_v57 = vmul.f32 %v18635_v47, %v6041_v26  ;;  %v6044_v21 = vadd.f32 %v12999_v1, %v6043_v28  ;;  %v6045_v14 = vpop.f32.mrb[103].mxu1  ;;  %v13000_v50 = vpop.f32.mrb[104].mxu0 }
 0x457   : > { %v13001_v12 = vpop.f32.mrb[105].mxu0 }
 0x458   : > { %v6485_v25 = vadd.f32 %v18639_v42, %v6247_v57  ;;  %v6260_v30 = vmul.f32 %v18635_v47, %v6044_v21  ;;  %13421 = vmatmul.mubr.msk.bf16.gmra.mrb[208].mxu0 %vm7582_vm3, %v6758_v10  ;;  %v13002_v59 = vadd.f32 %v13001_v12, %v13000_v50  ;;  %v13003_v38 = vpop.f32.mrb[106].mxu0 }
 0x459   : > { %v13004_v60 = vpop.f32.mrb[107].mxu0 }
 0x45a   : > { %v6654_v58 = vmax.f32 %v6485_v25, 0.0  ;;  %v6498_v6 = vadd.f32 %v18639_v42, %v6260_v30  ;;  %v13005_v46 = vadd.f32 %v13004_v60, %v13003_v38 }
 0x45b   : > { %v6048_v27 = vpop.f32.mrb[104].mxu1 }
 0x45c   : > { %v6667_v15 = vmax.f32 %v6498_v6, 0.0  ;;  %v6049_v61 = vadd.f32 %v13002_v59, %v6048_v27  ;;  %v6050_v18 = vpop.f32.mrb[105].mxu1 }
 0x45d   : > { %v6051_v48 = vpop.f32.mrb[106].mxu1 }
 0x45e   : > { %v6771_v0 = vpack.c.bf16 %v6667_v15, %v6654_v58  ;;  %v6273_v51 = vmul.f32 %v18635_v47, %v6049_v61  ;;  %v6052_v44 = vadd.f32 %v13005_v46, %v6051_v48  ;;  %v6053_v9 = vpop.f32.mrb[107].mxu1  ;;  %v13006_v4 = vpop.f32.mrb[108].mxu0 }
 0x45f   : > { %v13007_v20 = vpop.f32.mrb[109].mxu0 }
 0x460   : > { %v6511_v13 = vadd.f32 %v18639_v42, %v6273_v51  ;;  %v6286_v37 = vmul.f32 %v18635_v47, %v6052_v44  ;;  %13425 = vmatmul.mubr.msk.bf16.vlgmr.msra.gmra.mrb[196].mxu1 %vm7582_vm3, %v6771_v0  ;;  %v13008_v17 = vadd.f32 %v13007_v20, %v13006_v4  ;;  %v13009_v2 = vpop.f32.mrb[110].mxu0 }
 0x461   : > { %13428 = vmatprep.mubr.msk.bf16.mxu1 %vm15166_vm2, %v15165_v49  ;;  %v13010_v5 = vpop.f32.mrb[111].mxu0 }
 0x462   : > { %v6680_v55 = vmax.f32 %v6511_v13, 0.0  ;;  %v6524_v32 = vadd.f32 %v18639_v42, %v6286_v37 }
 0x463   : > { %v6056_v40 = vpop.f32.mrb[108].mxu1 }
 0x464   : > { %v6693_v22 = vmax.f32 %v6524_v32, 0.0  ;;  %v6057_v24 = vadd.f32 %v13008_v17, %v6056_v40  ;;  %v6058_v31 = vpop.f32.mrb[109].mxu1 }
 0x465   : > { %v6059_v36 = vpop.f32.mrb[110].mxu1 }
 0x466   : > { %v6784_v53 = vpack.c.bf16 %v6693_v22, %v6680_v55  ;;  %v6299_v54 = vmul.f32 %v18635_v47, %v6057_v24  ;;  %v6060_v39 = vpop.f32.mrb[111].mxu1  ;;  %v13028_v62 = vpop.f32.mrb[112].mxu0 }
 0x467   : > { %v13029_v52 = vpop.f32.mrb[113].mxu0 }
 0x468   : > { %v6537_v29 = vadd.f32 %v18639_v42, %v6299_v54  ;;  %13429 = vmatmul.mubr.msk.bf16.gmra.mrb[200].mxu1 %vm7582_vm3, %v6784_v53  ;;  %v13030_v34 = vadd.f32 %v13029_v52, %v13028_v62  ;;  %v13031_v63 = vpop.f32.mrb[114].mxu0 }
 0x469   : > { %13432 = vmatprep.mubr.msk.bf16.mxu1 %vm15166_vm2, %v15165_v49  ;;  %v13032_v11 = vpop.f32.mrb[115].mxu0 }
 0x46a   : > { %v6706_v45 = vmax.f32 %v6537_v29, 0.0  ;;  %v13033_v43 = vadd.f32 %v13032_v11, %v13031_v63 }
 0x46b   : > { %v13086_v16 = vpop.f32.mrb[112].mxu1 }
 0x46c   : > { %v6797_v56 = vpack.c.bf16 %v6706_v45, %v6706_v45  ;;  %v13087_v19 = vpop.f32.mrb[113].mxu1 }
 0x46d   : > { %v13088_v23 = vadd.f32 %v13087_v19, %v13086_v16  ;;  %v13089_v47 = vpop.f32.mrb[114].mxu1 }
 0x46e   : > { %v13090_v8 = vpop.f32.mrb[115].mxu1  ;;  %v13034_v7 = vpop.f32.mrb[116].mxu0 }
 0x46f   : > { %v18687_v35 = vadd.f32 %v13088_v23, %v13030_v34  ;;  %v13091_v42 = vadd.f32 %v13090_v8, %v13089_v47  ;;  %v13035_v1 = vpop.f32.mrb[117].mxu0 }
 0x470   : > { %13433 = vmatmul.mubr.msk.bf16.gmra.mrb[204].mxu1 %vm7582_vm3, %v6797_v56  ;;  %v13036_v41 = vadd.f32 %v13035_v1, %v13034_v7  ;;  %v13037_v49 = vpop.f32.mrb[118].mxu0 }
 0x471   : > { %v18690_v3 = vadd.f32 %v13091_v42, %v13033_v43  ;;  %v13038_v26 = vpop.f32.mrb[119].mxu0 }
 0x472   : > { %v13039_v33 = vadd.f32 %v13038_v26, %v13037_v49 }
 0x473   : > { %v13092_v28 = vpop.f32.mrb[116].mxu1 }
 0x474   : > { %v13093_v10 = vpop.f32.mrb[117].mxu1 }
 0x475   : > { %v13094_v57 = vadd.f32 %v13093_v10, %v13092_v28  ;;  %v13095_v21 = vpop.f32.mrb[118].mxu1 }
 0x476   : > { %v13096_v14 = vpop.f32.mrb[119].mxu1  ;;  %v13040_v30 = vpop.f32.mrb[120].mxu0 }
 0x477   : > { %v18692_v50 = vadd.f32 %v13094_v57, %v13036_v41  ;;  %v13097_v25 = vadd.f32 %v13096_v14, %v13095_v21  ;;  %v13041_v12 = vpop.f32.mrb[121].mxu0 }
 0x478   : > { %v13042_v38 = vadd.f32 %v13041_v12, %v13040_v30  ;;  %v13043_v58 = vpop.f32.mrb[122].mxu0 }
 0x479   : > { %v18694_v59 = vadd.f32 %v13097_v25, %v13039_v33  ;;  %v13044_v6 = vpop.f32.mrb[123].mxu0 }
 0x47a   : > { %v13045_v60 = vadd.f32 %v13044_v6, %v13043_v58 }
 0x47b   : > { %v13098_v46 = vpop.f32.mrb[120].mxu1 }
 0x47c   : > { %v13099_v27 = vpop.f32.mrb[121].mxu1 }
 0x47d   : > { %v13100_v15 = vadd.f32 %v13099_v27, %v13098_v46  ;;  %v13101_v61 = vpop.f32.mrb[122].mxu1 }
 0x47e   : > { %v13102_v18 = vpop.f32.mrb[123].mxu1  ;;  %v13046_v51 = vpop.f32.mrb[124].mxu0 }
 0x47f   : > { %v18696_v48 = vadd.f32 %v13100_v15, %v13042_v38  ;;  %v13103_v0 = vadd.f32 %v13102_v18, %v13101_v61  ;;  %v13047_v44 = vpop.f32.mrb[125].mxu0 }
 0x480   : > { %v13048_v4 = vadd.f32 %v13047_v44, %v13046_v51  ;;  %v13049_v13 = vpop.f32.mrb[126].mxu0 }
 0x481   : > { %v18698_v9 = vadd.f32 %v13103_v0, %v13045_v60  ;;  %v13050_v37 = vpop.f32.mrb[127].mxu0 }
 0x482   : > { %v13051_v20 = vadd.f32 %v13050_v37, %v13049_v13 }
 0x483   : > { %v13104_v17 = vpop.f32.mrb[124].mxu1 }
 0x484   : > { %v13105_v2 = vpop.f32.mrb[125].mxu1 }
 0x485   : > { %v13106_v55 = vadd.f32 %v13105_v2, %v13104_v17  ;;  %v13107_v32 = vpop.f32.mrb[126].mxu1 }
 0x486   : > { %v13108_v5 = vpop.f32.mrb[127].mxu1  ;;  %v13052_v24 = vpop.f32.mrb[128].mxu0 }
 0x487   : > { %v18700_v40 = vadd.f32 %v13106_v55, %v13048_v4  ;;  %v13109_v22 = vadd.f32 %v13108_v5, %v13107_v32  ;;  %v13053_v31 = vpop.f32.mrb[129].mxu0 }
 0x488   : > { %v13054_v53 = vadd.f32 %v13053_v31, %v13052_v24  ;;  %v13055_v54 = vpop.f32.mrb[130].mxu0 }
 0x489   : > { %v18702_v36 = vadd.f32 %v13109_v22, %v13051_v20  ;;  %v13056_v39 = vpop.f32.mrb[131].mxu0 }
 0x48a   : > { %v13057_v62 = vadd.f32 %v13056_v39, %v13055_v54 }
 0x48b   : > { %v13110_v29 = vpop.f32.mrb[128].mxu1 }
 0x48c   : > { %v13111_v52 = vpop.f32.mrb[129].mxu1 }
 0x48d   : > { %v13112_v34 = vadd.f32 %v13111_v52, %v13110_v29  ;;  %v13113_v63 = vpop.f32.mrb[130].mxu1 }
 0x48e   : > { %v13114_v45 = vpop.f32.mrb[131].mxu1  ;;  %v13058_v16 = vpop.f32.mrb[132].mxu0 }
 0x48f   : > { %v18704_v11 = vadd.f32 %v13112_v34, %v13054_v53  ;;  %v13115_v43 = vadd.f32 %v13114_v45, %v13113_v63  ;;  %v13059_v56 = vpop.f32.mrb[133].mxu0 }
 0x490   : > { %v13060_v23 = vadd.f32 %v13059_v56, %v13058_v16  ;;  %v13061_v47 = vpop.f32.mrb[134].mxu0 }
 0x491   : > { %v18706_v19 = vadd.f32 %v13115_v43, %v13057_v62  ;;  %v13062_v8 = vpop.f32.mrb[135].mxu0 }
 0x492   : > { %v13063_v42 = vadd.f32 %v13062_v8, %v13061_v47 }
 0x493   : > { %v13116_v7 = vpop.f32.mrb[132].mxu1 }
 0x494   : > { %v13117_v1 = vpop.f32.mrb[133].mxu1 }
 0x495   : > { %v13118_v41 = vadd.f32 %v13117_v1, %v13116_v7  ;;  %v13119_v49 = vpop.f32.mrb[134].mxu1 }
 0x496   : > { %v13120_v26 = vpop.f32.mrb[135].mxu1  ;;  %v13064_v10 = vpop.f32.mrb[136].mxu0 }
 0x497   : > { %v18708_v33 = vadd.f32 %v13118_v41, %v13060_v23  ;;  %v13121_v28 = vadd.f32 %v13120_v26, %v13119_v49  ;;  %v13065_v57 = vpop.f32.mrb[137].mxu0 }
 0x498   : > { %v13066_v14 = vadd.f32 %v13065_v57, %v13064_v10  ;;  %v13067_v25 = vpop.f32.mrb[138].mxu0 }
 0x499   : > { %v18710_v21 = vadd.f32 %v13121_v28, %v13063_v42  ;;  %v13068_v30 = vpop.f32.mrb[139].mxu0 }
 0x49b   : > { %v13122_v12 = vpop.f32.mrb[136].mxu1 }
 0x49c   : > { %v13123_v38 = vpop.f32.mrb[137].mxu1 }
 0x49d   : > { %v13124_v58 = vadd.f32 %v13123_v38, %v13122_v12  ;;  %v13125_v6 = vpop.f32.mrb[138].mxu1 }
 0x49e   : > { %v13126_v60 = vpop.f32.mrb[139].mxu1  ;;  %v13144_v27 = vpop.f32.mrb[140].mxu0 }
 0x49f   : > { %v18712_v46 = vadd.f32 %v13124_v58, %v13066_v14  ;;  %v13145_v15 = vpop.f32.mrb[141].mxu0 }
 0x4a0   : > { %v13146_v61 = vadd.f32 %v13145_v15, %v13144_v27  ;;  %v13147_v18 = vpop.f32.mrb[142].mxu0 }
 0x4a1   : > { %v13148_v0 = vpop.f32.mrb[143].mxu0 }
 0x4a2   : > { %v7815_v51 = vadd.f32 %v13146_v61, %v18687_v35  ;;  %v13149_v44 = vadd.f32 %v13148_v0, %v13147_v18 }
 0x4a3   : > { %v13202_v4 = vpop.f32.mrb[140].mxu1 }
 0x4a4   : > { %v13203_v13 = vpop.f32.mrb[141].mxu1  ;;  %v7818_v37 = vadd.f32 %v13149_v44, %v18690_v3 }
 0x4a5   : > { %v13204_v20 = vadd.f32 %v13203_v13, %v13202_v4  ;;  %v13205_v17 = vpop.f32.mrb[142].mxu1 }
 0x4a6   : > { %v13206_v2 = vpop.f32.mrb[143].mxu1  ;;  %v13150_v5 = vpop.f32.mrb[144].mxu0 }
 0x4a7   : > { %v18716_v55 = vadd.f32 %v13204_v20, %v7815_v51  ;;  %v13207_v32 = vadd.f32 %v13206_v2, %v13205_v17  ;;  %v13151_v22 = vpop.f32.mrb[145].mxu0 }
 0x4a8   : > { %v13152_v31 = vadd.f32 %v13151_v22, %v13150_v5  ;;  %v13153_v53 = vpop.f32.mrb[146].mxu0 }
 0x4a9   : > { %v18718_v24 = vadd.f32 %v13207_v32, %v7818_v37  ;;  %v13154_v54 = vpop.f32.mrb[147].mxu0 }
 0x4aa   : > { %v7823_v35 = vadd.f32 %v13152_v31, %v18692_v50  ;;  %v13155_v39 = vadd.f32 %v13154_v54, %v13153_v53 }
 0x4ab   : > { %v13208_v62 = vpop.f32.mrb[144].mxu1 }
 0x4ac   : > { %v13209_v29 = vpop.f32.mrb[145].mxu1  ;;  %v7826_v3 = vadd.f32 %v13155_v39, %v18694_v59 }
 0x4ad   : > { %v13210_v52 = vadd.f32 %v13209_v29, %v13208_v62  ;;  %v13211_v34 = vpop.f32.mrb[146].mxu1 }
 0x4ae   : > { %v13212_v63 = vpop.f32.mrb[147].mxu1  ;;  %v13156_v16 = vpop.f32.mrb[148].mxu0 }
 0x4af   : > { %v18722_v45 = vadd.f32 %v13210_v52, %v7823_v35  ;;  %v13213_v43 = vadd.f32 %v13212_v63, %v13211_v34  ;;  %v13157_v56 = vpop.f32.mrb[149].mxu0 }
 0x4b0   : > { %v13158_v47 = vadd.f32 %v13157_v56, %v13156_v16  ;;  %v13159_v8 = vpop.f32.mrb[150].mxu0 }
 0x4b1   : > { %v18724_v23 = vadd.f32 %v13213_v43, %v7826_v3  ;;  %v13160_v42 = vpop.f32.mrb[151].mxu0 }
 0x4b2   : > { %v7831_v50 = vadd.f32 %v13158_v47, %v18696_v48  ;;  %v13161_v7 = vadd.f32 %v13160_v42, %v13159_v8 }
 0x4b3   : > { %v13214_v1 = vpop.f32.mrb[148].mxu1 }
 0x4b4   : > { %v13215_v41 = vpop.f32.mrb[149].mxu1  ;;  %v7834_v59 = vadd.f32 %v13161_v7, %v18698_v9 }
 0x4b5   : > { %v13216_v49 = vadd.f32 %v13215_v41, %v13214_v1  ;;  %v13217_v26 = vpop.f32.mrb[150].mxu1 }
 0x4b6   : > { %v13218_v28 = vpop.f32.mrb[151].mxu1  ;;  %v13162_v14 = vpop.f32.mrb[152].mxu0 }
 0x4b7   : > { %v18728_v10 = vadd.f32 %v13216_v49, %v7831_v50  ;;  %v13219_v57 = vadd.f32 %v13218_v28, %v13217_v26  ;;  %v13163_v25 = vpop.f32.mrb[153].mxu0 }
 0x4b8   : > { %v13164_v12 = vadd.f32 %v13163_v25, %v13162_v14  ;;  %v13165_v38 = vpop.f32.mrb[154].mxu0 }
 0x4b9   : > { %v18730_v30 = vadd.f32 %v13219_v57, %v7834_v59  ;;  %v13166_v58 = vpop.f32.mrb[155].mxu0 }
 0x4ba   : > { %v7839_v48 = vadd.f32 %v13164_v12, %v18700_v40  ;;  %v13167_v6 = vadd.f32 %v13166_v58, %v13165_v38 }
 0x4bb   : > { %v13220_v60 = vpop.f32.mrb[152].mxu1 }
 0x4bc   : > { %v13221_v27 = vpop.f32.mrb[153].mxu1  ;;  %v7842_v9 = vadd.f32 %v13167_v6, %v18702_v36 }
 0x4bd   : > { %v13222_v15 = vadd.f32 %v13221_v27, %v13220_v60  ;;  %v13223_v61 = vpop.f32.mrb[154].mxu1 }
 0x4be   : > { %v13224_v18 = vpop.f32.mrb[155].mxu1  ;;  %v13168_v44 = vpop.f32.mrb[156].mxu0 }
 0x4bf   : > { %v18734_v0 = vadd.f32 %v13222_v15, %v7839_v48  ;;  %v13225_v51 = vadd.f32 %v13224_v18, %v13223_v61  ;;  %v13169_v4 = vpop.f32.mrb[157].mxu0 }
 0x4c0   : > { %v13170_v37 = vadd.f32 %v13169_v4, %v13168_v44  ;;  %v13171_v20 = vpop.f32.mrb[158].mxu0 }
 0x4c1   : > { %v18736_v13 = vadd.f32 %v13225_v51, %v7842_v9  ;;  %v13172_v17 = vpop.f32.mrb[159].mxu0 }
 0x4c2   : > { %v7847_v40 = vadd.f32 %v13170_v37, %v18704_v11  ;;  %v13173_v2 = vadd.f32 %v13172_v17, %v13171_v20 }
 0x4c3   : > { %v13226_v32 = vpop.f32.mrb[156].mxu1 }
 0x4c4   : > { %v13227_v5 = vpop.f32.mrb[157].mxu1  ;;  %v7850_v36 = vadd.f32 %v13173_v2, %v18706_v19 }
 0x4c5   : > { %v13228_v22 = vadd.f32 %v13227_v5, %v13226_v32  ;;  %v13229_v31 = vpop.f32.mrb[158].mxu1 }
 0x4c6   : > { %v13230_v53 = vpop.f32.mrb[159].mxu1  ;;  %v13174_v39 = vpop.f32.mrb[160].mxu0 }
 0x4c7   : > { %v18740_v54 = vadd.f32 %v13228_v22, %v7847_v40  ;;  %v13231_v35 = vadd.f32 %v13230_v53, %v13229_v31  ;;  %v13175_v62 = vpop.f32.mrb[161].mxu0 }
 0x4c8   : > { %v13176_v3 = vadd.f32 %v13175_v62, %v13174_v39  ;;  %v13177_v52 = vpop.f32.mrb[162].mxu0 }
 0x4c9   : > { %v18742_v29 = vadd.f32 %v13231_v35, %v7850_v36  ;;  %v13178_v34 = vpop.f32.mrb[163].mxu0 }
 0x4ca   : > { %v7855_v11 = vadd.f32 %v13176_v3, %v18708_v33  ;;  %v13179_v63 = vadd.f32 %v13178_v34, %v13177_v52 }
 0x4cb   : > { %v13232_v43 = vpop.f32.mrb[160].mxu1 }
 0x4cc   : > { %v13233_v16 = vpop.f32.mrb[161].mxu1  ;;  %v7858_v19 = vadd.f32 %v13179_v63, %v18710_v21 }
 0x4cd   : > { %v13234_v56 = vadd.f32 %v13233_v16, %v13232_v43  ;;  %v13235_v47 = vpop.f32.mrb[162].mxu1 }
 0x4ce   : > { %v13236_v8 = vpop.f32.mrb[163].mxu1  ;;  %v13180_v7 = vpop.f32.mrb[164].mxu0 }
 0x4cf   : > { %v18746_v42 = vadd.f32 %v13234_v56, %v7855_v11  ;;  %v13237_v50 = vadd.f32 %v13236_v8, %v13235_v47  ;;  %v13181_v1 = vpop.f32.mrb[165].mxu0 }
 0x4d0   : > { %v13182_v59 = vadd.f32 %v13181_v1, %v13180_v7  ;;  %v13183_v49 = vpop.f32.mrb[166].mxu0 }
 0x4d1   : > { %v18748_v41 = vadd.f32 %v13237_v50, %v7858_v19  ;;  %v13184_v26 = vpop.f32.mrb[167].mxu0 }
 0x4d2   : > { %v7863_v33 = vadd.f32 %v13182_v59, %v18712_v46 }
 0x4d3   : > { %v13238_v28 = vpop.f32.mrb[164].mxu1 }
 0x4d4   : > { %v13239_v57 = vpop.f32.mrb[165].mxu1 }
 0x4d5   : > { %v13240_v14 = vadd.f32 %v13239_v57, %v13238_v28  ;;  %v13241_v25 = vpop.f32.mrb[166].mxu1 }
 0x4d6   : > { %v13242_v21 = vpop.f32.mrb[167].mxu1  ;;  %v13260_v38 = vpop.f32.mrb[168].mxu0 }
 0x4d7   : > { %v18751_v12 = vadd.f32 %v13240_v14, %v7863_v33  ;;  %v13261_v58 = vpop.f32.mrb[169].mxu0 }
 0x4d8   : > { %v13262_v48 = vadd.f32 %v13261_v58, %v13260_v38  ;;  %v13263_v6 = vpop.f32.mrb[170].mxu0 }
 0x4d9   : > { %v13264_v60 = vpop.f32.mrb[171].mxu0 }
 0x4da   : > { %v7991_v27 = vadd.f32 %v13262_v48, %v18716_v55  ;;  %v13265_v9 = vadd.f32 %v13264_v60, %v13263_v6 }
 0x4db   : > { %v13318_v15 = vpop.f32.mrb[168].mxu1 }
 0x4dc   : > { %v13319_v61 = vpop.f32.mrb[169].mxu1  ;;  %v7994_v18 = vadd.f32 %v13265_v9, %v18718_v24 }
 0x4dd   : > { %v13320_v46 = vadd.f32 %v13319_v61, %v13318_v15  ;;  %v13321_v51 = vpop.f32.mrb[170].mxu1 }
 0x4de   : > { %v13322_v44 = vpop.f32.mrb[171].mxu1 }
 0x4df   : > { %v13323_v4 = vadd.f32 %v13322_v44, %v13321_v51  ;;  %v13266_v37 = vpop.f32.mrb[172].mxu0  ;;  %v18755_v20 = vadd.f32 %v13320_v46, %v7991_v27 }
 0x4e0   : > { %v13267_v17 = vpop.f32.mrb[173].mxu0 }
 0x4e1   : > { %v13268_v40 = vadd.f32 %v13267_v17, %v13266_v37  ;;  %v13269_v2 = vpop.f32.mrb[174].mxu0  ;;  %v18757_v32 = vadd.f32 %v13323_v4, %v7994_v18 }
 0x4e2   : > { %v13270_v5 = vpop.f32.mrb[175].mxu0 }
 0x4e3   : > { %v7999_v55 = vadd.f32 %v13268_v40, %v18722_v45  ;;  %v13271_v36 = vadd.f32 %v13270_v5, %v13269_v2  ;;  %v13324_v22 = vpop.f32.mrb[172].mxu1 }
 0x4e4   : > { %v13325_v31 = vpop.f32.mrb[173].mxu1 }
 0x4e5   : > { %v8002_v24 = vadd.f32 %v13271_v36, %v18724_v23  ;;  %v13326_v53 = vadd.f32 %v13325_v31, %v13324_v22  ;;  %v13327_v35 = vpop.f32.mrb[174].mxu1 }
 0x4e6   : > { %v13328_v39 = vpop.f32.mrb[175].mxu1 }
 0x4e7   : > { %v13329_v62 = vadd.f32 %v13328_v39, %v13327_v35  ;;  %v13272_v3 = vpop.f32.mrb[176].mxu0  ;;  %v18761_v52 = vadd.f32 %v13326_v53, %v7999_v55 }
 0x4e8   : > { %v13273_v34 = vpop.f32.mrb[177].mxu0 }
 0x4e9   : > { %v13274_v11 = vadd.f32 %v13273_v34, %v13272_v3  ;;  %v13275_v63 = vpop.f32.mrb[178].mxu0  ;;  %v18763_v43 = vadd.f32 %v13329_v62, %v8002_v24 }
 0x4ea   : > { %v13276_v16 = vpop.f32.mrb[179].mxu0 }
 0x4eb   : > { %v8007_v45 = vadd.f32 %v13274_v11, %v18728_v10  ;;  %v13277_v19 = vadd.f32 %v13276_v16, %v13275_v63  ;;  %v13330_v56 = vpop.f32.mrb[176].mxu1 }
 0x4ec   : > { %v13331_v47 = vpop.f32.mrb[177].mxu1 }
 0x4ed   : > { %v8010_v23 = vadd.f32 %v13277_v19, %v18730_v30  ;;  %v13332_v8 = vadd.f32 %v13331_v47, %v13330_v56  ;;  %v13333_v50 = vpop.f32.mrb[178].mxu1 }
 0x4ee   : > { %v13334_v7 = vpop.f32.mrb[179].mxu1 }
 0x4ef   : > { %v13335_v1 = vadd.f32 %v13334_v7, %v13333_v50  ;;  %v13278_v59 = vpop.f32.mrb[180].mxu0  ;;  %v18767_v49 = vadd.f32 %v13332_v8, %v8007_v45 }
 0x4f0   : > { %v13279_v26 = vpop.f32.mrb[181].mxu0 }
 0x4f1   : > { %v13280_v33 = vadd.f32 %v13279_v26, %v13278_v59  ;;  %v13281_v28 = vpop.f32.mrb[182].mxu0  ;;  %v18769_v57 = vadd.f32 %v13335_v1, %v8010_v23 }
 0x4f2   : > { %v13282_v14 = vpop.f32.mrb[183].mxu0 }
 0x4f3   : > { %v8015_v10 = vadd.f32 %v13280_v33, %v18734_v0  ;;  %v13283_v25 = vadd.f32 %v13282_v14, %v13281_v28  ;;  %v13336_v21 = vpop.f32.mrb[180].mxu1  ;;  %v18795_v14 = vld [vmem:[%s19502_s5] ss:$0 sm:$0xff] }
 0x4f4   : > { %v13337_v38 = vpop.f32.mrb[181].mxu1 }
 0x4f5   : > { %v8018_v30 = vadd.f32 %v13283_v25, %v18736_v13  ;;  %v13338_v58 = vadd.f32 %v13337_v38, %v13336_v21  ;;  %v13339_v48 = vpop.f32.mrb[182].mxu1 }
 0x4f6   : > { %v13340_v6 = vpop.f32.mrb[183].mxu1 }
 0x4f7   : > { %v13341_v60 = vadd.f32 %v13340_v6, %v13339_v48  ;;  %v13284_v27 = vpop.f32.mrb[184].mxu0  ;;  %v18773_v9 = vadd.f32 %v13338_v58, %v8015_v10 }
 0x4f8   : > { %v13285_v15 = vpop.f32.mrb[185].mxu0 }
 0x4f9   : > { %v13286_v61 = vadd.f32 %v13285_v15, %v13284_v27  ;;  %v13287_v18 = vpop.f32.mrb[186].mxu0  ;;  %v18775_v46 = vadd.f32 %v13341_v60, %v8018_v30 }
 0x4fa   : > { %v13288_v51 = vpop.f32.mrb[187].mxu0 }
 0x4fb   : > { %v8023_v0 = vadd.f32 %v13286_v61, %v18740_v54  ;;  %v13289_v44 = vadd.f32 %v13288_v51, %v13287_v18  ;;  %v13342_v4 = vpop.f32.mrb[184].mxu1 }
 0x4fc   : > { %v13343_v37 = vpop.f32.mrb[185].mxu1 }
 0x4fd   : > { %v8026_v13 = vadd.f32 %v13289_v44, %v18742_v29  ;;  %v13344_v17 = vadd.f32 %v13343_v37, %v13342_v4  ;;  %v13345_v40 = vpop.f32.mrb[186].mxu1 }
 0x4fe   : > { %v13346_v2 = vpop.f32.mrb[187].mxu1 }
 0x4ff   : > { %v13347_v5 = vadd.f32 %v13346_v2, %v13345_v40  ;;  %v13290_v55 = vpop.f32.mrb[188].mxu0  ;;  %v18779_v36 = vadd.f32 %v13344_v17, %v8023_v0 }
 0x500   : > { %v13291_v22 = vpop.f32.mrb[189].mxu0 }
 0x501   : > { %v13292_v31 = vadd.f32 %v13291_v22, %v13290_v55  ;;  %v13293_v24 = vpop.f32.mrb[190].mxu0  ;;  %v18781_v53 = vadd.f32 %v13347_v5, %v8026_v13 }
 0x502   : > { %v13294_v35 = vpop.f32.mrb[191].mxu0 }
 0x503   : > { %v8031_v54 = vadd.f32 %v13292_v31, %v18746_v42  ;;  %v13295_v39 = vadd.f32 %v13294_v35, %v13293_v24  ;;  %v13348_v62 = vpop.f32.mrb[188].mxu1 }
 0x504   : > { %v13349_v3 = vpop.f32.mrb[189].mxu1 }
 0x505   : > { %v8034_v29 = vadd.f32 %v13295_v39, %v18748_v41  ;;  %v13350_v34 = vadd.f32 %v13349_v3, %v13348_v62  ;;  %v13351_v11 = vpop.f32.mrb[190].mxu1 }
 0x506   : > { %v13352_v63 = vpop.f32.mrb[191].mxu1 }
 0x507   : > { %v13353_v16 = vadd.f32 %v13352_v63, %v13351_v11  ;;  %v13296_v45 = vpop.f32.mrb[192].mxu0  ;;  %v18785_v19 = vadd.f32 %v13350_v34, %v8031_v54 }
 0x508   : > { %v13297_v56 = vpop.f32.mrb[193].mxu0 }
 0x509   : > { %v13298_v47 = vadd.f32 %v13297_v56, %v13296_v45  ;;  %v13299_v23 = vpop.f32.mrb[194].mxu0  ;;  %v18787_v8 = vadd.f32 %v13353_v16, %v8034_v29 }
 0x50a   : > { %v13300_v50 = vpop.f32.mrb[195].mxu0 }
 0x50b   : > { %v8039_v42 = vadd.f32 %v13298_v47, %v18751_v12  ;;  %v13354_v7 = vpop.f32.mrb[192].mxu1  ;;  %v18801_v12 = vld [vmem:[%s19503_s6] ss:$0 sm:$0xff] }
 0x50c   : > { %v13355_v1 = vpop.f32.mrb[193].mxu1 }
 0x50d   : > { %v13356_v59 = vadd.f32 %v13355_v1, %v13354_v7  ;;  %v13357_v26 = vpop.f32.mrb[194].mxu1 }
 0x50e   : > { %v13358_v41 = vpop.f32.mrb[195].mxu1 }
 0x50f   : > { %v18790_v33 = vadd.f32 %v13356_v59, %v8039_v42 }
 0x513   : > { %v8166_v28 = vpop.f32.mrb[196].mxu0 }
 0x514   : > { %v8167_v10 = vadd.f32 %v8166_v28, %v18755_v20  ;;  %v13410_v25 = vpop.f32.mrb[197].mxu0 }
 0x515   : > { %v8169_v21 = vpop.f32.mrb[198].mxu0 }
 0x516   : > { %v8227_v38 = vmul.f32 %v18795_v14, %v8167_v10  ;;  %v8170_v30 = vadd.f32 %v8169_v21, %v18757_v32  ;;  %v13411_v58 = vpop.f32.mrb[199].mxu0 }
 0x518   : > { %v8247_v48 = vadd.f32 %v18801_v12, %v8227_v38  ;;  %v8228_v6 = vmul.f32 %v18795_v14, %v8170_v30 }
 0x51a   : > { %v8260_v60 = vmax.f32 %v8247_v48, 0.0  ;;  %v8248_v20 = vadd.f32 %v18801_v12, %v8228_v6 }
 0x51b   : > { %v8174_v27 = vpop.f32.mrb[200].mxu0 }
 0x51c   : > { %8274 = vst.msk [vmem:[#allocation2] sm:$0xff] %vm8273_vm4, %v8260_v60  ;;  %v8261_v15 = vmax.f32 %v8248_v20, 0.0  ;;  %v8175_v61 = vadd.f32 %v8174_v27, %v18761_v52  ;;  %v13414_v18 = vpop.f32.mrb[201].mxu0 }
 0x51d   : > { %v8177_v51 = vpop.f32.mrb[202].mxu0 }
 0x51e   : > { %8275 = vst.msk [vmem:[#allocation2 + $0x8] sm:$0xff] %vm8273_vm4, %v8261_v15  ;;  %v8229_v32 = vmul.f32 %v18795_v14, %v8175_v61  ;;  %v8178_v0 = vadd.f32 %v8177_v51, %v18763_v43  ;;  %v13415_v44 = vpop.f32.mrb[203].mxu0 }
 0x520   : > { %v8249_v4 = vadd.f32 %v18801_v12, %v8229_v32  ;;  %v8230_v37 = vmul.f32 %v18795_v14, %v8178_v0 }
 0x522   : > { %v8262_v13 = vmax.f32 %v8249_v4, 0.0  ;;  %v8250_v17 = vadd.f32 %v18801_v12, %v8230_v37 }
 0x523   : > { %v8182_v40 = vpop.f32.mrb[204].mxu0  ;;  %v12528_v2 = vld.sshfl [vmem:[#allocation2 + $0x2] sm:$0x3 pattern:$0x76325410] }
 0x524   : > { %8276 = vst.msk [vmem:[#allocation2 + $0x10] sm:$0xff] %vm8273_vm4, %v8262_v13  ;;  %v8263_v52 = vmax.f32 %v8250_v17, 0.0  ;;  %v8183_v5 = vadd.f32 %v8182_v40, %v18767_v49  ;;  %8299 = vrot.lane.b32.xlu0 %v12528_v2, %s15167_s15  ;;  %v13418_v55 = vpop.f32.mrb[205].mxu0  ;;  %v8288_v39 = vld [vmem:[#allocation2] sm:$0x3] }
 0x525   : > { %v8185_v43 = vpop.f32.mrb[206].mxu0  ;;  %v12530_v22 = vld.sshfl [vmem:[#allocation2 + $0xa] sm:$0x3 pattern:$0x76325410] }
 0x526   : > { %8277 = vst.msk [vmem:[#allocation2 + $0x18] sm:$0xff] %vm8273_vm4, %v8263_v52  ;;  %v8231_v31 = vmul.f32 %v18795_v14, %v8183_v5  ;;  %v8186_v24 = vadd.f32 %v8185_v43, %v18769_v57  ;;  %8330 = vrot.lane.b32.xlu1 %v12530_v22, %s15167_s15  ;;  %v13419_v35 = vpop.f32.mrb[207].mxu0  ;;  %v12529_v54 = vld.sshfl [vmem:[#allocation2 + $0x6] sm:$0x3 pattern:$0x76325410] }
 0x527   : > { %v8319_v62 = vld [vmem:[#allocation2 + $0x8] sm:$0x3]  ;;  %v8304_v49 = vld [vmem:[#allocation2 + $0x4] sm:$0x3]  ;;  %8289 = vst.msk [vmem:[#allocation3] sm:$0x3] %vm8286_vm5, %v8288_v39 }
 0x528   : > { %v8251_v3 = vadd.f32 %v18801_v12, %v8231_v31  ;;  %v8232_v29 = vmul.f32 %v18795_v14, %v8186_v24  ;;  %8315 = vrot.lane.b32.xlu0 %v12529_v54, %s15167_s15  ;;  %8320 = vst.msk [vmem:[#allocation3 + $0x4] sm:$0x3] %vm8286_vm5, %v8319_v62  ;;  %8305 = vst.msk [vmem:[#allocation3 + $0x2] sm:$0x3] %vm8286_vm5, %v8304_v49  ;;  %v8334_v57 = vld [vmem:[#allocation2 + $0xc] sm:$0x3] }
 0x529   : > { %v12531_v34 = vld.sshfl [vmem:[#allocation2 + $0xe] sm:$0x3 pattern:$0x76325410]  ;;  %8335 = vst.msk [vmem:[#allocation3 + $0x6] sm:$0x3] %vm8286_vm5, %v8334_v57 }
 0x52a   : > { %v8264_v11 = vmax.f32 %v8251_v3, 0.0  ;;  %v8252_v63 = vadd.f32 %v18801_v12, %v8232_v29  ;;  %8345 = vrot.lane.b32.xlu1 %v12531_v34, %s15167_s15 }
 0x52b   : > { %v8190_v16 = vpop.f32.mrb[208].mxu0  ;;  %v12532_v45 = vld.sshfl [vmem:[#allocation2 + $0x12] sm:$0x3 pattern:$0x76325410] }
 0x52c   : > { %8278 = vst.msk [vmem:[#allocation2 + $0x20] sm:$0xff] %vm8273_vm4, %v8264_v11  ;;  %v8265_v56 = vmax.f32 %v8252_v63, 0.0  ;;  %v8191_v47 = vadd.f32 %v8190_v16, %v18773_v9  ;;  %8360 = vrot.lane.b32.xlu0 %v12532_v45, %s15167_s15  ;;  %v13422_v23 = vpop.f32.mrb[209].mxu0  ;;  %v8349_v41 = vld [vmem:[#allocation2 + $0x10] sm:$0x3] }
 0x52d   : > { %v8193_v50 = vpop.f32.mrb[210].mxu0  ;;  %v12533_v42 = vld.sshfl [vmem:[#allocation2 + $0x16] sm:$0x3 pattern:$0x76325410] }
 0x52e   : > { %8279 = vst.msk [vmem:[#allocation2 + $0x28] sm:$0xff] %vm8273_vm4, %v8265_v56  ;;  %v8233_v7 = vmul.f32 %v18795_v14, %v8191_v47  ;;  %v8194_v1 = vadd.f32 %v8193_v50, %v18775_v46  ;;  %8375 = vrot.lane.b32.xlu1 %v12533_v42, %s15167_s15  ;;  %v13423_v59 = vpop.f32.mrb[211].mxu0  ;;  %v12534_v26 = vld.sshfl [vmem:[#allocation2 + $0x1a] sm:$0x3 pattern:$0x76325410] }
 0x52f   : > { %v8364_v28 = vld [vmem:[#allocation2 + $0x14] sm:$0x3]  ;;  %v8379_v10 = vld [vmem:[#allocation2 + $0x18] sm:$0x3]  ;;  %8350 = vst.msk [vmem:[#allocation3 + $0x8] sm:$0x3] %vm8286_vm5, %v8349_v41 }
 0x530   : > { %v8253_v9 = vadd.f32 %v18801_v12, %v8233_v7  ;;  %v8234_v25 = vmul.f32 %v18795_v14, %v8194_v1  ;;  %8390 = vrot.lane.b32.xlu0 %v12534_v26, %s15167_s15  ;;  %8365 = vst.msk [vmem:[#allocation3 + $0xa] sm:$0x3] %vm8286_vm5, %v8364_v28  ;;  %8380 = vst.msk [vmem:[#allocation3 + $0xc] sm:$0x3] %vm8286_vm5, %v8379_v10  ;;  %v8394_v46 = vld [vmem:[#allocation2 + $0x1c] sm:$0x3] }
 0x531   : > { %v12535_v21 = vld.sshfl [vmem:[#allocation2 + $0x1e] sm:$0x3 pattern:$0x76325410]  ;;  %8395 = vst.msk [vmem:[#allocation3 + $0xe] sm:$0x3] %vm8286_vm5, %v8394_v46 }
 0x532   : > { %v8266_v38 = vmax.f32 %v8253_v9, 0.0  ;;  %v8254_v30 = vadd.f32 %v18801_v12, %v8234_v25  ;;  %8405 = vrot.lane.b32.xlu1 %v12535_v21, %s15167_s15 }
 0x533   : > { %v8198_v58 = vpop.f32.mrb[196].mxu1  ;;  %v12536_v48 = vld.sshfl [vmem:[#allocation2 + $0x22] sm:$0x3 pattern:$0x76325410] }
 0x534   : > { %8280 = vst.msk [vmem:[#allocation2 + $0x30] sm:$0xff] %vm8273_vm4, %v8266_v38  ;;  %v8267_v6 = vmax.f32 %v8254_v30, 0.0  ;;  %v8199_v60 = vadd.f32 %v8198_v58, %v18779_v36  ;;  %v13426_v20 = vpop.f32.mrb[197].mxu1  ;;  %8420 = vrot.lane.b32.xlu0 %v12536_v48, %s15167_s15  ;;  %v8409_v0 = vld [vmem:[#allocation2 + $0x20] sm:$0x3] }
 0x535   : > { %v8201_v27 = vpop.f32.mrb[198].mxu1  ;;  %v12537_v15 = vld.sshfl [vmem:[#allocation2 + $0x26] sm:$0x3 pattern:$0x76325410] }
 0x536   : > { %8281 = vst.msk [vmem:[#allocation2 + $0x38] sm:$0xff] %vm8273_vm4, %v8267_v6  ;;  %v8235_v61 = vmul.f32 %v18795_v14, %v8199_v60  ;;  %v8202_v18 = vadd.f32 %v8201_v27, %v18781_v53  ;;  %v13427_v51 = vpop.f32.mrb[199].mxu1  ;;  %8435 = vrot.lane.b32.xlu1 %v12537_v15, %s15167_s15  ;;  %v12538_v32 = vld.sshfl [vmem:[#allocation2 + $0x2a] sm:$0x3 pattern:$0x76325410] }
 0x537   : > { %v8424_v44 = vld [vmem:[#allocation2 + $0x24] sm:$0x3]  ;;  %v8439_v4 = vld [vmem:[#allocation2 + $0x28] sm:$0x3]  ;;  %8410 = vst.msk [vmem:[#allocation3 + $0x10] sm:$0x3] %vm8286_vm5, %v8409_v0 }
 0x538   : > { %v8255_v36 = vadd.f32 %v18801_v12, %v8235_v61  ;;  %v8236_v37 = vmul.f32 %v18795_v14, %v8202_v18  ;;  %8450 = vrot.lane.b32.xlu0 %v12538_v32, %s15167_s15  ;;  %8425 = vst.msk [vmem:[#allocation3 + $0x12] sm:$0x3] %vm8286_vm5, %v8424_v44  ;;  %8440 = vst.msk [vmem:[#allocation3 + $0x14] sm:$0x3] %vm8286_vm5, %v8439_v4  ;;  %v8454_v53 = vld [vmem:[#allocation2 + $0x2c] sm:$0x3] }
 0x539   : > { %v12539_v13 = vld.sshfl [vmem:[#allocation2 + $0x2e] sm:$0x3 pattern:$0x76325410]  ;;  %8455 = vst.msk [vmem:[#allocation3 + $0x16] sm:$0x3] %vm8286_vm5, %v8454_v53 }
 0x53a   : > { %v8268_v17 = vmax.f32 %v8255_v36, 0.0  ;;  %v8256_v40 = vadd.f32 %v18801_v12, %v8236_v37  ;;  %8465 = vrot.lane.b32.xlu1 %v12539_v13, %s15167_s15 }
 0x53b   : > { %v8206_v2 = vpop.f32.mrb[200].mxu1  ;;  %v12540_v52 = vld.sshfl [vmem:[#allocation2 + $0x32] sm:$0x3 pattern:$0x76325410] }
 0x53c   : > { %8282 = vst.msk [vmem:[#allocation2 + $0x40] sm:$0xff] %vm8273_vm4, %v8268_v17  ;;  %v8269_v5 = vmax.f32 %v8256_v40, 0.0  ;;  %v8207_v55 = vadd.f32 %v8206_v2, %v18785_v19  ;;  %v13430_v43 = vpop.f32.mrb[201].mxu1  ;;  %8480 = vrot.lane.b32.xlu0 %v12540_v52, %s15167_s15  ;;  %v8469_v62 = vld [vmem:[#allocation2 + $0x30] sm:$0x3] }
 0x53d   : > { %v8209_v22 = vpop.f32.mrb[202].mxu1  ;;  %v12541_v31 = vld.sshfl [vmem:[#allocation2 + $0x36] sm:$0x3 pattern:$0x76325410] }
 0x53e   : > { %8283 = vst.msk [vmem:[#allocation2 + $0x48] sm:$0xff] %vm8273_vm4, %v8269_v5  ;;  %v8237_v24 = vmul.f32 %v18795_v14, %v8207_v55  ;;  %v8210_v35 = vadd.f32 %v8209_v22, %v18787_v8  ;;  %v13431_v54 = vpop.f32.mrb[203].mxu1  ;;  %8495 = vrot.lane.b32.xlu1 %v12541_v31, %s15167_s15  ;;  %v12542_v39 = vld.sshfl [vmem:[#allocation2 + $0x3a] sm:$0x3 pattern:$0x76325410] }
 0x53f   : > { %v8484_v49 = vld [vmem:[#allocation2 + $0x34] sm:$0x3]  ;;  %v8499_v3 = vld [vmem:[#allocation2 + $0x38] sm:$0x3]  ;;  %8470 = vst.msk [vmem:[#allocation3 + $0x18] sm:$0x3] %vm8286_vm5, %v8469_v62 }
 0x540   : > { %v8257_v19 = vadd.f32 %v18801_v12, %v8237_v24  ;;  %v8238_v29 = vmul.f32 %v18795_v14, %v8210_v35  ;;  %8510 = vrot.lane.b32.xlu0 %v12542_v39, %s15167_s15  ;;  %8485 = vst.msk [vmem:[#allocation3 + $0x1a] sm:$0x3] %vm8286_vm5, %v8484_v49  ;;  %8500 = vst.msk [vmem:[#allocation3 + $0x1c] sm:$0x3] %vm8286_vm5, %v8499_v3  ;;  %v8514_v8 = vld [vmem:[#allocation2 + $0x3c] sm:$0x3] }
 0x541   : > { %v12543_v57 = vld.sshfl [vmem:[#allocation2 + $0x3e] sm:$0x3 pattern:$0x76325410]  ;;  %8515 = vst.msk [vmem:[#allocation3 + $0x1e] sm:$0x3] %vm8286_vm5, %v8514_v8 }
 0x542   : > { %v8270_v34 = vmax.f32 %v8257_v19, 0.0  ;;  %v8258_v11 = vadd.f32 %v18801_v12, %v8238_v29  ;;  %8525 = vrot.lane.b32.xlu1 %v12543_v57, %s15167_s15 }
 0x543   : > { %v8214_v63 = vpop.f32.mrb[204].mxu1  ;;  %v12544_v16 = vld.sshfl [vmem:[#allocation2 + $0x42] sm:$0x3 pattern:$0x76325410] }
 0x544   : > { %8284 = vst.msk [vmem:[#allocation2 + $0x50] sm:$0xff] %vm8273_vm4, %v8270_v34  ;;  %v8271_v45 = vmax.f32 %v8258_v11, 0.0  ;;  %v8215_v56 = vadd.f32 %v8214_v63, %v18790_v33  ;;  %v13434_v47 = vpop.f32.mrb[205].mxu1  ;;  %8540 = vrot.lane.b32.xlu0 %v12544_v16, %s15167_s15  ;;  %v8529_v59 = vld [vmem:[#allocation2 + $0x40] sm:$0x3] }
 0x545   : > { %v8217_v23 = vpop.f32.mrb[206].mxu1  ;;  %v12545_v50 = vld.sshfl [vmem:[#allocation2 + $0x46] sm:$0x3 pattern:$0x76325410] }
 0x546   : > { %8285 = vst.msk [vmem:[#allocation2 + $0x58] sm:$0xff] %vm8273_vm4, %v8271_v45  ;;  %v8239_v42 = vmul.f32 %v18795_v14, %v8215_v56  ;;  %v13435_v7 = vpop.f32.mrb[207].mxu1  ;;  %8555 = vrot.lane.b32.xlu1 %v12545_v50, %s15167_s15  ;;  %v12546_v1 = vld.sshfl [vmem:[#allocation2 + $0x4a] sm:$0x3 pattern:$0x76325410] }
 0x547   : > { %v8544_v26 = vld [vmem:[#allocation2 + $0x44] sm:$0x3]  ;;  %v8559_v41 = vld [vmem:[#allocation2 + $0x48] sm:$0x3]  ;;  %8530 = vst.msk [vmem:[#allocation3 + $0x20] sm:$0x3] %vm8286_vm5, %v8529_v59 }
 0x548   : > { %v8259_v28 = vadd.f32 %v18801_v12, %v8239_v42  ;;  %8570 = vrot.lane.b32.xlu0 %v12546_v1, %s15167_s15  ;;  %8545 = vst.msk [vmem:[#allocation3 + $0x22] sm:$0x3] %vm8286_vm5, %v8544_v26  ;;  %8560 = vst.msk [vmem:[#allocation3 + $0x24] sm:$0x3] %vm8286_vm5, %v8559_v41  ;;  %v8574_v33 = vld [vmem:[#allocation2 + $0x4c] sm:$0x3] }
 0x549   : > { %v12552_v14 = vld [vmem:[%s19507_s10] ss:$0 sm:$0xff]  ;;  %v12547_v10 = vld.sshfl [vmem:[#allocation2 + $0x4e] sm:$0x3 pattern:$0x76325410] }
 0x54a   : > { %8575 = vst.msk [vmem:[#allocation3 + $0x26] sm:$0x3] %vm8286_vm5, %v8574_v33  ;;  %v8272_v9 = vmax.f32 %v8259_v28, 0.0  ;;  %8585 = vrot.lane.b32.xlu1 %v12547_v10, %s15167_s15 }
 0x54b   : > { %8659 = vst.msk [vmem:[#allocation5] sm:$0x3] %vm8658_vm6, %v12552_v14  ;;  %v12548_v12 = vld.sshfl [vmem:[#allocation2 + $0x52] sm:$0x3 pattern:$0x76325410] }
 0x54c   : > { %v8589_v25 = vld [vmem:[#allocation2 + $0x50] sm:$0x3]  ;;  %8287 = vst.msk [vmem:[#allocation2 + $0x60] sm:$0x3] %vm8286_vm5, %v8272_v9  ;;  %8600 = vrot.lane.b32.xlu0 %v12548_v12, %s15167_s15  ;;  %v8604_v46 = vld [vmem:[#allocation2 + $0x54] sm:$0x3] }
 0x54d   : > { %8590 = vst.msk [vmem:[#allocation3 + $0x28] sm:$0x3] %vm8286_vm5, %v8589_v25  ;;  %v12549_v21 = vld.sshfl [vmem:[#allocation2 + $0x56] sm:$0x3 pattern:$0x76325410] }
 0x54e   : > { %8605 = vst.msk [vmem:[#allocation3 + $0x2a] sm:$0x3] %vm8286_vm5, %v8604_v46  ;;  %v8619_v38 = vld [vmem:[#allocation2 + $0x58] sm:$0x3]  ;;  %8615 = vrot.lane.b32.xlu1 %v12549_v21, %s15167_s15  ;;  %v8634_v30 = vld [vmem:[#allocation2 + $0x5c] sm:$0x3] }
 0x54f   : > { %8620 = vst.msk [vmem:[#allocation3 + $0x2c] sm:$0x3] %vm8286_vm5, %v8619_v38  ;;  %v12550_v58 = vld.sshfl [vmem:[#allocation2 + $0x5a] sm:$0x3 pattern:$0x76325410] }
 0x550   : > { %8635 = vst.msk [vmem:[#allocation3 + $0x2e] sm:$0x3] %vm8286_vm5, %v8634_v30  ;;  %8630 = vrot.lane.b32.xlu0 %v12550_v58, %s15167_s15  ;;  %v12551_v48 = vld.sshfl [vmem:[#allocation2 + $0x5e] sm:$0x3 pattern:$0x76325410] }
 0x552   : > { %8645 = vrot.lane.b32.xlu1 %v12551_v48, %s15167_s15 }
 0x553   : > { %v8649_v6 = vld [vmem:[#allocation2 + $0x60] sm:$0x3] }
 0x554   : > { %8650 = vst.msk [vmem:[#allocation3 + $0x30] sm:$0x3] %vm8286_vm5, %v8649_v6 }
 0x596   : > { %v8300_v60 = vpop.permute.xlu0 %8299 }
 0x597   : > { %8303 = vst.msk [vmem:[#allocation3] sm:$0x3] %vm8302_vm7, %v8300_v60 }
 0x598   : > { %v8331_v20 = vpop.permute.xlu1 %8330 }
 0x599   : > { %8333 = vst.msk [vmem:[#allocation3 + $0x4] sm:$0x3] %vm8302_vm7, %v8331_v20 }
 0x59a   : > { %v8316_v27 = vpop.permute.xlu0 %8315 }
 0x59b   : > { %8318 = vst.msk [vmem:[#allocation3 + $0x2] sm:$0x3] %vm8302_vm7, %v8316_v27 }
 0x59c   : > { %v8346_v15 = vpop.permute.xlu1 %8345 }
 0x59d   : > { %8348 = vst.msk [vmem:[#allocation3 + $0x6] sm:$0x3] %vm8302_vm7, %v8346_v15 }
 0x59e   : > { %v8361_v61 = vpop.permute.xlu0 %8360 }
 0x59f   : > { %8363 = vst.msk [vmem:[#allocation3 + $0x8] sm:$0x3] %vm8302_vm7, %v8361_v61 }
 0x5a0   : > { %v8376_v18 = vpop.permute.xlu1 %8375 }
 0x5a1   : > { %8378 = vst.msk [vmem:[#allocation3 + $0xa] sm:$0x3] %vm8302_vm7, %v8376_v18 }
 0x5a2   : > { %v8391_v51 = vpop.permute.xlu0 %8390 }
 0x5a3   : > { %8393 = vst.msk [vmem:[#allocation3 + $0xc] sm:$0x3] %vm8302_vm7, %v8391_v51 }
 0x5a4   : > { %v8406_v32 = vpop.permute.xlu1 %8405 }
 0x5a5   : > { %8408 = vst.msk [vmem:[#allocation3 + $0xe] sm:$0x3] %vm8302_vm7, %v8406_v32 }
 0x5a6   : > { %v8421_v0 = vpop.permute.xlu0 %8420 }
 0x5a7   : > { %8423 = vst.msk [vmem:[#allocation3 + $0x10] sm:$0x3] %vm8302_vm7, %v8421_v0 }
 0x5a8   : > { %v8436_v44 = vpop.permute.xlu1 %8435 }
 0x5a9   : > { %8438 = vst.msk [vmem:[#allocation3 + $0x12] sm:$0x3] %vm8302_vm7, %v8436_v44 }
 0x5aa   : > { %v8451_v4 = vpop.permute.xlu0 %8450 }
 0x5ab   : > { %8453 = vst.msk [vmem:[#allocation3 + $0x14] sm:$0x3] %vm8302_vm7, %v8451_v4 }
 0x5ac   : > { %v8466_v36 = vpop.permute.xlu1 %8465 }
 0x5ad   : > { %8468 = vst.msk [vmem:[#allocation3 + $0x16] sm:$0x3] %vm8302_vm7, %v8466_v36 }
 0x5ae   : > { %v8481_v37 = vpop.permute.xlu0 %8480 }
 0x5af   : > { %8483 = vst.msk [vmem:[#allocation3 + $0x18] sm:$0x3] %vm8302_vm7, %v8481_v37 }
 0x5b0   : > { %v8496_v53 = vpop.permute.xlu1 %8495 }
 0x5b1   : > { %8498 = vst.msk [vmem:[#allocation3 + $0x1a] sm:$0x3] %vm8302_vm7, %v8496_v53 }
 0x5b2   : > { %v8511_v13 = vpop.permute.xlu0 %8510 }
 0x5b3   : > { %8513 = vst.msk [vmem:[#allocation3 + $0x1c] sm:$0x3] %vm8302_vm7, %v8511_v13 }
 0x5b4   : > { %v8526_v17 = vpop.permute.xlu1 %8525 }
 0x5b5   : > { %8528 = vst.msk [vmem:[#allocation3 + $0x1e] sm:$0x3] %vm8302_vm7, %v8526_v17 }
 0x5b6   : > { %v8541_v40 = vpop.permute.xlu0 %8540 }
 0x5b7   : > { %8543 = vst.msk [vmem:[#allocation3 + $0x20] sm:$0x3] %vm8302_vm7, %v8541_v40 }
 0x5b8   : > { %v8556_v2 = vpop.permute.xlu1 %8555 }
 0x5b9   : > { %8558 = vst.msk [vmem:[#allocation3 + $0x22] sm:$0x3] %vm8302_vm7, %v8556_v2 }
 0x5ba   : > { %v8571_v52 = vpop.permute.xlu0 %8570 }
 0x5bb   : > { %8573 = vst.msk [vmem:[#allocation3 + $0x24] sm:$0x3] %vm8302_vm7, %v8571_v52 }
 0x5bc   : > { %v8586_v5 = vpop.permute.xlu1 %8585 }
 0x5bd   : > { %8588 = vst.msk [vmem:[#allocation3 + $0x26] sm:$0x3] %vm8302_vm7, %v8586_v5 }
 0x5be   : > { %v8601_v55 = vpop.permute.xlu0 %8600 }
 0x5bf   : > { %8603 = vst.msk [vmem:[#allocation3 + $0x28] sm:$0x3] %vm8302_vm7, %v8601_v55 }
 0x5c0   : > { %v8616_v43 = vpop.permute.xlu1 %8615 }
 0x5c1   : > { %8618 = vst.msk [vmem:[#allocation3 + $0x2a] sm:$0x3] %vm8302_vm7, %v8616_v43 }
 0x5c2   : > { %v8631_v22 = vpop.permute.xlu0 %8630 }
 0x5c3   : > { %8633 = vst.msk [vmem:[#allocation3 + $0x2c] sm:$0x3] %vm8302_vm7, %v8631_v22 }
 0x5c4   : > { %v8646_v31 = vpop.permute.xlu1 %8645 }
 0x5c5   : > { %8648 = vst.msk [vmem:[#allocation3 + $0x2e] sm:$0x3] %vm8302_vm7, %v8646_v31 }
 0x5c6 PF: > { %v14508_v24 = vld [vmem:[%s16071_s17 + $0x4] ss:$8 sps:$4 sm:$0xff]   ;;  %v14512_v54 = vld [vmem:[%s16071_s17] ss:$8 sps:$4 sm:$0xff]   ;;  %v14514_v62 = vld [vmem:[%s16071_s17 + $0x14] ss:$8 sps:$4 sm:$0xff]   ;;  %v8678_v48 = vlaneseq }
 0x5c7   : > { %v14510_v35 = vld [vmem:[%s16071_s17 + $0x604] ss:$8 sps:$4 sm:$0xff]   ;;  %11201 = vmatprep.subr.bf16.mxu1 %v14508_v24  ;;  %v14513_v39 = vld [vmem:[%s16071_s17 + $0x600] ss:$8 sps:$4 sm:$0xff]   ;;  %v14516_v49 = vld [vmem:[%s16071_s17 + $0x614] ss:$8 sps:$4 sm:$0xff]  }
 0x5c8   : > { %11447 = vmatprep.subr.bf16.mxu0 %v14510_v35  ;;  %11202 = vmatpush1.bf16.msra.mxu1 %v14512_v54  ;;  %v14518_v3 = vld [vmem:[%s16071_s17 + $0x10] ss:$8 sps:$4 sm:$0xff]   ;;  %v14520_v29 = vld [vmem:[%s16071_s17 + $0x24] ss:$8 sps:$4 sm:$0xff]   ;;  %v14524_v57 = vld [vmem:[%s16071_s17 + $0x20] ss:$8 sps:$4 sm:$0xff]  }
 0x5c9   : > { %11448 = vmatpush1.bf16.msra.mxu0 %v14513_v39  ;;  %11203 = vmatprep.subr.bf16.mxu1 %v14514_v62  ;;  %v14519_v19 = vld [vmem:[%s16071_s17 + $0x610] ss:$8 sps:$4 sm:$0xff]   ;;  %v14522_v8 = vld [vmem:[%s16071_s17 + $0x624] ss:$8 sps:$4 sm:$0xff]   ;;  %v14525_v34 = vld [vmem:[%s16071_s17 + $0x620] ss:$8 sps:$4 sm:$0xff]  }
 0x5ca   : > { %11449 = vmatprep.subr.bf16.mxu0 %v14516_v49  ;;  %v14526_v11 = vld [vmem:[%s16071_s17 + $0x34] ss:$8 sps:$4 sm:$0xff]   ;;  %v14530_v16 = vld [vmem:[%s16071_s17 + $0x30] ss:$8 sps:$4 sm:$0xff]   ;;  %v14532_v56 = vld [vmem:[%s16071_s17 + $0x44] ss:$8 sps:$4 sm:$0xff]  }
 0x5cb   : > { %v14528_v63 = vld [vmem:[%s16071_s17 + $0x634] ss:$8 sps:$4 sm:$0xff]   ;;  %v14531_v45 = vld [vmem:[%s16071_s17 + $0x630] ss:$8 sps:$4 sm:$0xff]   ;;  %v14534_v47 = vld [vmem:[%s16071_s17 + $0x644] ss:$8 sps:$4 sm:$0xff]  }
 0x5cc   : > { %11204 = vmatpush1.bf16.msra.mxu1 %v14518_v3  ;;  %v14536_v23 = vld [vmem:[%s16071_s17 + $0x40] ss:$8 sps:$4 sm:$0xff]   ;;  %v14538_v42 = vld [vmem:[%s16071_s17 + $0x54] ss:$8 sps:$4 sm:$0xff]   ;;  %v14542_v1 = vld [vmem:[%s16071_s17 + $0x50] ss:$8 sps:$4 sm:$0xff]  }
 0x5cd   : > { %11450 = vmatpush1.bf16.msra.mxu0 %v14519_v19  ;;  %11205 = vmatprep.subr.bf16.mxu1 %v14520_v29  ;;  %v14537_v50 = vld [vmem:[%s16071_s17 + $0x640] ss:$8 sps:$4 sm:$0xff]   ;;  %v14540_v7 = vld [vmem:[%s16071_s17 + $0x654] ss:$8 sps:$4 sm:$0xff]   ;;  %v14543_v59 = vld [vmem:[%s16071_s17 + $0x650] ss:$8 sps:$4 sm:$0xff]  }
 0x5ce   : > { %11451 = vmatprep.subr.bf16.mxu0 %v14522_v8  ;;  %v14544_v26 = vld [vmem:[%s16071_s17 + $0x64] ss:$8 sps:$4 sm:$0xff]   ;;  %v14548_v28 = vld [vmem:[%s16071_s17 + $0x60] ss:$8 sps:$4 sm:$0xff]   ;;  %v14550_v14 = vld [vmem:[%s16071_s17 + $0x74] ss:$8 sps:$4 sm:$0xff]  }
 0x5cf   : > { %v14546_v41 = vld [vmem:[%s16071_s17 + $0x664] ss:$8 sps:$4 sm:$0xff]   ;;  %v14549_v33 = vld [vmem:[%s16071_s17 + $0x660] ss:$8 sps:$4 sm:$0xff]   ;;  %v14552_v10 = vld [vmem:[%s16071_s17 + $0x674] ss:$8 sps:$4 sm:$0xff]  }
 0x5d0   : > { %11206 = vmatpush1.bf16.msra.mxu1 %v14524_v57  ;;  %v14554_v9 = vld [vmem:[%s16071_s17 + $0x70] ss:$8 sps:$4 sm:$0xff]   ;;  %v14556_v25 = vld [vmem:[%s16071_s17 + $0x84] ss:$8 sps:$4 sm:$0xff]   ;;  %v14560_v21 = vld [vmem:[%s16071_s17 + $0x80] ss:$8 sps:$4 sm:$0xff]  }
 0x5d1   : > { %11452 = vmatpush1.bf16.msra.mxu0 %v14525_v34  ;;  %11207 = vmatprep.subr.bf16.mxu1 %v14526_v11  ;;  %v14555_v12 = vld [vmem:[%s16071_s17 + $0x670] ss:$8 sps:$4 sm:$0xff]   ;;  %v14558_v46 = vld [vmem:[%s16071_s17 + $0x684] ss:$8 sps:$4 sm:$0xff]   ;;  %v14561_v38 = vld [vmem:[%s16071_s17 + $0x680] ss:$8 sps:$4 sm:$0xff]  }
 0x5d2   : > { %11453 = vmatprep.subr.bf16.mxu0 %v14528_v63  ;;  %v15168_v30 = vmov 1983009808   ;;  %v14562_v6 = vld [vmem:[%s16071_s17 + $0x94] ss:$8 sps:$4 sm:$0xff]   ;;  %v14566_v20 = vld [vmem:[%s16071_s17 + $0x90] ss:$8 sps:$4 sm:$0xff]  }
 0x5d3   : > { %v8676_v58 = vunpack.c.l.s4 %v15168_v30  ;;  %v14564_v60 = vld [vmem:[%s16071_s17 + $0x694] ss:$8 sps:$4 sm:$0xff]   ;;  %v18969_v15 = vshrl.u32 %v8678_v48, 7  ;;  %v14567_v61 = vld [vmem:[%s16071_s17 + $0x690] ss:$8 sps:$4 sm:$0xff]   ;;  %v8663_v40 = vld [vmem:[#allocation3 + $0x18] sm:$0xff] }
 0x5d4   : > { %11208 = vmatpush1.bf16.msra.mxu1 %v14530_v16  ;;  %v14568_v18 = vld [vmem:[%s16071_s17 + $0xa4] ss:$8 sps:$4 sm:$0xff]   ;;  %v14572_v32 = vld [vmem:[%s16071_s17 + $0xa0] ss:$8 sps:$4 sm:$0xff]   ;;  %v14574_v4 = vld [vmem:[%s16071_s17 + $0xb4] ss:$8 sps:$4 sm:$0xff]   ;;  %v8725_v8 = vcombine.high %v8663_v40, %v8663_v40 }
 0x5d5   : > { %11454 = vmatpush1.bf16.msra.mxu0 %v14531_v45  ;;  %11209 = vmatprep.subr.bf16.mxu1 %v14532_v56  ;;  %v8677_v27 = vunpack.c.0.s8 %v8676_v58  ;;  %v14570_v51 = vld [vmem:[%s16071_s17 + $0x6a4] ss:$8 sps:$4 sm:$0xff]   ;;  %v14573_v0 = vld [vmem:[%s16071_s17 + $0x6a0] ss:$8 sps:$4 sm:$0xff]   ;;  %v14576_v36 = vld [vmem:[%s16071_s17 + $0x6b4] ss:$8 sps:$4 sm:$0xff]  }
 0x5d6   : > { %11455 = vmatprep.subr.bf16.mxu0 %v14534_v47  ;;  %v8660_v37 = vld [vmem:[#allocation3] sm:$0xff]  ;;  %v14584_v31 = vld [vmem:[%s16071_s17 + $0xc0] ss:$8 sps:$4 sm:$0xff]   ;;  %vm11197_vm8 = vcmask 523264   ;;  %s15170_s14 = smov [#allocation5]   ;;  %vm11850_vm9 = vcmask 74752  }
 0x5d7   : > { %v18977_v44 = vsub.s32 %v8677_v27, %v18969_v15  ;;  %v14578_v53 = vld [vmem:[%s16071_s17 + $0xb0] ss:$8 sps:$4 sm:$0xff]   ;;  %v14580_v2 = vld [vmem:[%s16071_s17 + $0xc4] ss:$8 sps:$4 sm:$0xff]   ;;  %v14585_v24 = vld [vmem:[%s16071_s17 + $0x6c0] ss:$8 sps:$4 sm:$0xff]   ;;  %v8674_v29 = vcombine.high %v8660_v37, %v8660_v37 }
 0x5d8   : > { %11210 = vmatpush1.bf16.msra.mxu1 %v14536_v23  ;;  %v14579_v17 = vld [vmem:[%s16071_s17 + $0x6b0] ss:$8 sps:$4 sm:$0xff]   ;;  %v14582_v52 = vld [vmem:[%s16071_s17 + $0x6c4] ss:$8 sps:$4 sm:$0xff]   ;;  %v14586_v35 = vld [vmem:[%s16071_s17 + $0xd4] ss:$8 sps:$4 sm:$0xff]  }
 0x5d9   : > { %11456 = vmatpush1.bf16.msra.mxu0 %v14537_v50  ;;  %11211 = vmatprep.subr.bf16.mxu1 %v14538_v42  ;;  %v18983_v13 = vrot.slane %v8660_v37, %v18977_v44  ;;  %v8732_v55 = vrot.slane %v8663_v40, %v18977_v44  ;;  %v14588_v54 = vld [vmem:[%s16071_s17 + $0x6d4] ss:$8 sps:$4 sm:$0xff]   ;;  %v14590_v62 = vld [vmem:[%s16071_s17 + $0xd0] ss:$8 sps:$4 sm:$0xff]   ;;  %v14592_v3 = vld [vmem:[%s16071_s17 + $0xe4] ss:$8 sps:$4 sm:$0xff]   ;;  %v19004_v16 = vrot.slane %v8674_v29, %v18977_v44 }
 0x5da   : > { %11457 = vmatprep.subr.bf16.mxu0 %v14540_v7  ;;  %v14591_v49 = vld [vmem:[%s16071_s17 + $0x6d0] ss:$8 sps:$4 sm:$0xff]   ;;  %v14594_v19 = vld [vmem:[%s16071_s17 + $0x6e4] ss:$8 sps:$4 sm:$0xff]   ;;  %v14596_v57 = vld [vmem:[%s16071_s17 + $0xe0] ss:$8 sps:$4 sm:$0xff]   ;;  %v19007_v45 = vrot.slane %v8725_v8, %v18977_v44 }
 0x5db   : > { %v8689_v5 = vcombine.high %v18983_v13, %v18983_v13  ;;  %v8740_v22 = vcombine.high %v8732_v55, %v8732_v55  ;;  %v14597_v34 = vld [vmem:[%s16071_s17 + $0x6e0] ss:$8 sps:$4 sm:$0xff]   ;;  %v14598_v11 = vld [vmem:[%s16071_s17 + $0xf4] ss:$8 sps:$4 sm:$0xff]   ;;  %v14602_v56 = vld [vmem:[%s16071_s17 + $0xf0] ss:$8 sps:$4 sm:$0xff]   ;;  %v8690_v42 = vcombine.high %v19004_v16, %v19004_v16 }
 0x5dc   : > { %11212 = vmatpush1.bf16.msra.mxu1 %v14542_v1  ;;  %v14600_v63 = vld [vmem:[%s16071_s17 + $0x6f4] ss:$8 sps:$4 sm:$0xff]   ;;  %v14603_v47 = vld [vmem:[%s16071_s17 + $0x6f0] ss:$8 sps:$4 sm:$0xff]   ;;  %v14607_v23 = vld [vmem:[%s16071_s17 + $0x104] ss:$8 sps:$4 sm:$0xff]   ;;  %v8741_v7 = vcombine.high %v19007_v45, %v19007_v45  ;;  %v8808_v1 = vpack.c.bf16 %v18983_v13, %v18983_v13 }
 0x5dd   : > { %11458 = vmatpush1.bf16.msra.mxu0 %v14543_v59  ;;  %11213 = vmatprep.subr.bf16.mxu1 %v14544_v26  ;;  %v8809_v43 = vpack.c.bf16 %v8689_v5, %v8689_v5  ;;  %v8821_v39 = vpack.c.bf16 %v8740_v22, %v8740_v22  ;;  %v14611_v50 = vld [vmem:[%s16071_s17 + $0x704] ss:$8 sps:$4 sm:$0xff]   ;;  %v8820_v59 = vpack.c.bf16 %v8732_v55, %v8732_v55  ;;  %v14605_v26 = vld [vmem:[%s16071_s17 + $0x100] ss:$8 sps:$4 sm:$0xff]   ;;  %v14626_v30 = vld [vmem:[%s16071_s17 + $0x134] ss:$8 sps:$4 sm:$0xff]  }
 0x5de   : > { %11459 = vmatprep.subr.bf16.mxu0 %v14546_v41  ;;  %v14609_v41 = vld [vmem:[%s16071_s17 + $0x700] ss:$8 sps:$4 sm:$0xff]   ;;  %v14629_v58 = vld [vmem:[%s16071_s17 + $0x734] ss:$8 sps:$4 sm:$0xff]   ;;  %v14624_v48 = vld [vmem:[%s16071_s17 + $0x130] ss:$8 sps:$4 sm:$0xff]  }
 0x5df   : > { %11233 = vmatprep.mubr.bf16.mxu1 %v8809_v43  ;;  %11479 = vmatprep.mubr.bf16.mxu0 %v8821_v39  ;;  %v14630_v27 = vld [vmem:[%s16071_s17 + $0x140] ss:$8 sps:$4 sm:$0xff]   ;;  %v14650_v13 = vld [vmem:[%s16071_s17 + $0x174] ss:$8 sps:$4 sm:$0xff]   ;;  %v14648_v40 = vld [vmem:[%s16071_s17 + $0x170] ss:$8 sps:$4 sm:$0xff]  }
 0x5e0   : > { %11214 = vmatpush1.bf16.msra.mxu1 %v14548_v28  ;;  %v14614_v28 = vld [vmem:[%s16071_s17 + $0x114] ss:$8 sps:$4 sm:$0xff]   ;;  %v14642_v37 = vld [vmem:[%s16071_s17 + $0x160] ss:$8 sps:$4 sm:$0xff]   ;;  %v14659_v5 = vld [vmem:[%s16071_s17 + $0x784] ss:$8 sps:$4 sm:$0xff]  }
 0x5e1   : > { %11460 = vmatpush1.bf16.msra.mxu0 %v14549_v33  ;;  %11215 = vmatprep.subr.bf16.mxu1 %v14550_v14  ;;  %v14617_v33 = vld [vmem:[%s16071_s17 + $0x714] ss:$8 sps:$4 sm:$0xff]   ;;  %v8811_v14 = vpack.c.bf16 %v8690_v42, %v8690_v42  ;;  %v14654_v55 = vld [vmem:[%s16071_s17 + $0x180] ss:$8 sps:$4 sm:$0xff]   ;;  %v14671_v39 = vld [vmem:[%s16071_s17 + $0x7a4] ss:$8 sps:$4 sm:$0xff]  }
 0x5e2   : > { %11461 = vmatprep.subr.bf16.mxu0 %v14552_v10  ;;  %v8823_v10 = vpack.c.bf16 %v8741_v7, %v8741_v7  ;;  %v14657_v43 = vld [vmem:[%s16071_s17 + $0x780] ss:$8 sps:$4 sm:$0xff]   ;;  %v14662_v22 = vld [vmem:[%s16071_s17 + $0x194] ss:$8 sps:$4 sm:$0xff]   ;;  %v14672_v29 = vld [vmem:[%s16071_s17 + $0x1b0] ss:$8 sps:$4 sm:$0xff]  }
 0x5e3   : > { %v14675_v8 = vld [vmem:[%s16071_s17 + $0x7b0] ss:$8 sps:$4 sm:$0xff]   ;;  %v14692_v42 = vld [vmem:[%s16071_s17 + $0x1e4] ss:$8 sps:$4 sm:$0xff]   ;;  %p13694_p11 = scmp.eq.s32.totalorder %s15247_s20, 3 }
 0x5e4   : > { %11216 = vmatpush1.bf16.msra.mxu1 %v14554_v9  ;;  %v14612_v9 = vld [vmem:[%s16071_s17 + $0x110] ss:$8 sps:$4 sm:$0xff]   ;;  %v14695_v7 = vld [vmem:[%s16071_s17 + $0x7e4] ss:$8 sps:$4 sm:$0xff]  }
 0x5e5   : > { %11462 = vmatpush1.bf16.msra.mxu0 %v14555_v12  ;;  %11217 = vmatprep.subr.bf16.mxu1 %v14556_v25  ;;  %v14615_v12 = vld [vmem:[%s16071_s17 + $0x710] ss:$8 sps:$4 sm:$0xff]   ;;  %v14620_v25 = vld [vmem:[%s16071_s17 + $0x124] ss:$8 sps:$4 sm:$0xff]  }
 0x5e6   : > { %11463 = vmatprep.subr.bf16.mxu0 %v14558_v46  ;;  %v14623_v46 = vld [vmem:[%s16071_s17 + $0x724] ss:$8 sps:$4 sm:$0xff]  }
 0x5e8   : > { %11218 = vmatpush1.bf16.msra.mxu1 %v14560_v21  ;;  %v14618_v21 = vld [vmem:[%s16071_s17 + $0x120] ss:$8 sps:$4 sm:$0xff]  }
 0x5e9   : > { %11464 = vmatpush1.bf16.msra.mxu0 %v14561_v38  ;;  %11219 = vmatprep.subr.bf16.mxu1 %v14562_v6  ;;  %v14621_v38 = vld [vmem:[%s16071_s17 + $0x720] ss:$8 sps:$4 sm:$0xff]   ;;  %v14627_v6 = vld [vmem:[%s16071_s17 + $0x730] ss:$8 sps:$4 sm:$0xff]  }
 0x5ea   : > { %11465 = vmatprep.subr.bf16.mxu0 %v14564_v60  ;;  %v14632_v60 = vld [vmem:[%s16071_s17 + $0x144] ss:$8 sps:$4 sm:$0xff]  }
 0x5ec   : > { %11220 = vmatpush1.bf16.msra.mxu1 %v14566_v20  ;;  %v14635_v20 = vld [vmem:[%s16071_s17 + $0x744] ss:$8 sps:$4 sm:$0xff]  }
 0x5ed   : > { %11466 = vmatpush1.bf16.msra.mxu0 %v14567_v61  ;;  %11221 = vmatprep.subr.bf16.mxu1 %v14568_v18  ;;  %v14633_v61 = vld [vmem:[%s16071_s17 + $0x740] ss:$8 sps:$4 sm:$0xff]   ;;  %v14638_v18 = vld [vmem:[%s16071_s17 + $0x154] ss:$8 sps:$4 sm:$0xff]  }
 0x5ee   : > { %11467 = vmatprep.subr.bf16.mxu0 %v14570_v51  ;;  %v14641_v51 = vld [vmem:[%s16071_s17 + $0x754] ss:$8 sps:$4 sm:$0xff]  }
 0x5f0   : > { %11222 = vmatpush1.bf16.msra.mxu1 %v14572_v32  ;;  %v14636_v32 = vld [vmem:[%s16071_s17 + $0x150] ss:$8 sps:$4 sm:$0xff]  }
 0x5f1   : > { %11468 = vmatpush1.bf16.msra.mxu0 %v14573_v0  ;;  %11223 = vmatprep.subr.bf16.mxu1 %v14574_v4  ;;  %v14639_v0 = vld [vmem:[%s16071_s17 + $0x750] ss:$8 sps:$4 sm:$0xff]   ;;  %v14644_v4 = vld [vmem:[%s16071_s17 + $0x164] ss:$8 sps:$4 sm:$0xff]  }
 0x5f2   : > { %11469 = vmatprep.subr.bf16.mxu0 %v14576_v36  ;;  %v14647_v36 = vld [vmem:[%s16071_s17 + $0x764] ss:$8 sps:$4 sm:$0xff]  }
 0x5f4   : > { %11224 = vmatpush1.bf16.msra.mxu1 %v14578_v53  ;;  %v14645_v53 = vld [vmem:[%s16071_s17 + $0x760] ss:$8 sps:$4 sm:$0xff]  }
 0x5f5   : > { %11470 = vmatpush1.bf16.msra.mxu0 %v14579_v17  ;;  %11225 = vmatprep.subr.bf16.mxu1 %v14580_v2  ;;  %v14653_v17 = vld [vmem:[%s16071_s17 + $0x774] ss:$8 sps:$4 sm:$0xff]   ;;  %v14651_v2 = vld [vmem:[%s16071_s17 + $0x770] ss:$8 sps:$4 sm:$0xff]  }
 0x5f6   : > { %11471 = vmatprep.subr.bf16.mxu0 %v14582_v52  ;;  %v14656_v52 = vld [vmem:[%s16071_s17 + $0x184] ss:$8 sps:$4 sm:$0xff]  }
 0x5f8   : > { %11226 = vmatpush1.bf16.msra.mxu1 %v14584_v31  ;;  %v14665_v31 = vld [vmem:[%s16071_s17 + $0x794] ss:$8 sps:$4 sm:$0xff]  }
 0x5f9   : > { %11472 = vmatpush1.bf16.msra.mxu0 %v14585_v24  ;;  %11227 = vmatprep.subr.bf16.mxu1 %v14586_v35  ;;  %v14660_v24 = vld [vmem:[%s16071_s17 + $0x190] ss:$8 sps:$4 sm:$0xff]  }
 0x5fa   : > { %11473 = vmatprep.subr.bf16.mxu0 %v14588_v54  ;;  %v14663_v35 = vld [vmem:[%s16071_s17 + $0x790] ss:$8 sps:$4 sm:$0xff]   ;;  %v14668_v54 = vld [vmem:[%s16071_s17 + $0x1a4] ss:$8 sps:$4 sm:$0xff]  }
 0x5fc   : > { %11228 = vmatpush1.bf16.msra.mxu1 %v14590_v62  ;;  %v14666_v62 = vld [vmem:[%s16071_s17 + $0x1a0] ss:$8 sps:$4 sm:$0xff]  }
 0x5fd   : > { %11474 = vmatpush1.bf16.msra.mxu0 %v14591_v49  ;;  %11229 = vmatprep.subr.bf16.mxu1 %v14592_v3  ;;  %v14669_v49 = vld [vmem:[%s16071_s17 + $0x7a0] ss:$8 sps:$4 sm:$0xff]   ;;  %v14674_v3 = vld [vmem:[%s16071_s17 + $0x1b4] ss:$8 sps:$4 sm:$0xff]  }
 0x5fe   : > { %11475 = vmatprep.subr.bf16.mxu0 %v14594_v19  ;;  %v14677_v19 = vld [vmem:[%s16071_s17 + $0x7b4] ss:$8 sps:$4 sm:$0xff]  }
 0x600   : > { %11230 = vmatpush1.bf16.msra.mxu1 %v14596_v57  ;;  %v14680_v57 = vld [vmem:[%s16071_s17 + $0x1c4] ss:$8 sps:$4 sm:$0xff]  }
 0x601   : > { %11476 = vmatpush1.bf16.msra.mxu0 %v14597_v34  ;;  %11231 = vmatprep.subr.bf16.mxu1 %v14598_v11  ;;  %v14683_v34 = vld [vmem:[%s16071_s17 + $0x7c4] ss:$8 sps:$4 sm:$0xff]   ;;  %v14678_v11 = vld [vmem:[%s16071_s17 + $0x1c0] ss:$8 sps:$4 sm:$0xff]  }
 0x602   : > { %11477 = vmatprep.subr.bf16.mxu0 %v14600_v63  ;;  %v14681_v63 = vld [vmem:[%s16071_s17 + $0x7c0] ss:$8 sps:$4 sm:$0xff]  }
 0x604   : > { %11232 = vmatpush1.bf16.msra.mxu1 %v14602_v56  ;;  %v14686_v56 = vld [vmem:[%s16071_s17 + $0x1d4] ss:$8 sps:$4 sm:$0xff]  }
 0x605   : > { %11478 = vmatpush1.bf16.msra.mxu0 %v14603_v47  ;;  %11242 = vmatprep.subr.bf16.mxu1 %v14607_v23  ;;  %v14689_v47 = vld [vmem:[%s16071_s17 + $0x7d4] ss:$8 sps:$4 sm:$0xff]   ;;  %v14684_v23 = vld [vmem:[%s16071_s17 + $0x1d0] ss:$8 sps:$4 sm:$0xff]  }
 0x606   : > { %11488 = vmatprep.subr.bf16.mxu0 %v14611_v50  ;;  %v14687_v50 = vld [vmem:[%s16071_s17 + $0x7d0] ss:$8 sps:$4 sm:$0xff]  }
 0x607   : > { %11234 = vmatmul.mubr.bf16.vlgmr.msra.gmra.mrb[0].mxu1 %v8808_v1  ;;  %v14690_v1 = vld [vmem:[%s16071_s17 + $0x1e0] ss:$8 sps:$4 sm:$0xff]  }
 0x608   : > { %11480 = vmatmul.mubr.bf16.vlgmr.msra.gmra.mrb[0].mxu0 %v8820_v59  ;;  %11243 = vmatpush1.bf16.msra.mxu1 %v14605_v26  ;;  %v14693_v59 = vld [vmem:[%s16071_s17 + $0x7e0] ss:$8 sps:$4 sm:$0xff]   ;;  %v14698_v26 = vld [vmem:[%s16071_s17 + $0x1f4] ss:$8 sps:$4 sm:$0xff]  }
 0x609   : > { %11489 = vmatpush1.bf16.msra.mxu0 %v14609_v41  ;;  %11244 = vmatprep.subr.bf16.mxu1 %v14614_v28  ;;  %v14701_v41 = vld [vmem:[%s16071_s17 + $0x7f4] ss:$8 sps:$4 sm:$0xff]   ;;  %v14696_v28 = vld [vmem:[%s16071_s17 + $0x1f0] ss:$8 sps:$4 sm:$0xff]  }
 0x60a   : > { %11490 = vmatprep.subr.bf16.mxu0 %v14617_v33  ;;  %11274 = vmatprep.mubr.bf16.mxu1 %v8811_v14  ;;  %v14699_v33 = vld [vmem:[%s16071_s17 + $0x7f0] ss:$8 sps:$4 sm:$0xff]   ;;  %v14704_v14 = vld [vmem:[%s16071_s17 + $0x204] ss:$8 sps:$4 sm:$0xff]  }
 0x60b   : > { %11520 = vmatprep.mubr.bf16.mxu0 %v8823_v10  ;;  %v14707_v10 = vld [vmem:[%s16071_s17 + $0x804] ss:$8 sps:$4 sm:$0xff]  }
 0x60c   : > { %11245 = vmatpush1.bf16.msra.mxu1 %v14612_v9  ;;  %v14702_v9 = vld [vmem:[%s16071_s17 + $0x200] ss:$8 sps:$4 sm:$0xff]  }
 0x60d   : > { %11491 = vmatpush1.bf16.msra.mxu0 %v14615_v12  ;;  %11246 = vmatprep.subr.bf16.mxu1 %v14620_v25  ;;  %v8810_v12 = vpack.c.bf16 %v19004_v16, %v19004_v16  ;;  %v8822_v25 = vpack.c.bf16 %v19007_v45, %v19007_v45  ;;  %v19097_v16 = vld [vmem:[#allocation3 + $0x20] sm:$0xff] }
 0x60e   : > { %11492 = vmatprep.subr.bf16.mxu0 %v14623_v46  ;;  %v14705_v46 = vld [vmem:[%s16071_s17 + $0x800] ss:$8 sps:$4 sm:$0xff]   ;;  %v14708_v45 = vld [vmem:[%s16071_s17 + $0x210] ss:$8 sps:$4 sm:$0xff]  }
 0x610   : > { %11247 = vmatpush1.bf16.msra.mxu1 %v14618_v21  ;;  %v14710_v21 = vld [vmem:[%s16071_s17 + $0x214] ss:$8 sps:$4 sm:$0xff]  }
 0x611   : > { %11493 = vmatpush1.bf16.msra.mxu0 %v14621_v38  ;;  %11248 = vmatprep.subr.bf16.mxu1 %v14626_v30  ;;  %v19090_v38 = vld [vmem:[#allocation3 + $0x8] sm:$0xff] }
 0x612   : > { %11494 = vmatprep.subr.bf16.mxu0 %v14629_v58  ;;  %v14713_v30 = vld [vmem:[%s16071_s17 + $0x814] ss:$8 sps:$4 sm:$0xff]   ;;  %v19095_v58 = vrot.slane %v19090_v38, %v18977_v44 }
 0x614   : > { %11249 = vmatpush1.bf16.msra.mxu1 %v14624_v48  ;;  %v14711_v48 = vld [vmem:[%s16071_s17 + $0x810] ss:$8 sps:$4 sm:$0xff]  }
 0x615   : > { %11495 = vmatpush1.bf16.msra.mxu0 %v14627_v6  ;;  %11250 = vmatprep.subr.bf16.mxu1 %v14632_v60  ;;  %v8706_v6 = vcombine.high %v19095_v58, %v19095_v58  ;;  %v19105_v60 = vrot.slane %v19097_v16, %v18977_v44 }
 0x616   : > { %11496 = vmatprep.subr.bf16.mxu0 %v14635_v20  ;;  %v14716_v20 = vld [vmem:[%s16071_s17 + $0x224] ss:$8 sps:$4 sm:$0xff]  }
 0x618   : > { %11251 = vmatpush1.bf16.msra.mxu1 %v14630_v27  ;;  %v14719_v27 = vld [vmem:[%s16071_s17 + $0x824] ss:$8 sps:$4 sm:$0xff]  }
 0x619   : > { %11497 = vmatpush1.bf16.msra.mxu0 %v14633_v61  ;;  %11252 = vmatprep.subr.bf16.mxu1 %v14638_v18  ;;  %v8813_v61 = vpack.c.bf16 %v8706_v6, %v8706_v6  ;;  %v8757_v18 = vcombine.high %v19105_v60, %v19105_v60  ;;  %v14794_v6 = vld [vmem:[%s16071_s17 + $0x2f4] ss:$8 sps:$4 sm:$0xff]  }
 0x61a   : > { %11498 = vmatprep.subr.bf16.mxu0 %v14641_v51  ;;  %v14714_v51 = vld [vmem:[%s16071_s17 + $0x220] ss:$8 sps:$4 sm:$0xff]  }
 0x61c   : > { %11253 = vmatpush1.bf16.msra.mxu1 %v14636_v32  ;;  %v14717_v32 = vld [vmem:[%s16071_s17 + $0x820] ss:$8 sps:$4 sm:$0xff]  }
 0x61d   : > { %11499 = vmatpush1.bf16.msra.mxu0 %v14639_v0  ;;  %11254 = vmatprep.subr.bf16.mxu1 %v14644_v4  ;;  %v8825_v0 = vpack.c.bf16 %v8757_v18, %v8757_v18  ;;  %v14722_v4 = vld [vmem:[%s16071_s17 + $0x234] ss:$8 sps:$4 sm:$0xff]   ;;  %v14800_v18 = vld [vmem:[%s16071_s17 + $0x304] ss:$8 sps:$4 sm:$0xff]  }
 0x61e   : > { %11500 = vmatprep.subr.bf16.mxu0 %v14647_v36  ;;  %v14725_v36 = vld [vmem:[%s16071_s17 + $0x834] ss:$8 sps:$4 sm:$0xff]  }
 0x620   : > { %11255 = vmatpush1.bf16.msra.mxu1 %v14642_v37  ;;  %v14720_v37 = vld [vmem:[%s16071_s17 + $0x230] ss:$8 sps:$4 sm:$0xff]  }
 0x621   : > { %11501 = vmatpush1.bf16.msra.mxu0 %v14645_v53  ;;  %11256 = vmatprep.subr.bf16.mxu1 %v14650_v13  ;;  %v14723_v53 = vld [vmem:[%s16071_s17 + $0x830] ss:$8 sps:$4 sm:$0xff]   ;;  %v14728_v13 = vld [vmem:[%s16071_s17 + $0x244] ss:$8 sps:$4 sm:$0xff]  }
 0x622   : > { %11502 = vmatprep.subr.bf16.mxu0 %v14653_v17  ;;  %v14731_v17 = vld [vmem:[%s16071_s17 + $0x844] ss:$8 sps:$4 sm:$0xff]  }
 0x624   : > { %11257 = vmatpush1.bf16.msra.mxu1 %v14648_v40  ;;  %v14726_v40 = vld [vmem:[%s16071_s17 + $0x240] ss:$8 sps:$4 sm:$0xff]  }
 0x625   : > { %11503 = vmatpush1.bf16.msra.mxu0 %v14651_v2  ;;  %11258 = vmatprep.subr.bf16.mxu1 %v14656_v52  ;;  %v14729_v2 = vld [vmem:[%s16071_s17 + $0x840] ss:$8 sps:$4 sm:$0xff]   ;;  %v14734_v52 = vld [vmem:[%s16071_s17 + $0x254] ss:$8 sps:$4 sm:$0xff]  }
 0x626   : > { %11504 = vmatprep.subr.bf16.mxu0 %v14659_v5  ;;  %v14737_v5 = vld [vmem:[%s16071_s17 + $0x854] ss:$8 sps:$4 sm:$0xff]  }
 0x628   : > { %11259 = vmatpush1.bf16.msra.mxu1 %v14654_v55  ;;  %v14732_v55 = vld [vmem:[%s16071_s17 + $0x250] ss:$8 sps:$4 sm:$0xff]  }
 0x629   : > { %11505 = vmatpush1.bf16.msra.mxu0 %v14657_v43  ;;  %11260 = vmatprep.subr.bf16.mxu1 %v14662_v22  ;;  %v14735_v43 = vld [vmem:[%s16071_s17 + $0x850] ss:$8 sps:$4 sm:$0xff]   ;;  %v14740_v22 = vld [vmem:[%s16071_s17 + $0x264] ss:$8 sps:$4 sm:$0xff]  }
 0x62a   : > { %11506 = vmatprep.subr.bf16.mxu0 %v14665_v31  ;;  %v14743_v31 = vld [vmem:[%s16071_s17 + $0x864] ss:$8 sps:$4 sm:$0xff]  }
 0x62c   : > { %11261 = vmatpush1.bf16.msra.mxu1 %v14660_v24  ;;  %v14738_v24 = vld [vmem:[%s16071_s17 + $0x260] ss:$8 sps:$4 sm:$0xff]  }
 0x62d   : > { %11507 = vmatpush1.bf16.msra.mxu0 %v14663_v35  ;;  %11262 = vmatprep.subr.bf16.mxu1 %v14668_v54  ;;  %v14741_v35 = vld [vmem:[%s16071_s17 + $0x860] ss:$8 sps:$4 sm:$0xff]   ;;  %v14746_v54 = vld [vmem:[%s16071_s17 + $0x274] ss:$8 sps:$4 sm:$0xff]  }
 0x62e   : > { %11508 = vmatprep.subr.bf16.mxu0 %v14671_v39  ;;  %v14749_v39 = vld [vmem:[%s16071_s17 + $0x874] ss:$8 sps:$4 sm:$0xff]  }
 0x630   : > { %11263 = vmatpush1.bf16.msra.mxu1 %v14666_v62  ;;  %v14744_v62 = vld [vmem:[%s16071_s17 + $0x270] ss:$8 sps:$4 sm:$0xff]  }
 0x631   : > { %11509 = vmatpush1.bf16.msra.mxu0 %v14669_v49  ;;  %11264 = vmatprep.subr.bf16.mxu1 %v14674_v3  ;;  %v14747_v49 = vld [vmem:[%s16071_s17 + $0x870] ss:$8 sps:$4 sm:$0xff]   ;;  %v14752_v3 = vld [vmem:[%s16071_s17 + $0x284] ss:$8 sps:$4 sm:$0xff]  }
 0x632   : > { %11510 = vmatprep.subr.bf16.mxu0 %v14677_v19  ;;  %v14755_v19 = vld [vmem:[%s16071_s17 + $0x884] ss:$8 sps:$4 sm:$0xff]  }
 0x634   : > { %11265 = vmatpush1.bf16.msra.mxu1 %v14672_v29  ;;  %v14750_v29 = vld [vmem:[%s16071_s17 + $0x280] ss:$8 sps:$4 sm:$0xff]  }
 0x635   : > { %11511 = vmatpush1.bf16.msra.mxu0 %v14675_v8  ;;  %11266 = vmatprep.subr.bf16.mxu1 %v14680_v57  ;;  %v14753_v8 = vld [vmem:[%s16071_s17 + $0x880] ss:$8 sps:$4 sm:$0xff]   ;;  %v14758_v57 = vld [vmem:[%s16071_s17 + $0x294] ss:$8 sps:$4 sm:$0xff]  }
 0x636   : > { %11512 = vmatprep.subr.bf16.mxu0 %v14683_v34  ;;  %v14761_v34 = vld [vmem:[%s16071_s17 + $0x894] ss:$8 sps:$4 sm:$0xff]  }
 0x638   : > { %11267 = vmatpush1.bf16.msra.mxu1 %v14678_v11  ;;  %v14756_v11 = vld [vmem:[%s16071_s17 + $0x290] ss:$8 sps:$4 sm:$0xff]  }
 0x639   : > { %11513 = vmatpush1.bf16.msra.mxu0 %v14681_v63  ;;  %11268 = vmatprep.subr.bf16.mxu1 %v14686_v56  ;;  %v14759_v63 = vld [vmem:[%s16071_s17 + $0x890] ss:$8 sps:$4 sm:$0xff]   ;;  %v14764_v56 = vld [vmem:[%s16071_s17 + $0x2a4] ss:$8 sps:$4 sm:$0xff]  }
 0x63a   : > { %11514 = vmatprep.subr.bf16.mxu0 %v14689_v47  ;;  %v14767_v47 = vld [vmem:[%s16071_s17 + $0x8a4] ss:$8 sps:$4 sm:$0xff]  }
 0x63c   : > { %11269 = vmatpush1.bf16.msra.mxu1 %v14684_v23  ;;  %v14762_v23 = vld [vmem:[%s16071_s17 + $0x2a0] ss:$8 sps:$4 sm:$0xff]  }
 0x63d   : > { %11515 = vmatpush1.bf16.msra.mxu0 %v14687_v50  ;;  %11270 = vmatprep.subr.bf16.mxu1 %v14692_v42  ;;  %v14765_v50 = vld [vmem:[%s16071_s17 + $0x8a0] ss:$8 sps:$4 sm:$0xff]   ;;  %v14770_v42 = vld [vmem:[%s16071_s17 + $0x2b4] ss:$8 sps:$4 sm:$0xff]  }
 0x63e   : > { %11516 = vmatprep.subr.bf16.mxu0 %v14695_v7  ;;  %v14773_v7 = vld [vmem:[%s16071_s17 + $0x8b4] ss:$8 sps:$4 sm:$0xff]  }
 0x640   : > { %11271 = vmatpush1.bf16.msra.mxu1 %v14690_v1  ;;  %v14768_v1 = vld [vmem:[%s16071_s17 + $0x2b0] ss:$8 sps:$4 sm:$0xff]  }
 0x641   : > { %11517 = vmatpush1.bf16.msra.mxu0 %v14693_v59  ;;  %11272 = vmatprep.subr.bf16.mxu1 %v14698_v26  ;;  %v14771_v59 = vld [vmem:[%s16071_s17 + $0x8b0] ss:$8 sps:$4 sm:$0xff]   ;;  %v14776_v26 = vld [vmem:[%s16071_s17 + $0x2c4] ss:$8 sps:$4 sm:$0xff]  }
 0x642   : > { %11518 = vmatprep.subr.bf16.mxu0 %v14701_v41  ;;  %v14779_v41 = vld [vmem:[%s16071_s17 + $0x8c4] ss:$8 sps:$4 sm:$0xff]  }
 0x644   : > { %11273 = vmatpush1.bf16.msra.mxu1 %v14696_v28  ;;  %v14774_v28 = vld [vmem:[%s16071_s17 + $0x2c0] ss:$8 sps:$4 sm:$0xff]  }
 0x645   : > { %11519 = vmatpush1.bf16.msra.mxu0 %v14699_v33  ;;  %11283 = vmatprep.subr.bf16.mxu1 %v14704_v14  ;;  %v14777_v33 = vld [vmem:[%s16071_s17 + $0x8c0] ss:$8 sps:$4 sm:$0xff]   ;;  %v14782_v14 = vld [vmem:[%s16071_s17 + $0x2d4] ss:$8 sps:$4 sm:$0xff]  }
 0x646   : > { %11529 = vmatprep.subr.bf16.mxu0 %v14707_v10  ;;  %v14785_v10 = vld [vmem:[%s16071_s17 + $0x8d4] ss:$8 sps:$4 sm:$0xff]  }
 0x647   : > { %11275 = vmatmul.mubr.bf16.vlgmr.msra.gmra.mrb[0].mxu1 %v8810_v12  ;;  %v14783_v12 = vld [vmem:[%s16071_s17 + $0x8d0] ss:$8 sps:$4 sm:$0xff]  }
 0x648   : > { %11521 = vmatmul.mubr.bf16.vlgmr.msra.gmra.mrb[0].mxu0 %v8822_v25  ;;  %11284 = vmatpush1.bf16.msra.mxu1 %v14702_v9  ;;  %v14780_v9 = vld [vmem:[%s16071_s17 + $0x2d0] ss:$8 sps:$4 sm:$0xff]   ;;  %v14788_v25 = vld [vmem:[%s16071_s17 + $0x2e4] ss:$8 sps:$4 sm:$0xff]  }
 0x649   : > { %11530 = vmatpush1.bf16.msra.mxu0 %v14705_v46  ;;  %11285 = vmatprep.subr.bf16.mxu1 %v14710_v21  ;;  %v14791_v46 = vld [vmem:[%s16071_s17 + $0x8e4] ss:$8 sps:$4 sm:$0xff]   ;;  %v8691_v21 = vcombine.high %v19090_v38, %v19090_v38 }
 0x64a   : > { %11531 = vmatprep.subr.bf16.mxu0 %v14713_v30  ;;  %11315 = vmatprep.mubr.bf16.mxu1 %v8813_v61  ;;  %v8742_v30 = vcombine.high %v19097_v16, %v19097_v16  ;;  %v14792_v61 = vld [vmem:[%s16071_s17 + $0x2f0] ss:$8 sps:$4 sm:$0xff]  }
 0x64b   : > { %11561 = vmatprep.mubr.bf16.mxu0 %v8825_v0  ;;  %v14795_v16 = vld [vmem:[%s16071_s17 + $0x8f0] ss:$8 sps:$4 sm:$0xff]  }
 0x64c   : > { %11286 = vmatpush1.bf16.msra.mxu1 %v14708_v45  ;;  %v14786_v45 = vld [vmem:[%s16071_s17 + $0x2e0] ss:$8 sps:$4 sm:$0xff]   ;;  %v19171_v38 = vrot.slane %v8742_v30, %v18977_v44  ;;  %v14867_v30 = vld [vmem:[%s16071_s17 + $0x9b0] ss:$8 sps:$4 sm:$0xff]  }
 0x64d   : > { %11532 = vmatpush1.bf16.msra.mxu0 %v14711_v48  ;;  %11287 = vmatprep.subr.bf16.mxu1 %v14716_v20  ;;  %v14789_v48 = vld [vmem:[%s16071_s17 + $0x8e0] ss:$8 sps:$4 sm:$0xff]   ;;  %v14797_v20 = vld [vmem:[%s16071_s17 + $0x8f4] ss:$8 sps:$4 sm:$0xff]  }
 0x64e   : > { %11533 = vmatprep.subr.bf16.mxu0 %v14719_v27  ;;  %v19168_v27 = vrot.slane %v8691_v21, %v18977_v44  ;;  %v8758_v0 = vcombine.high %v19171_v38, %v19171_v38  ;;  %v14864_v21 = vld [vmem:[%s16071_s17 + $0x3b0] ss:$8 sps:$4 sm:$0xff]  }
 0x650   : > { %11288 = vmatpush1.bf16.msra.mxu1 %v14714_v51  ;;  %v14803_v51 = vld [vmem:[%s16071_s17 + $0x904] ss:$8 sps:$4 sm:$0xff]  }
 0x651   : > { %11534 = vmatpush1.bf16.msra.mxu0 %v14717_v32  ;;  %11289 = vmatprep.subr.bf16.mxu1 %v14722_v4  ;;  %v8707_v32 = vcombine.high %v19168_v27, %v19168_v27  ;;  %v14798_v4 = vld [vmem:[%s16071_s17 + $0x300] ss:$8 sps:$4 sm:$0xff]  }
 0x652   : > { %11535 = vmatprep.subr.bf16.mxu0 %v14725_v36  ;;  %v14801_v36 = vld [vmem:[%s16071_s17 + $0x900] ss:$8 sps:$4 sm:$0xff]  }
 0x654   : > { %11290 = vmatpush1.bf16.msra.mxu1 %v14720_v37  ;;  %v8812_v37 = vpack.c.bf16 %v19095_v58, %v19095_v58  ;;  %v14807_v58 = vld [vmem:[%s16071_s17 + $0x910] ss:$8 sps:$4 sm:$0xff]  }
 0x655   : > { %11536 = vmatpush1.bf16.msra.mxu0 %v14723_v53  ;;  %11291 = vmatprep.subr.bf16.mxu1 %v14728_v13  ;;  %v8824_v53 = vpack.c.bf16 %v19105_v60, %v19105_v60  ;;  %v14806_v13 = vld [vmem:[%s16071_s17 + $0x314] ss:$8 sps:$4 sm:$0xff]   ;;  %v14812_v60 = vld [vmem:[%s16071_s17 + $0x324] ss:$8 sps:$4 sm:$0xff]  }
 0x656   : > { %11537 = vmatprep.subr.bf16.mxu0 %v14731_v17  ;;  %v14809_v17 = vld [vmem:[%s16071_s17 + $0x914] ss:$8 sps:$4 sm:$0xff]  }
 0x658   : > { %11292 = vmatpush1.bf16.msra.mxu1 %v14726_v40  ;;  %v8815_v40 = vpack.c.bf16 %v8707_v32, %v8707_v32  ;;  %v14884_v32 = vld [vmem:[%s16071_s17 + $0x3e4] ss:$8 sps:$4 sm:$0xff]  }
 0x659   : > { %11538 = vmatpush1.bf16.msra.mxu0 %v14729_v2  ;;  %11293 = vmatprep.subr.bf16.mxu1 %v14734_v52  ;;  %v8827_v2 = vpack.c.bf16 %v8758_v0, %v8758_v0  ;;  %v14804_v52 = vld [vmem:[%s16071_s17 + $0x310] ss:$8 sps:$4 sm:$0xff]   ;;  %v14887_v0 = vld [vmem:[%s16071_s17 + $0x9e4] ss:$8 sps:$4 sm:$0xff]  }
 0x65a   : > { %11539 = vmatprep.subr.bf16.mxu0 %v14737_v5  ;;  %v14815_v5 = vld [vmem:[%s16071_s17 + $0x924] ss:$8 sps:$4 sm:$0xff]  }
 0x65c   : > { %11294 = vmatpush1.bf16.msra.mxu1 %v14732_v55  ;;  %v14810_v55 = vld [vmem:[%s16071_s17 + $0x320] ss:$8 sps:$4 sm:$0xff]  }
 0x65d   : > { %11540 = vmatpush1.bf16.msra.mxu0 %v14735_v43  ;;  %11295 = vmatprep.subr.bf16.mxu1 %v14740_v22  ;;  %v14813_v43 = vld [vmem:[%s16071_s17 + $0x920] ss:$8 sps:$4 sm:$0xff]   ;;  %v14818_v22 = vld [vmem:[%s16071_s17 + $0x334] ss:$8 sps:$4 sm:$0xff]  }
 0x65e   : > { %11541 = vmatprep.subr.bf16.mxu0 %v14743_v31  ;;  %v14821_v31 = vld [vmem:[%s16071_s17 + $0x934] ss:$8 sps:$4 sm:$0xff]  }
 0x660   : > { %11296 = vmatpush1.bf16.msra.mxu1 %v14738_v24  ;;  %v14816_v24 = vld [vmem:[%s16071_s17 + $0x330] ss:$8 sps:$4 sm:$0xff]  }
 0x661   : > { %11542 = vmatpush1.bf16.msra.mxu0 %v14741_v35  ;;  %11297 = vmatprep.subr.bf16.mxu1 %v14746_v54  ;;  %v14819_v35 = vld [vmem:[%s16071_s17 + $0x930] ss:$8 sps:$4 sm:$0xff]   ;;  %v14824_v54 = vld [vmem:[%s16071_s17 + $0x344] ss:$8 sps:$4 sm:$0xff]  }
 0x662   : > { %11543 = vmatprep.subr.bf16.mxu0 %v14749_v39  ;;  %v14827_v39 = vld [vmem:[%s16071_s17 + $0x944] ss:$8 sps:$4 sm:$0xff]  }
 0x664   : > { %11298 = vmatpush1.bf16.msra.mxu1 %v14744_v62  ;;  %v14822_v62 = vld [vmem:[%s16071_s17 + $0x340] ss:$8 sps:$4 sm:$0xff]  }
 0x665   : > { %11544 = vmatpush1.bf16.msra.mxu0 %v14747_v49  ;;  %11299 = vmatprep.subr.bf16.mxu1 %v14752_v3  ;;  %v14825_v49 = vld [vmem:[%s16071_s17 + $0x940] ss:$8 sps:$4 sm:$0xff]   ;;  %v14830_v3 = vld [vmem:[%s16071_s17 + $0x354] ss:$8 sps:$4 sm:$0xff]  }
 0x666   : > { %11545 = vmatprep.subr.bf16.mxu0 %v14755_v19  ;;  %v14833_v19 = vld [vmem:[%s16071_s17 + $0x954] ss:$8 sps:$4 sm:$0xff]  }
 0x668   : > { %11300 = vmatpush1.bf16.msra.mxu1 %v14750_v29  ;;  %v14828_v29 = vld [vmem:[%s16071_s17 + $0x350] ss:$8 sps:$4 sm:$0xff]  }
 0x669   : > { %11546 = vmatpush1.bf16.msra.mxu0 %v14753_v8  ;;  %11301 = vmatprep.subr.bf16.mxu1 %v14758_v57  ;;  %v14831_v8 = vld [vmem:[%s16071_s17 + $0x950] ss:$8 sps:$4 sm:$0xff]   ;;  %v14836_v57 = vld [vmem:[%s16071_s17 + $0x364] ss:$8 sps:$4 sm:$0xff]  }
 0x66a   : > { %11547 = vmatprep.subr.bf16.mxu0 %v14761_v34  ;;  %v14839_v34 = vld [vmem:[%s16071_s17 + $0x964] ss:$8 sps:$4 sm:$0xff]  }
 0x66c   : > { %11302 = vmatpush1.bf16.msra.mxu1 %v14756_v11  ;;  %v14834_v11 = vld [vmem:[%s16071_s17 + $0x360] ss:$8 sps:$4 sm:$0xff]  }
 0x66d   : > { %11548 = vmatpush1.bf16.msra.mxu0 %v14759_v63  ;;  %11303 = vmatprep.subr.bf16.mxu1 %v14764_v56  ;;  %v14837_v63 = vld [vmem:[%s16071_s17 + $0x960] ss:$8 sps:$4 sm:$0xff]   ;;  %v14842_v56 = vld [vmem:[%s16071_s17 + $0x374] ss:$8 sps:$4 sm:$0xff]  }
 0x66e   : > { %11549 = vmatprep.subr.bf16.mxu0 %v14767_v47  ;;  %v14845_v47 = vld [vmem:[%s16071_s17 + $0x974] ss:$8 sps:$4 sm:$0xff]  }
 0x670   : > { %11304 = vmatpush1.bf16.msra.mxu1 %v14762_v23  ;;  %v14840_v23 = vld [vmem:[%s16071_s17 + $0x370] ss:$8 sps:$4 sm:$0xff]  }
 0x671   : > { %11550 = vmatpush1.bf16.msra.mxu0 %v14765_v50  ;;  %11305 = vmatprep.subr.bf16.mxu1 %v14770_v42  ;;  %v14843_v50 = vld [vmem:[%s16071_s17 + $0x970] ss:$8 sps:$4 sm:$0xff]   ;;  %v14848_v42 = vld [vmem:[%s16071_s17 + $0x384] ss:$8 sps:$4 sm:$0xff]  }
 0x672   : > { %11551 = vmatprep.subr.bf16.mxu0 %v14773_v7  ;;  %v14851_v7 = vld [vmem:[%s16071_s17 + $0x984] ss:$8 sps:$4 sm:$0xff]  }
 0x674   : > { %11306 = vmatpush1.bf16.msra.mxu1 %v14768_v1  ;;  %v14846_v1 = vld [vmem:[%s16071_s17 + $0x380] ss:$8 sps:$4 sm:$0xff]  }
 0x675   : > { %11552 = vmatpush1.bf16.msra.mxu0 %v14771_v59  ;;  %11307 = vmatprep.subr.bf16.mxu1 %v14776_v26  ;;  %v14849_v59 = vld [vmem:[%s16071_s17 + $0x980] ss:$8 sps:$4 sm:$0xff]   ;;  %v14854_v26 = vld [vmem:[%s16071_s17 + $0x394] ss:$8 sps:$4 sm:$0xff]  }
 0x676   : > { %11553 = vmatprep.subr.bf16.mxu0 %v14779_v41  ;;  %v14857_v41 = vld [vmem:[%s16071_s17 + $0x994] ss:$8 sps:$4 sm:$0xff]  }
 0x678   : > { %11308 = vmatpush1.bf16.msra.mxu1 %v14774_v28  ;;  %v14852_v28 = vld [vmem:[%s16071_s17 + $0x390] ss:$8 sps:$4 sm:$0xff]  }
 0x679   : > { %11554 = vmatpush1.bf16.msra.mxu0 %v14777_v33  ;;  %11309 = vmatprep.subr.bf16.mxu1 %v14782_v14  ;;  %v14855_v33 = vld [vmem:[%s16071_s17 + $0x990] ss:$8 sps:$4 sm:$0xff]   ;;  %v14860_v14 = vld [vmem:[%s16071_s17 + $0x3a4] ss:$8 sps:$4 sm:$0xff]  }
 0x67a   : > { %11555 = vmatprep.subr.bf16.mxu0 %v14785_v10  ;;  %v14863_v10 = vld [vmem:[%s16071_s17 + $0x9a4] ss:$8 sps:$4 sm:$0xff]  }
 0x67c   : > { %11310 = vmatpush1.bf16.msra.mxu1 %v14780_v9  ;;  %v14858_v9 = vld [vmem:[%s16071_s17 + $0x3a0] ss:$8 sps:$4 sm:$0xff]  }
 0x67d   : > { %11556 = vmatpush1.bf16.msra.mxu0 %v14783_v12  ;;  %11311 = vmatprep.subr.bf16.mxu1 %v14788_v25  ;;  %v14861_v12 = vld [vmem:[%s16071_s17 + $0x9a0] ss:$8 sps:$4 sm:$0xff]   ;;  %v14866_v25 = vld [vmem:[%s16071_s17 + $0x3b4] ss:$8 sps:$4 sm:$0xff]  }
 0x67e   : > { %11557 = vmatprep.subr.bf16.mxu0 %v14791_v46  ;;  %v14869_v46 = vld [vmem:[%s16071_s17 + $0x9b4] ss:$8 sps:$4 sm:$0xff]  }
 0x680   : > { %11312 = vmatpush1.bf16.msra.mxu1 %v14786_v45  ;;  %v14872_v45 = vld [vmem:[%s16071_s17 + $0x3c4] ss:$8 sps:$4 sm:$0xff]  }
 0x681   : > { %11558 = vmatpush1.bf16.msra.mxu0 %v14789_v48  ;;  %11313 = vmatprep.subr.bf16.mxu1 %v14794_v6  ;;  %v14875_v48 = vld [vmem:[%s16071_s17 + $0x9c4] ss:$8 sps:$4 sm:$0xff]   ;;  %v14870_v6 = vld [vmem:[%s16071_s17 + $0x3c0] ss:$8 sps:$4 sm:$0xff]  }
 0x682   : > { %11559 = vmatprep.subr.bf16.mxu0 %v14797_v20  ;;  %v14873_v20 = vld [vmem:[%s16071_s17 + $0x9c0] ss:$8 sps:$4 sm:$0xff]  }
 0x684   : > { %11314 = vmatpush1.bf16.msra.mxu1 %v14792_v61  ;;  %v14878_v61 = vld [vmem:[%s16071_s17 + $0x3d4] ss:$8 sps:$4 sm:$0xff]  }
 0x685   : > { %11560 = vmatpush1.bf16.msra.mxu0 %v14795_v16  ;;  %11324 = vmatprep.subr.bf16.mxu1 %v14800_v18  ;;  %v14881_v16 = vld [vmem:[%s16071_s17 + $0x9d4] ss:$8 sps:$4 sm:$0xff]   ;;  %v14876_v18 = vld [vmem:[%s16071_s17 + $0x3d0] ss:$8 sps:$4 sm:$0xff]  }
 0x686   : > { %11570 = vmatprep.subr.bf16.mxu0 %v14803_v51  ;;  %v14879_v51 = vld [vmem:[%s16071_s17 + $0x9d0] ss:$8 sps:$4 sm:$0xff]  }
 0x687   : > { %11316 = vmatmul.mubr.bf16.vlgmr.msra.gmra.mrb[0].mxu1 %v8812_v37  ;;  %v14882_v37 = vld [vmem:[%s16071_s17 + $0x3e0] ss:$8 sps:$4 sm:$0xff]  }
 0x688   : > { %11562 = vmatmul.mubr.bf16.vlgmr.msra.gmra.mrb[0].mxu0 %v8824_v53  ;;  %11325 = vmatpush1.bf16.msra.mxu1 %v14798_v4  ;;  %v19241_v4 = vld [vmem:[#allocation3 + $0x10] sm:$0xff] }
 0x689   : > { %11571 = vmatpush1.bf16.msra.mxu0 %v14801_v36  ;;  %11326 = vmatprep.subr.bf16.mxu1 %v14806_v13  ;;  %v19243_v36 = vld [vmem:[#allocation3 + $0x28] sm:$0xff]  ;;  %v14885_v53 = vld [vmem:[%s16071_s17 + $0x9e0] ss:$8 sps:$4 sm:$0xff]  }
 0x68a   : > { %11572 = vmatprep.subr.bf16.mxu0 %v14809_v17  ;;  %11356 = vmatprep.mubr.bf16.mxu1 %v8815_v40  ;;  %v14890_v13 = vld [vmem:[%s16071_s17 + $0x3f4] ss:$8 sps:$4 sm:$0xff]   ;;  %v19251_v40 = vrot.slane %v19241_v4, %v18977_v44 }
 0x68b   : > { %11602 = vmatprep.mubr.bf16.mxu0 %v8827_v2  ;;  %v14893_v17 = vld [vmem:[%s16071_s17 + $0x9f4] ss:$8 sps:$4 sm:$0xff]   ;;  %v19255_v2 = vrot.slane %v19243_v36, %v18977_v44 }
 0x68c   : > { %11327 = vmatpush1.bf16.msra.mxu1 %v14804_v52  ;;  %v14888_v52 = vld [vmem:[%s16071_s17 + $0x3f0] ss:$8 sps:$4 sm:$0xff]  }
 0x68d   : > { %11573 = vmatpush1.bf16.msra.mxu0 %v14807_v58  ;;  %11328 = vmatprep.subr.bf16.mxu1 %v14812_v60  ;;  %v14891_v58 = vld [vmem:[%s16071_s17 + $0x9f0] ss:$8 sps:$4 sm:$0xff]   ;;  %v14897_v60 = vld [vmem:[%s16071_s17 + $0x404] ss:$8 sps:$4 sm:$0xff]  }
 0x68e   : > { %11574 = vmatprep.subr.bf16.mxu0 %v14815_v5  ;;  %v14901_v5 = vld [vmem:[%s16071_s17 + $0xa04] ss:$8 sps:$4 sm:$0xff]  }
 0x690   : > { %11329 = vmatpush1.bf16.msra.mxu1 %v14810_v55  ;;  %v8723_v55 = vcombine.high %v19251_v40, %v19251_v40 }
 0x691   : > { %11575 = vmatpush1.bf16.msra.mxu0 %v14813_v43  ;;  %11330 = vmatprep.subr.bf16.mxu1 %v14818_v22  ;;  %v8774_v43 = vcombine.high %v19255_v2, %v19255_v2  ;;  %v8814_v22 = vpack.c.bf16 %v19168_v27, %v19168_v27  ;;  %v14905_v27 = vld [vmem:[%s16071_s17 + $0xa10] ss:$8 sps:$4 sm:$0xff]  }
 0x692   : > { %11576 = vmatprep.subr.bf16.mxu0 %v14821_v31  ;;  %v8826_v31 = vpack.c.bf16 %v19171_v38, %v19171_v38  ;;  %v14910_v38 = vld [vmem:[%s16071_s17 + $0x424] ss:$8 sps:$4 sm:$0xff]  }
 0x694   : > { %11331 = vmatpush1.bf16.msra.mxu1 %v14816_v24  ;;  %v14895_v24 = vld [vmem:[%s16071_s17 + $0x400] ss:$8 sps:$4 sm:$0xff]  }
 0x695   : > { %11577 = vmatpush1.bf16.msra.mxu0 %v14819_v35  ;;  %11332 = vmatprep.subr.bf16.mxu1 %v14824_v54  ;;  %v14899_v35 = vld [vmem:[%s16071_s17 + $0xa00] ss:$8 sps:$4 sm:$0xff]   ;;  %v14904_v54 = vld [vmem:[%s16071_s17 + $0x414] ss:$8 sps:$4 sm:$0xff]  }
 0x696   : > { %11578 = vmatprep.subr.bf16.mxu0 %v14827_v39  ;;  %v14907_v39 = vld [vmem:[%s16071_s17 + $0xa14] ss:$8 sps:$4 sm:$0xff]  }
 0x698   : > { %11333 = vmatpush1.bf16.msra.mxu1 %v14822_v62  ;;  %v14902_v62 = vld [vmem:[%s16071_s17 + $0x410] ss:$8 sps:$4 sm:$0xff]  }
 0x699   : > { %11579 = vmatpush1.bf16.msra.mxu0 %v14825_v49  ;;  %11334 = vmatprep.subr.bf16.mxu1 %v14830_v3  ;;  %v8817_v49 = vpack.c.bf16 %v8723_v55, %v8723_v55  ;;  %v8829_v3 = vpack.c.bf16 %v8774_v43, %v8774_v43  ;;  %v14974_v55 = vld [vmem:[%s16071_s17 + $0x4d0] ss:$8 sps:$4 sm:$0xff]  }
 0x69a   : > { %11580 = vmatprep.subr.bf16.mxu0 %v14833_v19  ;;  %v14913_v19 = vld [vmem:[%s16071_s17 + $0xa24] ss:$8 sps:$4 sm:$0xff]   ;;  %v14977_v43 = vld [vmem:[%s16071_s17 + $0xad0] ss:$8 sps:$4 sm:$0xff]  }
 0x69c   : > { %11335 = vmatpush1.bf16.msra.mxu1 %v14828_v29  ;;  %v14908_v29 = vld [vmem:[%s16071_s17 + $0x420] ss:$8 sps:$4 sm:$0xff]  }
 0x69d   : > { %11581 = vmatpush1.bf16.msra.mxu0 %v14831_v8  ;;  %11336 = vmatprep.subr.bf16.mxu1 %v14836_v57  ;;  %v14911_v8 = vld [vmem:[%s16071_s17 + $0xa20] ss:$8 sps:$4 sm:$0xff]   ;;  %v14916_v57 = vld [vmem:[%s16071_s17 + $0x434] ss:$8 sps:$4 sm:$0xff]  }
 0x69e   : > { %11582 = vmatprep.subr.bf16.mxu0 %v14839_v34  ;;  %v14919_v34 = vld [vmem:[%s16071_s17 + $0xa34] ss:$8 sps:$4 sm:$0xff]  }
 0x6a0   : > { %11337 = vmatpush1.bf16.msra.mxu1 %v14834_v11  ;;  %v14914_v11 = vld [vmem:[%s16071_s17 + $0x430] ss:$8 sps:$4 sm:$0xff]  }
 0x6a1   : > { %11583 = vmatpush1.bf16.msra.mxu0 %v14837_v63  ;;  %11338 = vmatprep.subr.bf16.mxu1 %v14842_v56  ;;  %v14917_v63 = vld [vmem:[%s16071_s17 + $0xa30] ss:$8 sps:$4 sm:$0xff]   ;;  %v14922_v56 = vld [vmem:[%s16071_s17 + $0x444] ss:$8 sps:$4 sm:$0xff]  }
 0x6a2   : > { %11584 = vmatprep.subr.bf16.mxu0 %v14845_v47  ;;  %v14925_v47 = vld [vmem:[%s16071_s17 + $0xa44] ss:$8 sps:$4 sm:$0xff]  }
 0x6a4   : > { %11339 = vmatpush1.bf16.msra.mxu1 %v14840_v23  ;;  %v14920_v23 = vld [vmem:[%s16071_s17 + $0x440] ss:$8 sps:$4 sm:$0xff]  }
 0x6a5   : > { %11585 = vmatpush1.bf16.msra.mxu0 %v14843_v50  ;;  %11340 = vmatprep.subr.bf16.mxu1 %v14848_v42  ;;  %v14923_v50 = vld [vmem:[%s16071_s17 + $0xa40] ss:$8 sps:$4 sm:$0xff]   ;;  %v14928_v42 = vld [vmem:[%s16071_s17 + $0x454] ss:$8 sps:$4 sm:$0xff]  }
 0x6a6   : > { %11586 = vmatprep.subr.bf16.mxu0 %v14851_v7  ;;  %v14931_v7 = vld [vmem:[%s16071_s17 + $0xa54] ss:$8 sps:$4 sm:$0xff]  }
 0x6a8   : > { %11341 = vmatpush1.bf16.msra.mxu1 %v14846_v1  ;;  %v14926_v1 = vld [vmem:[%s16071_s17 + $0x450] ss:$8 sps:$4 sm:$0xff]  }
 0x6a9   : > { %11587 = vmatpush1.bf16.msra.mxu0 %v14849_v59  ;;  %11342 = vmatprep.subr.bf16.mxu1 %v14854_v26  ;;  %v14929_v59 = vld [vmem:[%s16071_s17 + $0xa50] ss:$8 sps:$4 sm:$0xff]   ;;  %v14934_v26 = vld [vmem:[%s16071_s17 + $0x464] ss:$8 sps:$4 sm:$0xff]  }
 0x6aa   : > { %11588 = vmatprep.subr.bf16.mxu0 %v14857_v41  ;;  %v14937_v41 = vld [vmem:[%s16071_s17 + $0xa64] ss:$8 sps:$4 sm:$0xff]  }
 0x6ac   : > { %11343 = vmatpush1.bf16.msra.mxu1 %v14852_v28  ;;  %v14932_v28 = vld [vmem:[%s16071_s17 + $0x460] ss:$8 sps:$4 sm:$0xff]  }
 0x6ad   : > { %11589 = vmatpush1.bf16.msra.mxu0 %v14855_v33  ;;  %11344 = vmatprep.subr.bf16.mxu1 %v14860_v14  ;;  %v14935_v33 = vld [vmem:[%s16071_s17 + $0xa60] ss:$8 sps:$4 sm:$0xff]   ;;  %v14940_v14 = vld [vmem:[%s16071_s17 + $0x474] ss:$8 sps:$4 sm:$0xff]  }
 0x6ae   : > { %11590 = vmatprep.subr.bf16.mxu0 %v14863_v10  ;;  %v14943_v10 = vld [vmem:[%s16071_s17 + $0xa74] ss:$8 sps:$4 sm:$0xff]  }
 0x6b0   : > { %11345 = vmatpush1.bf16.msra.mxu1 %v14858_v9  ;;  %v14938_v9 = vld [vmem:[%s16071_s17 + $0x470] ss:$8 sps:$4 sm:$0xff]  }
 0x6b1   : > { %11591 = vmatpush1.bf16.msra.mxu0 %v14861_v12  ;;  %11346 = vmatprep.subr.bf16.mxu1 %v14866_v25  ;;  %v14941_v12 = vld [vmem:[%s16071_s17 + $0xa70] ss:$8 sps:$4 sm:$0xff]   ;;  %v14946_v25 = vld [vmem:[%s16071_s17 + $0x484] ss:$8 sps:$4 sm:$0xff]  }
 0x6b2   : > { %11592 = vmatprep.subr.bf16.mxu0 %v14869_v46  ;;  %v14949_v46 = vld [vmem:[%s16071_s17 + $0xa84] ss:$8 sps:$4 sm:$0xff]  }
 0x6b4   : > { %11347 = vmatpush1.bf16.msra.mxu1 %v14864_v21  ;;  %v14944_v21 = vld [vmem:[%s16071_s17 + $0x480] ss:$8 sps:$4 sm:$0xff]  }
 0x6b5   : > { %11593 = vmatpush1.bf16.msra.mxu0 %v14867_v30  ;;  %11348 = vmatprep.subr.bf16.mxu1 %v14872_v45  ;;  %v14947_v30 = vld [vmem:[%s16071_s17 + $0xa80] ss:$8 sps:$4 sm:$0xff]   ;;  %v14952_v45 = vld [vmem:[%s16071_s17 + $0x494] ss:$8 sps:$4 sm:$0xff]  }
 0x6b6   : > { %11594 = vmatprep.subr.bf16.mxu0 %v14875_v48  ;;  %v14955_v48 = vld [vmem:[%s16071_s17 + $0xa94] ss:$8 sps:$4 sm:$0xff]  }
 0x6b8   : > { %11349 = vmatpush1.bf16.msra.mxu1 %v14870_v6  ;;  %v14950_v6 = vld [vmem:[%s16071_s17 + $0x490] ss:$8 sps:$4 sm:$0xff]  }
 0x6b9   : > { %11595 = vmatpush1.bf16.msra.mxu0 %v14873_v20  ;;  %11350 = vmatprep.subr.bf16.mxu1 %v14878_v61  ;;  %v14953_v20 = vld [vmem:[%s16071_s17 + $0xa90] ss:$8 sps:$4 sm:$0xff]   ;;  %v14958_v61 = vld [vmem:[%s16071_s17 + $0x4a4] ss:$8 sps:$4 sm:$0xff]  }
 0x6ba   : > { %11596 = vmatprep.subr.bf16.mxu0 %v14881_v16  ;;  %v14961_v16 = vld [vmem:[%s16071_s17 + $0xaa4] ss:$8 sps:$4 sm:$0xff]  }
 0x6bc   : > { %11351 = vmatpush1.bf16.msra.mxu1 %v14876_v18  ;;  %v14956_v18 = vld [vmem:[%s16071_s17 + $0x4a0] ss:$8 sps:$4 sm:$0xff]  }
 0x6bd   : > { %11597 = vmatpush1.bf16.msra.mxu0 %v14879_v51  ;;  %11352 = vmatprep.subr.bf16.mxu1 %v14884_v32  ;;  %v14959_v51 = vld [vmem:[%s16071_s17 + $0xaa0] ss:$8 sps:$4 sm:$0xff]   ;;  %v14964_v32 = vld [vmem:[%s16071_s17 + $0x4b4] ss:$8 sps:$4 sm:$0xff]  }
 0x6be   : > { %11598 = vmatprep.subr.bf16.mxu0 %v14887_v0  ;;  %v14967_v0 = vld [vmem:[%s16071_s17 + $0xab4] ss:$8 sps:$4 sm:$0xff]  }
 0x6c0   : > { %11353 = vmatpush1.bf16.msra.mxu1 %v14882_v37  ;;  %v14962_v37 = vld [vmem:[%s16071_s17 + $0x4b0] ss:$8 sps:$4 sm:$0xff]  }
 0x6c1   : > { %11599 = vmatpush1.bf16.msra.mxu0 %v14885_v53  ;;  %11354 = vmatprep.subr.bf16.mxu1 %v14890_v13  ;;  %v14965_v53 = vld [vmem:[%s16071_s17 + $0xab0] ss:$8 sps:$4 sm:$0xff]   ;;  %v14970_v13 = vld [vmem:[%s16071_s17 + $0x4c4] ss:$8 sps:$4 sm:$0xff]  }
 0x6c2   : > { %11600 = vmatprep.subr.bf16.mxu0 %v14893_v17  ;;  %v14973_v17 = vld [vmem:[%s16071_s17 + $0xac4] ss:$8 sps:$4 sm:$0xff]  }
 0x6c4   : > { %11355 = vmatpush1.bf16.msra.mxu1 %v14888_v52  ;;  %v14968_v52 = vld [vmem:[%s16071_s17 + $0x4c0] ss:$8 sps:$4 sm:$0xff]  }
 0x6c5   : > { %11601 = vmatpush1.bf16.msra.mxu0 %v14891_v58  ;;  %11365 = vmatprep.subr.bf16.mxu1 %v14897_v60  ;;  %v14971_v58 = vld [vmem:[%s16071_s17 + $0xac0] ss:$8 sps:$4 sm:$0xff]   ;;  %v14976_v60 = vld [vmem:[%s16071_s17 + $0x4d4] ss:$8 sps:$4 sm:$0xff]  }
 0x6c6   : > { %11611 = vmatprep.subr.bf16.mxu0 %v14901_v5  ;;  %v14979_v5 = vld [vmem:[%s16071_s17 + $0xad4] ss:$8 sps:$4 sm:$0xff]  }
 0x6c7   : > { %11357 = vmatmul.mubr.bf16.vlgmr.msra.gmra.mrb[0].mxu1 %v8814_v22  ;;  %v14982_v22 = vld [vmem:[%s16071_s17 + $0x4e4] ss:$8 sps:$4 sm:$0xff]  }
 0x6c8   : > { %11603 = vmatmul.mubr.bf16.vlgmr.msra.gmra.mrb[0].mxu0 %v8826_v31  ;;  %11366 = vmatpush1.bf16.msra.mxu1 %v14895_v24  ;;  %v14985_v31 = vld [vmem:[%s16071_s17 + $0xae4] ss:$8 sps:$4 sm:$0xff]   ;;  %v8708_v24 = vcombine.high %v19241_v4, %v19241_v4  ;;  %v14986_v4 = vld [vmem:[%s16071_s17 + $0x4f0] ss:$8 sps:$4 sm:$0xff]  }
 0x6c9   : > { %11612 = vmatpush1.bf16.msra.mxu0 %v14899_v35  ;;  %11367 = vmatprep.subr.bf16.mxu1 %v14904_v54  ;;  %v8759_v35 = vcombine.high %v19243_v36, %v19243_v36  ;;  %v14980_v54 = vld [vmem:[%s16071_s17 + $0x4e0] ss:$8 sps:$4 sm:$0xff]   ;;  %v14989_v36 = vld [vmem:[%s16071_s17 + $0xaf0] ss:$8 sps:$4 sm:$0xff]  }
 0x6ca   : > { %11613 = vmatprep.subr.bf16.mxu0 %v14907_v39  ;;  %11397 = vmatprep.mubr.bf16.mxu1 %v8817_v49  ;;  %v14983_v39 = vld [vmem:[%s16071_s17 + $0xae0] ss:$8 sps:$4 sm:$0xff]   ;;  %v14991_v49 = vld [vmem:[%s16071_s17 + $0xaf4] ss:$8 sps:$4 sm:$0xff]  }
 0x6cb   : > { %11643 = vmatprep.mubr.bf16.mxu0 %v8829_v3  ;;  %v19334_v3 = vrot.slane %v8708_v24, %v18977_v44  ;;  %v15061_v24 = vld [vmem:[%s16071_s17 + $0xbb0] ss:$8 sps:$4 sm:$0xff]  }
 0x6cc   : > { %11368 = vmatpush1.bf16.msra.mxu1 %v14902_v62  ;;  %v14988_v62 = vld [vmem:[%s16071_s17 + $0x4f4] ss:$8 sps:$4 sm:$0xff]  }
 0x6cd   : > { %11614 = vmatpush1.bf16.msra.mxu0 %v14905_v27  ;;  %11369 = vmatprep.subr.bf16.mxu1 %v14910_v38  ;;  %v19337_v27 = vrot.slane %v8759_v35, %v18977_v44  ;;  %v14994_v38 = vld [vmem:[%s16071_s17 + $0x504] ss:$8 sps:$4 sm:$0xff]   ;;  %v8816_v44 = vpack.c.bf16 %v19251_v40, %v19251_v40  ;;  %v14998_v40 = vld [vmem:[%s16071_s17 + $0x510] ss:$8 sps:$4 sm:$0xff]  }
 0x6ce   : > { %11615 = vmatprep.subr.bf16.mxu0 %v14913_v19  ;;  %v14997_v19 = vld [vmem:[%s16071_s17 + $0xb04] ss:$8 sps:$4 sm:$0xff]  }
 0x6cf   : > { %v15066_v35 = vld [vmem:[%s16071_s17 + $0x5c4] ss:$8 sps:$4 sm:$0xff]  }
 0x6d0   : > { %11370 = vmatpush1.bf16.msra.mxu1 %v14908_v29  ;;  %v8724_v29 = vcombine.high %v19334_v3, %v19334_v3 }
 0x6d1   : > { %11616 = vmatpush1.bf16.msra.mxu0 %v14911_v8  ;;  %11371 = vmatprep.subr.bf16.mxu1 %v14916_v57  ;;  %v8775_v8 = vcombine.high %v19337_v27, %v19337_v27  ;;  %v8828_v57 = vpack.c.bf16 %v19255_v2, %v19255_v2  ;;  %v15001_v2 = vld [vmem:[%s16071_s17 + $0xb10] ss:$8 sps:$4 sm:$0xff]  }
 0x6d2   : > { %11617 = vmatprep.subr.bf16.mxu0 %v14919_v34  ;;  %v14992_v34 = vld [vmem:[%s16071_s17 + $0x500] ss:$8 sps:$4 sm:$0xff]  }
 0x6d4   : > { %11372 = vmatpush1.bf16.msra.mxu1 %v14914_v11  ;;  %v14995_v11 = vld [vmem:[%s16071_s17 + $0xb00] ss:$8 sps:$4 sm:$0xff]  }
 0x6d5   : > { %11618 = vmatpush1.bf16.msra.mxu0 %v14917_v63  ;;  %11373 = vmatprep.subr.bf16.mxu1 %v14922_v56  ;;  %v15000_v63 = vld [vmem:[%s16071_s17 + $0x514] ss:$8 sps:$4 sm:$0xff]  }
 0x6d6   : > { %11619 = vmatprep.subr.bf16.mxu0 %v14925_v47  ;;  %v15003_v56 = vld [vmem:[%s16071_s17 + $0xb14] ss:$8 sps:$4 sm:$0xff]   ;;  %v8819_v47 = vpack.c.bf16 %v8724_v29, %v8724_v29  ;;  %v15081_v29 = vld [vmem:[%s16071_s17 + $0xbe4] ss:$8 sps:$4 sm:$0xff]  }
 0x6d8   : > { %11374 = vmatpush1.bf16.msra.mxu1 %v14920_v23  ;;  %v8831_v23 = vpack.c.bf16 %v8775_v8, %v8775_v8  ;;  %v15076_v8 = vld [vmem:[%s16071_s17 + $0x5e0] ss:$8 sps:$4 sm:$0xff]  }
 0x6d9   : > { %11620 = vmatpush1.bf16.msra.mxu0 %v14923_v50  ;;  %11375 = vmatprep.subr.bf16.mxu1 %v14928_v42  ;;  %v15006_v50 = vld [vmem:[%s16071_s17 + $0x524] ss:$8 sps:$4 sm:$0xff]  }
 0x6da   : > { %11621 = vmatprep.subr.bf16.mxu0 %v14931_v7  ;;  %v15009_v42 = vld [vmem:[%s16071_s17 + $0xb24] ss:$8 sps:$4 sm:$0xff]   ;;  %v15004_v7 = vld [vmem:[%s16071_s17 + $0x520] ss:$8 sps:$4 sm:$0xff]  }
 0x6dc   : > { %11376 = vmatpush1.bf16.msra.mxu1 %v14926_v1  ;;  %v15007_v1 = vld [vmem:[%s16071_s17 + $0xb20] ss:$8 sps:$4 sm:$0xff]  }
 0x6dd   : > { %11622 = vmatpush1.bf16.msra.mxu0 %v14929_v59  ;;  %11377 = vmatprep.subr.bf16.mxu1 %v14934_v26  ;;  %v15012_v59 = vld [vmem:[%s16071_s17 + $0x534] ss:$8 sps:$4 sm:$0xff]  }
 0x6de   : > { %11623 = vmatprep.subr.bf16.mxu0 %v14937_v41  ;;  %v15015_v26 = vld [vmem:[%s16071_s17 + $0xb34] ss:$8 sps:$4 sm:$0xff]   ;;  %v15010_v41 = vld [vmem:[%s16071_s17 + $0x530] ss:$8 sps:$4 sm:$0xff]  }
 0x6e0   : > { %11378 = vmatpush1.bf16.msra.mxu1 %v14932_v28  ;;  %v15013_v28 = vld [vmem:[%s16071_s17 + $0xb30] ss:$8 sps:$4 sm:$0xff]  }
 0x6e1   : > { %11624 = vmatpush1.bf16.msra.mxu0 %v14935_v33  ;;  %11379 = vmatprep.subr.bf16.mxu1 %v14940_v14  ;;  %v15018_v33 = vld [vmem:[%s16071_s17 + $0x544] ss:$8 sps:$4 sm:$0xff]  }
 0x6e2   : > { %11625 = vmatprep.subr.bf16.mxu0 %v14943_v10  ;;  %v15021_v14 = vld [vmem:[%s16071_s17 + $0xb44] ss:$8 sps:$4 sm:$0xff]   ;;  %v15016_v10 = vld [vmem:[%s16071_s17 + $0x540] ss:$8 sps:$4 sm:$0xff]  }
 0x6e4   : > { %11380 = vmatpush1.bf16.msra.mxu1 %v14938_v9  ;;  %v15019_v9 = vld [vmem:[%s16071_s17 + $0xb40] ss:$8 sps:$4 sm:$0xff]  }
 0x6e5   : > { %11626 = vmatpush1.bf16.msra.mxu0 %v14941_v12  ;;  %11381 = vmatprep.subr.bf16.mxu1 %v14946_v25  ;;  %v15024_v12 = vld [vmem:[%s16071_s17 + $0x554] ss:$8 sps:$4 sm:$0xff]  }
 0x6e6   : > { %11627 = vmatprep.subr.bf16.mxu0 %v14949_v46  ;;  %v15027_v25 = vld [vmem:[%s16071_s17 + $0xb54] ss:$8 sps:$4 sm:$0xff]   ;;  %v15022_v46 = vld [vmem:[%s16071_s17 + $0x550] ss:$8 sps:$4 sm:$0xff]  }
 0x6e8   : > { %11382 = vmatpush1.bf16.msra.mxu1 %v14944_v21  ;;  %v15025_v21 = vld [vmem:[%s16071_s17 + $0xb50] ss:$8 sps:$4 sm:$0xff]  }
 0x6e9   : > { %11628 = vmatpush1.bf16.msra.mxu0 %v14947_v30  ;;  %11383 = vmatprep.subr.bf16.mxu1 %v14952_v45  ;;  %v15030_v30 = vld [vmem:[%s16071_s17 + $0x564] ss:$8 sps:$4 sm:$0xff]  }
 0x6ea   : > { %11629 = vmatprep.subr.bf16.mxu0 %v14955_v48  ;;  %v15033_v45 = vld [vmem:[%s16071_s17 + $0xb64] ss:$8 sps:$4 sm:$0xff]   ;;  %v15028_v48 = vld [vmem:[%s16071_s17 + $0x560] ss:$8 sps:$4 sm:$0xff]  }
 0x6ec   : > { %11384 = vmatpush1.bf16.msra.mxu1 %v14950_v6  ;;  %v15031_v6 = vld [vmem:[%s16071_s17 + $0xb60] ss:$8 sps:$4 sm:$0xff]  }
 0x6ed   : > { %11630 = vmatpush1.bf16.msra.mxu0 %v14953_v20  ;;  %11385 = vmatprep.subr.bf16.mxu1 %v14958_v61  ;;  %v15036_v20 = vld [vmem:[%s16071_s17 + $0x574] ss:$8 sps:$4 sm:$0xff]  }
 0x6ee   : > { %11631 = vmatprep.subr.bf16.mxu0 %v14961_v16  ;;  %v15039_v61 = vld [vmem:[%s16071_s17 + $0xb74] ss:$8 sps:$4 sm:$0xff]   ;;  %v15034_v16 = vld [vmem:[%s16071_s17 + $0x570] ss:$8 sps:$4 sm:$0xff]  }
 0x6f0   : > { %11386 = vmatpush1.bf16.msra.mxu1 %v14956_v18  ;;  %v15037_v18 = vld [vmem:[%s16071_s17 + $0xb70] ss:$8 sps:$4 sm:$0xff]  }
 0x6f1   : > { %11632 = vmatpush1.bf16.msra.mxu0 %v14959_v51  ;;  %11387 = vmatprep.subr.bf16.mxu1 %v14964_v32  ;;  %v15042_v51 = vld [vmem:[%s16071_s17 + $0x584] ss:$8 sps:$4 sm:$0xff]  }
 0x6f2   : > { %11633 = vmatprep.subr.bf16.mxu0 %v14967_v0  ;;  %v15045_v32 = vld [vmem:[%s16071_s17 + $0xb84] ss:$8 sps:$4 sm:$0xff]   ;;  %v15040_v0 = vld [vmem:[%s16071_s17 + $0x580] ss:$8 sps:$4 sm:$0xff]  }
 0x6f4   : > { %11388 = vmatpush1.bf16.msra.mxu1 %v14962_v37  ;;  %v15043_v37 = vld [vmem:[%s16071_s17 + $0xb80] ss:$8 sps:$4 sm:$0xff]  }
 0x6f5   : > { %11634 = vmatpush1.bf16.msra.mxu0 %v14965_v53  ;;  %11389 = vmatprep.subr.bf16.mxu1 %v14970_v13  ;;  %v15048_v53 = vld [vmem:[%s16071_s17 + $0x594] ss:$8 sps:$4 sm:$0xff]  }
 0x6f6   : > { %11635 = vmatprep.subr.bf16.mxu0 %v14973_v17  ;;  %v15051_v13 = vld [vmem:[%s16071_s17 + $0xb94] ss:$8 sps:$4 sm:$0xff]   ;;  %v15046_v17 = vld [vmem:[%s16071_s17 + $0x590] ss:$8 sps:$4 sm:$0xff]  }
 0x6f8   : > { %11390 = vmatpush1.bf16.msra.mxu1 %v14968_v52  ;;  %v15049_v52 = vld [vmem:[%s16071_s17 + $0xb90] ss:$8 sps:$4 sm:$0xff]  }
 0x6f9   : > { %11636 = vmatpush1.bf16.msra.mxu0 %v14971_v58  ;;  %11391 = vmatprep.subr.bf16.mxu1 %v14976_v60  ;;  %v15054_v58 = vld [vmem:[%s16071_s17 + $0x5a4] ss:$8 sps:$4 sm:$0xff]  }
 0x6fa   : > { %11637 = vmatprep.subr.bf16.mxu0 %v14979_v5  ;;  %v15057_v60 = vld [vmem:[%s16071_s17 + $0xba4] ss:$8 sps:$4 sm:$0xff]   ;;  %v15052_v5 = vld [vmem:[%s16071_s17 + $0x5a0] ss:$8 sps:$4 sm:$0xff]  }
 0x6fc   : > { %11392 = vmatpush1.bf16.msra.mxu1 %v14974_v55  ;;  %v15055_v55 = vld [vmem:[%s16071_s17 + $0xba0] ss:$8 sps:$4 sm:$0xff]  }
 0x6fd   : > { %11638 = vmatpush1.bf16.msra.mxu0 %v14977_v43  ;;  %11393 = vmatprep.subr.bf16.mxu1 %v14982_v22  ;;  %v15060_v43 = vld [vmem:[%s16071_s17 + $0x5b4] ss:$8 sps:$4 sm:$0xff]  }
 0x6fe   : > { %11639 = vmatprep.subr.bf16.mxu0 %v14985_v31  ;;  %v15063_v22 = vld [vmem:[%s16071_s17 + $0xbb4] ss:$8 sps:$4 sm:$0xff]   ;;  %v15058_v31 = vld [vmem:[%s16071_s17 + $0x5b0] ss:$8 sps:$4 sm:$0xff]  }
 0x700   : > { %11394 = vmatpush1.bf16.msra.mxu1 %v14980_v54  ;;  %v15069_v54 = vld [vmem:[%s16071_s17 + $0xbc4] ss:$8 sps:$4 sm:$0xff]  }
 0x701   : > { %11640 = vmatpush1.bf16.msra.mxu0 %v14983_v39  ;;  %11395 = vmatprep.subr.bf16.mxu1 %v14988_v62  ;;  %v15064_v39 = vld [vmem:[%s16071_s17 + $0x5c0] ss:$8 sps:$4 sm:$0xff]  }
 0x702   : > { %11641 = vmatprep.subr.bf16.mxu0 %v14991_v49  ;;  %v15067_v62 = vld [vmem:[%s16071_s17 + $0xbc0] ss:$8 sps:$4 sm:$0xff]   ;;  %v15072_v49 = vld [vmem:[%s16071_s17 + $0x5d4] ss:$8 sps:$4 sm:$0xff]  }
 0x704   : > { %11396 = vmatpush1.bf16.msra.mxu1 %v14986_v4  ;;  %v15075_v4 = vld [vmem:[%s16071_s17 + $0xbd4] ss:$8 sps:$4 sm:$0xff]  }
 0x705   : > { %11642 = vmatpush1.bf16.msra.mxu0 %v14989_v36  ;;  %11406 = vmatprep.subr.bf16.mxu1 %v14994_v38  ;;  %v15070_v36 = vld [vmem:[%s16071_s17 + $0x5d0] ss:$8 sps:$4 sm:$0xff]  }
 0x706   : > { %11652 = vmatprep.subr.bf16.mxu0 %v14997_v19  ;;  %v15073_v38 = vld [vmem:[%s16071_s17 + $0xbd0] ss:$8 sps:$4 sm:$0xff]   ;;  %v15078_v19 = vld [vmem:[%s16071_s17 + $0x5e4] ss:$8 sps:$4 sm:$0xff]  }
 0x707   : > { %11398 = vmatmul.mubr.bf16.vlgmr.msra.gmra.mrb[0].mxu1 %v8816_v44  ;;  %v15079_v44 = vld [vmem:[%s16071_s17 + $0xbe0] ss:$8 sps:$4 sm:$0xff]  }
 0x708   : > { %11644 = vmatmul.mubr.bf16.vlgmr.msra.gmra.mrb[0].mxu0 %v8828_v57  ;;  %11407 = vmatpush1.bf16.msra.mxu1 %v14992_v34  ;;  %v15084_v57 = vld [vmem:[%s16071_s17 + $0x5f4] ss:$8 sps:$4 sm:$0xff]  }
 0x709   : > { %11653 = vmatpush1.bf16.msra.mxu0 %v14995_v11  ;;  %11408 = vmatprep.subr.bf16.mxu1 %v15000_v63  ;;  %v15087_v34 = vld [vmem:[%s16071_s17 + $0xbf4] ss:$8 sps:$4 sm:$0xff]   ;;  %v15082_v11 = vld [vmem:[%s16071_s17 + $0x5f0] ss:$8 sps:$4 sm:$0xff]  }
 0x70a   : > { %11654 = vmatprep.subr.bf16.mxu0 %v15003_v56  ;;  %11438 = vmatprep.mubr.bf16.mxu1 %v8819_v47  ;;  %v15085_v63 = vld [vmem:[%s16071_s17 + $0xbf0] ss:$8 sps:$4 sm:$0xff]   ;;  %v15092_v56 = vld [vmem:[%s16071_s17 + $0xc04] ss:$8 sps:$4 sm:$0xff]   ;;  %v8818_v47 = vpack.c.bf16 %v19334_v3, %v19334_v3 }
 0x70b   : > { %11684 = vmatprep.mubr.bf16.mxu0 %v8831_v23  ;;  %v8830_v23 = vpack.c.bf16 %v19337_v27, %v19337_v27  ;;  %v15098_v3 = vld [vmem:[%s16071_s17 + $0xc24] ss:$8 sps:$4 sm:$0xff]   ;;  %v15096_v27 = vld [vmem:[%s16071_s17 + $0xc20] ss:$8 sps:$4 sm:$0xff]  }
 0x70c   : > { %11409 = vmatpush1.bf16.msra.mxu1 %v14998_v40  ;;  %v15090_v40 = vld [vmem:[%s16071_s17 + $0xc00] ss:$8 sps:$4 sm:$0xff]  }
 0x70d   : > { %11655 = vmatpush1.bf16.msra.mxu0 %v15001_v2  ;;  %11410 = vmatprep.subr.bf16.mxu1 %v15006_v50  ;;  %v15095_v2 = vld [vmem:[%s16071_s17 + $0xc14] ss:$8 sps:$4 sm:$0xff]   ;;  %v15093_v50 = vld [vmem:[%s16071_s17 + $0xc10] ss:$8 sps:$4 sm:$0xff]  }
 0x70e   : > { %11656 = vmatprep.subr.bf16.mxu0 %v15009_v42  ;;  %v15169_v42 = vmov 0  }
 0x710   : > { %11411 = vmatpush1.bf16.msra.mxu1 %v15004_v7  ;;  %v15101_v7 = vld [vmem:[%s16071_s17 + $0xc34] ss:$8 sps:$4 sm:$0xff]  }
 0x711   : > { %11657 = vmatpush1.bf16.msra.mxu0 %v15007_v1  ;;  %11412 = vmatprep.subr.bf16.mxu1 %v15012_v59  ;;  %v15099_v1 = vld [vmem:[%s16071_s17 + $0xc30] ss:$8 sps:$4 sm:$0xff]   ;;  %v12553_v59 = vld.sshfl [vmem:[#allocation3 + $0x30] sm:$0x3 pattern:$0x76325410] }
 0x712   : > { %11658 = vmatprep.subr.bf16.mxu0 %v15015_v26  ;;  %v8832_v26 = vpack.c.bf16 %v12553_v59, %v12553_v59 }
 0x714   : > { %11413 = vmatpush1.bf16.msra.mxu1 %v15010_v41  ;;  %v11763_v41 = vld [vmem:[%s16069_s28 + $0x80] sm:$0xff] }
 0x715   : > { %11659 = vmatpush1.bf16.msra.mxu0 %v15013_v28  ;;  %11414 = vmatprep.subr.bf16.mxu1 %v15018_v33  ;;  %v11764_v28 = vld [vmem:[%s16069_s28 + $0x88] sm:$0xff] }
 0x716   : > { %11660 = vmatprep.subr.bf16.mxu0 %v15021_v14  ;;  %v13436_v33 = vpack.c.bf16 %v11764_v28, %v11763_v41  ;;  %v11747_v14 = vld [vmem:[%s16069_s28] sm:$0xff] }
 0x718   : > { %11415 = vmatpush1.bf16.msra.mxu1 %v15016_v10  ;;  %v11748_v10 = vld [vmem:[%s16069_s28 + $0x8] sm:$0xff] }
 0x719   : > { %11661 = vmatpush1.bf16.msra.mxu0 %v15019_v9  ;;  %11416 = vmatprep.subr.bf16.mxu1 %v15024_v12  ;;  %v13438_v9 = vpack.c.bf16 %v11748_v10, %v11747_v14  ;;  %v11765_v12 = vld [vmem:[%s16069_s28 + $0x90] sm:$0xff] }
 0x71a   : > { %11662 = vmatprep.subr.bf16.mxu0 %v15027_v25  ;;  %v11766_v25 = vld [vmem:[%s16069_s28 + $0x98] sm:$0xff] }
 0x71c   : > { %11417 = vmatpush1.bf16.msra.mxu1 %v15022_v46  ;;  %v13440_v46 = vpack.c.bf16 %v11766_v25, %v11765_v12 }
 0x71d   : > { %11663 = vmatpush1.bf16.msra.mxu0 %v15025_v21  ;;  %11418 = vmatprep.subr.bf16.mxu1 %v15030_v30  ;;  %v11749_v21 = vld [vmem:[%s16069_s28 + $0x10] sm:$0xff]  ;;  %v11750_v30 = vld [vmem:[%s16069_s28 + $0x18] sm:$0xff] }
 0x71e   : > { %11664 = vmatprep.subr.bf16.mxu0 %v15033_v45  ;;  %v13442_v45 = vpack.c.bf16 %v11750_v30, %v11749_v21  ;;  %v11746_v30 = vld [vmem:[#allocation5] sm:$0x3] }
 0x720   : > { %11419 = vmatpush1.bf16.msra.mxu1 %v15028_v48  ;;  %v11767_v48 = vld [vmem:[%s16069_s28 + $0xa0] sm:$0xff] }
 0x721   : > { %11665 = vmatpush1.bf16.msra.mxu0 %v15031_v6  ;;  %11420 = vmatprep.subr.bf16.mxu1 %v15036_v20  ;;  %v11768_v6 = vld [vmem:[%s16069_s28 + $0xa8] sm:$0xff] }
 0x722   : > { %11666 = vmatprep.subr.bf16.mxu0 %v15039_v61  ;;  %v13444_v20 = vpack.c.bf16 %v11768_v6, %v11767_v48  ;;  %v11751_v61 = vld [vmem:[%s16069_s28 + $0x20] sm:$0xff] }
 0x724   : > { %11421 = vmatpush1.bf16.msra.mxu1 %v15034_v16  ;;  %v11752_v16 = vld [vmem:[%s16069_s28 + $0x28] sm:$0xff] }
 0x725   : > { %11667 = vmatpush1.bf16.msra.mxu0 %v15037_v18  ;;  %11422 = vmatprep.subr.bf16.mxu1 %v15042_v51  ;;  %v13446_v18 = vpack.c.bf16 %v11752_v16, %v11751_v61  ;;  %v11769_v51 = vld [vmem:[%s16069_s28 + $0xb0] sm:$0xff] }
 0x726   : > { %11668 = vmatprep.subr.bf16.mxu0 %v15045_v32  ;;  %v11770_v32 = vld [vmem:[%s16069_s28 + $0xb8] sm:$0xff] }
 0x728   : > { %11423 = vmatpush1.bf16.msra.mxu1 %v15040_v0  ;;  %v13448_v0 = vpack.c.bf16 %v11770_v32, %v11769_v51 }
 0x729   : > { %11669 = vmatpush1.bf16.msra.mxu0 %v15043_v37  ;;  %11424 = vmatprep.subr.bf16.mxu1 %v15048_v53  ;;  %v11753_v37 = vld [vmem:[%s16069_s28 + $0x30] sm:$0xff]  ;;  %v11754_v53 = vld [vmem:[%s16069_s28 + $0x38] sm:$0xff] }
 0x72a   : > { %11670 = vmatprep.subr.bf16.mxu0 %v15051_v13  ;;  %v13450_v13 = vpack.c.bf16 %v11754_v53, %v11753_v37 }
 0x72c   : > { %11425 = vmatpush1.bf16.msra.mxu1 %v15046_v17  ;;  %v11771_v17 = vld [vmem:[%s16069_s28 + $0xc0] sm:$0xff] }
 0x72d   : > { %11671 = vmatpush1.bf16.msra.mxu0 %v15049_v52  ;;  %11426 = vmatprep.subr.bf16.mxu1 %v15054_v58  ;;  %v11772_v52 = vld [vmem:[%s16069_s28 + $0xc8] sm:$0xff] }
 0x72e   : > { %11672 = vmatprep.subr.bf16.mxu0 %v15057_v60  ;;  %v13452_v58 = vpack.c.bf16 %v11772_v52, %v11771_v17  ;;  %v11755_v60 = vld [vmem:[%s16069_s28 + $0x40] sm:$0xff] }
 0x730   : > { %11427 = vmatpush1.bf16.msra.mxu1 %v15052_v5  ;;  %v11756_v5 = vld [vmem:[%s16069_s28 + $0x48] sm:$0xff] }
 0x731   : > { %11673 = vmatpush1.bf16.msra.mxu0 %v15055_v55  ;;  %11428 = vmatprep.subr.bf16.mxu1 %v15060_v43  ;;  %v13454_v55 = vpack.c.bf16 %v11756_v5, %v11755_v60  ;;  %v11773_v43 = vld [vmem:[%s16069_s28 + $0xd0] sm:$0xff] }
 0x732   : > { %11674 = vmatprep.subr.bf16.mxu0 %v15063_v22  ;;  %v11774_v22 = vld [vmem:[%s16069_s28 + $0xd8] sm:$0xff] }
 0x734   : > { %11429 = vmatpush1.bf16.msra.mxu1 %v15058_v31  ;;  %v13456_v31 = vpack.c.bf16 %v11774_v22, %v11773_v43 }
 0x735   : > { %11675 = vmatpush1.bf16.msra.mxu0 %v15061_v24  ;;  %11430 = vmatprep.subr.bf16.mxu1 %v15066_v35  ;;  %v11757_v24 = vld [vmem:[%s16069_s28 + $0x50] sm:$0xff]  ;;  %v11758_v35 = vld [vmem:[%s16069_s28 + $0x58] sm:$0xff] }
 0x736   : > { %11676 = vmatprep.subr.bf16.mxu0 %v15069_v54  ;;  %v13458_v54 = vpack.c.bf16 %v11758_v35, %v11757_v24 }
 0x738   : > { %11431 = vmatpush1.bf16.msra.mxu1 %v15064_v39  ;;  %v11775_v39 = vld [vmem:[%s16069_s28 + $0xe0] sm:$0xff] }
 0x739   : > { %11677 = vmatpush1.bf16.msra.mxu0 %v15067_v62  ;;  %11432 = vmatprep.subr.bf16.mxu1 %v15072_v49  ;;  %v11776_v62 = vld [vmem:[%s16069_s28 + $0xe8] sm:$0xff]  ;;  %v11759_v49 = vld [vmem:[%s16069_s28 + $0x60] sm:$0xff] }
 0x73a   : > { %11678 = vmatprep.subr.bf16.mxu0 %v15075_v4  ;;  %v13460_v4 = vpack.c.bf16 %v11776_v62, %v11775_v39 }
 0x73c   : > { %11433 = vmatpush1.bf16.msra.mxu1 %v15070_v36  ;;  %v11760_v36 = vld [vmem:[%s16069_s28 + $0x68] sm:$0xff] }
 0x73d   : > { %11679 = vmatpush1.bf16.msra.mxu0 %v15073_v38  ;;  %11434 = vmatprep.subr.bf16.mxu1 %v15078_v19  ;;  %v11777_v38 = vld [vmem:[%s16069_s28 + $0xf0] sm:$0xff]  ;;  %v11778_v19 = vld [vmem:[%s16069_s28 + $0xf8] sm:$0xff] }
 0x73e   : > { %11680 = vmatprep.subr.bf16.mxu0 %v15081_v29  ;;  %v13462_v29 = vpack.c.bf16 %v11760_v36, %v11759_v49 }
 0x740   : > { %11435 = vmatpush1.bf16.msra.mxu1 %v15076_v8  ;;  %v13464_v8 = vpack.c.bf16 %v11778_v19, %v11777_v38 }
 0x741   : > { %11681 = vmatpush1.bf16.msra.mxu0 %v15079_v44  ;;  %11436 = vmatprep.subr.bf16.mxu1 %v15084_v57  ;;  %v11761_v44 = vld [vmem:[%s16069_s28 + $0x70] sm:$0xff]  ;;  %v11762_v57 = vld [vmem:[%s16069_s28 + $0x78] sm:$0xff] }
 0x742   : > { %11682 = vmatprep.subr.bf16.mxu0 %v15087_v34  ;;  %v13466_v34 = vpack.c.bf16 %v11762_v57, %v11761_v44 }
 0x744   : > { %11437 = vmatpush1.bf16.msra.mxu1 %v15082_v11 }
 0x745   : > { %11683 = vmatpush1.bf16.msra.mxu0 %v15085_v63  ;;  %13437 = vmatprep.subr.bf16.mxu1 %v13436_v33 }
 0x746   : > { %11693 = vmatprep.subr.bf16.mxu0 %v15092_v56 }
 0x747   : > { %11439 = vmatmul.mubr.bf16.vlgmr.msra.gmra.mrb[0].mxu1 %v8818_v47 }
 0x748   : > { %11685 = vmatmul.mubr.bf16.vlgmr.msra.gmra.mrb[0].mxu0 %v8830_v23  ;;  %13439 = vmatpush3.bf16.msra.mxu1 %v13438_v9  ;;  %v9229_v23 = vsub.s32 0, %v18969_v15 }
 0x749   : > { %11694 = vmatpush1.bf16.msra.mxu0 %v15090_v40  ;;  %11725 = vmatprep.mubr.bf16.mxu0 %v15169_v42  ;;  %v9225_v40 = vld [vmem:[%s2006_s25] sm:$0x3]  ;;  %s11859_s25 = sshll.u32 %s15170_s14, 4  ;;  %s11860_s25 = int_to_ptr.vmem [resolvable:$true] %s11859_s25 }
 0x74a   : > { %11695 = vmatprep.subr.bf16.mxu0 %v15095_v2  ;;  %13441 = vmatprep.subr.bf16.mxu1 %v13440_v46  ;;  %v9233_v2 = vsub.s32 1, %v18969_v15  ;;  %s15110_s28 = scalar_lea.vmem %s11860_s25, 32  ;;  %p15117_p1 = scmp.lt.s32.totalorder %s11860_s25, %s11860_s25 }
 0x74b   : > { %p15111_p12 = scmp.ne.s32.totalorder %s11860_s25, %s15110_s28  ;;  %p15118_p2 = scmp.lt.s32.totalorder %s15110_s28, %s15110_s28 }
 0x74c   : > { %13443 = vmatpush3.bf16.msra.mxu1 %v13442_v45  ;;  %v9234_v42 = vrot.slane %v9225_v40, %v9233_v2 }
 0x74d   : > { %11696 = vmatpush1.bf16.msra.mxu0 %v15093_v50  ;;  %13445 = vmatprep.subr.bf16.mxu1 %v13444_v20  ;;  %v9230_v50 = vrot.slane %v9225_v40, %v9229_v23  ;;  %p15112_p13 = pnand %p15111_p12, %p13694_p11  ;;  %p15119_p3 = por %p15118_p2, %p15117_p1 }
 0x74e   : > { %11697 = vmatprep.subr.bf16.mxu0 %v15098_v3 }
 0x74f   : > { %p15113_p0 = pneg %p15112_p13 }
 0x750   : > { %13447 = vmatpush3.bf16.msra.mxu1 %v13446_v18 }
 0x751   : > { %11698 = vmatpush1.bf16.msra.mxu0 %v15096_v27  ;;  %13449 = vmatprep.subr.bf16.mxu1 %v13448_v0  ;;  %p15120_p4 = pnand %p15119_p3, %p15113_p0 }
 0x752   : > { %11699 = vmatprep.subr.bf16.mxu0 %v15101_v7 }
 0x754   : > { %13451 = vmatpush3.bf16.msra.mxu1 %v13450_v13 }
 0x755   : > { %11700 = vmatpush1.bf16.msra.mxu0 %v15099_v1  ;;  %13453 = vmatprep.subr.bf16.mxu1 %v13452_v58 }
 0x758   : > { %12946 = vmatmul.mubr.msk.bf16.vlgmr.msra.gmra.mrb[0].mxu0 %vm11197_vm8, %v8832_v26  ;;  %13455 = vmatpush3.bf16.msra.mxu1 %v13454_v55 }
 0x759   : > { %13457 = vmatprep.subr.bf16.mxu1 %v13456_v31 }
 0x75c   : > { %13459 = vmatpush3.bf16.msra.mxu1 %v13458_v54 }
 0x75d   : > { %13461 = vmatprep.subr.bf16.mxu1 %v13460_v4 }
 0x760   : > { %13463 = vmatpush3.bf16.msra.mxu1 %v13462_v29 }
 0x761   : > { %13465 = vmatprep.subr.bf16.mxu1 %v13464_v8 }
 0x764   : > { %13467 = vmatpush3.bf16.msra.mxu1 %v13466_v34 }
 0x81a   : > { %v11440_v11 = vpop.f32.mrb[0].mxu1 }
 0x81b   : > { %v11442_v63 = vpop.f32.mrb[1].mxu1  ;;  %v13640_v3 = vadd.f32 %v11440_v11, %v9230_v50 }
 0x81c   : > { %v11444_v56 = vpop.f32.mrb[2].mxu1  ;;  %v13642_v27 = vadd.f32 %v11442_v63, %v9234_v42 }
 0x81d   : > { %v11445_v47 = vpop.f32.mrb[3].mxu1 }
 0x82b   : > { %v11727_v7 = vpop.f32.mrb[0].mxu0 }
 0x82c   : > { %v13641_v1 = vadd.f32 %v13640_v3, %v11727_v7  ;;  %v11729_v59 = vpop.f32.mrb[1].mxu0 }
 0x82d   : > { %v13643_v26 = vadd.f32 %v13642_v27, %v11729_v59  ;;  %v11731_v41 = vpop.f32.mrb[2].mxu0 }
 0x82e   : > { %v12947_v28 = vmul.f32 -1.442695, %v13641_v1  ;;  %v11732_v33 = vpop.f32.mrb[3].mxu0 }
 0x82f   : > { %v12948_v14 = vmul.f32 -1.442695, %v13643_v26 }
 0x830   : > { %15102 = vpow2.f32 %v12947_v28 }
 0x831   : > { %15104 = vpow2.f32 %v12948_v14 }
 0x83a   : > { %v15103_v10 = vpop.eup %15102 }
 0x83b   : > { %v15105_v9 = vpop.eup %15104  ;;  %v11740_v12 = vadd.f32 1.0, %v15103_v10 }
 0x83c   : > { %v11741_v25 = vadd.f32 1.0, %v15105_v9 }
 0x83e   : > { %15106 = vrcp.f32 %v11741_v25 }
 0x83f   : > { %15108 = vrcp.f32 %v11740_v12 }
 0x848   : > { %v15107_v15 = vpop.eup %15106 }
 0x849   : > { %v15109_v46 = vpop.eup %15108  ;;  %11843 = vmatprep.mubr.f32.mxu1 %v15107_v15 }
 0x84a   : > { %11844 = vmatmul.mubr.f32.vlgmr.msra.gmra.mrb[4].mxu1 %v15109_v46 }
 0x91d   : > { %v13401_v21 = vpop.f32.mrb[4].mxu1 }
 0x91e   : > { %v13402_v45 = vpop.f32.mrb[5].mxu1 }
 0x91f   : > { %v13403_v48 = vadd.f32 %v13402_v45, %v13401_v21 }
 0x921   : > { %v11849_v6 = vadd.f32 %v13403_v48, %v11746_v30 }
 0x923   : > { %11851 = vst.msk [vmem:[#allocation5] sm:$0x3] %vm11850_vm9, %v11849_v6 }
 0x924   : > { %15123 = shalt.err (!%p15120_p4)
}
 0x925   : > { %s15124_s13 = scalar_lea.hbm %s19508_s11, 32 }
 0x926   : > { %p15125_p5 = scmp.ne.s32.totalorder %s19508_s11, %s15124_s13  ;;  %p15130_p8 = scmp.lt.u32.totalorder %s15124_s13, %s19508_s11 }
 0x928   : > { %p15126_p6 = pnand %p15125_p5, %p13694_p11 }
 0x92a   : > { %p15127_p7 = pneg %p15126_p6 }
 0x92c   : > { %p15132_p9 = pnand %p15130_p8, %p15127_p7 }
 0x92e   : > { %15135 = shalt.err (!%p15132_p9)
}
 0x92f   : > { %13691 = dma.vmem_to_hbm [thread:$0]  (%p13694_p11), %s11860_s25, 32, %s19508_s11, [#allocation6]  }
 0x930   : > { %15149 = dma.done.wait (%p13694_p11), [#allocation6], 32  }
 0x931   : > { %15151 = vsyncadd (%p13694_p11), [#allocation6], 4294967264 }
 0x932 PF: > { %p19_p10 = scmp.ge.s32.totalorder %s15250_s21, 6   ;;  %s19559_s17 = smov %s15158_s18 }
 0x933   : > { %s19560_s18 = smov %s15259_s24  ;;  %s19561_s19 = smov %s15250_s21 }
 0x934   :  { %21 = sbr.rel (!%p19_p10) target bundleno = 2 (0x2), region = 144 }
 0x93b   :  { %11872 = vsyncpa [#allocation6], 1 }
 0x93c   :  { %11874 = vsyncpa [#allocation6 + $0x1], 1 }

</bundles_post_ra>
